<compile_context>
chip_gen: v7x
topology: tpu7x:2x2x1
jax: 0.10.0
libtpu: 0.0.40
codegen_flags: <defaults>
</compile_context>

<pallas_src>
import functools

import jax
import jax.numpy as jnp
from jax.experimental import pallas as pl
from jax.experimental.pallas import tpu as pltpu

BN_EPS = 1e-5


# ------------------------------ tiling helpers ------------------------------

def _pick_tile(dim, candidates):
    """Largest candidate that divides dim, else the full dim (always legal)."""
    for c in candidates:
        if dim % c == 0:
            return c
    return dim


def _pick_tn(n):
    """Output-channel tile: prefer >=2 blocks on the parallel axis (v7x)."""
    for c in (512, 256, 128):
        if n % c == 0 and n // c >= 2:
            return c
    return _pick_tile(n, (512, 256, 128))


def _rup128(c):
    return ((c + 127) // 128) * 128


# -------------- Pallas kernel: matmul + BN + residual + ReLU fused ----------
# Used for 1x1 convs and (via a small im2col) the three stride-2 3x3 convs.
# Grid = (cout tiles, K tiles); M is NOT tiled, so the f32 VMEM accumulator
# holds the full column block and the batch statistics computed from it at the
# last K step are exact.  Only the final bf16 activation hits HBM.

def _mm_bn_kernel(*refs, inv_m, relu, has_res):
    if has_res:
        a_ref, w_ref, g_ref, b_ref, r_ref, o_ref, acc_ref = refs
    else:
        a_ref, w_ref, g_ref, b_ref, o_ref, acc_ref = refs
        r_ref = None
    k = pl.program_id(1)
    nk = pl.num_programs(1)

    @pl.when(k == 0)
    def _():
        acc_ref[...] = jnp.zeros_like(acc_ref)

    acc_ref[...] += jnp.dot(a_ref[...], w_ref[...],
                            preferred_element_type=jnp.float32)

    @pl.when(k == nk - 1)
    def _():
        y = acc_ref[...]
        # nn.BatchNorm2d training mode: biased batch variance, eps=1e-5.
        s = jnp.sum(y, axis=0, keepdims=True)
        q = jnp.sum(y * y, axis=0, keepdims=True)
        mean = s * inv_m
        var = jnp.maximum(q * inv_m - mean * mean, 0.0)
        scale = g_ref[...] * jax.lax.rsqrt(var + BN_EPS)
        shift = b_ref[...] - mean * scale
        out = y * scale + shift
        if has_res:
            out = out + r_ref[...].astype(jnp.float32)
        if relu:
            out = jnp.maximum(out, 0.0)
        o_ref[...] = out.astype(o_ref.dtype)


def matmul_bn_fused(a, w, gamma, beta, residual, *, inv_m, relu):
    M, K = a.shape
    _, N = w.shape
    tn = _pick_tn(N)
    tk = _pick_tile(K, (1152, 576, 512, 384, 256, 128))
    grid = (N // tn, K // tk)
    in_specs = [
        pl.BlockSpec((M, tk), lambda n, k: (0, k)),
        pl.BlockSpec((tk, tn), lambda n, k: (k, n)),
        pl.BlockSpec((1, tn), lambda n, k: (0, n)),
        pl.BlockSpec((1, tn), lambda n, k: (0, n)),
    ]
    args = [a, w, gamma, beta]
    has_res = residual is not None
    if has_res:
        in_specs.append(pl.BlockSpec((M, tn), lambda n, k: (0, n)))
        args.append(residual)
    return pl.pallas_call(
        functools.partial(_mm_bn_kernel, inv_m=inv_m, relu=relu, has_res=has_res),
        out_shape=jax.ShapeDtypeStruct((M, N), jnp.bfloat16),
        grid=grid,
        in_specs=in_specs,
        out_specs=pl.BlockSpec((M, tn), lambda n, k: (0, n)),
        scratch_shapes=[pltpu.VMEM((M, tn), jnp.float32)],
        compiler_params=pltpu.CompilerParams(
            dimension_semantics=("parallel", "arbitrary")),
    )(*args)


# --------- Pallas kernel: 3x3 stride-1 conv via 9 taps + BN fused -----------
# Input is the spatially zero-padded activation flattened to (N*Hp*Wp, Cin)
# with (Wp+1) extra zero rows on each end, so every tap is a contiguous
# row-offset slice of the same block (no im2col, no 9x HBM traffic).  Output
# is computed on the padded grid; halo rows are masked out of the BN stats,
# zeroed, and sliced away afterwards.

def _tap_bn_kernel(*refs, taps_off, m_out, inv_m, relu, has_res):
    if has_res:
        a_ref, w_ref, g_ref, b_ref, m_ref, r_ref, o_ref, acc_ref = refs
    else:
        a_ref, w_ref, g_ref, b_ref, m_ref, o_ref, acc_ref = refs
        r_ref = None
    k = pl.program_id(1)
    nk = pl.num_programs(1)

    @pl.when(k == 0)
    def _():
        acc_ref[...] = jnp.zeros_like(acc_ref)

    acc = acc_ref[...]
    for t, off in enumerate(taps_off):
        a_t = a_ref[pl.ds(off, m_out), :]
        acc = acc + jnp.dot(a_t, w_ref[t], preferred_element_type=jnp.float32)
    acc_ref[...] = acc

    @pl.when(k == nk - 1)
    def _():
        y = acc_ref[...]
        msk = m_ref[...]                      # (m_out, 1): 1 for valid rows
        ym = y * msk
        s = jnp.sum(ym, axis=0, keepdims=True)
        q = jnp.sum(ym * y, axis=0, keepdims=True)
        mean = s * inv_m
        var = jnp.maximum(q * inv_m - mean * mean, 0.0)
        scale = g_ref[...] * jax.lax.rsqrt(var + BN_EPS)
        shift = b_ref[...] - mean * scale
        out = y * scale + shift
        if has_res:
            out = out + r_ref[...].astype(jnp.float32)
        if relu:
            out = jnp.maximum(out, 0.0)
        o_ref[...] = (out * msk).astype(o_ref.dtype)


def conv3x3_bn_fused(a2, wtap, gamma, beta, mask, residual, *, taps_off, m_out,
                     inv_m, relu):
    m_rows, cin = a2.shape
    cout = wtap.shape[2]
    tn = _pick_tn(cout)
    tk = _pick_tile(cin, (512, 384, 256, 128))
    grid = (cout // tn, cin // tk)
    in_specs = [
        pl.BlockSpec((m_rows, tk), lambda n, k: (0, k)),
        pl.BlockSpec((9, tk, tn), lambda n, k: (0, k, n)),
        pl.BlockSpec((1, tn), lambda n, k: (0, n)),
        pl.BlockSpec((1, tn), lambda n, k: (0, n)),
        pl.BlockSpec((m_out, 1), lambda n, k: (0, 0)),
    ]
    args = [a2, wtap, gamma, beta, mask]
    has_res = residual is not None
    if has_res:
        in_specs.append(pl.BlockSpec((m_out, tn), lambda n, k: (0, n)))
        args.append(residual)
    return pl.pallas_call(
        functools.partial(_tap_bn_kernel, taps_off=taps_off, m_out=m_out,
                          inv_m=inv_m, relu=relu, has_res=has_res),
        out_shape=jax.ShapeDtypeStruct((m_out, cout), jnp.bfloat16),
        grid=grid,
        in_specs=in_specs,
        out_specs=pl.BlockSpec((m_out, tn), lambda n, k: (0, n)),
        scratch_shapes=[pltpu.VMEM((m_out, tn), jnp.float32)],
        compiler_params=pltpu.CompilerParams(
            dimension_semantics=("parallel", "arbitrary")),
    )(*args)


# -------- Pallas kernel: avgpool + projection head + L2 normalize fused -----
# Pooling is folded into the K loop of the first linear; the second linear and
# F.normalize run in the finalize.  One dispatch for the whole head.
# TODO(synk): tile M (batch) for large batch sizes; at batch<=8 this is moot.

def _head_kernel(*refs, inv_hw, mlp):
    if mlp:
        x_ref, w1_ref, b1_ref, w2_ref, b2_ref, o_ref, acc_ref = refs
    else:
        x_ref, w1_ref, b1_ref, o_ref, acc_ref = refs
        w2_ref = b2_ref = None
    k = pl.program_id(0)
    nk = pl.num_programs(0)

    @pl.when(k == 0)
    def _():
        acc_ref[...] = jnp.zeros_like(acc_ref)

    pooled = (jnp.sum(x_ref[...].astype(jnp.float32), axis=1) * inv_hw
              ).astype(jnp.bfloat16)
    acc_ref[...] += jnp.dot(pooled, w1_ref[...],
                            preferred_element_type=jnp.float32)

    @pl.when(k == nk - 1)
    def _():
        h = acc_ref[...] + b1_ref[...]
        if mlp:
            h = jnp.maximum(h, 0.0)
            h = jnp.dot(h.astype(jnp.bfloat16), w2_ref[...],
                        preferred_element_type=jnp.float32) + b2_ref[...]
        # F.normalize(dim=1): x / max(||x||_2, eps), eps = 1e-12
        nrm = jnp.sqrt(jnp.sum(h * h, axis=1, keepdims=True))
        o_ref[...] = h / jnp.maximum(nrm, 1e-12)


def head_forward(x_nhwc, head_params, head_type):
    N, H, W, C = x_nhwc.shape
    xf = x_nhwc.reshape(N, H * W, C)
    mlp = head_type == 'mlp'
    if mlp:
        (w1, b1), (w2, b2) = head_params
    else:
        ((w1, b1),) = head_params
        w2 = b2 = None
    if w1.shape[0] != C:            # activation channels were lane-padded
        w1 = jnp.pad(w1, ((0, C - w1.shape[0]), (0, 0)))
    d1 = w1.shape[1]
    tk = _pick_tile(C, (512, 256, 128))
    in_specs = [
        pl.BlockSpec((N, H * W, tk), lambda k: (0, 0, k)),
        pl.BlockSpec((tk, d1), lambda k: (k, 0)),
        pl.BlockSpec((1, d1), lambda k: (0, 0)),
    ]
    args = [xf, w1.astype(jnp.bfloat16), b1]
    if mlp:
        dout = w2.shape[1]
        in_specs += [pl.BlockSpec((d1, dout), lambda k: (0, 0)),
                     pl.BlockSpec((1, dout), lambda k: (0, 0))]
        args += [w2.astype(jnp.bfloat16), b2]
    else:
        dout = d1
    return pl.pallas_call(
        functools.partial(_head_kernel, inv_hw=1.0 / (H * W), mlp=mlp),
        out_shape=jax.ShapeDtypeStruct((N, dout), jnp.float32),
        grid=(C // tk,),
        in_specs=in_specs,
        out_specs=pl.BlockSpec((N, dout), lambda k: (0, 0)),
        scratch_shapes=[pltpu.VMEM((N, d1), jnp.float32)],
        compiler_params=pltpu.CompilerParams(
            dimension_semantics=("arbitrary",)),
    )(*args)


# ------------------------------ conv plumbing -------------------------------

def _im2col(x, kh, kw, stride, pad):
    """x: (N,H,W,C) -> (N*Ho*Wo, kh*kw*C); only used for the 3 stride-2 3x3s."""
    N, H, W, C = x.shape
    if pad:
        x = jnp.pad(x, ((0, 0), (pad, pad), (pad, pad), (0, 0)))
    Ho = (H + 2 * pad - kh) // stride + 1
    Wo = (W + 2 * pad - kw) // stride + 1
    patches = []
    for i in range(kh):
        for j in range(kw):
            patches.append(x[:, i:i + (Ho - 1) * stride + 1:stride,
                              j:j + (Wo - 1) * stride + 1:stride, :])
    cols = jnp.stack(patches, axis=3)                      # (N, Ho, Wo, 9, C)
    return cols.reshape(N * Ho * Wo, kh * kw * C), Ho, Wo


def conv_bn(x, w_hwio, bn_params, *, stride, pad, relu, residual=None):
    """Conv2d(bias=False) + BatchNorm2d (+ residual add) (+ ReLU), one kernel.

    Activations are NHWC bf16 with channels zero-padded to a multiple of 128;
    padded channels stay exactly zero through BN / ReLU / residual.
    """
    kh, kw, cin_w, cout = w_hwio.shape
    gamma, beta = bn_params
    N, H, W, cin_x = x.shape
    if cin_x != cin_w:          # activation channels were lane-padded upstream
        w_hwio = jnp.pad(w_hwio, ((0, 0), (0, 0), (0, cin_x - cin_w), (0, 0)))
    cout_p = _rup128(cout)
    if cout_p != cout:
        w_hwio = jnp.pad(w_hwio, ((0, 0), (0, 0), (0, 0), (0, cout_p - cout)))
        gamma = jnp.pad(gamma, ((0, 0), (0, cout_p - cout)), constant_values=1.0)
        beta = jnp.pad(beta, ((0, 0), (0, cout_p - cout)))
    w_hwio = w_hwio.astype(jnp.bfloat16)

    if kh == 1 and kw == 1:     # 1x1 conv: no im2col, just a (strided) reshape
        xs = x[:, ::stride, ::stride, :] if stride > 1 else x
        Ho, Wo = xs.shape[1], xs.shape[2]
        M = N * Ho * Wo
        a = xs.reshape(M, cin_x)
        wmat = w_hwio.reshape(cin_x, cout_p)
        res2d = residual.reshape(M, cout_p) if residual is not None else None
        y = matmul_bn_fused(a, wmat, gamma, beta, res2d, inv_m=1.0 / M, relu=relu)
        return y.reshape(N, Ho, Wo, cout_p)

    if stride == 1:             # 3x3 / pad=1: tap-decomposed, no im2col at all
        Hp, Wp = H + 2, W + 2
        pad_rows = Wp + 1
        m_out = N * Hp * Wp
        xp = jnp.pad(x, ((0, 0), (1, 1), (1, 1), (0, 0))).reshape(m_out, cin_x)
        a2 = jnp.pad(xp, ((pad_rows, pad_rows), (0, 0)))
        wtap = w_hwio.reshape(9, cin_x, cout_p)
        vi = (jnp.arange(Hp) >= 1) & (jnp.arange(Hp) <= H)
        vj = (jnp.arange(Wp) >= 1) & (jnp.arange(Wp) <= W)
        m2 = (vi[:, None] & vj[None, :]).astype(jnp.float32)
        mask = jnp.broadcast_to(m2.reshape(1, Hp * Wp),
                                (N, Hp * Wp)).reshape(m_out, 1)
        rp = None
        if residual is not None:
            rp = jnp.pad(residual, ((0, 0), (1, 1), (1, 1), (0, 0))
                         ).reshape(m_out, cout_p)
        taps_off = tuple(pad_rows + (dy - 1) * Wp + (dx - 1)
                         for dy in range(3) for dx in range(3))
        y = conv3x3_bn_fused(a2, wtap, gamma, beta, mask, rp,
                             taps_off=taps_off, m_out=m_out,
                             inv_m=1.0 / (N * H * W), relu=relu)
        return y.reshape(N, Hp, Wp, cout_p)[:, 1:1 + H, 1:1 + W, :]

    # 3x3 stride-2 (3 convs in the whole net, tiny M): bf16 im2col + fused mm.
    cols, Ho, Wo = _im2col(x, kh, kw, stride, pad)
    M = cols.shape[0]
    wmat = w_hwio.reshape(kh * kw * cin_x, cout_p)
    res2d = residual.reshape(M, cout_p) if residual is not None else None
    y = matmul_bn_fused(cols, wmat, gamma, beta, res2d, inv_m=1.0 / M, relu=relu)
    return y.reshape(N, Ho, Wo, cout_p)


# ------------------------------- ResNet blocks -------------------------------

def _basic_block(bp, x):
    out = conv_bn(x, bp['conv1'], bp['bn1'], stride=bp['stride'], pad=1, relu=True)
    if 'sc_conv' in bp:
        sc = conv_bn(x, bp['sc_conv'], bp['sc_bn'], stride=bp['stride'], pad=0,
                     relu=False)
    else:
        sc = x
    return conv_bn(out, bp['conv2'], bp['bn2'], stride=1, pad=1, relu=True,
                   residual=sc)


def _bottleneck_block(bp, x):
    out = conv_bn(x, bp['conv1'], bp['bn1'], stride=1, pad=0, relu=True)
    out = conv_bn(out, bp['conv2'], bp['bn2'], stride=bp['stride'], pad=1,
                  relu=True)
    if 'sc_conv' in bp:
        sc = conv_bn(x, bp['sc_conv'], bp['sc_bn'], stride=bp['stride'], pad=0,
                     relu=False)
    else:
        sc = x
    return conv_bn(out, bp['conv3'], bp['bn3'], stride=1, pad=0, relu=True,
                   residual=sc)


def supcon_forward(params, x_nchw):
    """SupConResNet.forward: feat = F.normalize(head(encoder(x)), dim=1)."""
    x = jnp.transpose(x_nchw, (0, 2, 3, 1)).astype(jnp.bfloat16)   # NCHW -> NHWC
    cin = x.shape[-1]
    cin_p = _rup128(cin)
    if cin_p != cin:     # lane-dense stem: pad image channels, weight rows too
        x = jnp.pad(x, ((0, 0), (0, 0), (0, 0), (0, cin_p - cin)))
    x = conv_bn(x, params['conv1'], params['bn1'], stride=1, pad=1, relu=True)
    block_fn = _bottleneck_block if params['block'] == 'bottleneck' else _basic_block
    for layer in params['layers']:
        for bp in layer:
            x = block_fn(bp, x)
    return head_forward(x, params['head'], params['head_type'])


# ----------------------------- parameter setup -------------------------------

MODEL_CFG = {
    'resnet18': ('basic', [2, 2, 2, 2], 512),
    'resnet34': ('basic', [3, 4, 6, 3], 512),
    'resnet50': ('bottleneck', [3, 4, 6, 3], 2048),
    'resnet101': ('bottleneck', [3, 4, 23, 3], 2048),
}


def _kaiming_conv(key, kh, kw, cin, cout):
    # kaiming_normal_(mode='fan_out', nonlinearity='relu'); stored HWIO.
    fan_out = cout * kh * kw
    std = (2.0 / fan_out) ** 0.5
    return jax.random.normal(key, (kh, kw, cin, cout), jnp.float32) * std


def _bn_init(c):
    return (jnp.ones((1, c), jnp.float32), jnp.zeros((1, c), jnp.float32))


def _linear_init(key, fan_in, fan_out):
    kw_, kb = jax.random.split(key)
    bound = 1.0 / (fan_in ** 0.5)
    w = jax.random.uniform(kw_, (fan_in, fan_out), jnp.float32, -bound, bound)
    b = jax.random.uniform(kb, (1, fan_out), jnp.float32, -bound, bound)
    return (w, b)


def build_supcon_params(key, name='resnet50', head='mlp', feat_dim=128, in_channel=3):
    if head not in ('mlp', 'linear'):
        raise NotImplementedError('head not supported: {}'.format(head))
    block, num_blocks, dim_in = MODEL_CFG[name]
    keys = iter(jax.random.split(key, 512))
    params = {'block': block, 'head_type': head}
    params['conv1'] = _kaiming_conv(next(keys), 3, 3, in_channel, 64)
    params['bn1'] = _bn_init(64)
    in_planes = 64
    layers = []
    for planes, nb, stride in zip([64, 128, 256, 512], num_blocks, [1, 2, 2, 2]):
        strides = [stride] + [1] * (nb - 1)
        blocks = []
        for s in strides:
            bp = {'stride': s}
            if block == 'bottleneck':
                bp['conv1'] = _kaiming_conv(next(keys), 1, 1, in_planes, planes)
                bp['bn1'] = _bn_init(planes)
                bp['conv2'] = _kaiming_conv(next(keys), 3, 3, planes, planes)
                bp['bn2'] = _bn_init(planes)
                bp['conv3'] = _kaiming_conv(next(keys), 1, 1, planes, planes * 4)
                bp['bn3'] = _bn_init(planes * 4)
                out_planes = planes * 4
            else:
                bp['conv1'] = _kaiming_conv(next(keys), 3, 3, in_planes, planes)
                bp['bn1'] = _bn_init(planes)
                bp['conv2'] = _kaiming_conv(next(keys), 3, 3, planes, planes)
                bp['bn2'] = _bn_init(planes)
                out_planes = planes
            if s != 1 or in_planes != out_planes:
                bp['sc_conv'] = _kaiming_conv(next(keys), 1, 1, in_planes, out_planes)
                bp['sc_bn'] = _bn_init(out_planes)
            in_planes = out_planes
            blocks.append(bp)
        layers.append(blocks)
    params['layers'] = layers
    if head == 'mlp':
        params['head'] = (_linear_init(next(keys), dim_in, dim_in),
                          _linear_init(next(keys), dim_in, feat_dim))
    else:
        params['head'] = (_linear_init(next(keys), dim_in, feat_dim),)
    return params
    # TODO(synk): BatchNorm running-stat updates (a training side effect) are not
    # materialized; only the forward activations are reproduced.


# ----------------------------------- main ------------------------------------

if __name__ == "__main__":
    key = jax.random.PRNGKey(0)
    pkey, xkey = jax.random.split(key)
    # Small shapes consistent with the module: batch=2, in_channel=3, 16x16 image.
    x = jax.random.normal(xkey, (2, 3, 16, 16), jnp.float32)   # NCHW (PyTorch layout)
    params = build_supcon_params(pkey, name='resnet50', head='mlp', feat_dim=128)
    feat = supcon_forward(params, x)
    feat = jax.block_until_ready(feat)
    assert feat.shape == (2, 128), feat.shape
    assert bool(jnp.all(jnp.isfinite(feat)))
    # each row is L2-normalized
    norms = jnp.linalg.norm(feat, axis=1)
    assert bool(jnp.all(jnp.abs(norms - 1.0) < 1e-3)), norms
    print("KERNEL_OK")
</pallas_src>

<mosaic_0001>
module attributes {stable_mosaic.version = 11 : i64} {
  func.func @_tap_bn_kernel(%arg0: i32, %arg1: i32, %arg2: memref<686x128xbf16, #tpu.memory_space<vmem>>, %arg3: memref<9x128x128xbf16, #tpu.memory_space<vmem>>, %arg4: memref<1x128xf32, #tpu.memory_space<vmem>>, %arg5: memref<1x128xf32, #tpu.memory_space<vmem>>, %arg6: memref<648x1xf32, #tpu.memory_space<vmem>>, %arg7: memref<648x128xbf16, #tpu.memory_space<vmem>>, %arg8: memref<648x128xf32, #tpu.memory_space<vmem>>) attributes {dimension_semantics = [#tpu.dimension_semantics<parallel>, #tpu.dimension_semantics<arbitrary>], iteration_bounds = array<i64: 1, 1>, scalar_prefetch = 0 : i64, scratch_operands = 1 : i64, tpu.core_type = #tpu.core_type<tc>, window_params = [{transform_indices = @transform_0, window_bounds = array<i64: 686, 128>}, {transform_indices = @transform_1, window_bounds = array<i64: 9, 128, 128>}, {transform_indices = @transform_2, window_bounds = array<i64: 1, 128>}, {transform_indices = @transform_3, window_bounds = array<i64: 1, 128>}, {pipeline_mode = #tpu.pipeline_mode<synchronous>, transform_indices = @transform_4, window_bounds = array<i64: 648, 1>}, {transform_indices = @transform_5, window_bounds = array<i64: 648, 128>}]} {
    %c0_i32 = arith.constant 0 : i32
    %0 = arith.cmpi eq, %arg1, %c0_i32 : i32
    %1 = arith.extui %0 : i1 to i32
    %c0_i32_0 = arith.constant 0 : i32
    %2 = arith.cmpi ne, %1, %c0_i32_0 : i32
    scf.if %2 {
      %cst_45 = arith.constant 0.000000e+00 : f32
      %53 = vector.broadcast %cst_45 : f32 to vector<648x128xf32>
      %c0_46 = arith.constant 0 : index
      %c0_47 = arith.constant 0 : index
      %54 = vector.load %arg8[%c0_46, %c0_47] : memref<648x128xf32, #tpu.memory_space<vmem>>, vector<648x128xf32>
      tpu.vector_store %arg8[%c0_46, %c0_47], %53 {strides = array<i32>} : memref<648x128xf32, #tpu.memory_space<vmem>>, vector<648x128xf32>,
    } else {
    }
    %c0 = arith.constant 0 : index
    %c0_1 = arith.constant 0 : index
    %3 = vector.load %arg8[%c0, %c0_1] : memref<648x128xf32, #tpu.memory_space<vmem>>, vector<648x128xf32>
    %c0_2 = arith.constant 0 : index
    %c0_3 = arith.constant 0 : index
    %4 = vector.load %arg2[%c0_2, %c0_3] : memref<686x128xbf16, #tpu.memory_space<vmem>>, vector<648x128xbf16>
    %c0_4 = arith.constant 0 : index
    %c0_5 = arith.constant 0 : index
    %c0_6 = arith.constant 0 : index
    %5 = vector.load %arg3[%c0_4, %c0_5, %c0_6] : memref<9x128x128xbf16, #tpu.memory_space<vmem>>, vector<1x128x128xbf16>
    %6 = vector.shape_cast %5 : vector<1x128x128xbf16> to vector<128x128xbf16>
    %cst = arith.constant dense<0.000000e+00> : vector<648x128xf32>
    %7 = tpu.matmul %4, %6, %cst {dimension_numbers = #tpu.dot_dimension_numbers<[1], [0], [0], [1], [0, 0, 1, 1], [], []>} : vector<648x128xbf16>, vector<128x128xbf16>, vector<648x128xf32> -> vector<648x128xf32>
    %8 = arith.addf %3, %7 : vector<648x128xf32>
    %c1 = arith.constant 1 : index
    %c0_7 = arith.constant 0 : index
    %9 = vector.load %arg2[%c1, %c0_7] : memref<686x128xbf16, #tpu.memory_space<vmem>>, vector<648x128xbf16>
    %c1_8 = arith.constant 1 : index
    %c0_9 = arith.constant 0 : index
    %c0_10 = arith.constant 0 : index
    %10 = vector.load %arg3[%c1_8, %c0_9, %c0_10] : memref<9x128x128xbf16, #tpu.memory_space<vmem>>, vector<1x128x128xbf16>
    %11 = vector.shape_cast %10 : vector<1x128x128xbf16> to vector<128x128xbf16>
    %cst_11 = arith.constant dense<0.000000e+00> : vector<648x128xf32>
    %12 = tpu.matmul %9, %11, %cst_11 {dimension_numbers = #tpu.dot_dimension_numbers<[1], [0], [0], [1], [0, 0, 1, 1], [], []>} : vector<648x128xbf16>, vector<128x128xbf16>, vector<648x128xf32> -> vector<648x128xf32>
    %13 = arith.addf %8, %12 : vector<648x128xf32>
    %c2 = arith.constant 2 : index
    %c0_12 = arith.constant 0 : index
    %14 = vector.load %arg2[%c2, %c0_12] : memref<686x128xbf16, #tpu.memory_space<vmem>>, vector<648x128xbf16>
    %c2_13 = arith.constant 2 : index
    %c0_14 = arith.constant 0 : index
    %c0_15 = arith.constant 0 : index
    %15 = vector.load %arg3[%c2_13, %c0_14, %c0_15] : memref<9x128x128xbf16, #tpu.memory_space<vmem>>, vector<1x128x128xbf16>
    %16 = vector.shape_cast %15 : vector<1x128x128xbf16> to vector<128x128xbf16>
    %cst_16 = arith.constant dense<0.000000e+00> : vector<648x128xf32>
    %17 = tpu.matmul %14, %16, %cst_16 {dimension_numbers = #tpu.dot_dimension_numbers<[1], [0], [0], [1], [0, 0, 1, 1], [], []>} : vector<648x128xbf16>, vector<128x128xbf16>, vector<648x128xf32> -> vector<648x128xf32>
    %18 = arith.addf %13, %17 : vector<648x128xf32>
    %c18 = arith.constant 18 : index
    %c0_17 = arith.constant 0 : index
    %19 = vector.load %arg2[%c18, %c0_17] : memref<686x128xbf16, #tpu.memory_space<vmem>>, vector<648x128xbf16>
    %c3 = arith.constant 3 : index
    %c0_18 = arith.constant 0 : index
    %c0_19 = arith.constant 0 : index
    %20 = vector.load %arg3[%c3, %c0_18, %c0_19] : memref<9x128x128xbf16, #tpu.memory_space<vmem>>, vector<1x128x128xbf16>
    %21 = vector.shape_cast %20 : vector<1x128x128xbf16> to vector<128x128xbf16>
    %cst_20 = arith.constant dense<0.000000e+00> : vector<648x128xf32>
    %22 = tpu.matmul %19, %21, %cst_20 {dimension_numbers = #tpu.dot_dimension_numbers<[1], [0], [0], [1], [0, 0, 1, 1], [], []>} : vector<648x128xbf16>, vector<128x128xbf16>, vector<648x128xf32> -> vector<648x128xf32>
    %23 = arith.addf %18, %22 : vector<648x128xf32>
    %c19 = arith.constant 19 : index
    %c0_21 = arith.constant 0 : index
    %24 = vector.load %arg2[%c19, %c0_21] : memref<686x128xbf16, #tpu.memory_space<vmem>>, vector<648x128xbf16>
    %c4 = arith.constant 4 : index
    %c0_22 = arith.constant 0 : index
    %c0_23 = arith.constant 0 : index
    %25 = vector.load %arg3[%c4, %c0_22, %c0_23] : memref<9x128x128xbf16, #tpu.memory_space<vmem>>, vector<1x128x128xbf16>
    %26 = vector.shape_cast %25 : vector<1x128x128xbf16> to vector<128x128xbf16>
    %cst_24 = arith.constant dense<0.000000e+00> : vector<648x128xf32>
    %27 = tpu.matmul %24, %26, %cst_24 {dimension_numbers = #tpu.dot_dimension_numbers<[1], [0], [0], [1], [0, 0, 1, 1], [], []>} : vector<648x128xbf16>, vector<128x128xbf16>, vector<648x128xf32> -> vector<648x128xf32>
    %28 = arith.addf %23, %27 : vector<648x128xf32>
    %c20 = arith.constant 20 : index
    %c0_25 = arith.constant 0 : index
    %29 = vector.load %arg2[%c20, %c0_25] : memref<686x128xbf16, #tpu.memory_space<vmem>>, vector<648x128xbf16>
    %c5 = arith.constant 5 : index
    %c0_26 = arith.constant 0 : index
    %c0_27 = arith.constant 0 : index
    %30 = vector.load %arg3[%c5, %c0_26, %c0_27] : memref<9x128x128xbf16, #tpu.memory_space<vmem>>, vector<1x128x128xbf16>
    %31 = vector.shape_cast %30 : vector<1x128x128xbf16> to vector<128x128xbf16>
    %cst_28 = arith.constant dense<0.000000e+00> : vector<648x128xf32>
    %32 = tpu.matmul %29, %31, %cst_28 {dimension_numbers = #tpu.dot_dimension_numbers<[1], [0], [0], [1], [0, 0, 1, 1], [], []>} : vector<648x128xbf16>, vector<128x128xbf16>, vector<648x128xf32> -> vector<648x128xf32>
    %33 = arith.addf %28, %32 : vector<648x128xf32>
    %c36 = arith.constant 36 : index
    %c0_29 = arith.constant 0 : index
    %34 = vector.load %arg2[%c36, %c0_29] : memref<686x128xbf16, #tpu.memory_space<vmem>>, vector<648x128xbf16>
    %c6 = arith.constant 6 : index
    %c0_30 = arith.constant 0 : index
    %c0_31 = arith.constant 0 : index
    %35 = vector.load %arg3[%c6, %c0_30, %c0_31] : memref<9x128x128xbf16, #tpu.memory_space<vmem>>, vector<1x128x128xbf16>
    %36 = vector.shape_cast %35 : vector<1x128x128xbf16> to vector<128x128xbf16>
    %cst_32 = arith.constant dense<0.000000e+00> : vector<648x128xf32>
    %37 = tpu.matmul %34, %36, %cst_32 {dimension_numbers = #tpu.dot_dimension_numbers<[1], [0], [0], [1], [0, 0, 1, 1], [], []>} : vector<648x128xbf16>, vector<128x128xbf16>, vector<648x128xf32> -> vector<648x128xf32>
    %38 = arith.addf %33, %37 : vector<648x128xf32>
    %c37 = arith.constant 37 : index
    %c0_33 = arith.constant 0 : index
    %39 = vector.load %arg2[%c37, %c0_33] : memref<686x128xbf16, #tpu.memory_space<vmem>>, vector<648x128xbf16>
    %c7 = arith.constant 7 : index
    %c0_34 = arith.constant 0 : index
    %c0_35 = arith.constant 0 : index
    %40 = vector.load %arg3[%c7, %c0_34, %c0_35] : memref<9x128x128xbf16, #tpu.memory_space<vmem>>, vector<1x128x128xbf16>
    %41 = vector.shape_cast %40 : vector<1x128x128xbf16> to vector<128x128xbf16>
    %cst_36 = arith.constant dense<0.000000e+00> : vector<648x128xf32>
    %42 = tpu.matmul %39, %41, %cst_36 {dimension_numbers = #tpu.dot_dimension_numbers<[1], [0], [0], [1], [0, 0, 1, 1], [], []>} : vector<648x128xbf16>, vector<128x128xbf16>, vector<648x128xf32> -> vector<648x128xf32>
    %43 = arith.addf %38, %42 : vector<648x128xf32>
    %c38 = arith.constant 38 : index
    %c0_37 = arith.constant 0 : index
    %44 = vector.load %arg2[%c38, %c0_37] : memref<686x128xbf16, #tpu.memory_space<vmem>>, vector<648x128xbf16>
    %c8 = arith.constant 8 : index
    %c0_38 = arith.constant 0 : index
    %c0_39 = arith.constant 0 : index
    %45 = vector.load %arg3[%c8, %c0_38, %c0_39] : memref<9x128x128xbf16, #tpu.memory_space<vmem>>, vector<1x128x128xbf16>
    %46 = vector.shape_cast %45 : vector<1x128x128xbf16> to vector<128x128xbf16>
    %cst_40 = arith.constant dense<0.000000e+00> : vector<648x128xf32>
    %47 = tpu.matmul %44, %46, %cst_40 {dimension_numbers = #tpu.dot_dimension_numbers<[1], [0], [0], [1], [0, 0, 1, 1], [], []>} : vector<648x128xbf16>, vector<128x128xbf16>, vector<648x128xf32> -> vector<648x128xf32>
    %48 = arith.addf %43, %47 : vector<648x128xf32>
    %c0_41 = arith.constant 0 : index
    %c0_42 = arith.constant 0 : index
    %49 = vector.load %arg8[%c0_41, %c0_42] : memref<648x128xf32, #tpu.memory_space<vmem>>, vector<648x128xf32>
    tpu.vector_store %arg8[%c0_41, %c0_42], %48 {strides = array<i32>} : memref<648x128xf32, #tpu.memory_space<vmem>>, vector<648x128xf32>,
    %c0_i32_43 = arith.constant 0 : i32
    %50 = arith.cmpi eq, %arg1, %c0_i32_43 : i32
    %51 = arith.extui %50 : i1 to i32
    %c0_i32_44 = arith.constant 0 : i32
    %52 = arith.cmpi ne, %51, %c0_i32_44 : i32
    scf.if %52 {
      %c0_45 = arith.constant 0 : index
      %c0_46 = arith.constant 0 : index
      %53 = vector.load %arg8[%c0_45, %c0_46] : memref<648x128xf32, #tpu.memory_space<vmem>>, vector<648x128xf32>
      %c0_47 = arith.constant 0 : index
      %c0_48 = arith.constant 0 : index
      %54 = vector.load %arg6[%c0_47, %c0_48] : memref<648x1xf32, #tpu.memory_space<vmem>>, vector<648x1xf32>
      %55 = vector.broadcast %54 : vector<648x1xf32> to vector<648x128xf32>
      %56 = arith.mulf %53, %55 : vector<648x128xf32>
      %cst_49 = arith.constant dense<0.000000e+00> : vector<128xf32>
      %57 = vector.multi_reduction <add>, %56, %cst_49 [0] : vector<648x128xf32> to vector<128xf32>
      %58 = vector.shape_cast %57 : vector<128xf32> to vector<1x128xf32>
      %59 = arith.mulf %56, %53 : vector<648x128xf32>
      %cst_50 = arith.constant dense<0.000000e+00> : vector<128xf32>
      %60 = vector.multi_reduction <add>, %59, %cst_50 [0] : vector<648x128xf32> to vector<128xf32>
      %61 = vector.shape_cast %60 : vector<128xf32> to vector<1x128xf32>
      %cst_51 = arith.constant 0.001953125 : f32
      %62 = vector.broadcast %cst_51 : f32 to vector<1x128xf32>
      %63 = arith.mulf %58, %62 : vector<1x128xf32>
      %cst_52 = arith.constant 0.001953125 : f32
      %64 = vector.broadcast %cst_52 : f32 to vector<1x128xf32>
      %65 = arith.mulf %61, %64 : vector<1x128xf32>
      %66 = arith.mulf %63, %63 : vector<1x128xf32>
      %67 = arith.subf %65, %66 : vector<1x128xf32>
      %cst_53 = arith.constant 0.000000e+00 : f32
      %68 = vector.broadcast %cst_53 : f32 to vector<1x128xf32>
      %69 = arith.maximumf %67, %68 : vector<1x128xf32>
      %c0_54 = arith.constant 0 : index
      %c0_55 = arith.constant 0 : index
      %70 = vector.load %arg4[%c0_54, %c0_55] : memref<1x128xf32, #tpu.memory_space<vmem>>, vector<1x128xf32>
      %cst_56 = arith.constant 9.99999974E-6 : f32
      %71 = vector.broadcast %cst_56 : f32 to vector<1x128xf32>
      %72 = arith.addf %69, %71 : vector<1x128xf32>
      %73 = math.rsqrt %72 : vector<1x128xf32>
      %74 = arith.mulf %70, %73 : vector<1x128xf32>
      %c0_57 = arith.constant 0 : index
      %c0_58 = arith.constant 0 : index
      %75 = vector.load %arg5[%c0_57, %c0_58] : memref<1x128xf32, #tpu.memory_space<vmem>>, vector<1x128xf32>
      %76 = arith.mulf %63, %74 : vector<1x128xf32>
      %77 = arith.subf %75, %76 : vector<1x128xf32>
      %78 = vector.broadcast %74 : vector<1x128xf32> to vector<648x128xf32>
      %79 = arith.mulf %53, %78 : vector<648x128xf32>
      %80 = vector.broadcast %77 : vector<1x128xf32> to vector<648x128xf32>
      %81 = arith.addf %79, %80 : vector<648x128xf32>
      %cst_59 = arith.constant 0.000000e+00 : f32
      %82 = vector.broadcast %cst_59 : f32 to vector<648x128xf32>
      %83 = arith.maximumf %81, %82 : vector<648x128xf32>
      %84 = vector.broadcast %54 : vector<648x1xf32> to vector<648x128xf32>
      %85 = arith.mulf %83, %84 : vector<648x128xf32>
      %86 = arith.truncf %85 : vector<648x128xf32> to vector<648x128xbf16>
      %c0_60 = arith.constant 0 : index
      %c0_61 = arith.constant 0 : index
      %87 = vector.load %arg7[%c0_60, %c0_61] : memref<648x128xbf16, #tpu.memory_space<vmem>>, vector<648x128xbf16>
      tpu.vector_store %arg7[%c0_60, %c0_61], %86 {strides = array<i32>} : memref<648x128xbf16, #tpu.memory_space<vmem>>, vector<648x128xbf16>,
    } else {
    }
    return
  }
  func.func @transform_0(%arg0: i32, %arg1: i32) -> (i32, i32) {
    %c0_i32 = arith.constant 0 : i32
    %c0_i32_0 = arith.constant 0 : i32
    return %c0_i32, %arg1 : i32, i32
  }
  func.func @transform_1(%arg0: i32, %arg1: i32) -> (i32, i32, i32) {
    %c0_i32 = arith.constant 0 : i32
    %c0_i32_0 = arith.constant 0 : i32
    return %c0_i32, %arg1, %arg0 : i32, i32, i32
  }
  func.func @transform_2(%arg0: i32, %arg1: i32) -> (i32, i32) {
    %c0_i32 = arith.constant 0 : i32
    %c0_i32_0 = arith.constant 0 : i32
    return %c0_i32, %arg0 : i32, i32
  }
  func.func @transform_3(%arg0: i32, %arg1: i32) -> (i32, i32) {
    %c0_i32 = arith.constant 0 : i32
    %c0_i32_0 = arith.constant 0 : i32
    return %c0_i32, %arg0 : i32, i32
  }
  func.func @transform_4(%arg0: i32, %arg1: i32) -> (i32, i32) {
    %c0_i32 = arith.constant 0 : i32
    %c0_i32_0 = arith.constant 0 : i32
    %c0_i32_1 = arith.constant 0 : i32
    return %c0_i32, %c0_i32_0 : i32, i32
  }
  func.func @transform_5(%arg0: i32, %arg1: i32) -> (i32, i32) {
    %c0_i32 = arith.constant 0 : i32
    %c0_i32_0 = arith.constant 0 : i32
    return %c0_i32, %arg0 : i32, i32
  }
}

</mosaic_0001>

<bundles_post_ra>
// kernel: tpu_custom_call.1
= control target key start
LH: loop header
LB: loop body
LE: loop exit
PB: predicated region body
PF: predicated region fallthrough
CT: control target
= control target key end

     0   :  { %10 = vsyncpa [#allocation4], 0  ;;  %s18022_s0 = inlined_call_operand.hbm [shape: bf16[686,128], index: 0, kind: input, shape index: {}]   ;;  %s18023_s1 = inlined_call_operand.vmem [shape: bf16[9,128,128], index: 1, kind: input, shape index: {}]   ;;  %s18024_s2 = inlined_call_operand.vmem [shape: f32[1,128], index: 2, kind: input, shape index: {}]   ;;  %s18025_s3 = inlined_call_operand.vmem [shape: f32[1,128], index: 3, kind: input, shape index: {}]   ;;  %s18026_s4 = inlined_call_operand.vmem [shape: f32[648,1], index: 4, kind: input, shape index: {}]   ;;  %s18027_s5 = inlined_call_operand.hbm [shape: bf16[648,128], index: 5, kind: output, shape index: {}]  }
   0x1   :  { %11 = vsyncpa [#allocation5], 0  ;;  %s14030_s18 = smov [#allocation3]   ;;  %s13982_s22 = scalar_lea.hbm %s18022_s0, 5504 }
   0x2   :  { %s17_s19 = sshll.u32 %s14030_s18, 4  ;;  %p13983_p0 = scmp.ne.s32.totalorder %s18022_s0, %s13982_s22  ;;  %s18_s19 = int_to_ptr.vmem [resolvable:$true] %s17_s19 }
   0x3   :  { %p13986_p1 = scmp.lt.u32.totalorder %s13982_s22, %s18022_s0 }
   0x5   :  { %p13988_p2 = pnand %p13986_p1, %p13983_p0 }
   0x7   :  { %13991 = shalt.err (!%p13988_p2)
}
   0x8   :  { %s13992_s27 = scalar_lea.vmem %s18_s19, 5504  ;;  %p13997_p4 = scmp.lt.s32.totalorder %s18_s19, %s18_s19 }
   0x9   :  { %p13993_p3 = scmp.ne.s32.totalorder %s18_s19, %s13992_s27  ;;  %p13998_p5 = scmp.lt.s32.totalorder %s13992_s27, %s13992_s27 }
   0xb   :  { %p13999_p6 = por %p13998_p5, %p13997_p4 }
   0xd   :  { %p14000_p7 = pnand %p13999_p6, %p13993_p3 }
   0xf   :  { %14003 = shalt.err (!%p14000_p7)
}
  0x10   :  { %s14031_s28 = smov 64   ;;  %s14032_s29 = smov 4  }
  0x11   :  { %23 = dma.hbm_to_vmem [thread:$0]  %s18022_s0, 5504, %s18_s19, [#allocation4], %s14031_s28, %s14031_s28, %s14032_s29  }
  0x12   :  { %14026 = dma.done.wait [#allocation4], 5504  }
  0x13   :  { %14027 = vsyncadd [#allocation4], 4294961792  ;;  %v18033_v0 = vmov 0.0   ;;  %vm14034_vm0 = vmmov 0   ;;  %v13604_v1 = vld [vmem:[%s18023_s1] sm:$0xff]   ;;  %v13606_v3 = vld [vmem:[%s18023_s1 + $0x8] sm:$0xff]  }
  0x14   :  { %10730 = vmatprep.subr.bf16.mxu1 %v18033_v0  ;;  %11450 = vmatprep.subr.bf16.mxu0 %v18033_v0  ;;  %v13605_v2 = vld [vmem:[%s18023_s1 + $0x100] sm:$0xff]   ;;  %v13607_v4 = vld [vmem:[%s18023_s1 + $0x108] sm:$0xff]   ;;  %v13608_v5 = vld [vmem:[%s18023_s1 + $0x10] sm:$0xff]   ;;  %vm3763_vm1 = vsmask.f32 6400  ;;  %vm4683_vm2 = vcmask 1045504  }
  0x15   :  { %10746 = vmatprep.mubr.msk.bf16.mxu1 %vm14034_vm0, %v18033_v0  ;;  %11466 = vmatprep.mubr.msk.bf16.mxu0 %vm14034_vm0, %v18033_v0  ;;  %v13609_v6 = vld [vmem:[%s18023_s1 + $0x110] sm:$0xff]   ;;  %v13610_v7 = vld [vmem:[%s18023_s1 + $0x18] sm:$0xff]   ;;  %v13612_v9 = vld [vmem:[%s18023_s1 + $0x20] sm:$0xff]   ;;  %vm1336_vm3 = vsmask.f32 7424  ;;  %vm2215_vm4 = vcmask 1046528  }
  0x16   :  { %10731 = vmatpush3.bf16.msra.mxu1 %v13604_v1  ;;  %11451 = vmatpush3.bf16.msra.mxu0 %v13605_v2  ;;  %v13611_v8 = vld [vmem:[%s18023_s1 + $0x118] sm:$0xff]   ;;  %v13613_v10 = vld [vmem:[%s18023_s1 + $0x120] sm:$0xff]   ;;  %v13614_v11 = vld [vmem:[%s18023_s1 + $0x28] sm:$0xff]   ;;  %vm6231_vm5 = vsmask.f32 5376  ;;  %vm7151_vm6 = vcmask 1044480  }
  0x17   :  { %10732 = vmatprep.subr.bf16.mxu1 %v18033_v0  ;;  %11452 = vmatprep.subr.bf16.mxu0 %v18033_v0  ;;  %v2827_v12 = vld [vmem:[#allocation3 + $0x8] sm:$0xe]  ;;  %v2828_v13 = vld [vmem:[#allocation3 + $0xc] sm:$0xf]  ;;  %v13622_v15 = vld [vmem:[#allocation3 + $0x10] sm:$0xff]  }
  0x18   :  { %v14129_v14 = vcombine.low %v2827_v12, %v2828_v13  ;;  %v13615_v16 = vld [vmem:[%s18023_s1 + $0x128] sm:$0xff]   ;;  %v3773_v19 = vshrl.u32 %v13622_v15, 16  ;;  %v3776_v20 = vshll.u32 %v13622_v15, 16  ;;  %v13616_v21 = vld [vmem:[%s18023_s1 + $0x30] sm:$0xff]   ;;  %v13625_v27 = vld [vmem:[#allocation3 + $0x18] sm:$0xff]  }
  0x19   :  { %v13617_v22 = vld [vmem:[%s18023_s1 + $0x130] sm:$0xff]   ;;  %v13618_v28 = vld [vmem:[%s18023_s1 + $0x38] sm:$0xff]   ;;  %v3782_v32 = vshrl.u32 %v13625_v27, 16  ;;  %v3785_v33 = vshll.u32 %v13625_v27, 16  ;;  %v13620_v34 = vld [vmem:[#allocation3] sm:$0xff]  }
  0x1a   :  { %10733 = vmatpush3.bf16.msra.mxu1 %v13606_v3  ;;  %11453 = vmatpush3.bf16.msra.mxu0 %v13607_v4  ;;  %v3765_v17 = vshrl.u32 %v14129_v14, 16  ;;  %v3768_v18 = vshll.u32 %v14129_v14, 16  ;;  %v3775_v25 = vrot.slane %v3773_v19, 1  ;;  %v3778_v26 = vrot.slane %v3776_v20, 2  ;;  %v13619_v29 = vld [vmem:[%s18023_s1 + $0x138] sm:$0xff]   ;;  %v13623_v35 = vld [vmem:[%s18023_s1 + $0x140] sm:$0xff]  }
  0x1b   :  { %10734 = vmatprep.subr.bf16.mxu1 %v18033_v0  ;;  %11454 = vmatprep.subr.bf16.mxu0 %v18033_v0  ;;  %v13628_v36 = vld [vmem:[#allocation3 + $0x20] sm:$0xff]   ;;  %v3784_v38 = vrot.slane %v3782_v32, 1  ;;  %v3787_v39 = vrot.slane %v3785_v33, 2  ;;  %v13629_v44 = vld [vmem:[%s18023_s1 + $0x148] sm:$0xff]   ;;  %v13636_v51 = vld [vmem:[%s18023_s1 + $0x150] sm:$0xff]  }
  0x1c   :  { %v3767_v23 = vrot.slane %v3765_v17, 1  ;;  %v3770_v24 = vrot.slane %v3768_v18, 2  ;;  %v3779_v31 = vor.u32 %v3778_v26, %v3775_v25  ;;  %v13626_v40 = vld [vmem:[%s18023_s1 + $0x40] sm:$0xff]   ;;  %v3791_v41 = vshrl.u32 %v13628_v36, 16  ;;  %v13624_v45 = vld [vmem:[#allocation3 + $0x8] sm:$0xff]   ;;  %v13644_v55 = vld [vmem:[%s18023_s1 + $0x158] sm:$0xff]  }
  0x1d   :  { %v3788_v42 = vor.u32 %v3787_v39, %v3784_v38  ;;  %v3794_v43 = vshll.u32 %v13628_v36, 16  ;;  %v13639_v46 = vld [vmem:[%s18023_s1 + $0x48] sm:$0xff]   ;;  %v13627_v56 = vld [vmem:[#allocation3 + $0x10] sm:$0xff]   ;;  %v13649_v61 = vld [vmem:[%s18023_s1 + $0x160] sm:$0xff]  }
  0x1e   :  { %10735 = vmatpush3.bf16.msra.mxu1 %v13608_v5  ;;  %11455 = vmatpush3.bf16.msra.mxu0 %v13609_v6  ;;  %v3771_v30 = vor.u32 %v3770_v24, %v3767_v23  ;;  %v3793_v48 = vrot.slane %v3791_v41, 1  ;;  %v13631_v50 = vld [vmem:[#allocation3 + $0x28] sm:$0xff]   ;;  %v13633_v57 = vld [vmem:[#allocation3 + $0x30] sm:$0xff]   ;;  %v13630_v3 = vld [vmem:[#allocation3 + $0x18] sm:$0xff]  }
  0x1f   :  { %10736 = vmatprep.subr.bf16.mxu1 %v18033_v0  ;;  %11456 = vmatprep.subr.bf16.mxu0 %v18033_v0  ;;  %v3789_v47 = vsel %vm3763_vm1, %v3779_v31, %v3788_v42  ;;  %v3796_v49 = vrot.slane %v3794_v43, 2  ;;  %v3800_v53 = vshrl.u32 %v13631_v50, 16  ;;  %v3803_v54 = vshll.u32 %v13631_v50, 16  ;;  %v13652_v2 = vld [vmem:[%s18023_s1 + $0x50] sm:$0xff]   ;;  %v13635_v4 = vld [vmem:[#allocation3 + $0x38] sm:$0xff]   ;;  %v13632_v12 = vld [vmem:[#allocation3 + $0x20] sm:$0xff]  }
  0x20   :  { %v3780_v37 = vsel %vm3763_vm1, %v3771_v30, %v3779_v31  ;;  %v3809_v63 = vshrl.u32 %v13633_v57, 16  ;;  %v3812_v1 = vshll.u32 %v13633_v57, 16  ;;  %v13662_v17 = vld [vmem:[%s18023_s1 + $0x170] sm:$0xff]   ;;  %v13665_v19 = vld [vmem:[%s18023_s1 + $0x58] sm:$0xff]   ;;  %v13634_v23 = vld [vmem:[#allocation3 + $0x28] sm:$0xff]  }
  0x21   :  { %v3797_v52 = vor.u32 %v3796_v49, %v3793_v48  ;;  %v3802_v59 = vrot.slane %v3800_v53, 1  ;;  %v3805_v60 = vrot.slane %v3803_v54, 2  ;;  %v13641_v24 = vld [vmem:[#allocation3 + $0x48] sm:$0xff]   ;;  %v13643_v30 = vld [vmem:[#allocation3 + $0x50] sm:$0xff]   ;;  %v13646_v39 = vld [vmem:[#allocation3 + $0x58] sm:$0xff]  }
  0x22   :  { %10737 = vmatpush3.bf16.msra.mxu1 %v13610_v7  ;;  %11457 = vmatpush3.bf16.msra.mxu0 %v13611_v8  ;;  %v3811_v6 = vrot.slane %v3809_v63, 1  ;;  %v3814_v7 = vrot.slane %v3812_v1, 2  ;;  %v3818_v8 = vshrl.u32 %v13635_v4, 16  ;;  %v3839_v32 = vshll.u32 %v13641_v24, 16  ;;  %v13637_v33 = vld [vmem:[#allocation3 + $0x30] sm:$0xff]   ;;  %v13640_v43 = vld [vmem:[#allocation3 + $0x38] sm:$0xff]  }
  0x23   :  { %10738 = vmatprep.subr.bf16.mxu1 %v18033_v0  ;;  %11458 = vmatprep.subr.bf16.mxu0 %v18033_v0  ;;  %v3798_v58 = vsel %vm3763_vm1, %v3788_v42, %v3797_v52  ;;  %v3806_v62 = vor.u32 %v3805_v60, %v3802_v59  ;;  %v3848_v36 = vshll.u32 %v13643_v30, 16  ;;  %v13645_v59 = vld [vmem:[#allocation3 + $0x48] sm:$0xff]  }
  0x24   :  { %v3820_v13 = vrot.slane %v3818_v8, 1  ;;  %v3841_v38 = vrot.slane %v3839_v32, 2 }
  0x25   :  { %v3807_v5 = vsel %vm3763_vm1, %v3797_v52, %v3806_v62  ;;  %v3850_v42 = vrot.slane %v3848_v36, 2 }
  0x26   :  { %10739 = vmatpush3.bf16.msra.mxu1 %v13612_v9  ;;  %11459 = vmatpush3.bf16.msra.mxu0 %v13613_v10  ;;  %v3821_v9 = vshll.u32 %v13635_v4, 16  ;;  %v13657_v10 = vld [vmem:[%s18023_s1 + $0x168] sm:$0xff]  }
  0x27   :  { %10740 = vmatprep.subr.bf16.mxu1 %v18033_v0  ;;  %11460 = vmatprep.subr.bf16.mxu0 %v18033_v0 }
  0x28   :  { %v3823_v15 = vrot.slane %v3821_v9, 2  ;;  %v14263_v9 = vld [vmem:[#allocation3 + $0x78] sm:$0xff]  }
  0x2a   :  { %10741 = vmatpush3.bf16.msra.mxu1 %v13614_v11  ;;  %11461 = vmatpush3.bf16.msra.mxu0 %v13615_v16  ;;  %v3815_v11 = vor.u32 %v3814_v7, %v3811_v6  ;;  %v13638_v16 = vld [vmem:[#allocation3 + $0x40] sm:$0xff]   ;;  %v3824_v20 = vor.u32 %v3823_v15, %v3820_v13 }
  0x2b   :  { %10742 = vmatprep.subr.bf16.mxu1 %v18033_v0  ;;  %11462 = vmatprep.subr.bf16.mxu0 %v18033_v0 }
  0x2c   :  { %v3816_v18 = vsel %vm3763_vm1, %v3806_v62, %v3815_v11  ;;  %v3825_v25 = vsel %vm3763_vm1, %v3815_v11, %v3824_v20  ;;  %v13685_v11 = vld [vmem:[%s18023_s1 + $0x68] sm:$0xff]  }
  0x2e   :  { %10743 = vmatpush3.bf16.msra.mxu1 %v13616_v21  ;;  %11463 = vmatpush3.bf16.msra.mxu0 %v13617_v22  ;;  %v3827_v21 = vshrl.u32 %v13638_v16, 16  ;;  %v3830_v22 = vshll.u32 %v13638_v16, 16  ;;  %v3890_v16 = vshrl.u32 %v14263_v9, 16 }
  0x2f   :  { %10744 = vmatprep.subr.bf16.mxu1 %v18033_v0  ;;  %11464 = vmatprep.subr.bf16.mxu0 %v18033_v0 }
  0x30   :  { %v3829_v26 = vrot.slane %v3827_v21, 1  ;;  %v3832_v27 = vrot.slane %v3830_v22, 2 }
  0x32   :  { %10745 = vmatpush3.bf16.msra.mxu1 %v13618_v28  ;;  %11465 = vmatpush3.bf16.msra.mxu0 %v13619_v29  ;;  %v13670_v28 = vld [vmem:[%s18023_s1 + $0x178] sm:$0xff]   ;;  %v3836_v29 = vshrl.u32 %v13641_v24, 16  ;;  %v3833_v31 = vor.u32 %v3832_v27, %v3829_v26  ;;  %v14285_v27 = vld [vmem:[#allocation3 + $0x88] sm:$0xff]  }
  0x33   :  { %10910 = vmatprep.subr.bf16.mxu1 %v18033_v0  ;;  %11630 = vmatprep.subr.bf16.mxu0 %v18033_v0 }
  0x35   :  { %10747 = vmatmul.mubr.bf16.vlgmr.msra.gmra.mrb[0].mxu1 %v13620_v34  ;;  %11467 = vmatmul.mubr.bf16.vlgmr.msra.gmra.mrb[0].mxu0 %v3780_v37  ;;  %v3838_v34 = vrot.slane %v3836_v29, 1  ;;  %v3834_v37 = vsel %vm3763_vm1, %v3824_v20, %v3833_v31  ;;  %v13653_v20 = vld [vmem:[#allocation3 + $0x60] sm:$0xff]  }
  0x36   :  { %10750 = vmatprep.mubr.msk.bf16.mxu1 %vm14034_vm0, %v18033_v0  ;;  %11631 = vmatpush3.bf16.msra.mxu0 %v13623_v35  ;;  %v3845_v35 = vshrl.u32 %v13643_v30, 16 }
  0x37   :  { %11470 = vmatprep.mubr.msk.bf16.mxu0 %vm14034_vm0, %v18033_v0  ;;  %10911 = vmatpush3.bf16.msra.mxu1 %v13626_v40  ;;  %v13678_v40 = vld [vmem:[%s18023_s1 + $0x60] sm:$0xff]  }
  0x38   :  { %11632 = vmatprep.subr.bf16.mxu0 %v18033_v0  ;;  %10912 = vmatprep.subr.bf16.mxu1 %v18033_v0  ;;  %v3847_v41 = vrot.slane %v3845_v35, 1  ;;  %v13658_v35 = vld [vmem:[#allocation3 + $0x70] sm:$0xff]  }
  0x3a   :  { %11633 = vmatpush3.bf16.msra.mxu0 %v13629_v44  ;;  %v3842_v44 = vor.u32 %v3841_v38, %v3838_v34  ;;  %v3851_v52 = vor.u32 %v3850_v42, %v3847_v41  ;;  %v3911_v34 = vshll.u32 %v14285_v27, 16  ;;  %v14298_v38 = vld [vmem:[#allocation3 + $0x90] sm:$0xff]   ;;  %v13660_v42 = vld [vmem:[#allocation3 + $0x78] sm:$0xff]  }
  0x3b   :  { %11634 = vmatprep.subr.bf16.mxu0 %v18033_v0  ;;  %10913 = vmatpush3.bf16.msra.mxu1 %v13639_v46  ;;  %v3857_v46 = vshll.u32 %v13646_v39, 16  ;;  %v3917_v41 = vshrl.u32 %v14298_v38, 16 }
  0x3c   :  { %10914 = vmatprep.subr.bf16.mxu1 %v18033_v0  ;;  %v3843_v48 = vsel %vm3763_vm1, %v3833_v31, %v3842_v44 }
  0x3d   :  { %10751 = vmatmul.mubr.bf16.gmra.mrb[4].mxu1 %v13624_v45  ;;  %11471 = vmatmul.mubr.bf16.gmra.mrb[4].mxu0 %v3789_v47  ;;  %v3854_v45 = vshrl.u32 %v13646_v39, 16  ;;  %v13648_v47 = vld [vmem:[#allocation3 + $0x60] sm:$0xff]   ;;  %v3859_v50 = vrot.slane %v3857_v46, 2 }
  0x3e   :  { %10754 = vmatprep.mubr.msk.bf16.mxu1 %vm14034_vm0, %v18033_v0  ;;  %11474 = vmatprep.mubr.msk.bf16.mxu0 %vm14034_vm0, %v18033_v0  ;;  %v3863_v53 = vshrl.u32 %v13648_v47, 16  ;;  %v3866_v54 = vshll.u32 %v13648_v47, 16 }
  0x3f   :  { %11635 = vmatpush3.bf16.msra.mxu0 %v13636_v51  ;;  %10915 = vmatpush3.bf16.msra.mxu1 %v13652_v2  ;;  %v3856_v49 = vrot.slane %v3854_v45, 1  ;;  %v13642_v51 = vld [vmem:[#allocation3 + $0x40] sm:$0xff]   ;;  %v14254_v2 = vld [vmem:[#allocation3 + $0x70] sm:$0xff]   ;;  %v3920_v45 = vshll.u32 %v14298_v38, 16 }
  0x40   :  { %11636 = vmatprep.subr.bf16.mxu0 %v18033_v0  ;;  %10916 = vmatprep.subr.bf16.mxu1 %v18033_v0  ;;  %v3865_v57 = vrot.slane %v3863_v53, 1  ;;  %v3881_v6 = vshrl.u32 %v14254_v2, 16  ;;  %v3884_v8 = vshll.u32 %v14254_v2, 16 }
  0x41   :  { %v3860_v60 = vor.u32 %v3859_v50, %v3856_v49  ;;  %v3922_v47 = vrot.slane %v3920_v45, 2  ;;  %v13692_v49 = vld [vmem:[%s18023_s1 + $0x70] sm:$0xff]   ;;  %v13663_v50 = vld [vmem:[#allocation3 + $0x80] sm:$0xff]   ;;  %v13698_v45 = vld [vmem:[%s18023_s1 + $0x198] sm:$0xff]  }
  0x42   :  { %v3886_v15 = vrot.slane %v3884_v8, 2  ;;  %v14338_v8 = vld [vmem:[#allocation3 + $0xb0] sm:$0xff]  }
  0x43   :  { %11637 = vmatpush3.bf16.msra.mxu0 %v13644_v55  ;;  %10917 = vmatpush3.bf16.msra.mxu1 %v13665_v19  ;;  %v13651_v55 = vld [vmem:[#allocation3 + $0x68] sm:$0xff]   ;;  %v3861_v63 = vsel %vm3763_vm1, %v3851_v52, %v3860_v60  ;;  %v3893_v19 = vshll.u32 %v14263_v9, 16 }
  0x44   :  { %11638 = vmatprep.subr.bf16.mxu0 %v18033_v0  ;;  %10918 = vmatprep.subr.bf16.mxu1 %v18033_v0  ;;  %v3875_v62 = vshll.u32 %v13651_v55, 16 }
  0x45   :  { %10755 = vmatmul.mubr.bf16.gmra.mrb[8].mxu1 %v13627_v56  ;;  %11475 = vmatmul.mubr.bf16.gmra.mrb[8].mxu0 %v3798_v58  ;;  %v3852_v56 = vsel %vm3763_vm1, %v3842_v44, %v3851_v52  ;;  %v3868_v58 = vrot.slane %v3866_v54, 2  ;;  %v3895_v22 = vrot.slane %v3893_v19, 2  ;;  %v3919_v44 = vrot.slane %v3917_v41, 1  ;;  %v14319_v54 = vld [vmem:[#allocation3 + $0xa0] sm:$0xff]  }
  0x46   :  { %10758 = vmatprep.mubr.msk.bf16.mxu1 %vm14034_vm0, %v18033_v0  ;;  %11478 = vmatprep.mubr.msk.bf16.mxu0 %vm14034_vm0, %v18033_v0 }
  0x47   :  { %11639 = vmatpush3.bf16.msra.mxu0 %v13649_v61  ;;  %10919 = vmatpush3.bf16.msra.mxu1 %v13678_v40  ;;  %v3872_v61 = vshrl.u32 %v13651_v55, 16  ;;  %v3869_v4 = vor.u32 %v3868_v58, %v3865_v57  ;;  %v3913_v40 = vrot.slane %v3911_v34, 2  ;;  %v13666_v58 = vld [vmem:[#allocation3 + $0x88] sm:$0xff]   ;;  %v13677_v34 = vld [vmem:[%s18023_s1 + $0x180] sm:$0xff]  }
  0x48   :  { %11640 = vmatprep.subr.bf16.mxu0 %v18033_v0  ;;  %10920 = vmatprep.subr.bf16.mxu1 %v18033_v0 }
  0x49   :  { %v3874_v1 = vrot.slane %v3872_v61, 1  ;;  %v3870_v7 = vsel %vm3763_vm1, %v3860_v60, %v3869_v4  ;;  %v3935_v60 = vshrl.u32 %v14319_v54, 16  ;;  %v3938_v61 = vshll.u32 %v14319_v54, 16 }
  0x4b   :  { %11641 = vmatpush3.bf16.msra.mxu0 %v13657_v10  ;;  %v3883_v10 = vrot.slane %v3881_v6, 1  ;;  %10921 = vmatpush3.bf16.msra.mxu1 %v13685_v11 }
  0x4c   :  { %11642 = vmatprep.subr.bf16.mxu0 %v18033_v0  ;;  %10922 = vmatprep.subr.bf16.mxu1 %v18033_v0 }
  0x4d   :  { %10759 = vmatmul.mubr.bf16.gmra.mrb[12].mxu1 %v13630_v3  ;;  %11479 = vmatmul.mubr.bf16.gmra.mrb[12].mxu0 %v3807_v5  ;;  %v13647_v3 = vld [vmem:[#allocation3 + $0x50] sm:$0xff]   ;;  %v3877_v5 = vrot.slane %v3875_v62, 2  ;;  %v3887_v21 = vor.u32 %v3886_v15, %v3883_v10  ;;  %v14329_v62 = vld [vmem:[#allocation3 + $0xa8] sm:$0xff]  }
  0x4e   :  { %10762 = vmatprep.mubr.msk.bf16.mxu1 %vm14034_vm0, %v18033_v0  ;;  %11482 = vmatprep.mubr.msk.bf16.mxu0 %vm14034_vm0, %v18033_v0  ;;  %v3944_v6 = vshrl.u32 %v14329_v62, 16 }
  0x4f   :  { %11643 = vmatpush3.bf16.msra.mxu0 %v13662_v17  ;;  %v3878_v13 = vor.u32 %v3877_v5, %v3874_v1  ;;  %10923 = vmatpush3.bf16.msra.mxu1 %v13692_v49  ;;  %v3937_v1 = vrot.slane %v3935_v60, 1  ;;  %v13851_v49 = vld [vmem:[#allocation3 + $0x28] sm:$0xff]  }
  0x50   :  { %11644 = vmatprep.subr.bf16.mxu0 %v18033_v0  ;;  %10924 = vmatprep.subr.bf16.mxu1 %v18033_v0  ;;  %v3946_v11 = vrot.slane %v3944_v6, 1  ;;  %v13855_v6 = vld [vmem:[#allocation3 + $0x48] sm:$0xff]  }
  0x51   :  { %v3879_v17 = vsel %vm3763_vm1, %v3869_v4, %v3878_v13  ;;  %v3888_v24 = vsel %vm3763_vm1, %v3878_v13, %v3887_v21  ;;  %v13668_v4 = vld [vmem:[#allocation3 + $0x90] sm:$0xff]   ;;  %v13671_v13 = vld [vmem:[#allocation3 + $0x98] sm:$0xff]  }
  0x53   :  { %11645 = vmatpush3.bf16.msra.mxu0 %v13670_v28  ;;  %v13655_v28 = vld [vmem:[#allocation3 + $0x68] sm:$0xff]  }
  0x54   :  { %11810 = vmatprep.subr.bf16.mxu0 %v18033_v0 }
  0x55   :  { %10763 = vmatmul.mubr.bf16.gmra.mrb[16].mxu1 %v13632_v12  ;;  %11483 = vmatmul.mubr.bf16.gmra.mrb[16].mxu0 %v3816_v18  ;;  %v13650_v12 = vld [vmem:[#allocation3 + $0x58] sm:$0xff]   ;;  %v3892_v18 = vrot.slane %v3890_v16, 1  ;;  %v3953_v16 = vshrl.u32 %v14338_v8, 16 }
  0x56   :  { %10766 = vmatprep.mubr.msk.bf16.mxu1 %vm14034_vm0, %v18033_v0  ;;  %11486 = vmatprep.mubr.msk.bf16.mxu0 %vm14034_vm0, %v18033_v0 }
  0x57   :  { %v3896_v29 = vor.u32 %v3895_v22, %v3892_v18  ;;  %v3955_v19 = vrot.slane %v3953_v16, 1 }
  0x59   :  { %v3897_v32 = vsel %vm3763_vm1, %v3887_v21, %v3896_v29  ;;  %v13673_v21 = vld [vmem:[#allocation3 + $0xa0] sm:$0xff]  }
  0x5d   :  { %10767 = vmatmul.mubr.bf16.gmra.mrb[20].mxu1 %v13634_v23  ;;  %11487 = vmatmul.mubr.bf16.gmra.mrb[20].mxu0 %v3825_v25  ;;  %v14280_v23 = vld [vmem:[#allocation3 + $0x80] sm:$0xff]  }
  0x5e   :  { %10770 = vmatprep.mubr.msk.bf16.mxu1 %vm14034_vm0, %v18033_v0  ;;  %11490 = vmatprep.mubr.msk.bf16.mxu0 %vm14034_vm0, %v18033_v0  ;;  %v3899_v25 = vshrl.u32 %v14280_v23, 16  ;;  %v3902_v26 = vshll.u32 %v14280_v23, 16 }
  0x60   :  { %v3901_v30 = vrot.slane %v3899_v25, 1  ;;  %v3904_v31 = vrot.slane %v3902_v26, 2  ;;  %v13847_v26 = vld [vmem:[#allocation3 + $0xc] sm:$0xf] }
  0x62   :  { %v3905_v36 = vor.u32 %v3904_v31, %v3901_v30  ;;  %v13848_v31 = vld [vmem:[#allocation3 + $0x10] sm:$0xff]  }
  0x64   :  { %v3906_v39 = vsel %vm3763_vm1, %v3896_v29, %v3905_v36  ;;  %v13675_v29 = vld [vmem:[#allocation3 + $0xa8] sm:$0xff]  }
  0x65   :  { %10771 = vmatmul.mubr.bf16.gmra.mrb[24].mxu1 %v13637_v33  ;;  %11491 = vmatmul.mubr.bf16.gmra.mrb[24].mxu0 %v3834_v37  ;;  %v3908_v33 = vshrl.u32 %v14285_v27, 16 }
  0x66   :  { %10774 = vmatprep.mubr.msk.bf16.mxu1 %vm14034_vm0, %v18033_v0  ;;  %11494 = vmatprep.mubr.msk.bf16.mxu0 %vm14034_vm0, %v18033_v0 }
  0x67   :  { %v3910_v37 = vrot.slane %v3908_v33, 1 }
  0x6d   :  { %10775 = vmatmul.mubr.bf16.gmra.mrb[28].mxu1 %v13640_v43  ;;  %11495 = vmatmul.mubr.bf16.gmra.mrb[28].mxu0 %v3843_v48  ;;  %v3914_v43 = vor.u32 %v3913_v40, %v3910_v37  ;;  %v14308_v48 = vld [vmem:[#allocation3 + $0x98] sm:$0xff]   ;;  %v13679_v40 = vld [vmem:[#allocation3 + $0xb0] sm:$0xff]  }
  0x6e   :  { %10778 = vmatprep.mubr.msk.bf16.mxu1 %vm14034_vm0, %v18033_v0  ;;  %11498 = vmatprep.mubr.msk.bf16.mxu0 %vm14034_vm0, %v18033_v0  ;;  %v3926_v52 = vshrl.u32 %v14308_v48, 16  ;;  %v3929_v53 = vshll.u32 %v14308_v48, 16 }
  0x6f   :  { %v3915_v46 = vsel %vm3763_vm1, %v3905_v36, %v3914_v43  ;;  %v13849_v36 = vld [vmem:[#allocation3 + $0x18] sm:$0xff]  }
  0x70   :  { %v3931_v57 = vrot.slane %v3929_v53, 2  ;;  %v4687_v37 = vrot.slane %v13849_v36, 2  ;;  %v13852_v53 = vld [vmem:[#allocation3 + $0x30] sm:$0xff]   ;;  %v4711_v36 = vrot.slane %v14263_v9, 2  ;;  %v4715_v9 = vrot.slane %v14285_v27, 2 }
  0x71   :  { %v4717_v27 = vrot.slane %v14298_v38, 2  ;;  %v4721_v38 = vrot.slane %v14319_v54, 2 }
  0x75   :  { %10779 = vmatmul.mubr.bf16.gmra.mrb[32].mxu1 %v13642_v51  ;;  %11499 = vmatmul.mubr.bf16.gmra.mrb[32].mxu0 %v3852_v56  ;;  %v3923_v51 = vor.u32 %v3922_v47, %v3919_v44  ;;  %v3928_v56 = vrot.slane %v3926_v52, 1 }
  0x76   :  { %10782 = vmatprep.mubr.msk.bf16.mxu1 %vm14034_vm0, %v18033_v0  ;;  %11502 = vmatprep.mubr.msk.bf16.mxu0 %vm14034_vm0, %v18033_v0 }
  0x77   :  { %v3924_v55 = vsel %vm3763_vm1, %v3914_v43, %v3923_v51  ;;  %v13850_v43 = vld [vmem:[#allocation3 + $0x20] sm:$0xff]  }
  0x78   :  { %v4689_v44 = vrot.slane %v13850_v43, 2  ;;  %v13697_v43 = vld [vmem:[#allocation3 + $0x120] sm:$0xff]  }
  0x7a   :  { %v4690_v47 = vsel %vm4683_vm2, %v4687_v37, %v4689_v44 }
  0x7d   :  { %10783 = vmatmul.mubr.bf16.gmra.mrb[36].mxu1 %v13645_v59  ;;  %11503 = vmatmul.mubr.bf16.gmra.mrb[36].mxu0 %v3861_v63  ;;  %v3932_v59 = vor.u32 %v3931_v57, %v3928_v56  ;;  %v13682_v56 = vld [vmem:[#allocation3 + $0xc8] sm:$0xff]  }
  0x7e   :  { %10786 = vmatprep.mubr.msk.bf16.mxu1 %vm14034_vm0, %v18033_v0  ;;  %11506 = vmatprep.mubr.msk.bf16.mxu0 %vm14034_vm0, %v18033_v0 }
  0x7f   :  { %v3933_v63 = vsel %vm3763_vm1, %v3923_v51, %v3932_v59  ;;  %v13681_v51 = vld [vmem:[#allocation3 + $0xc0] sm:$0xff]  }
  0x85   :  { %10787 = vmatmul.mubr.bf16.gmra.mrb[40].mxu1 %v13647_v3  ;;  %11507 = vmatmul.mubr.bf16.gmra.mrb[40].mxu0 %v3870_v7  ;;  %v3940_v3 = vrot.slane %v3938_v61, 2  ;;  %v3947_v7 = vshll.u32 %v14329_v62, 16  ;;  %v13683_v61 = vld [vmem:[#allocation3 + $0xd0] sm:$0xff]  }
  0x86   :  { %10790 = vmatprep.mubr.msk.bf16.mxu1 %vm14034_vm0, %v18033_v0  ;;  %11510 = vmatprep.mubr.msk.bf16.mxu0 %vm14034_vm0, %v18033_v0 }
  0x87   :  { %v3941_v5 = vor.u32 %v3940_v3, %v3937_v1  ;;  %v13854_v1 = vld [vmem:[#allocation3 + $0x40] sm:$0xff]  }
  0x88   :  { %v4697_v3 = vrot.slane %v13854_v1, 2 }
  0x89   :  { %v3942_v10 = vsel %vm3763_vm1, %v3932_v59, %v3941_v5  ;;  %v13853_v59 = vld [vmem:[#allocation3 + $0x38] sm:$0xff]  }
  0x8a   :  { %v4695_v60 = vrot.slane %v13853_v59, 2 }
  0x8d   :  { %10791 = vmatmul.mubr.bf16.gmra.mrb[44].mxu1 %v13650_v12  ;;  %11511 = vmatmul.mubr.bf16.gmra.mrb[44].mxu0 %v3879_v17  ;;  %v3949_v12 = vrot.slane %v3947_v7, 2  ;;  %v3956_v17 = vshll.u32 %v14338_v8, 16  ;;  %v4699_v7 = vrot.slane %v13855_v6, 2 }
  0x8e   :  { %10794 = vmatprep.mubr.msk.bf16.mxu1 %vm14034_vm0, %v18033_v0  ;;  %11514 = vmatprep.mubr.msk.bf16.mxu0 %vm14034_vm0, %v18033_v0 }
  0x8f   :  { %v3950_v15 = vor.u32 %v3949_v12, %v3946_v11  ;;  %v4700_v11 = vsel %vm4683_vm2, %v4697_v3, %v4699_v7  ;;  %v13856_v12 = vld [vmem:[#allocation3 + $0x50] sm:$0xff]  }
  0x91   :  { %v3951_v18 = vsel %vm3763_vm1, %v3941_v5, %v3950_v15  ;;  %v4698_v5 = vsel %vm4683_vm2, %v4695_v60, %v4697_v3  ;;  %v13707_v3 = vld [vmem:[#allocation3 + $0x10] sm:$0xff]  }
  0x92   :  { %v1353_v6 = vshll.u32 %v13707_v3, 16 }
  0x95   :  { %10795 = vmatmul.mubr.bf16.gmra.mrb[48].mxu1 %v13653_v20  ;;  %11515 = vmatmul.mubr.bf16.gmra.mrb[48].mxu0 %v3888_v24  ;;  %v3958_v20 = vrot.slane %v3956_v17, 2  ;;  %v4662_v24 = vld [vmem:[#allocation3 + $0x8] sm:$0xc]  ;;  %v13857_v17 = vld [vmem:[#allocation3 + $0x58] sm:$0xff]  }
  0x96   :  { %10798 = vmatprep.mubr.msk.bf16.mxu1 %vm14034_vm0, %v18033_v0  ;;  %11518 = vmatprep.mubr.msk.bf16.mxu0 %vm14034_vm0, %v18033_v0 }
  0x97   :  { %v14352_v22 = vor.u32 %v3958_v20, %v3955_v19  ;;  %v13689_v19 = vld [vmem:[#allocation3 + $0xf0] sm:$0xff]  }
  0x99   :  { %18204 = vst [vmem:[#allocation9_spill] sm:$0xff] %v14352_v22  ;;  %v3960_v25 = vsel %vm3763_vm1, %v3950_v15, %v14352_v22  ;;  %v13688_v15 = vld [vmem:[#allocation3 + $0xe8] sm:$0xff]  }
  0x9d   :  { %10799 = vmatmul.mubr.bf16.gmra.mrb[52].mxu1 %v13655_v28  ;;  %11519 = vmatmul.mubr.bf16.gmra.mrb[52].mxu0 %v3897_v32  ;;  %v9764_v28 = vcombine.low %v4662_v24, %v13847_v26  ;;  %v4685_v32 = vrot.slane %v13848_v31, 2  ;;  %v13858_v24 = vld [vmem:[#allocation3 + $0x60] sm:$0xff]   ;;  %v13690_v26 = vld [vmem:[#allocation3 + $0xf8] sm:$0xff]  }
  0x9e   :  { %10802 = vmatprep.mubr.msk.bf16.mxu1 %vm14034_vm0, %v18033_v0  ;;  %11522 = vmatprep.mubr.msk.bf16.mxu0 %vm14034_vm0, %v18033_v0  ;;  %v13693_v31 = vld [vmem:[#allocation3 + $0x100] sm:$0xff]  }
  0x9f   :  { %v4684_v30 = vrot.slane %v9764_v28, 2  ;;  %v4688_v41 = vsel %vm4683_vm2, %v4685_v32, %v4687_v37  ;;  %v13695_v37 = vld [vmem:[#allocation3 + $0x110] sm:$0xff]  }
  0xa1   :  { %v4686_v33 = vsel %vm4683_vm2, %v4684_v30, %v4685_v32 }
  0xa5   :  { %10803 = vmatmul.mubr.bf16.gmra.mrb[56].mxu1 %v13658_v35  ;;  %11523 = vmatmul.mubr.bf16.gmra.mrb[56].mxu0 %v3906_v39  ;;  %v13700_v35 = vld [vmem:[%s18023_s1 + $0x78] sm:$0xff]   ;;  %v13684_v39 = vld [vmem:[%s18023_s1 + $0x188] sm:$0xff]  }
  0xa6   :  { %10806 = vmatprep.mubr.msk.bf16.mxu1 %vm14034_vm0, %v18033_v0  ;;  %11526 = vmatprep.mubr.msk.bf16.mxu0 %vm14034_vm0, %v18033_v0 }
  0xa7   :  { %10925 = vmatpush3.bf16.msra.mxu1 %v13700_v35 }
  0xa8   :  { %11090 = vmatprep.subr.bf16.mxu1 %v18033_v0 }
  0xad   :  { %10807 = vmatmul.mubr.bf16.gmra.mrb[60].mxu1 %v13660_v42  ;;  %11527 = vmatmul.mubr.bf16.gmra.mrb[60].mxu0 %v3915_v46  ;;  %v13691_v42 = vld [vmem:[%s18023_s1 + $0x190] sm:$0xff]   ;;  %v13680_v46 = vld [vmem:[#allocation3 + $0xb8] sm:$0xff]  }
  0xae   :  { %10810 = vmatprep.mubr.msk.bf16.mxu1 %vm14034_vm0, %v18033_v0  ;;  %11530 = vmatprep.mubr.msk.bf16.mxu0 %vm14034_vm0, %v18033_v0 }
  0xb5   :  { %10811 = vmatmul.mubr.bf16.gmra.mrb[64].mxu1 %v13663_v50  ;;  %11531 = vmatmul.mubr.bf16.gmra.mrb[64].mxu0 %v3924_v55  ;;  %v4691_v50 = vrot.slane %v13851_v49, 2  ;;  %v4693_v55 = vrot.slane %v13852_v53, 2 }
  0xb6   :  { %10814 = vmatprep.mubr.msk.bf16.mxu1 %vm14034_vm0, %v18033_v0  ;;  %11534 = vmatprep.mubr.msk.bf16.mxu0 %vm14034_vm0, %v18033_v0 }
  0xb7   :  { %v4692_v52 = vsel %vm4683_vm2, %v4689_v44, %v4691_v50  ;;  %v4694_v57 = vsel %vm4683_vm2, %v4691_v50, %v4693_v55  ;;  %v13699_v44 = vld [vmem:[#allocation3 + $0x128] sm:$0xff]   ;;  %v1032_v50 = vld [vmem:[#allocation3] sm:$0xf] }
  0xbd   :  { %10815 = vmatmul.mubr.bf16.gmra.mrb[68].mxu1 %v13666_v58  ;;  %11535 = vmatmul.mubr.bf16.gmra.mrb[68].mxu0 %v3933_v63  ;;  %v13706_v58 = vld [vmem:[%s18023_s1 + $0x1a0] sm:$0xff]   ;;  %v4696_v63 = vsel %vm4683_vm2, %v4693_v55, %v4695_v60 }
  0xbe   :  { %10818 = vmatprep.mubr.msk.bf16.mxu1 %vm14034_vm0, %v18033_v0  ;;  %11538 = vmatprep.mubr.msk.bf16.mxu0 %vm14034_vm0, %v18033_v0 }
  0xc5   :  { %10819 = vmatmul.mubr.bf16.gmra.mrb[72].mxu1 %v13668_v4  ;;  %11539 = vmatmul.mubr.bf16.gmra.mrb[72].mxu0 %v3942_v10  ;;  %v13686_v4 = vld [vmem:[#allocation3 + $0xd8] sm:$0xff]   ;;  %v13687_v10 = vld [vmem:[#allocation3 + $0xe0] sm:$0xff]  }
  0xc6   :  { %10822 = vmatprep.mubr.msk.bf16.mxu1 %vm14034_vm0, %v18033_v0  ;;  %11542 = vmatprep.mubr.msk.bf16.mxu0 %vm14034_vm0, %v18033_v0 }
  0xcd   :  { %10823 = vmatmul.mubr.bf16.gmra.mrb[76].mxu1 %v13671_v13  ;;  %11543 = vmatmul.mubr.bf16.gmra.mrb[76].mxu0 %v3951_v18  ;;  %v4701_v13 = vrot.slane %v13856_v12, 2  ;;  %v4703_v18 = vrot.slane %v13857_v17, 2  ;;  %v13721_v17 = vld [vmem:[%s18023_s1 + $0x88] sm:$0xff]  }
  0xce   :  { %10826 = vmatprep.mubr.msk.bf16.mxu1 %vm14034_vm0, %v18033_v0  ;;  %11546 = vmatprep.mubr.msk.bf16.mxu0 %vm14034_vm0, %v18033_v0 }
  0xcf   :  { %v4702_v16 = vsel %vm4683_vm2, %v4699_v7, %v4701_v13  ;;  %v4704_v20 = vsel %vm4683_vm2, %v4701_v13, %v4703_v18  ;;  %v1355_v13 = vrot.slane %v1353_v6, 1 }
  0xd5   :  { %10827 = vmatmul.mubr.bf16.gmra.mrb[80].mxu1 %v13673_v21  ;;  %11547 = vmatmul.mubr.bf16.gmra.mrb[80].mxu0 %v3960_v25  ;;  %v13718_v21 = vld [vmem:[%s18023_s1 + $0x1a8] sm:$0xff]   ;;  %v4705_v25 = vrot.slane %v13858_v24, 2  ;;  %v13711_v24 = vld [vmem:[#allocation3 + $0xc0] sm:$0xff]  }
  0xd6   :  { %10830 = vmatprep.mubr.msk.bf16.mxu1 %vm14034_vm0, %v18033_v0  ;;  %11646 = vmatprep.mubr.msk.bf16.mxu0 %vm14034_vm0, %v18033_v0 }
  0xd7   :  { %v4706_v28 = vsel %vm4683_vm2, %v4703_v18, %v4705_v25 }
  0xdd   :  { %10831 = vmatmul.mubr.bf16.gmra.mrb[84].mxu1 %v13675_v29  ;;  %11647 = vmatmul.mubr.bf16.vlgmr.msra.gmra.mrb[0].mxu0 %v4686_v33  ;;  %v13859_v29 = vld [vmem:[#allocation3 + $0x68] sm:$0xff]   ;;  %v4709_v33 = vrot.slane %v14254_v2, 2  ;;  %v4713_v2 = vrot.slane %v14280_v23, 2 }
  0xde   :  { %10834 = vmatprep.mubr.msk.bf16.mxu1 %vm14034_vm0, %v18033_v0  ;;  %11811 = vmatpush3.bf16.msra.mxu0 %v13677_v34  ;;  %v4707_v30 = vrot.slane %v13859_v29, 2  ;;  %v13694_v34 = vld [vmem:[#allocation3 + $0x108] sm:$0xff]   ;;  %v13712_v29 = vld [vmem:[#allocation3 + $0x20] sm:$0xff]  }
  0xdf   :  { %11650 = vmatprep.mubr.msk.bf16.mxu0 %vm14034_vm0, %v18033_v0  ;;  %11812 = vmatprep.subr.bf16.mxu0 %v18033_v0  ;;  %v4716_v23 = vsel %vm4683_vm2, %v4713_v2, %v4715_v9 }
  0xe0   :  { %v4708_v32 = vsel %vm4683_vm2, %v4705_v25, %v4707_v30  ;;  %v4710_v35 = vsel %vm4683_vm2, %v4707_v30, %v4709_v33  ;;  %v13733_v25 = vld [vmem:[%s18023_s1 + $0x90] sm:$0xff]   ;;  %v4729_v30 = vrot.slane %v13711_v24, 2 }
  0xe2   :  { %11813 = vmatpush3.bf16.msra.mxu0 %v13684_v39  ;;  %v4712_v39 = vsel %vm4683_vm2, %v4709_v33, %v4711_v36 }
  0xe3   :  { %11814 = vmatprep.subr.bf16.mxu0 %v18033_v0 }
  0xe5   :  { %10835 = vmatmul.mubr.bf16.gmra.mrb[88].mxu1 %v13679_v40  ;;  %11651 = vmatmul.mubr.bf16.gmra.mrb[4].mxu0 %v4688_v41  ;;  %v13696_v40 = vld [vmem:[#allocation3 + $0x118] sm:$0xff]   ;;  %v4714_v41 = vsel %vm4683_vm2, %v4711_v36, %v4713_v2  ;;  %v13713_v36 = vld [vmem:[#allocation3 + $0xc8] sm:$0xff]  }
  0xe6   :  { %10838 = vmatprep.mubr.msk.bf16.mxu1 %vm14034_vm0, %v18033_v0  ;;  %11654 = vmatprep.mubr.msk.bf16.mxu0 %vm14034_vm0, %v18033_v0  ;;  %v13714_v2 = vld [vmem:[#allocation3 + $0x28] sm:$0xff]  }
  0xe7   :  { %11815 = vmatpush3.bf16.msra.mxu0 %v13691_v42  ;;  %v13730_v42 = vld [vmem:[%s18023_s1 + $0x1b0] sm:$0xff]  }
  0xe8   :  { %11816 = vmatprep.subr.bf16.mxu0 %v18033_v0 }
  0xeb   :  { %11817 = vmatpush3.bf16.msra.mxu0 %v13698_v45  ;;  %v4718_v45 = vsel %vm4683_vm2, %v4715_v9, %v4717_v27  ;;  %v1373_v9 = vshrl.u32 %v13712_v29, 16 }
  0xec   :  { %11818 = vmatprep.subr.bf16.mxu0 %v18033_v0 }
  0xed   :  { %10839 = vmatmul.mubr.bf16.gmra.mrb[92].mxu1 %v13680_v46  ;;  %11655 = vmatmul.mubr.bf16.gmra.mrb[8].mxu0 %v4690_v47  ;;  %v4719_v46 = vrot.slane %v14308_v48, 2  ;;  %v13701_v47 = vld [vmem:[#allocation3 + $0x130] sm:$0xff]   ;;  %v13705_v48 = vld [vmem:[#allocation3 + $0x8] sm:$0xff]  }
  0xee   :  { %10842 = vmatprep.mubr.msk.bf16.mxu1 %vm14034_vm0, %v18033_v0  ;;  %11658 = vmatprep.mubr.msk.bf16.mxu0 %vm14034_vm0, %v18033_v0  ;;  %v1345_v60 = vshll.u32 %v13705_v48, 16 }
  0xef   :  { %11819 = vmatpush3.bf16.msra.mxu0 %v13706_v58  ;;  %v4720_v49 = vsel %vm4683_vm2, %v4717_v27, %v4719_v46  ;;  %v4722_v55 = vsel %vm4683_vm2, %v4719_v46, %v4721_v38  ;;  %v13703_v58 = vld [vmem:[#allocation3 + $0x140] ss:$0 sps:$4 sm:$0xff]  }
  0xf0   :  { %11820 = vmatprep.subr.bf16.mxu0 %v18033_v0  ;;  %v1347_v1 = vrot.slane %v1345_v60, 1 }
  0xf3   :  { %11821 = vmatpush3.bf16.msra.mxu0 %v13718_v21 }
  0xf4   :  { %11822 = vmatprep.subr.bf16.mxu0 %v18033_v0 }
  0xf5   :  { %10843 = vmatmul.mubr.bf16.gmra.mrb[96].mxu1 %v13681_v51  ;;  %11659 = vmatmul.mubr.bf16.gmra.mrb[12].mxu0 %v4692_v52  ;;  %v1033_v51 = vld [vmem:[#allocation3 + $0x4] sm:$0xf]  ;;  %v13702_v52 = vld [vmem:[#allocation3 + $0x138] sm:$0xff]  }
  0xf6   :  { %10846 = vmatprep.mubr.msk.bf16.mxu1 %vm14034_vm0, %v18033_v0  ;;  %11662 = vmatprep.mubr.msk.bf16.mxu0 %vm14034_vm0, %v18033_v0  ;;  %v9584_v53 = vcombine.low %v1032_v50, %v1033_v51  ;;  %v13717_v51 = vld [vmem:[#allocation3 + $0xd8] sm:$0xff]  }
  0xf7   :  { %11823 = vmatpush3.bf16.msra.mxu0 %v13730_v42  ;;  %v1377_v42 = vshll.u32 %v13714_v2, 16 }
  0xf8   :  { %11824 = vmatprep.subr.bf16.mxu0 %v18033_v0  ;;  %v1338_v54 = vshrl.u32 %v9584_v53, 16 }
  0xfd   :  { %10847 = vmatmul.mubr.bf16.gmra.mrb[100].mxu1 %v13682_v56  ;;  %11663 = vmatmul.mubr.bf16.gmra.mrb[16].mxu0 %v4694_v57  ;;  %v1340_v56 = vshll.u32 %v9584_v53, 16  ;;  %v4723_v57 = vrot.slane %v14329_v62, 2  ;;  %v4725_v62 = vrot.slane %v14338_v8, 2  ;;  %v13744_v8 = vld [vmem:[%s18023_s1 + $0x1b8] sm:$0xff]  }
  0xfe   :  { %10850 = vmatprep.mubr.msk.bf16.mxu1 %vm14034_vm0, %v18033_v0  ;;  %11666 = vmatprep.mubr.msk.bf16.mxu0 %vm14034_vm0, %v18033_v0 }
  0xff   :  { %v1342_v59 = vrot.slane %v1340_v56, 1  ;;  %v4726_v7 = vsel %vm4683_vm2, %v4723_v57, %v4725_v62  ;;  %11825 = vmatpush3.bf16.msra.mxu0 %v13744_v8 }
 0x100   :  { %11990 = vmatprep.subr.bf16.mxu0 %v18033_v0 }
 0x105   :  { %10851 = vmatmul.mubr.bf16.gmra.mrb[104].mxu1 %v13683_v61  ;;  %11667 = vmatmul.mubr.bf16.gmra.mrb[20].mxu0 %v4696_v63  ;;  %v4724_v61 = vsel %vm4683_vm2, %v4721_v38, %v4723_v57  ;;  %v1343_v63 = vor.u32 %v1342_v59, %v1338_v54  ;;  %v13720_v59 = vld [vmem:[#allocation3 + $0xe0] sm:$0xff]  }
 0x106   :  { %10854 = vmatprep.mubr.msk.bf16.mxu1 %vm14034_vm0, %v18033_v0  ;;  %11670 = vmatprep.mubr.msk.bf16.mxu0 %vm14034_vm0, %v18033_v0 }
 0x10d   :  { %10855 = vmatmul.mubr.bf16.gmra.mrb[108].mxu1 %v13686_v4  ;;  %11671 = vmatmul.mubr.bf16.gmra.mrb[24].mxu0 %v4698_v5  ;;  %v1348_v4 = vsel %vm1336_vm3, %v1343_v63, %v1347_v1  ;;  %v1349_v5 = vshrl.u32 %v13705_v48, 16  ;;  %v4735_v48 = vrot.slane %v13717_v51, 2  ;;  %v13722_v63 = vld [vmem:[#allocation3 + $0x40] sm:$0xff]  }
 0x10e   :  { %10858 = vmatprep.mubr.msk.bf16.mxu1 %vm14034_vm0, %v18033_v0  ;;  %11674 = vmatprep.mubr.msk.bf16.mxu0 %vm14034_vm0, %v18033_v0  ;;  %v1405_v8 = vshrl.u32 %v13722_v63, 16 }
 0x10f   :  { %v1351_v12 = vor.u32 %v1349_v5, %v1347_v1  ;;  %v4737_v1 = vrot.slane %v13720_v59, 2  ;;  %v1401_v5 = vshll.u32 %v13722_v63, 16 }
 0x111   :  { %v1356_v18 = vsel %vm1336_vm3, %v1351_v12, %v1355_v13  ;;  %v4738_v6 = vsel %vm4683_vm2, %v4735_v48, %v4737_v1  ;;  %v13724_v12 = vld [vmem:[#allocation3 + $0x48] sm:$0xff]  }
 0x115   :  { %10859 = vmatmul.mubr.bf16.gmra.mrb[112].mxu1 %v13687_v10  ;;  %11675 = vmatmul.mubr.bf16.gmra.mrb[28].mxu0 %v4700_v11  ;;  %v13708_v10 = vld [vmem:[#allocation3 + $0xb8] sm:$0xff]   ;;  %v13709_v11 = vld [vmem:[%s18023_s1 + $0x80] sm:$0xff]  }
 0x116   :  { %10862 = vmatprep.mubr.msk.bf16.mxu1 %vm14034_vm0, %v18033_v0  ;;  %11678 = vmatprep.mubr.msk.bf16.mxu0 %vm14034_vm0, %v18033_v0 }
 0x11d   :  { %10863 = vmatmul.mubr.bf16.gmra.mrb[116].mxu1 %v13688_v15  ;;  %11679 = vmatmul.mubr.bf16.gmra.mrb[32].mxu0 %v4702_v16  ;;  %v13710_v15 = vld [vmem:[#allocation3 + $0x18] sm:$0xff]   ;;  %v4727_v16 = vrot.slane %v13708_v10, 2 }
 0x11e   :  { %10866 = vmatprep.mubr.msk.bf16.mxu1 %vm14034_vm0, %v18033_v0  ;;  %11682 = vmatprep.mubr.msk.bf16.mxu0 %vm14034_vm0, %v18033_v0  ;;  %v1365_v33 = vshrl.u32 %v13710_v15, 16 }
 0x11f   :  { %v4728_v21 = vsel %vm4683_vm2, %v4725_v62, %v4727_v16 }
 0x125   :  { %10867 = vmatmul.mubr.bf16.gmra.mrb[120].mxu1 %v13689_v19  ;;  %11683 = vmatmul.mubr.bf16.gmra.mrb[36].mxu0 %v4704_v20  ;;  %v1357_v19 = vshrl.u32 %v13707_v3, 16  ;;  %v1361_v20 = vshll.u32 %v13710_v15, 16  ;;  %v13757_v3 = vld [vmem:[%s18023_s1 + $0xa0] sm:$0xff]  }
 0x126   :  { %10870 = vmatprep.mubr.msk.bf16.mxu1 %vm14034_vm0, %v18033_v0  ;;  %11686 = vmatprep.mubr.msk.bf16.mxu0 %vm14034_vm0, %v18033_v0 }
 0x12d   :  { %10871 = vmatmul.mubr.bf16.gmra.mrb[124].mxu1 %v13690_v26  ;;  %11687 = vmatmul.mubr.bf16.gmra.mrb[40].mxu0 %v4706_v28  ;;  %v1359_v26 = vor.u32 %v1357_v19, %v1355_v13  ;;  %v1363_v28 = vrot.slane %v1361_v20, 1 }
 0x12e   :  { %10874 = vmatprep.mubr.msk.bf16.mxu1 %vm14034_vm0, %v18033_v0  ;;  %11690 = vmatprep.mubr.msk.bf16.mxu0 %vm14034_vm0, %v18033_v0 }
 0x135   :  { %10875 = vmatmul.mubr.bf16.gmra.mrb[128].mxu1 %v13693_v31  ;;  %11691 = vmatmul.mubr.bf16.gmra.mrb[44].mxu0 %v4708_v32  ;;  %v13745_v31 = vld [vmem:[%s18023_s1 + $0x98] sm:$0xff]   ;;  %v1364_v32 = vsel %vm1336_vm3, %v1359_v26, %v1363_v28  ;;  %v1413_v26 = vshrl.u32 %v13724_v12, 16 }
 0x136   :  { %10878 = vmatprep.mubr.msk.bf16.mxu1 %vm14034_vm0, %v18033_v0  ;;  %11694 = vmatprep.mubr.msk.bf16.mxu0 %vm14034_vm0, %v18033_v0 }
 0x13d   :  { %10879 = vmatmul.mubr.bf16.gmra.mrb[132].mxu1 %v13694_v34  ;;  %11695 = vmatmul.mubr.bf16.gmra.mrb[48].mxu0 %v4710_v35  ;;  %v1369_v34 = vshll.u32 %v13712_v29, 16  ;;  %v4730_v35 = vsel %vm4683_vm2, %v4727_v16, %v4729_v30  ;;  %v1409_v16 = vshll.u32 %v13724_v12, 16  ;;  %v13739_v12 = vld [vmem:[#allocation3 + $0x120] sm:$0xff]  }
 0x13e   :  { %10882 = vmatprep.mubr.msk.bf16.mxu1 %vm14034_vm0, %v18033_v0  ;;  %11698 = vmatprep.mubr.msk.bf16.mxu0 %vm14034_vm0, %v18033_v0 }
 0x13f   :  { %v1411_v20 = vrot.slane %v1409_v16, 1  ;;  %v4753_v16 = vrot.slane %v13739_v12, 2  ;;  %v5296_v12 = vld [vmem:[#allocation3 + $0x14] sm:$0xf] }
 0x145   :  { %10883 = vmatmul.mubr.bf16.gmra.mrb[136].mxu1 %v13695_v37  ;;  %11699 = vmatmul.mubr.bf16.gmra.mrb[52].mxu0 %v4712_v39  ;;  %v1367_v37 = vor.u32 %v1365_v33, %v1363_v28  ;;  %v1371_v39 = vrot.slane %v1369_v34, 1  ;;  %v13728_v33 = vld [vmem:[#allocation3 + $0x58] sm:$0xff]  }
 0x146   :  { %10886 = vmatprep.mubr.msk.bf16.mxu1 %vm14034_vm0, %v18033_v0  ;;  %11702 = vmatprep.mubr.msk.bf16.mxu0 %vm14034_vm0, %v18033_v0 }
 0x147   :  { %v1375_v27 = vor.u32 %v1373_v9, %v1371_v39  ;;  %v13731_v9 = vld [vmem:[#allocation3 + $0x60] sm:$0xff]  }
 0x14d   :  { %10887 = vmatmul.mubr.bf16.gmra.mrb[140].mxu1 %v13696_v40  ;;  %11703 = vmatmul.mubr.bf16.gmra.mrb[56].mxu0 %v4714_v41  ;;  %v4731_v40 = vrot.slane %v13713_v36, 2  ;;  %v1372_v41 = vsel %vm1336_vm3, %v1367_v37, %v1371_v39  ;;  %v1425_v37 = vshll.u32 %v13728_v33, 16 }
 0x14e   :  { %10890 = vmatprep.mubr.msk.bf16.mxu1 %vm14034_vm0, %v18033_v0  ;;  %11706 = vmatprep.mubr.msk.bf16.mxu0 %vm14034_vm0, %v18033_v0 }
 0x155   :  { %10891 = vmatmul.mubr.bf16.gmra.mrb[144].mxu1 %v13697_v43  ;;  %11707 = vmatmul.mubr.bf16.gmra.mrb[60].mxu0 %v4716_v23  ;;  %v4732_v43 = vsel %vm4683_vm2, %v4729_v30, %v4731_v40  ;;  %v13715_v23 = vld [vmem:[#allocation3 + $0xd0] sm:$0xff]   ;;  %v13727_v30 = vld [vmem:[#allocation3 + $0xf8] sm:$0xff]  }
 0x156   :  { %10894 = vmatprep.mubr.msk.bf16.mxu1 %vm14034_vm0, %v18033_v0  ;;  %11710 = vmatprep.mubr.msk.bf16.mxu0 %vm14034_vm0, %v18033_v0  ;;  %v4733_v46 = vrot.slane %v13715_v23, 2  ;;  %v4743_v34 = vrot.slane %v13727_v30, 2  ;;  %v1429_v23 = vshrl.u32 %v13728_v33, 16  ;;  %v13743_v33 = vld [vmem:[#allocation3 + $0x130] sm:$0xff]  }
 0x158   :  { %v4734_v50 = vsel %vm4683_vm2, %v4731_v40, %v4733_v46  ;;  %v4736_v54 = vsel %vm4683_vm2, %v4733_v46, %v4735_v48  ;;  %v13735_v48 = vld [vmem:[#allocation3 + $0x110] sm:$0xff]  }
 0x15d   :  { %10895 = vmatmul.mubr.bf16.gmra.mrb[148].mxu1 %v13699_v44  ;;  %11711 = vmatmul.mubr.bf16.gmra.mrb[64].mxu0 %v4718_v45  ;;  %v1379_v44 = vrot.slane %v1377_v42, 1  ;;  %v13716_v45 = vld [vmem:[#allocation3 + $0x30] sm:$0xff]  }
 0x15e   :  { %10898 = vmatprep.mubr.msk.bf16.mxu1 %vm14034_vm0, %v18033_v0  ;;  %11714 = vmatprep.mubr.msk.bf16.mxu0 %vm14034_vm0, %v18033_v0  ;;  %v1385_v38 = vshll.u32 %v13716_v45, 16  ;;  %v1389_v57 = vshrl.u32 %v13716_v45, 16  ;;  %v13732_v45 = vld [vmem:[#allocation3 + $0x108] sm:$0xff]  }
 0x160   :  { %v1387_v53 = vrot.slane %v1385_v38, 1  ;;  %v13769_v38 = vld [vmem:[%s18023_s1 + $0xa8] sm:$0xff]  }
 0x162   :  { %v1391_v60 = vor.u32 %v1389_v57, %v1387_v53 }
 0x165   :  { %10899 = vmatmul.mubr.bf16.gmra.mrb[152].mxu1 %v13701_v47  ;;  %11715 = vmatmul.mubr.bf16.gmra.mrb[68].mxu0 %v4720_v49  ;;  %v1380_v47 = vsel %vm1336_vm3, %v1375_v27, %v1379_v44  ;;  %v1381_v49 = vshrl.u32 %v13714_v2, 16  ;;  %v13729_v2 = vld [vmem:[#allocation3 + $0x100] sm:$0xff]   ;;  %v1433_v27 = vshll.u32 %v13731_v9, 16 }
 0x166   :  { %10902 = vmatprep.mubr.msk.bf16.mxu1 %vm14034_vm0, %v18033_v0  ;;  %11718 = vmatprep.mubr.msk.bf16.mxu0 %vm14034_vm0, %v18033_v0  ;;  %v4745_v42 = vrot.slane %v13729_v2, 2 }
 0x16d   :  { %10903 = vmatmul.mubr.bf16.gmra.mrb[156].mxu1 %v13702_v52  ;;  %11719 = vmatmul.mubr.bf16.gmra.mrb[72].mxu0 %v4722_v55  ;;  %v1383_v52 = vor.u32 %v1381_v49, %v1379_v44  ;;  %v13719_v55 = vld [vmem:[#allocation3 + $0x38] sm:$0xff]   ;;  %v4746_v44 = vsel %vm4683_vm2, %v4743_v34, %v4745_v42  ;;  %v13734_v49 = vld [vmem:[#allocation3 + $0x68] sm:$0xff]  }
 0x16e   :  { %10906 = vmatprep.mubr.msk.bf16.mxu1 %vm14034_vm0, %v18033_v0  ;;  %11722 = vmatprep.mubr.msk.bf16.mxu0 %vm14034_vm0, %v18033_v0 }
 0x16f   :  { %v1388_v56 = vsel %vm1336_vm3, %v1383_v52, %v1387_v53  ;;  %v1437_v52 = vshrl.u32 %v13731_v9, 16  ;;  %v1441_v53 = vshll.u32 %v13734_v49, 16 }
 0x171   :  { %v1443_v57 = vrot.slane %v1441_v53, 1 }
 0x175   :  { %10907 = vmatmul.mubr.bf16.gmra.mrb[160].mxu1 %v13703_v58  ;;  %11723 = vmatmul.mubr.bf16.gmra.mrb[76].mxu0 %v4724_v61  ;;  %v1393_v58 = vshll.u32 %v13719_v55, 16 }
 0x176   :  { %10926 = vmatprep.mubr.msk.bf16.mxu1 %vm14034_vm0, %v18033_v0  ;;  %11726 = vmatprep.mubr.msk.bf16.mxu0 %vm14034_vm0, %v18033_v0 }
 0x177   :  { %v1395_v61 = vrot.slane %v1393_v58, 1  ;;  %v13736_v58 = vld [vmem:[#allocation3 + $0x70] sm:$0xff]  }
 0x179   :  { %v1396_v62 = vsel %vm1336_vm3, %v1391_v60, %v1395_v61  ;;  %v1445_v60 = vshrl.u32 %v13734_v49, 16 }
 0x17d   :  { %10927 = vmatmul.mubr.bf16.vlgmr.msra.gmra.mrb[0].mxu1 %v1348_v4  ;;  %11727 = vmatmul.mubr.bf16.gmra.mrb[80].mxu0 %v4726_v7  ;;  %v1397_v4 = vshrl.u32 %v13719_v55, 16  ;;  %v13723_v7 = vld [vmem:[#allocation3 + $0xe8] sm:$0xff]  }
 0x17e   :  { %10930 = vmatprep.mubr.msk.bf16.mxu1 %vm14034_vm0, %v18033_v0  ;;  %11730 = vmatprep.mubr.msk.bf16.mxu0 %vm14034_vm0, %v18033_v0  ;;  %v4739_v13 = vrot.slane %v13723_v7, 2  ;;  %v1453_v7 = vshrl.u32 %v13736_v58, 16 }
 0x17f   :  { %11091 = vmatpush3.bf16.msra.mxu1 %v13709_v11  ;;  %v1399_v10 = vor.u32 %v1397_v4, %v1395_v61  ;;  %v1403_v11 = vrot.slane %v1401_v5, 1  ;;  %v1449_v61 = vshll.u32 %v13736_v58, 16  ;;  %v13738_v4 = vld [vmem:[#allocation3 + $0x78] sm:$0xff]  }
 0x180   :  { %11092 = vmatprep.subr.bf16.mxu1 %v18033_v0 }
 0x181   :  { %v1404_v15 = vsel %vm1336_vm3, %v1399_v10, %v1403_v11  ;;  %v1407_v19 = vor.u32 %v1405_v8, %v1403_v11  ;;  %v1457_v10 = vshll.u32 %v13738_v4, 16  ;;  %v13740_v8 = vld [vmem:[#allocation3 + $0x80] sm:$0xff]  }
 0x182   :  { %v1469_v30 = vshrl.u32 %v13740_v8, 16 }
 0x183   :  { %11093 = vmatpush3.bf16.msra.mxu1 %v13721_v17  ;;  %v4740_v17 = vsel %vm4683_vm2, %v4737_v1, %v4739_v13  ;;  %v13737_v1 = vld [vmem:[#allocation3 + $0x118] sm:$0xff]  }
 0x184   :  { %11094 = vmatprep.subr.bf16.mxu1 %v18033_v0  ;;  %v4751_v5 = vrot.slane %v13737_v1, 2 }
 0x185   :  { %10931 = vmatmul.mubr.bf16.gmra.mrb[4].mxu1 %v1356_v18  ;;  %11731 = vmatmul.mubr.bf16.gmra.mrb[84].mxu0 %v4728_v21  ;;  %v13725_v18 = vld [vmem:[#allocation3 + $0xf0] sm:$0xff]  }
 0x186   :  { %10934 = vmatprep.mubr.msk.bf16.mxu1 %vm14034_vm0, %v18033_v0  ;;  %11734 = vmatprep.mubr.msk.bf16.mxu0 %vm14034_vm0, %v18033_v0  ;;  %v13726_v21 = vld [vmem:[#allocation3 + $0x50] sm:$0xff]   ;;  %v4741_v24 = vrot.slane %v13725_v18, 2  ;;  %v1461_v18 = vshrl.u32 %v13738_v4, 16 }
 0x187   :  { %11095 = vmatpush3.bf16.msra.mxu1 %v13733_v25  ;;  %v1412_v25 = vsel %vm1336_vm3, %v1407_v19, %v1411_v20  ;;  %v1417_v28 = vshll.u32 %v13726_v21, 16  ;;  %v1421_v36 = vshrl.u32 %v13726_v21, 16  ;;  %v1465_v19 = vshll.u32 %v13740_v8, 16  ;;  %v13741_v21 = vld [vmem:[#allocation3 + $0x128] sm:$0xff]  }
 0x188   :  { %11096 = vmatprep.subr.bf16.mxu1 %v18033_v0  ;;  %v4742_v29 = vsel %vm4683_vm2, %v4739_v13, %v4741_v24  ;;  %v4744_v39 = vsel %vm4683_vm2, %v4741_v24, %v4743_v34 }
 0x18b   :  { %11097 = vmatpush3.bf16.msra.mxu1 %v13745_v31  ;;  %v1415_v31 = vor.u32 %v1413_v26, %v1411_v20  ;;  %v4754_v20 = vsel %vm4683_vm2, %v4751_v5, %v4753_v16  ;;  %v13742_v26 = vld [vmem:[#allocation3 + $0x88] sm:$0xff]  }
 0x18c   :  { %11098 = vmatprep.subr.bf16.mxu1 %v18033_v0 }
 0x18d   :  { %10935 = vmatmul.mubr.bf16.gmra.mrb[8].mxu1 %v1364_v32  ;;  %11735 = vmatmul.mubr.bf16.gmra.mrb[88].mxu0 %v4730_v35  ;;  %v1419_v32 = vrot.slane %v1417_v28, 1  ;;  %v4755_v28 = vrot.slane %v13741_v21, 2 }
 0x18e   :  { %10938 = vmatprep.mubr.msk.bf16.mxu1 %vm14034_vm0, %v18033_v0  ;;  %11738 = vmatprep.mubr.msk.bf16.mxu0 %vm14034_vm0, %v18033_v0 }
 0x18f   :  { %11099 = vmatpush3.bf16.msra.mxu1 %v13757_v3  ;;  %v1420_v35 = vsel %vm1336_vm3, %v1415_v31, %v1419_v32  ;;  %v1423_v40 = vor.u32 %v1421_v36, %v1419_v32  ;;  %v1447_v3 = vor.u32 %v1445_v60, %v1443_v57  ;;  %v1473_v31 = vshll.u32 %v13742_v26, 16  ;;  %v13746_v36 = vld [vmem:[#allocation3 + $0x90] sm:$0xff]  }
 0x190   :  { %11100 = vmatprep.subr.bf16.mxu1 %v18033_v0  ;;  %v4756_v32 = vsel %vm4683_vm2, %v4753_v16, %v4755_v28 }
 0x193   :  { %11101 = vmatpush3.bf16.msra.mxu1 %v13769_v38  ;;  %v13749_v38 = vld [vmem:[#allocation3 + $0x140] sm:$0xff]  }
 0x194   :  { %11102 = vmatprep.subr.bf16.mxu1 %v18033_v0  ;;  %v4761_v53 = vrot.slane %v13749_v38, 2 }
 0x195   :  { %10939 = vmatmul.mubr.bf16.gmra.mrb[12].mxu1 %v1372_v41  ;;  %11739 = vmatmul.mubr.bf16.gmra.mrb[92].mxu0 %v4732_v43  ;;  %v1427_v41 = vrot.slane %v1425_v37, 1  ;;  %v13781_v37 = vld [vmem:[%s18023_s1 + $0xb0] sm:$0xff]  }
 0x196   :  { %10942 = vmatprep.mubr.msk.bf16.mxu1 %vm14034_vm0, %v18033_v0  ;;  %11742 = vmatprep.mubr.msk.bf16.mxu0 %vm14034_vm0, %v18033_v0 }
 0x197   :  { %v1428_v43 = vsel %vm1336_vm3, %v1423_v40, %v1427_v41  ;;  %v1431_v46 = vor.u32 %v1429_v23, %v1427_v41  ;;  %11103 = vmatpush3.bf16.msra.mxu1 %v13781_v37  ;;  %v1477_v40 = vshrl.u32 %v13742_v26, 16  ;;  %v1481_v41 = vshll.u32 %v13746_v36, 16  ;;  %v13768_v37 = vld [vmem:[%s18023_s1 + $0x1c8] sm:$0xff]  }
 0x198   :  { %11104 = vmatprep.subr.bf16.mxu1 %v18033_v0 }
 0x199   :  { %v1483_v23 = vrot.slane %v1481_v41, 1 }
 0x19d   :  { %10943 = vmatmul.mubr.bf16.gmra.mrb[16].mxu1 %v1380_v47  ;;  %11743 = vmatmul.mubr.bf16.gmra.mrb[96].mxu0 %v4734_v50  ;;  %v1435_v47 = vrot.slane %v1433_v27, 1  ;;  %v4747_v50 = vrot.slane %v13732_v45, 2  ;;  %v13748_v27 = vld [vmem:[#allocation3 + $0x98] sm:$0xff]  }
 0x19e   :  { %10946 = vmatprep.mubr.msk.bf16.mxu1 %vm14034_vm0, %v18033_v0  ;;  %11746 = vmatprep.mubr.msk.bf16.mxu0 %vm14034_vm0, %v18033_v0 }
 0x19f   :  { %v1436_v51 = vsel %vm1336_vm3, %v1431_v46, %v1435_v47  ;;  %v4748_v55 = vsel %vm4683_vm2, %v4745_v42, %v4747_v50  ;;  %v13747_v42 = vld [vmem:[#allocation3 + $0x138] sm:$0xff]   ;;  %v1485_v46 = vshrl.u32 %v13746_v36, 16 }
 0x1a5   :  { %10947 = vmatmul.mubr.bf16.gmra.mrb[20].mxu1 %v1388_v56  ;;  %11747 = vmatmul.mubr.bf16.gmra.mrb[100].mxu0 %v4736_v54  ;;  %v1439_v56 = vor.u32 %v1437_v52, %v1435_v47  ;;  %v4749_v54 = vrot.slane %v13735_v48, 2  ;;  %v1489_v47 = vshll.u32 %v13748_v27, 16  ;;  %v13750_v52 = vld [vmem:[#allocation3 + $0xa0] sm:$0xff]   ;;  %v3742_v48 = vld [vmem:[#allocation3 + $0x14c] sm:$0x3] }
 0x1a6   :  { %10950 = vmatprep.mubr.msk.bf16.mxu1 %vm14034_vm0, %v18033_v0  ;;  %11750 = vmatprep.mubr.msk.bf16.mxu0 %vm14034_vm0, %v18033_v0  ;;  %v1497_v58 = vshll.u32 %v13750_v52, 16 }
 0x1a7   :  { %v1444_v59 = vsel %vm1336_vm3, %v1439_v56, %v1443_v57  ;;  %v4750_v63 = vsel %vm4683_vm2, %v4747_v50, %v4749_v54  ;;  %v4752_v11 = vsel %vm4683_vm2, %v4749_v54, %v4751_v5  ;;  %v1487_v50 = vor.u32 %v1485_v46, %v1483_v23 }
 0x1a8   :  { %v1493_v57 = vshrl.u32 %v13748_v27, 16  ;;  %v13762_v27 = vld [vmem:[#allocation3 + $0xc8] sm:$0xff]  }
 0x1ad   :  { %10951 = vmatmul.mubr.bf16.gmra.mrb[24].mxu1 %v1396_v62  ;;  %11751 = vmatmul.mubr.bf16.gmra.mrb[104].mxu0 %v4738_v6  ;;  %v1451_v62 = vrot.slane %v1449_v61, 1  ;;  %v1499_v61 = vrot.slane %v1497_v58, 1 }
 0x1ae   :  { %10954 = vmatprep.mubr.msk.bf16.mxu1 %vm14034_vm0, %v18033_v0  ;;  %11754 = vmatprep.mubr.msk.bf16.mxu0 %vm14034_vm0, %v18033_v0 }
 0x1af   :  { %v1452_v6 = vsel %vm1336_vm3, %v1447_v3, %v1451_v62  ;;  %v1455_v13 = vor.u32 %v1453_v7, %v1451_v62  ;;  %v1501_v62 = vshrl.u32 %v13750_v52, 16 }
 0x1b5   :  { %10955 = vmatmul.mubr.bf16.gmra.mrb[28].mxu1 %v1404_v15  ;;  %11755 = vmatmul.mubr.bf16.gmra.mrb[108].mxu0 %v4740_v17  ;;  %v1459_v15 = vrot.slane %v1457_v10, 1  ;;  %v13753_v10 = vld [vmem:[#allocation3 + $0xb0] sm:$0xff]  }
 0x1b6   :  { %10958 = vmatprep.mubr.msk.bf16.mxu1 %vm14034_vm0, %v18033_v0  ;;  %11758 = vmatprep.mubr.msk.bf16.mxu0 %vm14034_vm0, %v18033_v0  ;;  %v1513_v8 = vshll.u32 %v13753_v10, 16  ;;  %v1517_v26 = vshrl.u32 %v13753_v10, 16 }
 0x1b7   :  { %v1460_v17 = vsel %vm1336_vm3, %v1455_v13, %v1459_v15  ;;  %v1463_v24 = vor.u32 %v1461_v18, %v1459_v15 }
 0x1bd   :  { %10959 = vmatmul.mubr.bf16.gmra.mrb[32].mxu1 %v1412_v25  ;;  %11759 = vmatmul.mubr.bf16.gmra.mrb[112].mxu0 %v4742_v29  ;;  %v1467_v25 = vrot.slane %v1465_v19, 1  ;;  %v1515_v19 = vrot.slane %v1513_v8, 1 }
 0x1be   :  { %10962 = vmatprep.mubr.msk.bf16.mxu1 %vm14034_vm0, %v18033_v0  ;;  %11762 = vmatprep.mubr.msk.bf16.mxu0 %vm14034_vm0, %v18033_v0 }
 0x1bf   :  { %v1468_v29 = vsel %vm1336_vm3, %v1463_v24, %v1467_v25  ;;  %v1471_v34 = vor.u32 %v1469_v30, %v1467_v25  ;;  %v13756_v30 = vld [vmem:[%s18023_s1 + $0x1c0] sm:$0xff]  }
 0x1c5   :  { %10963 = vmatmul.mubr.bf16.gmra.mrb[36].mxu1 %v1420_v35  ;;  %11763 = vmatmul.mubr.bf16.gmra.mrb[116].mxu0 %v4744_v39  ;;  %v1475_v35 = vrot.slane %v1473_v31, 1  ;;  %v4757_v39 = vrot.slane %v13743_v33, 2  ;;  %v14676_v31 = vld [vmem:[#allocation3 + $0x20] sm:$0xff]   ;;  %v1519_v33 = vor.u32 %v1517_v26, %v1515_v19  ;;  %v14757_v26 = vld [vmem:[#allocation3 + $0xe8] sm:$0xff]  }
 0x1c6   :  { %10966 = vmatprep.mubr.msk.bf16.mxu1 %vm14034_vm0, %v18033_v0  ;;  %11766 = vmatprep.mubr.msk.bf16.mxu0 %vm14034_vm0, %v18033_v0  ;;  %v5602_v36 = vrot.slane %v14676_v31, 2 }
 0x1c7   :  { %v1476_v2 = vsel %vm1336_vm3, %v1471_v34, %v1475_v35  ;;  %v4758_v9 = vsel %vm4683_vm2, %v4755_v28, %v4757_v39 }
 0x1cd   :  { %10967 = vmatmul.mubr.bf16.gmra.mrb[40].mxu1 %v1428_v43  ;;  %11767 = vmatmul.mubr.bf16.gmra.mrb[120].mxu0 %v4746_v44  ;;  %v1479_v43 = vor.u32 %v1477_v40, %v1475_v35  ;;  %v4759_v44 = vrot.slane %v13747_v42, 2  ;;  %v13760_v35 = vld [vmem:[#allocation3 + $0xc0] sm:$0xff]   ;;  %v13780_v42 = vld [vmem:[%s18023_s1 + $0x1d0] sm:$0xff]  }
 0x1ce   :  { %10970 = vmatprep.mubr.msk.bf16.mxu1 %vm14034_vm0, %v18033_v0  ;;  %11770 = vmatprep.mubr.msk.bf16.mxu0 %vm14034_vm0, %v18033_v0  ;;  %v1529_v40 = vshll.u32 %v13760_v35, 16 }
 0x1cf   :  { %v1484_v45 = vsel %vm1336_vm3, %v1479_v43, %v1483_v23  ;;  %v4760_v49 = vsel %vm4683_vm2, %v4757_v39, %v4759_v44  ;;  %v4762_v54 = vsel %vm4683_vm2, %v4759_v44, %v4761_v53 }
 0x1d0   :  { %v1531_v23 = vrot.slane %v1529_v40, 1  ;;  %v1573_v40 = vshrl.u32 %v14757_v26, 16 }
 0x1d5   :  { %10971 = vmatmul.mubr.bf16.gmra.mrb[44].mxu1 %v1436_v51  ;;  %11771 = vmatmul.mubr.bf16.gmra.mrb[124].mxu0 %v4748_v55  ;;  %v1491_v51 = vrot.slane %v1489_v47, 1  ;;  %v2907_v55 = vld [vmem:[#allocation3 + $0x148] sm:$0xf]  ;;  %v1533_v47 = vshrl.u32 %v13760_v35, 16 }
 0x1d6   :  { %10974 = vmatprep.mubr.msk.bf16.mxu1 %vm14034_vm0, %v18033_v0  ;;  %11774 = vmatprep.mubr.msk.bf16.mxu0 %vm14034_vm0, %v18033_v0 }
 0x1d7   :  { %v1492_v56 = vsel %vm1336_vm3, %v1487_v50, %v1491_v51  ;;  %v1495_v60 = vor.u32 %v1493_v57, %v1491_v51  ;;  %v14710_v50 = vld [vmem:[#allocation3 + $0x30] sm:$0xff]   ;;  %v1535_v51 = vor.u32 %v1533_v47, %v1531_v23 }
 0x1d9   :  { %v1500_v3 = vsel %vm1336_vm3, %v1495_v60, %v1499_v61 }
 0x1dd   :  { %10975 = vmatmul.mubr.bf16.gmra.mrb[48].mxu1 %v1444_v59  ;;  %11775 = vmatmul.mubr.bf16.gmra.mrb[128].mxu0 %v4750_v63  ;;  %v14643_v59 = vcombine.low %v2907_v55, %v3742_v48  ;;  %v14647_v63 = vld [vmem:[#allocation3 + $0xa8] sm:$0xff]   ;;  %v5606_v55 = vrot.slane %v14710_v50, 2 }
 0x1de   :  { %10978 = vmatprep.mubr.msk.bf16.mxu1 %vm14034_vm0, %v18033_v0  ;;  %11778 = vmatprep.mubr.msk.bf16.mxu0 %vm14034_vm0, %v18033_v0  ;;  %v1505_v4 = vshll.u32 %v14647_v63, 16  ;;  %v1509_v15 = vshrl.u32 %v14647_v63, 16 }
 0x1df   :  { %18205 = vst [vmem:[#allocation10_spill] sm:$0xff] %v14643_v59  ;;  %v4763_v1 = vrot.slane %v14643_v59, 2  ;;  %v13821_v59 = vld [vmem:[#allocation3 + $0x120] sm:$0xff]  }
 0x1e0   :  { %v1507_v7 = vrot.slane %v1505_v4, 1 }
 0x1e1   :  { %v4764_v5 = vsel %vm4683_vm2, %v4761_v53, %v4763_v1  ;;  %v14715_v53 = vld [vmem:[#allocation3 + $0xd0] sm:$0xff]  }
 0x1e2   :  { %v1511_v18 = vor.u32 %v1509_v15, %v1507_v7  ;;  %v1545_v57 = vshll.u32 %v14715_v53, 16  ;;  %v1549_v4 = vshrl.u32 %v14715_v53, 16 }
 0x1e4   :  { %v1516_v25 = vsel %vm1336_vm3, %v1511_v18, %v1515_v19 }
 0x1e5   :  { %10979 = vmatmul.mubr.bf16.gmra.mrb[52].mxu1 %v1452_v6  ;;  %11779 = vmatmul.mubr.bf16.gmra.mrb[132].mxu0 %v4752_v11  ;;  %v1503_v6 = vor.u32 %v1501_v62, %v1499_v61  ;;  %v5295_v11 = vld [vmem:[#allocation3 + $0x10] sm:$0xc]  ;;  %v1547_v61 = vrot.slane %v1545_v57, 1 }
 0x1e6   :  { %10982 = vmatprep.mubr.msk.bf16.mxu1 %vm14034_vm0, %v18033_v0  ;;  %11782 = vmatprep.mubr.msk.bf16.mxu0 %vm14034_vm0, %v18033_v0  ;;  %v14661_v16 = vcombine.low %v5295_v11, %v5296_v12  ;;  %v14740_v12 = vld [vmem:[#allocation3 + $0xe0] sm:$0xff]  }
 0x1e7   :  { %v1508_v13 = vsel %vm1336_vm3, %v1503_v6, %v1507_v7  ;;  %v14736_v7 = vld [vmem:[#allocation3 + $0x40] sm:$0xff]   ;;  %v1551_v10 = vor.u32 %v1549_v4, %v1547_v61  ;;  %v1561_v19 = vshll.u32 %v14740_v12, 16 }
 0x1e8   :  { %v5599_v21 = vrot.slane %v14661_v16, 2  ;;  %v5610_v15 = vrot.slane %v14736_v7, 2 }
 0x1ed   :  { %10983 = vmatmul.mubr.bf16.gmra.mrb[56].mxu1 %v1460_v17  ;;  %11783 = vmatmul.mubr.bf16.gmra.mrb[136].mxu0 %v4754_v20  ;;  %v14663_v17 = vld [vmem:[#allocation3 + $0x18] sm:$0xff]  }
 0x1ee   :  { %10986 = vmatprep.mubr.msk.bf16.mxu1 %vm14034_vm0, %v18033_v0  ;;  %11786 = vmatprep.mubr.msk.bf16.mxu0 %vm14034_vm0, %v18033_v0  ;;  %v13758_v20 = vld [vmem:[#allocation3 + $0xb8] sm:$0xff]   ;;  %v5600_v24 = vrot.slane %v14663_v17, 2 }
 0x1ef   :  { %v1521_v28 = vshll.u32 %v13758_v20, 16 }
 0x1f0   :  { %v5603_v41 = vsel %vm4683_vm2, %v5600_v24, %v5602_v36 }
 0x1f1   :  { %v1523_v34 = vrot.slane %v1521_v28, 1 }
 0x1f3   :  { %v1524_v39 = vsel %vm1336_vm3, %v1519_v33, %v1523_v34 }
 0x1f5   :  { %10987 = vmatmul.mubr.bf16.gmra.mrb[60].mxu1 %v1468_v29  ;;  %11787 = vmatmul.mubr.bf16.gmra.mrb[140].mxu0 %v4756_v32  ;;  %v5601_v29 = vsel %vm4683_vm2, %v5599_v21, %v5600_v24  ;;  %v13794_v32 = vld [vmem:[%s18023_s1 + $0xb8] sm:$0xff]   ;;  %v14753_v21 = vld [vmem:[#allocation3 + $0x48] sm:$0xff]  }
 0x1f6   :  { %10990 = vmatprep.mubr.msk.bf16.mxu1 %vm14034_vm0, %v18033_v0  ;;  %11790 = vmatprep.mubr.msk.bf16.mxu0 %vm14034_vm0, %v18033_v0  ;;  %v5612_v28 = vrot.slane %v14753_v21, 2 }
 0x1f7   :  { %11105 = vmatpush3.bf16.msra.mxu1 %v13794_v32  ;;  %v1569_v32 = vshll.u32 %v14757_v26, 16 }
 0x1f8   :  { %11270 = vmatprep.subr.bf16.mxu1 %v18033_v0  ;;  %v5613_v33 = vsel %vm4683_vm2, %v5610_v15, %v5612_v28 }
 0x1fd   :  { %10991 = vmatmul.mubr.bf16.gmra.mrb[64].mxu1 %v1476_v2  ;;  %11791 = vmatmul.mubr.bf16.gmra.mrb[144].mxu0 %v4758_v9  ;;  %v1525_v2 = vshrl.u32 %v13758_v20, 16  ;;  %v14693_v9 = vld [vmem:[#allocation3 + $0x28] sm:$0xff]  }
 0x1fe   :  { %10994 = vmatprep.mubr.msk.bf16.mxu1 %vm14034_vm0, %v18033_v0  ;;  %11794 = vmatprep.mubr.msk.bf16.mxu0 %vm14034_vm0, %v18033_v0  ;;  %v5604_v44 = vrot.slane %v14693_v9, 2 }
 0x1ff   :  { %v1527_v43 = vor.u32 %v1525_v2, %v1523_v34  ;;  %v14766_v34 = vld [vmem:[#allocation3 + $0x50] sm:$0xff]  }
 0x200   :  { %v5605_v38 = vsel %vm4683_vm2, %v5602_v36, %v5604_v44  ;;  %v5607_v58 = vsel %vm4683_vm2, %v5604_v44, %v5606_v55  ;;  %v1571_v36 = vrot.slane %v1569_v32, 1  ;;  %v14783_v44 = vld [vmem:[#allocation3 + $0xf8] sm:$0xff]  }
 0x201   :  { %v1532_v46 = vsel %vm1336_vm3, %v1527_v43, %v1531_v23  ;;  %v14779_v43 = vld [vmem:[#allocation3 + $0x58] sm:$0xff]  }
 0x202   :  { %v1575_v23 = vor.u32 %v1573_v40, %v1571_v36 }
 0x205   :  { %10995 = vmatmul.mubr.bf16.gmra.mrb[68].mxu1 %v1484_v45  ;;  %11795 = vmatmul.mubr.bf16.gmra.mrb[148].mxu0 %v4760_v49  ;;  %v13792_v45 = vld [vmem:[%s18023_s1 + $0x1d8] sm:$0xff]   ;;  %v1537_v49 = vshll.u32 %v13762_v27, 16 }
 0x206   :  { %10998 = vmatprep.mubr.msk.bf16.mxu1 %vm14034_vm0, %v18033_v0  ;;  %11798 = vmatprep.mubr.msk.bf16.mxu0 %vm14034_vm0, %v18033_v0 }
 0x207   :  { %v1539_v52 = vrot.slane %v1537_v49, 1  ;;  %v1585_v49 = vshll.u32 %v14783_v44, 16 }
 0x209   :  { %v1540_v48 = vsel %vm1336_vm3, %v1535_v51, %v1539_v52  ;;  %v14792_v51 = vld [vmem:[#allocation3 + $0x60] sm:$0xff]  }
 0x20d   :  { %10999 = vmatmul.mubr.bf16.gmra.mrb[72].mxu1 %v1492_v56  ;;  %11799 = vmatmul.mubr.bf16.gmra.mrb[152].mxu0 %v4762_v54  ;;  %v1541_v56 = vshrl.u32 %v13762_v27, 16  ;;  %v14723_v54 = vld [vmem:[#allocation3 + $0x38] sm:$0xff]  }
 0x20e   :  { %11002 = vmatprep.mubr.msk.bf16.mxu1 %vm14034_vm0, %v18033_v0  ;;  %11802 = vmatprep.mubr.msk.bf16.mxu0 %vm14034_vm0, %v18033_v0 }
 0x20f   :  { %v1543_v60 = vor.u32 %v1541_v56, %v1539_v52  ;;  %v5618_v56 = vrot.slane %v14792_v51, 2 }
 0x211   :  { %v1548_v62 = vsel %vm1336_vm3, %v1543_v60, %v1547_v61 }
 0x215   :  { %11003 = vmatmul.mubr.bf16.gmra.mrb[76].mxu1 %v1500_v3  ;;  %11803 = vmatmul.mubr.bf16.gmra.mrb[156].mxu0 %v4764_v5  ;;  %v5608_v3 = vrot.slane %v14723_v54, 2 }
 0x216   :  { %11006 = vmatprep.mubr.msk.bf16.mxu1 %vm14034_vm0, %v18033_v0  ;;  %11806 = vmatprep.mubr.msk.bf16.mxu0 %vm14034_vm0, %v18033_v0 }
 0x217   :  { %v5609_v6 = vsel %vm4683_vm2, %v5606_v55, %v5608_v3  ;;  %v5611_v20 = vsel %vm4683_vm2, %v5608_v3, %v5610_v15  ;;  %v1587_v55 = vrot.slane %v1585_v49, 1  ;;  %v14805_v3 = vld [vmem:[#allocation3 + $0x68] sm:$0xff]  }
 0x21d   :  { %11007 = vmatmul.mubr.bf16.gmra.mrb[80].mxu1 %v1508_v13  ;;  %11807 = vmatmul.mubr.bf16.gmra.mrb[160].mxu0 %v4763_v1  ;;  %v14727_v1 = vld [vmem:[#allocation3 + $0xd8] sm:$0xff]   ;;  %v13803_v13 = vld [vmem:[%s18023_s1 + $0x1e0] sm:$0xff]  }
 0x21e   :  { %11010 = vmatprep.mubr.msk.bf16.mxu1 %vm14034_vm0, %v18033_v0  ;;  %11826 = vmatprep.mubr.msk.bf16.mxu0 %vm14034_vm0, %v18033_v0  ;;  %v1553_v5 = vshll.u32 %v14727_v1, 16  ;;  %v1557_v18 = vshrl.u32 %v14727_v1, 16 }
 0x220   :  { %v1555_v11 = vrot.slane %v1553_v5, 1  ;;  %v14809_v5 = vld [vmem:[#allocation3 + $0x108] sm:$0xff]  }
 0x221   :  { %v1601_v15 = vshll.u32 %v14809_v5, 16 }
 0x222   :  { %v1556_v8 = vsel %vm1336_vm3, %v1551_v10, %v1555_v11  ;;  %v1559_v24 = vor.u32 %v1557_v18, %v1555_v11  ;;  %v5620_v10 = vrot.slane %v14805_v3, 2  ;;  %v14822_v18 = vld [vmem:[#allocation3 + $0x70] sm:$0xff]  }
 0x225   :  { %11011 = vmatmul.mubr.bf16.gmra.mrb[84].mxu1 %v1516_v25  ;;  %11827 = vmatmul.mubr.bf16.vlgmr.msra.gmra.mrb[0].mxu0 %v5601_v29  ;;  %v1563_v25 = vrot.slane %v1561_v19, 1 }
 0x226   :  { %11014 = vmatprep.mubr.msk.bf16.mxu1 %vm14034_vm0, %v18033_v0  ;;  %11991 = vmatpush3.bf16.msra.mxu0 %v13756_v30  ;;  %v1565_v30 = vshrl.u32 %v14740_v12, 16 }
 0x227   :  { %11830 = vmatprep.mubr.msk.bf16.mxu0 %vm14034_vm0, %v18033_v0  ;;  %11992 = vmatprep.subr.bf16.mxu0 %v18033_v0  ;;  %v1564_v29 = vsel %vm1336_vm3, %v1559_v24, %v1563_v25  ;;  %v14826_v24 = vld [vmem:[#allocation3 + $0x110] sm:$0xff]  }
 0x228   :  { %v1567_v35 = vor.u32 %v1565_v30, %v1563_v25  ;;  %v5622_v25 = vrot.slane %v14822_v18, 2  ;;  %v1609_v30 = vshll.u32 %v14826_v24, 16 }
 0x22a   :  { %11993 = vmatpush3.bf16.msra.mxu0 %v13768_v37  ;;  %v14770_v37 = vld [vmem:[#allocation3 + $0xf0] sm:$0xff]   ;;  %v1572_v2 = vsel %vm1336_vm3, %v1567_v35, %v1571_v36  ;;  %v5623_v32 = vsel %vm4683_vm2, %v5620_v10, %v5622_v25  ;;  %v1611_v36 = vrot.slane %v1609_v30, 1 }
 0x22b   :  { %11994 = vmatprep.subr.bf16.mxu0 %v18033_v0  ;;  %v1581_v47 = vshrl.u32 %v14770_v37, 16 }
 0x22d   :  { %11015 = vmatmul.mubr.bf16.gmra.mrb[88].mxu1 %v1524_v39  ;;  %11831 = vmatmul.mubr.bf16.gmra.mrb[4].mxu0 %v5603_v41  ;;  %v5614_v39 = vrot.slane %v14766_v34, 2  ;;  %v1577_v41 = vshll.u32 %v14770_v37, 16 }
 0x22e   :  { %11018 = vmatprep.mubr.msk.bf16.mxu1 %vm14034_vm0, %v18033_v0  ;;  %11834 = vmatprep.mubr.msk.bf16.mxu0 %vm14034_vm0, %v18033_v0 }
 0x22f   :  { %11995 = vmatpush3.bf16.msra.mxu0 %v13780_v42  ;;  %v5615_v42 = vsel %vm4683_vm2, %v5612_v28, %v5614_v39  ;;  %v1579_v27 = vrot.slane %v1577_v41, 1  ;;  %v1613_v41 = vshrl.u32 %v14826_v24, 16 }
 0x230   :  { %11996 = vmatprep.subr.bf16.mxu0 %v18033_v0 }
 0x231   :  { %v1583_v52 = vor.u32 %v1581_v47, %v1579_v27  ;;  %v14852_v47 = vld [vmem:[#allocation3 + $0x120] sm:$0xff]  }
 0x233   :  { %11997 = vmatpush3.bf16.msra.mxu0 %v13792_v45  ;;  %v5616_v45 = vrot.slane %v14779_v43, 2  ;;  %v1588_v57 = vsel %vm1336_vm3, %v1583_v52, %v1587_v55 }
 0x234   :  { %11998 = vmatprep.subr.bf16.mxu0 %v18033_v0 }
 0x235   :  { %11019 = vmatmul.mubr.bf16.gmra.mrb[92].mxu1 %v1532_v46  ;;  %11835 = vmatmul.mubr.bf16.gmra.mrb[8].mxu0 %v5605_v38  ;;  %v1580_v46 = vsel %vm1336_vm3, %v1575_v23, %v1579_v27  ;;  %v5617_v38 = vsel %vm4683_vm2, %v5614_v39, %v5616_v45  ;;  %v5619_v61 = vsel %vm4683_vm2, %v5616_v45, %v5618_v56  ;;  %v14839_v39 = vld [vmem:[#allocation3 + $0x118] sm:$0xff]   ;;  %v14848_v27 = vld [vmem:[#allocation3 + $0x80] sm:$0xff]  }
 0x236   :  { %11022 = vmatprep.mubr.msk.bf16.mxu1 %vm14034_vm0, %v18033_v0  ;;  %11838 = vmatprep.mubr.msk.bf16.mxu0 %vm14034_vm0, %v18033_v0  ;;  %v1615_v45 = vor.u32 %v1613_v41, %v1611_v36  ;;  %v5626_v49 = vrot.slane %v14848_v27, 2  ;;  %v1621_v52 = vshrl.u32 %v14839_v39, 16 }
 0x237   :  { %11999 = vmatpush3.bf16.msra.mxu0 %v13803_v13 }
 0x238   :  { %12000 = vmatprep.subr.bf16.mxu0 %v18033_v0 }
 0x23d   :  { %11023 = vmatmul.mubr.bf16.gmra.mrb[96].mxu1 %v1540_v48  ;;  %11839 = vmatmul.mubr.bf16.gmra.mrb[12].mxu0 %v5607_v58  ;;  %v14796_v48 = vld [vmem:[#allocation3 + $0x100] sm:$0xff]   ;;  %v1589_v58 = vshrl.u32 %v14783_v44, 16 }
 0x23e   :  { %11026 = vmatprep.mubr.msk.bf16.mxu1 %vm14034_vm0, %v18033_v0  ;;  %11842 = vmatprep.mubr.msk.bf16.mxu0 %vm14034_vm0, %v18033_v0  ;;  %v1593_v60 = vshll.u32 %v14796_v48, 16  ;;  %v1597_v13 = vshrl.u32 %v14796_v48, 16 }
 0x240   :  { %v1595_v4 = vrot.slane %v1593_v60, 1 }
 0x242   :  { %v1599_v19 = vor.u32 %v1597_v13, %v1595_v4  ;;  %v14874_v13 = vld [vmem:[#allocation3 + $0x90] sm:$0xff]  }
 0x245   :  { %11027 = vmatmul.mubr.bf16.gmra.mrb[100].mxu1 %v1548_v62  ;;  %11843 = vmatmul.mubr.bf16.gmra.mrb[16].mxu0 %v5609_v6  ;;  %v1591_v62 = vor.u32 %v1589_v58, %v1587_v55  ;;  %v13810_v6 = vld [vmem:[%s18023_s1 + $0x1e8] sm:$0xff]   ;;  %v1625_v55 = vshll.u32 %v14852_v47, 16 }
 0x246   :  { %11030 = vmatprep.mubr.msk.bf16.mxu1 %vm14034_vm0, %v18033_v0  ;;  %11846 = vmatprep.mubr.msk.bf16.mxu0 %vm14034_vm0, %v18033_v0 }
 0x247   :  { %12001 = vmatpush3.bf16.msra.mxu0 %v13810_v6  ;;  %v1596_v11 = vsel %vm1336_vm3, %v1591_v62, %v1595_v4  ;;  %v1627_v60 = vrot.slane %v1625_v55, 1  ;;  %v1629_v6 = vshrl.u32 %v14852_v47, 16  ;;  %v14908_v55 = vld [vmem:[#allocation3 + $0x140] sm:$0x1f]  }
 0x248   :  { %12002 = vmatprep.subr.bf16.mxu0 %v18033_v0 }
 0x24d   :  { %11031 = vmatmul.mubr.bf16.gmra.mrb[104].mxu1 %v1556_v8  ;;  %11847 = vmatmul.mubr.bf16.gmra.mrb[20].mxu0 %v5611_v20  ;;  %v5621_v8 = vsel %vm4683_vm2, %v5618_v56, %v5620_v10  ;;  %v1603_v20 = vrot.slane %v1601_v15, 1  ;;  %v1631_v15 = vor.u32 %v1629_v6, %v1627_v60  ;;  %v14917_v6 = vld [vmem:[#allocation3 + $0xa8] sm:$0xff]  }
 0x24e   :  { %11034 = vmatprep.mubr.msk.bf16.mxu1 %vm14034_vm0, %v18033_v0  ;;  %11850 = vmatprep.mubr.msk.bf16.mxu0 %vm14034_vm0, %v18033_v0 }
 0x24f   :  { %v1604_v28 = vsel %vm1336_vm3, %v1599_v19, %v1603_v20  ;;  %v14878_v19 = vld [vmem:[#allocation3 + $0x130] sm:$0xff]  }
 0x250   :  { %v1641_v30 = vshll.u32 %v14878_v19, 16 }
 0x255   :  { %11035 = vmatmul.mubr.bf16.gmra.mrb[108].mxu1 %v1564_v29  ;;  %11851 = vmatmul.mubr.bf16.gmra.mrb[24].mxu0 %v5613_v33  ;;  %v1605_v29 = vshrl.u32 %v14809_v5, 16  ;;  %v14835_v33 = vld [vmem:[#allocation3 + $0x78] sm:$0xff]  }
 0x256   :  { %11038 = vmatprep.mubr.msk.bf16.mxu1 %vm14034_vm0, %v18033_v0  ;;  %11854 = vmatprep.mubr.msk.bf16.mxu0 %vm14034_vm0, %v18033_v0 }
 0x257   :  { %v1607_v35 = vor.u32 %v1605_v29, %v1603_v20  ;;  %v5630_v20 = vrot.slane %v14874_v13, 2 }
 0x259   :  { %v1612_v40 = vsel %vm1336_vm3, %v1607_v35, %v1611_v36  ;;  %v14891_v35 = vld [vmem:[#allocation3 + $0x98] sm:$0xff]  }
 0x25a   :  { %v5632_v41 = vrot.slane %v14891_v35, 2 }
 0x25d   :  { %11039 = vmatmul.mubr.bf16.gmra.mrb[112].mxu1 %v1572_v2  ;;  %11855 = vmatmul.mubr.bf16.gmra.mrb[28].mxu0 %v5615_v42  ;;  %v5624_v2 = vrot.slane %v14835_v33, 2  ;;  %v1617_v42 = vshll.u32 %v14839_v39, 16 }
 0x25e   :  { %11042 = vmatprep.mubr.msk.bf16.mxu1 %vm14034_vm0, %v18033_v0  ;;  %11858 = vmatprep.mubr.msk.bf16.mxu0 %vm14034_vm0, %v18033_v0 }
 0x25f   :  { %v5625_v23 = vsel %vm4683_vm2, %v5622_v25, %v5624_v2  ;;  %v5627_v56 = vsel %vm4683_vm2, %v5624_v2, %v5626_v49  ;;  %v13817_v25 = vld [vmem:[%s18023_s1 + $0x1f0] sm:$0xff]   ;;  %v1643_v2 = vrot.slane %v1641_v30, 1  ;;  %v2194_v30 = vld [vmem:[#allocation3] sm:$0xe] }
 0x260   :  { %12003 = vmatpush3.bf16.msra.mxu0 %v13817_v25  ;;  %v14926_v25 = vld [vmem:[#allocation3 + $0xb0] sm:$0xff]  }
 0x261   :  { %12004 = vmatprep.subr.bf16.mxu0 %v18033_v0 }
 0x265   :  { %11043 = vmatmul.mubr.bf16.gmra.mrb[116].mxu1 %v1580_v46  ;;  %11859 = vmatmul.mubr.bf16.gmra.mrb[32].mxu0 %v5617_v38  ;;  %v1619_v46 = vrot.slane %v1617_v42, 1 }
 0x266   :  { %11046 = vmatprep.mubr.msk.bf16.mxu1 %vm14034_vm0, %v18033_v0  ;;  %11862 = vmatprep.mubr.msk.bf16.mxu0 %vm14034_vm0, %v18033_v0 }
 0x267   :  { %v1620_v38 = vsel %vm1336_vm3, %v1615_v45, %v1619_v46  ;;  %v1623_v58 = vor.u32 %v1621_v52, %v1619_v46  ;;  %v5633_v46 = vsel %vm4683_vm2, %v5630_v20, %v5632_v41 }
 0x269   :  { %v1628_v4 = vsel %vm1336_vm3, %v1623_v58, %v1627_v60 }
 0x26d   :  { %11047 = vmatmul.mubr.bf16.gmra.mrb[120].mxu1 %v1588_v57  ;;  %11863 = vmatmul.mubr.bf16.gmra.mrb[36].mxu0 %v5619_v61  ;;  %v14861_v57 = vld [vmem:[#allocation3 + $0x88] sm:$0xff]  }
 0x26e   :  { %11050 = vmatprep.mubr.msk.bf16.mxu1 %vm14034_vm0, %v18033_v0  ;;  %11866 = vmatprep.mubr.msk.bf16.mxu0 %vm14034_vm0, %v18033_v0  ;;  %v14865_v61 = vld [vmem:[#allocation3 + $0x128] sm:$0xff]   ;;  %v5628_v62 = vrot.slane %v14861_v57, 2 }
 0x26f   :  { %v1633_v10 = vshll.u32 %v14865_v61, 16  ;;  %v1637_v29 = vshrl.u32 %v14865_v61, 16 }
 0x275   :  { %11051 = vmatmul.mubr.bf16.gmra.mrb[124].mxu1 %v1596_v11  ;;  %11867 = vmatmul.mubr.bf16.gmra.mrb[40].mxu0 %v5621_v8  ;;  %v5629_v11 = vsel %vm4683_vm2, %v5626_v49, %v5628_v62  ;;  %v1635_v8 = vrot.slane %v1633_v10, 1  ;;  %v14904_v49 = vld [vmem:[#allocation3 + $0xa0] sm:$0xff]  }
 0x276   :  { %11054 = vmatprep.mubr.msk.bf16.mxu1 %vm14034_vm0, %v18033_v0  ;;  %11870 = vmatprep.mubr.msk.bf16.mxu0 %vm14034_vm0, %v18033_v0 }
 0x277   :  { %v1639_v36 = vor.u32 %v1637_v29, %v1635_v8  ;;  %v5638_v29 = vrot.slane %v14926_v25, 2 }
 0x279   :  { %v1644_v42 = vsel %vm1336_vm3, %v1639_v36, %v1643_v2  ;;  %v13860_v36 = vld [vmem:[#allocation3 + $0x4] sm:$0xf] }
 0x27d   :  { %11055 = vmatmul.mubr.bf16.gmra.mrb[128].mxu1 %v1604_v28  ;;  %11871 = vmatmul.mubr.bf16.gmra.mrb[44].mxu0 %v5623_v32  ;;  %v1636_v28 = vsel %vm1336_vm3, %v1631_v15, %v1635_v8  ;;  %v5631_v32 = vsel %vm4683_vm2, %v5628_v62, %v5630_v20  ;;  %v1657_v62 = vshll.u32 %v14908_v55, 16  ;;  %v5636_v15 = vrot.slane %v14917_v6, 2 }
 0x27e   :  { %11058 = vmatprep.mubr.msk.bf16.mxu1 %vm14034_vm0, %v18033_v0  ;;  %11874 = vmatprep.mubr.msk.bf16.mxu0 %vm14034_vm0, %v18033_v0 }
 0x285   :  { %11059 = vmatmul.mubr.bf16.gmra.mrb[132].mxu1 %v1612_v40  ;;  %11875 = vmatmul.mubr.bf16.gmra.mrb[48].mxu0 %v5625_v23  ;;  %v14895_v40 = vld [vmem:[#allocation3 + $0x138] sm:$0xff]   ;;  %v1645_v23 = vshrl.u32 %v14878_v19, 16 }
 0x286   :  { %11062 = vmatprep.mubr.msk.bf16.mxu1 %vm14034_vm0, %v18033_v0  ;;  %11878 = vmatprep.mubr.msk.bf16.mxu0 %vm14034_vm0, %v18033_v0  ;;  %v1649_v45 = vshll.u32 %v14895_v40, 16  ;;  %v1653_v60 = vshrl.u32 %v14895_v40, 16 }
 0x288   :  { %v1651_v52 = vrot.slane %v1649_v45, 1  ;;  %v13861_v45 = vld [vmem:[#allocation3 + $0x8] sm:$0xff]  }
 0x28a   :  { %v1655_v10 = vor.u32 %v1653_v60, %v1651_v52  ;;  %v13805_v60 = vld [vmem:[%s18023_s1 + $0xc0] sm:$0xff]  }
 0x28d   :  { %11063 = vmatmul.mubr.bf16.gmra.mrb[136].mxu1 %v1620_v38  ;;  %11879 = vmatmul.mubr.bf16.gmra.mrb[52].mxu0 %v5627_v56  ;;  %v1647_v38 = vor.u32 %v1645_v23, %v1643_v2  ;;  %v5634_v56 = vrot.slane %v14904_v49, 2  ;;  %v9649_v2 = vcombine.low %v2194_v30, %v13860_v36  ;;  %v13863_v30 = vld [vmem:[#allocation3 + $0x18] sm:$0xff]  }
 0x28e   :  { %11066 = vmatprep.mubr.msk.bf16.mxu1 %vm14034_vm0, %v18033_v0  ;;  %11882 = vmatprep.mubr.msk.bf16.mxu0 %vm14034_vm0, %v18033_v0 }
 0x28f   :  { %v1652_v58 = vsel %vm1336_vm3, %v1647_v38, %v1651_v52  ;;  %v5637_v20 = vsel %vm4683_vm2, %v5634_v56, %v5636_v15  ;;  %v2216_v23 = vrot.slane %v9649_v2, 1  ;;  %v13826_v2 = vld [vmem:[%s18023_s1 + $0xd8] sm:$0xff]  }
 0x295   :  { %11067 = vmatmul.mubr.bf16.gmra.mrb[140].mxu1 %v1628_v4  ;;  %11883 = vmatmul.mubr.bf16.gmra.mrb[56].mxu0 %v5629_v11  ;;  %v5635_v4 = vsel %vm4683_vm2, %v5632_v41, %v5634_v56  ;;  %v1659_v11 = vrot.slane %v1657_v62, 1  ;;  %v5639_v41 = vsel %vm4683_vm2, %v5636_v15, %v5638_v29  ;;  %v13862_v62 = vld [vmem:[#allocation3 + $0x10] sm:$0xff]   ;;  %v13812_v15 = vld [vmem:[%s18023_s1 + $0xc8] sm:$0xff]  }
 0x296   :  { %11070 = vmatprep.mubr.msk.bf16.mxu1 %vm14034_vm0, %v18033_v0  ;;  %11886 = vmatprep.mubr.msk.bf16.mxu0 %vm14034_vm0, %v18033_v0 }
 0x297   :  { %v1660_v8 = vsel %vm1336_vm3, %v1655_v10, %v1659_v11  ;;  %v13825_v10 = vld [vmem:[%s18023_s1 + $0x1f8] sm:$0xff]  }
 0x298   :  { %12005 = vmatpush3.bf16.msra.mxu0 %v13825_v10 }
 0x299   :  { %12170 = vmatprep.subr.bf16.mxu0 %v18033_v0 }
 0x29d   :  { %11071 = vmatmul.mubr.bf16.gmra.mrb[144].mxu1 %v1636_v28  ;;  %11887 = vmatmul.mubr.bf16.gmra.mrb[60].mxu0 %v5631_v32  ;;  %v1661_v28 = vshrl.u32 %v14908_v55, 16 }
 0x29e   :  { %11074 = vmatprep.mubr.msk.bf16.mxu1 %vm14034_vm0, %v18033_v0  ;;  %11890 = vmatprep.mubr.msk.bf16.mxu0 %vm14034_vm0, %v18033_v0 }
 0x29f   :  { %v1663_v32 = vor.u32 %v1661_v28, %v1659_v11  ;;  %v14964_v28 = vld [vmem:[#allocation3 + $0xc8] sm:$0xff]  }
 0x2a0   :  { %v5644_v36 = vrot.slane %v14964_v28, 2 }
 0x2a5   :  { %11075 = vmatmul.mubr.bf16.gmra.mrb[148].mxu1 %v1644_v42  ;;  %11891 = vmatmul.mubr.bf16.gmra.mrb[64].mxu0 %v5633_v46  ;;  %v14935_v42 = vld [vmem:[#allocation3 + $0xb8] sm:$0xff]   ;;  %v2217_v46 = vrot.slane %v13861_v45, 1  ;;  %v14981_v45 = vld [vmem:[#allocation3 + $0xd0] sm:$0xff]  }
 0x2a6   :  { %11078 = vmatprep.mubr.msk.bf16.mxu1 %vm14034_vm0, %v18033_v0  ;;  %11894 = vmatprep.mubr.msk.bf16.mxu0 %vm14034_vm0, %v18033_v0  ;;  %v5640_v38 = vrot.slane %v14935_v42, 2 }
 0x2a7   :  { %v2218_v52 = vsel %vm2215_vm4, %v2216_v23, %v2217_v46 }
 0x2a8   :  { %v5641_v56 = vsel %vm4683_vm2, %v5638_v29, %v5640_v38  ;;  %v13819_v29 = vld [vmem:[%s18023_s1 + $0xd0] sm:$0xff]  }
 0x2ad   :  { %11079 = vmatmul.mubr.bf16.gmra.mrb[152].mxu1 %v1652_v58  ;;  %11895 = vmatmul.mubr.bf16.gmra.mrb[68].mxu0 %v5635_v4  ;;  %v14944_v58 = vld [vmem:[#allocation3 + $0xc0] sm:$0xff]   ;;  %v2219_v4 = vrot.slane %v13862_v62, 1  ;;  %v14991_v62 = vld [vmem:[#allocation3 + $0xd8] sm:$0xff]  }
 0x2ae   :  { %11082 = vmatprep.mubr.msk.bf16.mxu1 %vm14034_vm0, %v18033_v0  ;;  %11898 = vmatprep.mubr.msk.bf16.mxu0 %vm14034_vm0, %v18033_v0  ;;  %v5642_v11 = vrot.slane %v14944_v58, 2 }
 0x2b0   :  { %v5645_v23 = vsel %vm4683_vm2, %v5642_v11, %v5644_v36 }
 0x2b5   :  { %11083 = vmatmul.mubr.bf16.gmra.mrb[156].mxu1 %v1660_v8  ;;  %11899 = vmatmul.mubr.bf16.gmra.mrb[72].mxu0 %v5637_v20  ;;  %v2220_v8 = vsel %vm2215_vm4, %v2217_v46, %v2219_v4  ;;  %v5643_v20 = vsel %vm4683_vm2, %v5640_v38, %v5642_v11  ;;  %v13864_v46 = vld [vmem:[#allocation3 + $0x20] sm:$0xff]   ;;  %v5648_v11 = vrot.slane %v14991_v62, 2 }
 0x2b6   :  { %11086 = vmatprep.mubr.msk.bf16.mxu1 %vm14034_vm0, %v18033_v0  ;;  %11902 = vmatprep.mubr.msk.bf16.mxu0 %vm14034_vm0, %v18033_v0  ;;  %v2223_v38 = vrot.slane %v13864_v46, 1 }
 0x2bd   :  { %11087 = vmatmul.mubr.bf16.gmra.mrb[160].mxu1 %v1663_v32  ;;  %11903 = vmatmul.mubr.bf16.gmra.mrb[76].mxu0 %v5639_v41  ;;  %v2221_v32 = vrot.slane %v13863_v30, 1 }
 0x2be   :  { %11106 = vmatprep.mubr.msk.bf16.mxu1 %vm14034_vm0, %v18033_v0  ;;  %11906 = vmatprep.mubr.msk.bf16.mxu0 %vm14034_vm0, %v18033_v0 }
 0x2bf   :  { %v2222_v41 = vsel %vm2215_vm4, %v2219_v4, %v2221_v32  ;;  %v13865_v4 = vld [vmem:[#allocation3 + $0x28] sm:$0xff]  }
 0x2c0   :  { %v2225_v10 = vrot.slane %v13865_v4, 1  ;;  %v15022_v4 = vld [vmem:[#allocation3 + $0xf0] sm:$0xff]  }
 0x2c5   :  { %11107 = vmatmul.mubr.bf16.vlgmr.msra.gmra.mrb[0].mxu1 %v2218_v52  ;;  %11907 = vmatmul.mubr.bf16.gmra.mrb[80].mxu0 %v5641_v56  ;;  %v5646_v52 = vrot.slane %v14981_v45, 2  ;;  %v2224_v56 = vsel %vm2215_vm4, %v2221_v32, %v2223_v38 }
 0x2c6   :  { %11110 = vmatprep.mubr.msk.bf16.mxu1 %vm14034_vm0, %v18033_v0  ;;  %11910 = vmatprep.mubr.msk.bf16.mxu0 %vm14034_vm0, %v18033_v0 }
 0x2c7   :  { %11271 = vmatpush3.bf16.msra.mxu1 %v13805_v60  ;;  %v5647_v60 = vsel %vm4683_vm2, %v5644_v36, %v5646_v52 }
 0x2c8   :  { %11272 = vmatprep.subr.bf16.mxu1 %v18033_v0 }
 0x2cb   :  { %11273 = vmatpush3.bf16.msra.mxu1 %v13812_v15  ;;  %v2226_v15 = vsel %vm2215_vm4, %v2223_v38, %v2225_v10 }
 0x2cc   :  { %11274 = vmatprep.subr.bf16.mxu1 %v18033_v0 }
 0x2cd   :  { %11111 = vmatmul.mubr.bf16.gmra.mrb[4].mxu1 %v2220_v8  ;;  %11911 = vmatmul.mubr.bf16.gmra.mrb[84].mxu0 %v5643_v20  ;;  %v5649_v8 = vsel %vm4683_vm2, %v5646_v52, %v5648_v11  ;;  %v15000_v20 = vld [vmem:[#allocation3 + $0xe0] sm:$0xff]  }
 0x2ce   :  { %11114 = vmatprep.mubr.msk.bf16.mxu1 %vm14034_vm0, %v18033_v0  ;;  %11914 = vmatprep.mubr.msk.bf16.mxu0 %vm14034_vm0, %v18033_v0  ;;  %v5650_v32 = vrot.slane %v15000_v20, 2  ;;  %v13832_v52 = vld [vmem:[%s18023_s1 + $0xe0] sm:$0xff]  }
 0x2cf   :  { %11275 = vmatpush3.bf16.msra.mxu1 %v13819_v29  ;;  %v13866_v29 = vld [vmem:[#allocation3 + $0x30] sm:$0xff]  }
 0x2d0   :  { %11276 = vmatprep.subr.bf16.mxu1 %v18033_v0  ;;  %v2227_v30 = vrot.slane %v13866_v29, 1 }
 0x2d2   :  { %v2228_v36 = vsel %vm2215_vm4, %v2225_v10, %v2227_v30  ;;  %v13868_v10 = vld [vmem:[#allocation3 + $0x40] sm:$0xff]  }
 0x2d3   :  { %11277 = vmatpush3.bf16.msra.mxu1 %v13826_v2  ;;  %v5651_v2 = vsel %vm4683_vm2, %v5648_v11, %v5650_v32  ;;  %v2231_v11 = vrot.slane %v13868_v10, 1 }
 0x2d4   :  { %11278 = vmatprep.subr.bf16.mxu1 %v18033_v0 }
 0x2d5   :  { %11115 = vmatmul.mubr.bf16.gmra.mrb[8].mxu1 %v2222_v41  ;;  %11915 = vmatmul.mubr.bf16.gmra.mrb[88].mxu0 %v5645_v23  ;;  %v15009_v41 = vld [vmem:[#allocation3 + $0xe8] sm:$0xff]   ;;  %v13867_v23 = vld [vmem:[#allocation3 + $0x38] sm:$0xff]  }
 0x2d6   :  { %11118 = vmatprep.mubr.msk.bf16.mxu1 %vm14034_vm0, %v18033_v0  ;;  %11918 = vmatprep.mubr.msk.bf16.mxu0 %vm14034_vm0, %v18033_v0  ;;  %v2229_v46 = vrot.slane %v13867_v23, 1  ;;  %v5652_v38 = vrot.slane %v15009_v41, 2 }
 0x2d7   :  { %11279 = vmatpush3.bf16.msra.mxu1 %v13832_v52  ;;  %v15040_v52 = vld [vmem:[#allocation3 + $0x100] sm:$0xff]  }
 0x2d8   :  { %11280 = vmatprep.subr.bf16.mxu1 %v18033_v0 }
 0x2dd   :  { %11119 = vmatmul.mubr.bf16.gmra.mrb[12].mxu1 %v2224_v56  ;;  %11919 = vmatmul.mubr.bf16.gmra.mrb[92].mxu0 %v5647_v60  ;;  %v2230_v56 = vsel %vm2215_vm4, %v2227_v30, %v2229_v46  ;;  %v5653_v60 = vsel %vm4683_vm2, %v5650_v32, %v5652_v38  ;;  %v15031_v30 = vld [vmem:[#allocation3 + $0xf8] sm:$0xff]   ;;  %v13869_v32 = vld [vmem:[#allocation3 + $0x48] sm:$0xff]  }
 0x2de   :  { %11122 = vmatprep.mubr.msk.bf16.mxu1 %vm14034_vm0, %v18033_v0  ;;  %11922 = vmatprep.mubr.msk.bf16.mxu0 %vm14034_vm0, %v18033_v0 }
 0x2e5   :  { %11123 = vmatmul.mubr.bf16.gmra.mrb[16].mxu1 %v2226_v15  ;;  %11923 = vmatmul.mubr.bf16.gmra.mrb[96].mxu0 %v5649_v8  ;;  %v5654_v15 = vrot.slane %v15022_v4, 2  ;;  %v2232_v8 = vsel %vm2215_vm4, %v2229_v46, %v2231_v11 }
 0x2e6   :  { %11126 = vmatprep.mubr.msk.bf16.mxu1 %vm14034_vm0, %v18033_v0  ;;  %11926 = vmatprep.mubr.msk.bf16.mxu0 %vm14034_vm0, %v18033_v0 }
 0x2e7   :  { %v5655_v29 = vsel %vm4683_vm2, %v5652_v38, %v5654_v15  ;;  %v13870_v38 = vld [vmem:[#allocation3 + $0x50] sm:$0xff]  }
 0x2ed   :  { %11127 = vmatmul.mubr.bf16.gmra.mrb[20].mxu1 %v2228_v36  ;;  %11927 = vmatmul.mubr.bf16.gmra.mrb[100].mxu0 %v5651_v2  ;;  %v2233_v36 = vrot.slane %v13869_v32, 1  ;;  %v5656_v2 = vrot.slane %v15031_v30, 2 }
 0x2ee   :  { %11130 = vmatprep.mubr.msk.bf16.mxu1 %vm14034_vm0, %v18033_v0  ;;  %11930 = vmatprep.mubr.msk.bf16.mxu0 %vm14034_vm0, %v18033_v0 }
 0x2ef   :  { %v2234_v23 = vsel %vm2215_vm4, %v2231_v11, %v2233_v36  ;;  %v5657_v46 = vsel %vm4683_vm2, %v5654_v15, %v5656_v2  ;;  %v13871_v15 = vld [vmem:[#allocation3 + $0x58] sm:$0xff]  }
 0x2f5   :  { %11131 = vmatmul.mubr.bf16.gmra.mrb[24].mxu1 %v2230_v56  ;;  %11931 = vmatmul.mubr.bf16.gmra.mrb[104].mxu0 %v5653_v60  ;;  %v2235_v56 = vrot.slane %v13870_v38, 1  ;;  %v5658_v60 = vrot.slane %v15040_v52, 2 }
 0x2f6   :  { %11134 = vmatprep.mubr.msk.bf16.mxu1 %vm14034_vm0, %v18033_v0  ;;  %11934 = vmatprep.mubr.msk.bf16.mxu0 %vm14034_vm0, %v18033_v0 }
 0x2f7   :  { %v2236_v10 = vsel %vm2215_vm4, %v2233_v36, %v2235_v56  ;;  %v5659_v11 = vsel %vm4683_vm2, %v5656_v2, %v5658_v60  ;;  %v13872_v2 = vld [vmem:[#allocation3 + $0x60] sm:$0xff]  }
 0x2f8   :  { %v2239_v38 = vrot.slane %v13872_v2, 1 }
 0x2fd   :  { %11135 = vmatmul.mubr.bf16.gmra.mrb[28].mxu1 %v2232_v8  ;;  %11935 = vmatmul.mubr.bf16.gmra.mrb[108].mxu0 %v5655_v29  ;;  %v15049_v8 = vld [vmem:[#allocation3 + $0x108] sm:$0xff]   ;;  %v2237_v29 = vrot.slane %v13871_v15, 1  ;;  %v15071_v15 = vld [vmem:[#allocation3 + $0x118] sm:$0xff]  }
 0x2fe   :  { %11138 = vmatprep.mubr.msk.bf16.mxu1 %vm14034_vm0, %v18033_v0  ;;  %11938 = vmatprep.mubr.msk.bf16.mxu0 %vm14034_vm0, %v18033_v0  ;;  %v5660_v32 = vrot.slane %v15049_v8, 2  ;;  %18207 = vst [vmem:[#allocation12_spill] sm:$0xff] %v15071_v15  ;;  %v5664_v2 = vrot.slane %v15071_v15, 2  ;;  %v13822_v15 = vld [vmem:[#allocation3 + $0x128] sm:$0xff]  }
 0x300   :  { %v5661_v36 = vsel %vm4683_vm2, %v5658_v60, %v5660_v32  ;;  %v2240_v60 = vsel %vm2215_vm4, %v2237_v29, %v2239_v38 }
 0x305   :  { %11139 = vmatmul.mubr.bf16.gmra.mrb[32].mxu1 %v2234_v23  ;;  %11939 = vmatmul.mubr.bf16.gmra.mrb[112].mxu0 %v5657_v46  ;;  %v2238_v23 = vsel %vm2215_vm4, %v2235_v56, %v2237_v29  ;;  %v15058_v46 = vld [vmem:[#allocation3 + $0x110] sm:$0xff]  }
 0x306   :  { %11142 = vmatprep.mubr.msk.bf16.mxu1 %vm14034_vm0, %v18033_v0  ;;  %11942 = vmatprep.mubr.msk.bf16.mxu0 %vm14034_vm0, %v18033_v0  ;;  %18206 = vst [vmem:[#allocation11_spill] sm:$0xff] %v15058_v46  ;;  %v5662_v56 = vrot.slane %v15058_v46, 2 }
 0x308   :  { %v5665_v29 = vsel %vm4683_vm2, %v5662_v56, %v5664_v2 }
 0x30d   :  { %11143 = vmatmul.mubr.bf16.gmra.mrb[36].mxu1 %v2236_v10  ;;  %11943 = vmatmul.mubr.bf16.gmra.mrb[116].mxu0 %v5659_v11  ;;  %v13834_v10 = vld [vmem:[%s18023_s1 + $0xe8] sm:$0xff]   ;;  %v5663_v11 = vsel %vm4683_vm2, %v5660_v32, %v5662_v56  ;;  %v13874_v32 = vld [vmem:[#allocation3 + $0x70] sm:$0xff]  }
 0x30e   :  { %11146 = vmatprep.mubr.msk.bf16.mxu1 %vm14034_vm0, %v18033_v0  ;;  %11946 = vmatprep.mubr.msk.bf16.mxu0 %vm14034_vm0, %v18033_v0 }
 0x30f   :  { %11281 = vmatpush3.bf16.msra.mxu1 %v13834_v10 }
 0x310   :  { %11282 = vmatprep.subr.bf16.mxu1 %v18033_v0 }
 0x315   :  { %11147 = vmatmul.mubr.bf16.gmra.mrb[40].mxu1 %v2238_v23  ;;  %11947 = vmatmul.mubr.bf16.gmra.mrb[120].mxu0 %v5661_v36  ;;  %v13873_v23 = vld [vmem:[#allocation3 + $0x68] sm:$0xff]  }
 0x316   :  { %11150 = vmatprep.mubr.msk.bf16.mxu1 %vm14034_vm0, %v18033_v0  ;;  %11950 = vmatprep.mubr.msk.bf16.mxu0 %vm14034_vm0, %v18033_v0  ;;  %v2241_v36 = vrot.slane %v13873_v23, 1 }
 0x318   :  { %v2242_v10 = vsel %vm2215_vm4, %v2239_v38, %v2241_v36  ;;  %v13875_v38 = vld [vmem:[#allocation3 + $0x78] sm:$0xff]  }
 0x319   :  { %v2245_v56 = vrot.slane %v13875_v38, 1  ;;  %v13824_v38 = vld [vmem:[#allocation3 + $0x138] sm:$0xff]  }
 0x31d   :  { %11151 = vmatmul.mubr.bf16.gmra.mrb[44].mxu1 %v2240_v60  ;;  %11951 = vmatmul.mubr.bf16.gmra.mrb[124].mxu0 %v5663_v11  ;;  %v2243_v60 = vrot.slane %v13874_v32, 1  ;;  %v5666_v11 = vrot.slane %v13821_v59, 2  ;;  %v13823_v32 = vld [vmem:[#allocation3 + $0x130] sm:$0xff]  }
 0x31e   :  { %11154 = vmatprep.mubr.msk.bf16.mxu1 %vm14034_vm0, %v18033_v0  ;;  %11954 = vmatprep.mubr.msk.bf16.mxu0 %vm14034_vm0, %v18033_v0 }
 0x31f   :  { %v2244_v23 = vsel %vm2215_vm4, %v2241_v36, %v2243_v60  ;;  %v5667_v22 = vsel %vm4683_vm2, %v5664_v2, %v5666_v11  ;;  %v5670_v2 = vrot.slane %v13823_v32, 2  ;;  %v13827_v32 = vld [vmem:[#allocation3 + $0x140] sm:$0xff]  }
 0x325   :  { %11155 = vmatmul.mubr.bf16.gmra.mrb[48].mxu1 %v2242_v10  ;;  %11955 = vmatmul.mubr.bf16.gmra.mrb[128].mxu0 %v5665_v29  ;;  %v5668_v10 = vrot.slane %v13822_v15, 2  ;;  %v2246_v29 = vsel %vm2215_vm4, %v2243_v60, %v2245_v56  ;;  %v13877_v60 = vld [vmem:[#allocation3 + $0x88] sm:$0xff]  }
 0x326   :  { %11158 = vmatprep.mubr.msk.bf16.mxu1 %vm14034_vm0, %v18033_v0  ;;  %11958 = vmatprep.mubr.msk.bf16.mxu0 %vm14034_vm0, %v18033_v0 }
 0x327   :  { %v5669_v59 = vsel %vm4683_vm2, %v5666_v11, %v5668_v10  ;;  %v5671_v15 = vsel %vm4683_vm2, %v5668_v10, %v5670_v2  ;;  %v2249_v11 = vrot.slane %v13877_v60, 1 }
 0x32d   :  { %11159 = vmatmul.mubr.bf16.gmra.mrb[52].mxu1 %v2244_v23  ;;  %11959 = vmatmul.mubr.bf16.gmra.mrb[132].mxu0 %v5667_v22  ;;  %v13876_v22 = vld [vmem:[#allocation3 + $0x80] sm:$0xff]  }
 0x32e   :  { %11162 = vmatprep.mubr.msk.bf16.mxu1 %vm14034_vm0, %v18033_v0  ;;  %11962 = vmatprep.mubr.msk.bf16.mxu0 %vm14034_vm0, %v18033_v0  ;;  %v2247_v36 = vrot.slane %v13876_v22, 1  ;;  %v13878_v22 = vld [vmem:[#allocation3 + $0x90] sm:$0xff]  }
 0x330   :  { %v2248_v23 = vsel %vm2215_vm4, %v2245_v56, %v2247_v36  ;;  %v2250_v56 = vsel %vm2215_vm4, %v2247_v36, %v2249_v11  ;;  %v13879_v36 = vld [vmem:[#allocation3 + $0x98] sm:$0xff]  }
 0x335   :  { %11163 = vmatmul.mubr.bf16.gmra.mrb[56].mxu1 %v2246_v29  ;;  %11963 = vmatmul.mubr.bf16.gmra.mrb[136].mxu0 %v5669_v59  ;;  %v13836_v29 = vld [vmem:[%s18023_s1 + $0xf0] sm:$0xff]   ;;  %v5672_v59 = vrot.slane %v13824_v38, 2 }
 0x336   :  { %11166 = vmatprep.mubr.msk.bf16.mxu1 %vm14034_vm0, %v18033_v0  ;;  %11966 = vmatprep.mubr.msk.bf16.mxu0 %vm14034_vm0, %v18033_v0 }
 0x337   :  { %11283 = vmatpush3.bf16.msra.mxu1 %v13836_v29  ;;  %v5673_v10 = vsel %vm4683_vm2, %v5670_v2, %v5672_v59  ;;  %v13828_v29 = vld [vmem:[#allocation3 + $0x148] sm:$0xff]   ;;  %v2253_v2 = vrot.slane %v13879_v36, 1 }
 0x338   :  { %11284 = vmatprep.subr.bf16.mxu1 %v18033_v0 }
 0x33d   :  { %11167 = vmatmul.mubr.bf16.gmra.mrb[60].mxu1 %v2248_v23  ;;  %11967 = vmatmul.mubr.bf16.gmra.mrb[140].mxu0 %v5671_v15  ;;  %v2251_v23 = vrot.slane %v13878_v22, 1  ;;  %v5674_v15 = vrot.slane %v13827_v32, 2  ;;  %v5376_v22 = vld [vmem:[#allocation3 + $0x154] sm:$0x3] }
 0x33e   :  { %11170 = vmatprep.mubr.msk.bf16.mxu1 %vm14034_vm0, %v18033_v0  ;;  %11970 = vmatprep.mubr.msk.bf16.mxu0 %vm14034_vm0, %v18033_v0 }
 0x33f   :  { %v2252_v38 = vsel %vm2215_vm4, %v2249_v11, %v2251_v23  ;;  %v5675_v60 = vsel %vm4683_vm2, %v5672_v59, %v5674_v15  ;;  %v2254_v32 = vsel %vm2215_vm4, %v2251_v23, %v2253_v2  ;;  %v13880_v59 = vld [vmem:[#allocation3 + $0xa0] sm:$0xff]   ;;  %v2257_v23 = vrot.slane %v14647_v63, 1  ;;  %v13881_v63 = vld [vmem:[#allocation3 + $0xb0] sm:$0xff]  }
 0x345   :  { %11171 = vmatmul.mubr.bf16.gmra.mrb[64].mxu1 %v2250_v56  ;;  %11971 = vmatmul.mubr.bf16.gmra.mrb[144].mxu0 %v5673_v10  ;;  %v5676_v56 = vrot.slane %v13828_v29, 2  ;;  %v5375_v10 = vld [vmem:[#allocation3 + $0x150] sm:$0xf] }
 0x346   :  { %11174 = vmatprep.mubr.msk.bf16.mxu1 %vm14034_vm0, %v18033_v0  ;;  %11974 = vmatprep.mubr.msk.bf16.mxu0 %vm14034_vm0, %v18033_v0  ;;  %v9829_v46 = vcombine.low %v5375_v10, %v5376_v22  ;;  %v6236_v10 = vshll.u32 %v14661_v16, 16 }
 0x347   :  { %v5677_v11 = vsel %vm4683_vm2, %v5674_v15, %v5676_v56  ;;  %v6233_v15 = vshrl.u32 %v14661_v16, 16 }
 0x349   :  { %v6235_v22 = vrot.slane %v6233_v15, 2 }
 0x34d   :  { %11175 = vmatmul.mubr.bf16.gmra.mrb[68].mxu1 %v2252_v38  ;;  %11975 = vmatmul.mubr.bf16.gmra.mrb[148].mxu0 %v5675_v60  ;;  %v2255_v38 = vrot.slane %v13880_v59, 1  ;;  %v5678_v60 = vrot.slane %v9829_v46, 2  ;;  %v6241_v46 = vshrl.u32 %v14663_v17, 16 }
 0x34e   :  { %11178 = vmatprep.mubr.msk.bf16.mxu1 %vm14034_vm0, %v18033_v0  ;;  %11978 = vmatprep.mubr.msk.bf16.mxu0 %vm14034_vm0, %v18033_v0 }
 0x34f   :  { %v2256_v29 = vsel %vm2215_vm4, %v2253_v2, %v2255_v38  ;;  %v5679_v36 = vsel %vm4683_vm2, %v5676_v56, %v5678_v60  ;;  %v6244_v2 = vshll.u32 %v14663_v17, 16  ;;  %v2258_v56 = vsel %vm2215_vm4, %v2255_v38, %v2257_v23 }
 0x350   :  { %v6250_v17 = vshrl.u32 %v14676_v31, 16  ;;  %v6253_v38 = vshll.u32 %v14676_v31, 16  ;;  %v13882_v31 = vld [vmem:[#allocation3 + $0xb8] sm:$0xff]  }
 0x351   :  { %v6246_v59 = vrot.slane %v6244_v2, 3 }
 0x352   :  { %v6255_v2 = vrot.slane %v6253_v38, 3 }
 0x355   :  { %11179 = vmatmul.mubr.bf16.gmra.mrb[72].mxu1 %v2254_v32  ;;  %11979 = vmatmul.mubr.bf16.gmra.mrb[152].mxu0 %v5677_v11  ;;  %v6238_v32 = vrot.slane %v6236_v10, 3  ;;  %v6243_v11 = vrot.slane %v6241_v46, 2  ;;  %v6252_v46 = vrot.slane %v6250_v17, 2 }
 0x356   :  { %11182 = vmatprep.mubr.msk.bf16.mxu1 %vm14034_vm0, %v18033_v0  ;;  %11982 = vmatprep.mubr.msk.bf16.mxu0 %vm14034_vm0, %v18033_v0 }
 0x357   :  { %v6239_v16 = vor.u32 %v6238_v32, %v6235_v22  ;;  %v2261_v22 = vrot.slane %v13882_v31, 1  ;;  %v6259_v32 = vshrl.u32 %v14693_v9, 16 }
 0x359   :  { %v6261_v17 = vrot.slane %v6259_v32, 2 }
 0x35d   :  { %11183 = vmatmul.mubr.bf16.gmra.mrb[76].mxu1 %v2256_v29  ;;  %11983 = vmatmul.mubr.bf16.gmra.mrb[156].mxu0 %v5679_v36  ;;  %v2259_v29 = vrot.slane %v13881_v63, 1  ;;  %v6247_v36 = vor.u32 %v6246_v59, %v6243_v11  ;;  %v6262_v11 = vshll.u32 %v14693_v9, 16  ;;  %v13833_v59 = vld [vmem:[%s18023_s1 + $0x208] sm:$0xff]   ;;  %v13835_v9 = vld [vmem:[%s18023_s1 + $0x210] sm:$0xff]  }
 0x35e   :  { %11186 = vmatprep.mubr.msk.bf16.mxu1 %vm14034_vm0, %v18033_v0  ;;  %11986 = vmatprep.mubr.msk.bf16.mxu0 %vm14034_vm0, %v18033_v0 }
 0x35f   :  { %v2260_v15 = vsel %vm2215_vm4, %v2257_v23, %v2259_v29  ;;  %v6248_v10 = vsel %vm6231_vm5, %v6239_v16, %v6247_v36  ;;  %v6256_v23 = vor.u32 %v6255_v2, %v6252_v46  ;;  %v2262_v63 = vsel %vm2215_vm4, %v2259_v29, %v2261_v22  ;;  %v13837_v46 = vld [vmem:[%s18023_s1 + $0x218] sm:$0xff]  }
 0x360   :  { %v6264_v38 = vrot.slane %v6262_v11, 3 }
 0x361   :  { %v6257_v16 = vsel %vm6231_vm5, %v6247_v36, %v6256_v23  ;;  %v6268_v36 = vshrl.u32 %v14710_v50, 16 }
 0x362   :  { %v6265_v29 = vor.u32 %v6264_v38, %v6261_v17 }
 0x363   :  { %v6270_v31 = vrot.slane %v6268_v36, 2  ;;  %v6286_v36 = vshrl.u32 %v14736_v7, 16 }
 0x365   :  { %11187 = vmatmul.mubr.bf16.gmra.mrb[80].mxu1 %v2258_v56  ;;  %11987 = vmatmul.mubr.bf16.gmra.mrb[160].mxu0 %v5678_v60  ;;  %v13831_v60 = vld [vmem:[%s18023_s1 + $0x200] sm:$0xff]   ;;  %v13838_v56 = vld [vmem:[%s18023_s1 + $0xf8] sm:$0xff]  }
 0x366   :  { %11190 = vmatprep.mubr.msk.bf16.mxu1 %vm14034_vm0, %v18033_v0  ;;  %12006 = vmatprep.mubr.msk.bf16.mxu0 %vm14034_vm0, %v18033_v0 }
 0x367   :  { %11285 = vmatpush3.bf16.msra.mxu1 %v13838_v56  ;;  %v6266_v56 = vsel %vm6231_vm5, %v6256_v23, %v6265_v29  ;;  %v6280_v23 = vshll.u32 %v14723_v54, 16 }
 0x368   :  { %12350 = vmatprep.subr.bf16.mxu1 %v18033_v0 }
 0x369   :  { %v6282_v38 = vrot.slane %v6280_v23, 3  ;;  %v6307_v23 = vshll.u32 %v14766_v34, 16 }
 0x36d   :  { %11191 = vmatmul.mubr.bf16.gmra.mrb[84].mxu1 %v2260_v15  ;;  %12007 = vmatmul.mubr.bf16.vlgmr.msra.gmra.mrb[0].mxu0 %v6248_v10  ;;  %v13883_v15 = vld [vmem:[#allocation3 + $0xc0] sm:$0xff]  }
 0x36e   :  { %11194 = vmatprep.mubr.msk.bf16.mxu1 %vm14034_vm0, %v18033_v0  ;;  %12171 = vmatpush3.bf16.msra.mxu0 %v13831_v60  ;;  %v2263_v10 = vrot.slane %v13883_v15, 1  ;;  %v6271_v60 = vshll.u32 %v14710_v50, 16  ;;  %v13884_v50 = vld [vmem:[#allocation3 + $0xc8] sm:$0xff]  }
 0x36f   :  { %12010 = vmatprep.mubr.msk.bf16.mxu0 %vm14034_vm0, %v18033_v0  ;;  %12172 = vmatprep.subr.bf16.mxu0 %v18033_v0  ;;  %v2265_v11 = vrot.slane %v13884_v50, 1 }
 0x370   :  { %v2264_v2 = vsel %vm2215_vm4, %v2261_v22, %v2263_v10  ;;  %v6273_v32 = vrot.slane %v6271_v60, 3  ;;  %v6277_v22 = vshrl.u32 %v14723_v54, 16  ;;  %v6289_v54 = vshll.u32 %v14736_v7, 16 }
 0x371   :  { %v6288_v60 = vrot.slane %v6286_v36, 2 }
 0x372   :  { %12173 = vmatpush3.bf16.msra.mxu0 %v13833_v59  ;;  %v6274_v59 = vor.u32 %v6273_v32, %v6270_v31  ;;  %v6279_v17 = vrot.slane %v6277_v22, 2  ;;  %v6298_v31 = vshll.u32 %v14753_v21, 16  ;;  %v6304_v22 = vshrl.u32 %v14766_v34, 16 }
 0x373   :  { %12174 = vmatprep.subr.bf16.mxu0 %v18033_v0  ;;  %v6316_v34 = vshll.u32 %v14779_v43, 16 }
 0x374   :  { %v6283_v15 = vor.u32 %v6282_v38, %v6279_v17  ;;  %v6306_v17 = vrot.slane %v6304_v22, 2  ;;  %v6309_v38 = vrot.slane %v6307_v23, 3  ;;  %v6340_v22 = vshrl.u32 %v14822_v18, 16 }
 0x375   :  { %11195 = vmatmul.mubr.bf16.gmra.mrb[88].mxu1 %v2262_v63  ;;  %12011 = vmatmul.mubr.bf16.gmra.mrb[4].mxu0 %v6257_v16  ;;  %v2266_v63 = vsel %vm2215_vm4, %v2263_v10, %v2265_v11  ;;  %v6275_v16 = vsel %vm6231_vm5, %v6265_v29, %v6274_v59  ;;  %v6343_v23 = vshll.u32 %v14822_v18, 16 }
 0x376   :  { %11198 = vmatprep.mubr.msk.bf16.mxu1 %vm14034_vm0, %v18033_v0  ;;  %12014 = vmatprep.mubr.msk.bf16.mxu0 %vm14034_vm0, %v18033_v0  ;;  %v6284_v29 = vsel %vm6231_vm5, %v6274_v59, %v6283_v15  ;;  %v2271_v59 = vrot.slane %v14740_v12, 1  ;;  %v2273_v12 = vrot.slane %v14757_v26, 1  ;;  %v2275_v26 = vrot.slane %v14770_v37, 1 }
 0x377   :  { %12175 = vmatpush3.bf16.msra.mxu0 %v13835_v9  ;;  %v2267_v9 = vrot.slane %v14715_v53, 1  ;;  %v2269_v53 = vrot.slane %v14727_v1, 1  ;;  %v2277_v37 = vrot.slane %v14783_v44, 1  ;;  %v2279_v44 = vrot.slane %v14796_v48, 1 }
 0x378   :  { %12176 = vmatprep.subr.bf16.mxu0 %v18033_v0  ;;  %v2274_v36 = vsel %vm2215_vm4, %v2271_v59, %v2273_v12  ;;  %v6342_v48 = vrot.slane %v6340_v22, 2 }
 0x379   :  { %v2268_v10 = vsel %vm2215_vm4, %v2265_v11, %v2267_v9  ;;  %v2270_v32 = vsel %vm2215_vm4, %v2267_v9, %v2269_v53  ;;  %v6300_v11 = vrot.slane %v6298_v31, 3  ;;  %v6310_v9 = vor.u32 %v6309_v38, %v6306_v17 }
 0x37a   :  { %v6345_v17 = vrot.slane %v6343_v23, 3  ;;  %v2281_v38 = vrot.slane %v14809_v5, 1  ;;  %v2283_v5 = vrot.slane %v14826_v24, 1  ;;  %v2285_v24 = vrot.slane %v14839_v39, 1 }
 0x37b   :  { %12177 = vmatpush3.bf16.msra.mxu0 %v13837_v46  ;;  %v6291_v46 = vrot.slane %v6289_v54, 3  ;;  %v2287_v39 = vrot.slane %v14852_v47, 1  ;;  %v2289_v47 = vrot.slane %v14865_v61, 1 }
 0x37c   :  { %12178 = vmatprep.subr.bf16.mxu0 %v18033_v0  ;;  %v6346_v18 = vor.u32 %v6345_v17, %v6342_v48  ;;  %v6394_v48 = vshrl.u32 %v14904_v49, 16  ;;  %v6397_v17 = vshll.u32 %v14904_v49, 16  ;;  %v6406_v49 = vshll.u32 %v14917_v6, 16 }
 0x37d   :  { %11199 = vmatmul.mubr.bf16.gmra.mrb[92].mxu1 %v2264_v2  ;;  %12015 = vmatmul.mubr.bf16.gmra.mrb[8].mxu0 %v6266_v56  ;;  %v13839_v2 = vld [vmem:[%s18023_s1 + $0x220] sm:$0xff]   ;;  %v6292_v7 = vor.u32 %v6291_v46, %v6288_v60  ;;  %v6295_v56 = vshrl.u32 %v14753_v21, 16  ;;  %v6322_v46 = vshrl.u32 %v14792_v51, 16  ;;  %v2290_v22 = vsel %vm2215_vm4, %v2287_v39, %v2289_v47 }
 0x37e   :  { %11202 = vmatprep.mubr.msk.bf16.mxu1 %vm14034_vm0, %v18033_v0  ;;  %12018 = vmatprep.mubr.msk.bf16.mxu0 %vm14034_vm0, %v18033_v0 }
 0x37f   :  { %12179 = vmatpush3.bf16.msra.mxu0 %v13839_v2  ;;  %v6293_v50 = vsel %vm6231_vm5, %v6283_v15, %v6292_v7  ;;  %v6297_v1 = vrot.slane %v6295_v56, 2  ;;  %v6313_v15 = vshrl.u32 %v14779_v43, 16  ;;  %v6325_v43 = vshll.u32 %v14792_v51, 16 }
 0x380   :  { %12180 = vmatprep.subr.bf16.mxu0 %v18033_v0  ;;  %v6334_v51 = vshll.u32 %v14805_v3, 16 }
 0x381   :  { %v6301_v21 = vor.u32 %v6300_v11, %v6297_v1  ;;  %v6327_v56 = vrot.slane %v6325_v43, 3 }
 0x383   :  { %v6311_v54 = vsel %vm6231_vm5, %v6301_v21, %v6310_v9 }
 0x385   :  { %11203 = vmatmul.mubr.bf16.gmra.mrb[96].mxu1 %v2266_v63  ;;  %12019 = vmatmul.mubr.bf16.gmra.mrb[12].mxu0 %v6275_v16  ;;  %v2272_v63 = vsel %vm2215_vm4, %v2269_v53, %v2271_v59  ;;  %v6302_v16 = vsel %vm6231_vm5, %v6292_v7, %v6301_v21  ;;  %v2276_v53 = vsel %vm2215_vm4, %v2273_v12, %v2275_v26  ;;  %v6324_v7 = vrot.slane %v6322_v46, 2  ;;  %v13840_v21 = vld [vmem:[%s18023_s1 + $0x228] sm:$0xff]  }
 0x386   :  { %11206 = vmatprep.mubr.msk.bf16.mxu1 %vm14034_vm0, %v18033_v0  ;;  %12022 = vmatprep.mubr.msk.bf16.mxu0 %vm14034_vm0, %v18033_v0  ;;  %v6336_v59 = vrot.slane %v6334_v51, 3  ;;  %v6349_v12 = vshrl.u32 %v14835_v33, 16  ;;  %v6376_v51 = vshrl.u32 %v14874_v13, 16 }
 0x387   :  { %v6328_v31 = vor.u32 %v6327_v56, %v6324_v7  ;;  %12181 = vmatpush3.bf16.msra.mxu0 %v13840_v21  ;;  %v2286_v7 = vsel %vm2215_vm4, %v2283_v5, %v2285_v24  ;;  %v6385_v21 = vshrl.u32 %v14891_v35, 16 }
 0x388   :  { %12182 = vmatprep.subr.bf16.mxu0 %v18033_v0 }
 0x389   :  { %v6387_v61 = vrot.slane %v6385_v21, 2 }
 0x38d   :  { %11207 = vmatmul.mubr.bf16.gmra.mrb[100].mxu1 %v2268_v10  ;;  %12023 = vmatmul.mubr.bf16.gmra.mrb[16].mxu0 %v6284_v29  ;;  %v6315_v10 = vrot.slane %v6313_v15, 2  ;;  %v6318_v29 = vrot.slane %v6316_v34, 3  ;;  %v2282_v15 = vsel %vm2215_vm4, %v2279_v44, %v2281_v38 }
 0x38e   :  { %11210 = vmatprep.mubr.msk.bf16.mxu1 %vm14034_vm0, %v18033_v0  ;;  %12026 = vmatprep.mubr.msk.bf16.mxu0 %vm14034_vm0, %v18033_v0 }
 0x38f   :  { %v6319_v60 = vor.u32 %v6318_v29, %v6315_v10  ;;  %v6358_v29 = vshrl.u32 %v14848_v27, 16 }
 0x391   :  { %v6320_v2 = vsel %vm6231_vm5, %v6310_v9, %v6319_v60  ;;  %v6329_v1 = vsel %vm6231_vm5, %v6319_v60, %v6328_v31  ;;  %v6352_v9 = vshll.u32 %v14835_v33, 16  ;;  %v6361_v33 = vshll.u32 %v14848_v27, 16 }
 0x392   :  { %v6360_v46 = vrot.slane %v6358_v29, 2  ;;  %v6370_v27 = vshll.u32 %v14861_v57, 16 }
 0x393   :  { %v6363_v43 = vrot.slane %v6361_v33, 3  ;;  %v6412_v33 = vshrl.u32 %v14926_v25, 16 }
 0x395   :  { %11211 = vmatmul.mubr.bf16.gmra.mrb[104].mxu1 %v2270_v32  ;;  %12027 = vmatmul.mubr.bf16.gmra.mrb[20].mxu0 %v6293_v50  ;;  %v6331_v32 = vshrl.u32 %v14805_v3, 16  ;;  %v2278_v50 = vsel %vm2215_vm4, %v2275_v26, %v2277_v37  ;;  %v2284_v26 = vsel %vm2215_vm4, %v2281_v38, %v2283_v5 }
 0x396   :  { %11214 = vmatprep.mubr.msk.bf16.mxu1 %vm14034_vm0, %v18033_v0  ;;  %12030 = vmatprep.mubr.msk.bf16.mxu0 %vm14034_vm0, %v18033_v0 }
 0x397   :  { %v6333_v11 = vrot.slane %v6331_v32, 2 }
 0x399   :  { %v6337_v3 = vor.u32 %v6336_v59, %v6333_v11  ;;  %v6378_v11 = vrot.slane %v6376_v51, 2 }
 0x39b   :  { %v6347_v34 = vsel %vm6231_vm5, %v6337_v3, %v6346_v18 }
 0x39d   :  { %11215 = vmatmul.mubr.bf16.gmra.mrb[108].mxu1 %v2272_v63  ;;  %12031 = vmatmul.mubr.bf16.gmra.mrb[24].mxu0 %v6302_v16  ;;  %v2280_v63 = vsel %vm2215_vm4, %v2277_v37, %v2279_v44  ;;  %v6338_v16 = vsel %vm6231_vm5, %v6328_v31, %v6337_v3  ;;  %v6372_v31 = vrot.slane %v6370_v27, 3  ;;  %v13841_v3 = vld [vmem:[%s18023_s1 + $0x230] sm:$0xff]  }
 0x39e   :  { %11218 = vmatprep.mubr.msk.bf16.mxu1 %vm14034_vm0, %v18033_v0  ;;  %12034 = vmatprep.mubr.msk.bf16.mxu0 %vm14034_vm0, %v18033_v0 }
 0x39f   :  { %12183 = vmatpush3.bf16.msra.mxu0 %v13841_v3 }
 0x3a0   :  { %12184 = vmatprep.subr.bf16.mxu0 %v18033_v0 }
 0x3a5   :  { %11219 = vmatmul.mubr.bf16.gmra.mrb[112].mxu1 %v2274_v36  ;;  %12035 = vmatmul.mubr.bf16.gmra.mrb[28].mxu0 %v6311_v54  ;;  %v6351_v36 = vrot.slane %v6349_v12, 2  ;;  %v6354_v54 = vrot.slane %v6352_v9, 3  ;;  %v6396_v12 = vrot.slane %v6394_v48, 2  ;;  %v6399_v9 = vrot.slane %v6397_v17, 3  ;;  %v13890_v48 = vld [vmem:[%s18023_s1 + $0x110] sm:$0xff]  }
 0x3a6   :  { %11222 = vmatprep.mubr.msk.bf16.mxu1 %vm14034_vm0, %v18033_v0  ;;  %12038 = vmatprep.mubr.msk.bf16.mxu0 %vm14034_vm0, %v18033_v0 }
 0x3a7   :  { %v6355_v10 = vor.u32 %v6354_v54, %v6351_v36 }
 0x3a9   :  { %v6356_v60 = vsel %vm6231_vm5, %v6346_v18, %v6355_v10 }
 0x3ad   :  { %11223 = vmatmul.mubr.bf16.gmra.mrb[116].mxu1 %v2276_v53  ;;  %12039 = vmatmul.mubr.bf16.gmra.mrb[32].mxu0 %v6320_v2  ;;  %v6364_v53 = vor.u32 %v6363_v43, %v6360_v46  ;;  %v6367_v2 = vshrl.u32 %v14861_v57, 16  ;;  %v6379_v57 = vshll.u32 %v14874_v13, 16  ;;  %v6388_v13 = vshll.u32 %v14891_v35, 16 }
 0x3ae   :  { %11226 = vmatprep.mubr.msk.bf16.mxu1 %vm14034_vm0, %v18033_v0  ;;  %12042 = vmatprep.mubr.msk.bf16.mxu0 %vm14034_vm0, %v18033_v0  ;;  %v2291_v35 = vrot.slane %v14878_v19, 1  ;;  %v2293_v19 = vrot.slane %v14895_v40, 1  ;;  %v2295_v40 = vrot.slane %v14908_v55, 1  ;;  %v6414_v46 = vrot.slane %v6412_v33, 2 }
 0x3af   :  { %v6365_v56 = vsel %vm6231_vm5, %v6355_v10, %v6364_v53  ;;  %v6369_v37 = vrot.slane %v6367_v2, 2  ;;  %v6381_v59 = vrot.slane %v6379_v57, 3  ;;  %v6408_v10 = vrot.slane %v6406_v49, 3 }
 0x3b0   :  { %v2292_v38 = vsel %vm2215_vm4, %v2289_v47, %v2291_v35  ;;  %v2294_v36 = vsel %vm2215_vm4, %v2291_v35, %v2293_v19  ;;  %v6439_v47 = vshrl.u32 %v14964_v28, 16  ;;  %v6448_v35 = vshrl.u32 %v14981_v45, 16 }
 0x3b1   :  { %v6373_v32 = vor.u32 %v6372_v31, %v6369_v37  ;;  %v6382_v44 = vor.u32 %v6381_v59, %v6378_v11  ;;  %v13842_v11 = vld [vmem:[%s18023_s1 + $0x238] sm:$0xff]   ;;  %v13887_v59 = vld [vmem:[%s18023_s1 + $0x100] sm:$0xff]   ;;  %v6460_v49 = vshll.u32 %v14991_v62, 16 }
 0x3b2   :  { %12185 = vmatpush3.bf16.msra.mxu0 %v13842_v11  ;;  %v6441_v3 = vrot.slane %v6439_v47, 2 }
 0x3b3   :  { %v6383_v23 = vsel %vm6231_vm5, %v6373_v32, %v6382_v44 }
 0x3b5   :  { %11227 = vmatmul.mubr.bf16.gmra.mrb[120].mxu1 %v2278_v50  ;;  %12043 = vmatmul.mubr.bf16.gmra.mrb[36].mxu0 %v6329_v1  ;;  %v2288_v50 = vsel %vm2215_vm4, %v2285_v24, %v2287_v39  ;;  %v6374_v1 = vsel %vm6231_vm5, %v6364_v53, %v6373_v32  ;;  %v6421_v24 = vshrl.u32 %v14935_v42, 16  ;;  %v6424_v53 = vshll.u32 %v14935_v42, 16 }
 0x3b6   :  { %11230 = vmatprep.mubr.msk.bf16.mxu1 %vm14034_vm0, %v18033_v0  ;;  %12046 = vmatprep.mubr.msk.bf16.mxu0 %vm14034_vm0, %v18033_v0  ;;  %v6430_v39 = vshrl.u32 %v14944_v58, 16  ;;  %v6433_v42 = vshll.u32 %v14944_v58, 16 }
 0x3b7   :  { %v6423_v2 = vrot.slane %v6421_v24, 2  ;;  %v6426_v27 = vrot.slane %v6424_v53, 3 }
 0x3b8   :  { %v6432_v57 = vrot.slane %v6430_v39, 2 }
 0x3b9   :  { %v6427_v31 = vor.u32 %v6426_v27, %v6423_v2 }
 0x3bd   :  { %11231 = vmatmul.mubr.bf16.gmra.mrb[124].mxu1 %v2280_v63  ;;  %12047 = vmatmul.mubr.bf16.gmra.mrb[40].mxu0 %v6338_v16  ;;  %v6390_v63 = vrot.slane %v6388_v13, 3 }
 0x3be   :  { %11234 = vmatprep.mubr.msk.bf16.mxu1 %vm14034_vm0, %v18033_v0  ;;  %12050 = vmatprep.mubr.msk.bf16.mxu0 %vm14034_vm0, %v18033_v0 }
 0x3bf   :  { %v6391_v16 = vor.u32 %v6390_v63, %v6387_v61 }
 0x3c1   :  { %v6392_v18 = vsel %vm6231_vm5, %v6382_v44, %v6391_v16  ;;  %v6442_v44 = vshll.u32 %v14964_v28, 16  ;;  %v13889_v28 = vld [vmem:[#allocation3 + $0x20] sm:$0xff]  }
 0x3c2   :  { %v3136_v61 = vrot.slane %v13889_v28, 1  ;;  %v13901_v28 = vld [vmem:[#allocation3 + $0x50] sm:$0xff]  }
 0x3c5   :  { %11235 = vmatmul.mubr.bf16.gmra.mrb[128].mxu1 %v2282_v15  ;;  %12051 = vmatmul.mubr.bf16.gmra.mrb[44].mxu0 %v6347_v34  ;;  %v6400_v15 = vor.u32 %v6399_v9, %v6396_v12  ;;  %v6403_v34 = vshrl.u32 %v14917_v6, 16  ;;  %v6415_v6 = vshll.u32 %v14926_v25, 16  ;;  %v13891_v9 = vld [vmem:[%s18023_s1 + $0x118] sm:$0xff]  }
 0x3c6   :  { %11238 = vmatprep.mubr.msk.bf16.mxu1 %vm14034_vm0, %v18033_v0  ;;  %12054 = vmatprep.mubr.msk.bf16.mxu0 %vm14034_vm0, %v18033_v0 }
 0x3c7   :  { %v6401_v54 = vsel %vm6231_vm5, %v6391_v16, %v6400_v15  ;;  %v6405_v5 = vrot.slane %v6403_v34, 2  ;;  %v6417_v43 = vrot.slane %v6415_v6, 3  ;;  %v6451_v16 = vshll.u32 %v14981_v45, 16  ;;  %v13892_v45 = vld [vmem:[#allocation3 + $0x28] sm:$0xff]  }
 0x3c8   :  { %v6457_v34 = vshrl.u32 %v14991_v62, 16  ;;  %v13895_v62 = vld [vmem:[#allocation3 + $0x30] sm:$0xff]  }
 0x3c9   :  { %v6409_v29 = vor.u32 %v6408_v10, %v6405_v5  ;;  %v6418_v55 = vor.u32 %v6417_v43, %v6414_v46  ;;  %v6453_v12 = vrot.slane %v6451_v16, 3  ;;  %v3140_v33 = vrot.slane %v13895_v62, 1  ;;  %v13896_v46 = vld [vmem:[%s18023_s1 + $0x130] sm:$0xff]  }
 0x3ca   :  { %v6459_v10 = vrot.slane %v6457_v34, 2 }
 0x3cb   :  { %v6419_v25 = vsel %vm6231_vm5, %v6409_v29, %v6418_v55  ;;  %v6428_v51 = vsel %vm6231_vm5, %v6418_v55, %v6427_v31 }
 0x3cd   :  { %11239 = vmatmul.mubr.bf16.gmra.mrb[132].mxu1 %v2284_v26  ;;  %12055 = vmatmul.mubr.bf16.gmra.mrb[48].mxu0 %v6356_v60  ;;  %v2296_v26 = vsel %vm2215_vm4, %v2293_v19, %v2295_v40  ;;  %v6410_v60 = vsel %vm6231_vm5, %v6400_v15, %v6409_v29  ;;  %v3138_v19 = vrot.slane %v13892_v45, 1  ;;  %v13894_v29 = vld [vmem:[%s18023_s1 + $0x128] sm:$0xff]   ;;  %v6511_v45 = vshrl.u32 %v15049_v8, 16 }
 0x3ce   :  { %11242 = vmatprep.mubr.msk.bf16.mxu1 %vm14034_vm0, %v18033_v0  ;;  %12058 = vmatprep.mubr.msk.bf16.mxu0 %vm14034_vm0, %v18033_v0 }
 0x3cf   :  { %v3141_v43 = vsel %vm2215_vm4, %v3138_v19, %v3140_v33  ;;  %v6513_v34 = vrot.slane %v6511_v45, 2 }
 0x3d5   :  { %11243 = vmatmul.mubr.bf16.gmra.mrb[136].mxu1 %v2286_v7  ;;  %12059 = vmatmul.mubr.bf16.gmra.mrb[52].mxu0 %v6365_v56  ;;  %v3131_v7 = vrot.slane %v14129_v14, 1  ;;  %v13885_v56 = vld [vmem:[#allocation3 + $0x10] sm:$0xff]   ;;  %v13886_v14 = vld [vmem:[#allocation3 + $0x18] sm:$0xff]  }
 0x3d6   :  { %11246 = vmatprep.mubr.msk.bf16.mxu1 %vm14034_vm0, %v18033_v0  ;;  %12062 = vmatprep.mubr.msk.bf16.mxu0 %vm14034_vm0, %v18033_v0  ;;  %v3132_v37 = vrot.slane %v13885_v56, 1  ;;  %v6478_v56 = vshll.u32 %v15009_v41, 16 }
 0x3d8   :  { %v3133_v32 = vsel %vm2215_vm4, %v3131_v7, %v3132_v37  ;;  %v6475_v7 = vshrl.u32 %v15009_v41, 16  ;;  %v6487_v41 = vshll.u32 %v15022_v4, 16 }
 0x3da   :  { %v6477_v39 = vrot.slane %v6475_v7, 2 }
 0x3dd   :  { %11247 = vmatmul.mubr.bf16.gmra.mrb[140].mxu1 %v2288_v50  ;;  %12063 = vmatmul.mubr.bf16.gmra.mrb[56].mxu0 %v6374_v1  ;;  %v6435_v50 = vrot.slane %v6433_v42, 3  ;;  %v3134_v1 = vrot.slane %v13886_v14, 1  ;;  %v6480_v42 = vrot.slane %v6478_v56, 3  ;;  %v13907_v56 = vld [vmem:[#allocation3 + $0x70] sm:$0xff]  }
 0x3de   :  { %11250 = vmatprep.mubr.msk.bf16.mxu1 %vm14034_vm0, %v18033_v0  ;;  %12066 = vmatprep.mubr.msk.bf16.mxu0 %vm14034_vm0, %v18033_v0 }
 0x3df   :  { %v6436_v58 = vor.u32 %v6435_v50, %v6432_v57  ;;  %v3135_v21 = vsel %vm2215_vm4, %v3132_v37, %v3134_v1  ;;  %v3137_v17 = vsel %vm2215_vm4, %v3134_v1, %v3136_v61  ;;  %v6481_v57 = vor.u32 %v6480_v42, %v6477_v39  ;;  %v13908_v39 = vld [vmem:[#allocation3 + $0x120] sm:$0xff]  }
 0x3e0   :  { %v6484_v50 = vshrl.u32 %v15022_v4, 16  ;;  %v6496_v4 = vshll.u32 %v15031_v30, 16  ;;  %v6538_v42 = vshrl.u32 %v13908_v39, 16 }
 0x3e1   :  { %v6437_v13 = vsel %vm6231_vm5, %v6427_v31, %v6436_v58 }
 0x3e2   :  { %v6486_v11 = vrot.slane %v6484_v50, 2  ;;  %v6540_v50 = vrot.slane %v6538_v42, 2 }
 0x3e5   :  { %11251 = vmatmul.mubr.bf16.gmra.mrb[144].mxu1 %v2290_v22  ;;  %12067 = vmatmul.mubr.bf16.gmra.mrb[60].mxu0 %v6383_v23  ;;  %v6444_v22 = vrot.slane %v6442_v44, 3  ;;  %v13888_v23 = vld [vmem:[%s18023_s1 + $0x108] sm:$0xff]  }
 0x3e6   :  { %11254 = vmatprep.mubr.msk.bf16.mxu1 %vm14034_vm0, %v18033_v0  ;;  %12070 = vmatprep.mubr.msk.bf16.mxu0 %vm14034_vm0, %v18033_v0 }
 0x3e7   :  { %v6445_v63 = vor.u32 %v6444_v22, %v6441_v3 }
 0x3ed   :  { %11255 = vmatmul.mubr.bf16.gmra.mrb[148].mxu1 %v2292_v38  ;;  %12071 = vmatmul.mubr.bf16.gmra.mrb[64].mxu0 %v6392_v18  ;;  %v6446_v38 = vsel %vm6231_vm5, %v6436_v58, %v6445_v63  ;;  %v6450_v18 = vrot.slane %v6448_v35, 2  ;;  %v6489_v58 = vrot.slane %v6487_v41, 3  ;;  %v6502_v35 = vshrl.u32 %v15040_v52, 16 }
 0x3ee   :  { %11258 = vmatprep.mubr.msk.bf16.mxu1 %vm14034_vm0, %v18033_v0  ;;  %12074 = vmatprep.mubr.msk.bf16.mxu0 %vm14034_vm0, %v18033_v0 }
 0x3ef   :  { %v6454_v15 = vor.u32 %v6453_v12, %v6450_v18  ;;  %v6490_v44 = vor.u32 %v6489_v58, %v6486_v11  ;;  %v13902_v18 = vld [vmem:[#allocation3 + $0x58] sm:$0xff]   ;;  %v13910_v58 = vld [vmem:[#allocation3 + $0x128] sm:$0xff]  }
 0x3f0   :  { %v3150_v12 = vrot.slane %v13902_v18, 1 }
 0x3f1   :  { %v6455_v5 = vsel %vm6231_vm5, %v6445_v63, %v6454_v15  ;;  %v6491_v3 = vsel %vm6231_vm5, %v6481_v57, %v6490_v44 }
 0x3f5   :  { %11259 = vmatmul.mubr.bf16.gmra.mrb[152].mxu1 %v2294_v36  ;;  %12075 = vmatmul.mubr.bf16.gmra.mrb[68].mxu0 %v6401_v54  ;;  %v13893_v36 = vld [vmem:[%s18023_s1 + $0x120] sm:$0xff]   ;;  %v3139_v54 = vsel %vm2215_vm4, %v3136_v61, %v3138_v19  ;;  %v3148_v61 = vrot.slane %v13901_v28, 1  ;;  %v13912_v28 = vld [vmem:[#allocation3 + $0x130] sm:$0xff]  }
 0x3f6   :  { %11262 = vmatprep.mubr.msk.bf16.mxu1 %vm14034_vm0, %v18033_v0  ;;  %12078 = vmatprep.mubr.msk.bf16.mxu0 %vm14034_vm0, %v18033_v0 }
 0x3f7   :  { %v3151_v19 = vsel %vm2215_vm4, %v3148_v61, %v3150_v12 }
 0x3fd   :  { %11263 = vmatmul.mubr.bf16.gmra.mrb[156].mxu1 %v2296_v26  ;;  %12079 = vmatmul.mubr.bf16.gmra.mrb[72].mxu0 %v6410_v60  ;;  %v6466_v26 = vshrl.u32 %v15000_v20, 16  ;;  %v6469_v60 = vshll.u32 %v15000_v20, 16  ;;  %v13898_v20 = vld [vmem:[#allocation3 + $0x38] sm:$0xff]  }
 0x3fe   :  { %11266 = vmatprep.mubr.msk.bf16.mxu1 %vm14034_vm0, %v18033_v0  ;;  %12082 = vmatprep.mubr.msk.bf16.mxu0 %vm14034_vm0, %v18033_v0  ;;  %v3142_v2 = vrot.slane %v13898_v20, 1 }
 0x3ff   :  { %v6468_v24 = vrot.slane %v6466_v26, 2  ;;  %v6471_v53 = vrot.slane %v6469_v60, 3  ;;  %v13905_v60 = vld [vmem:[#allocation3 + $0x68] sm:$0xff]  }
 0x400   :  { %v3143_v37 = vsel %vm2215_vm4, %v3140_v33, %v3142_v2 }
 0x401   :  { %v6472_v27 = vor.u32 %v6471_v53, %v6468_v24  ;;  %v13906_v53 = vld [vmem:[#allocation3 + $0x118] sm:$0xff]  }
 0x403   :  { %v6482_v1 = vsel %vm6231_vm5, %v6472_v27, %v6481_v57 }
 0x405   :  { %11267 = vmatmul.mubr.bf16.gmra.mrb[160].mxu1 %v2295_v40  ;;  %12083 = vmatmul.mubr.bf16.gmra.mrb[76].mxu0 %v6419_v25  ;;  %v6462_v40 = vrot.slane %v6460_v49, 3  ;;  %v13897_v25 = vld [vmem:[%s18023_s1 + $0x138] sm:$0xff]  }
 0x406   :  { %11286 = vmatprep.mubr.msk.bf16.mxu1 %vm14034_vm0, %v18033_v0  ;;  %12086 = vmatprep.mubr.msk.bf16.mxu0 %vm14034_vm0, %v18033_v0 }
 0x407   :  { %v6463_v6 = vor.u32 %v6462_v40, %v6459_v10  ;;  %v18208_v10 = vld [vmem:[#allocation11_spill] sm:$0xff] }
 0x408   :  { %v6520_v40 = vshrl.u32 %v18208_v10, 16 }
 0x409   :  { %v6464_v55 = vsel %vm6231_vm5, %v6454_v15, %v6463_v6  ;;  %v6473_v31 = vsel %vm6231_vm5, %v6463_v6, %v6472_v27 }
 0x40a   :  { %v6522_v6 = vrot.slane %v6520_v40, 2 }
 0x40d   :  { %11287 = vmatmul.mubr.bf16.vlgmr.msra.gmra.mrb[0].mxu1 %v3133_v32  ;;  %12087 = vmatmul.mubr.bf16.gmra.mrb[80].mxu0 %v6428_v51  ;;  %v13899_v32 = vld [vmem:[#allocation3 + $0x40] sm:$0xff]  }
 0x40e   :  { %11290 = vmatprep.mubr.msk.bf16.mxu1 %vm14034_vm0, %v18033_v0  ;;  %12090 = vmatprep.mubr.msk.bf16.mxu0 %vm14034_vm0, %v18033_v0  ;;  %v3144_v51 = vrot.slane %v13899_v32, 1  ;;  %v6541_v32 = vshll.u32 %v13908_v39, 16 }
 0x40f   :  { %12358 = vmatpush3.bf16.msra.mxu1 %v13887_v59  ;;  %v13900_v59 = vld [vmem:[#allocation3 + $0x48] sm:$0xff]  }
 0x410   :  { %12351 = vmatprep.subr.bf16.mxu1 %v18033_v0  ;;  %v3145_v14 = vsel %vm2215_vm4, %v3142_v2, %v3144_v51  ;;  %v3146_v47 = vrot.slane %v13900_v59, 1  ;;  %v6543_v41 = vrot.slane %v6541_v32, 3  ;;  %v6547_v59 = vshrl.u32 %v13910_v58, 16  ;;  %v7931_v32 = vld [vmem:[%s18026_s4 + $0x18] sm:$0xff] }
 0x412   :  { %v3149_v16 = vsel %vm2215_vm4, %v3146_v47, %v3148_v61  ;;  %v6544_v11 = vor.u32 %v6543_v41, %v6540_v50  ;;  %v6556_v61 = vshrl.u32 %v13912_v28, 16 }
 0x413   :  { %12359 = vmatpush3.bf16.msra.mxu1 %v13888_v23  ;;  %v6498_v23 = vrot.slane %v6496_v4, 3  ;;  %v6549_v4 = vrot.slane %v6547_v59, 2 }
 0x414   :  { %12352 = vmatprep.subr.bf16.mxu1 %v18033_v0 }
 0x415   :  { %11291 = vmatmul.mubr.bf16.gmra.mrb[4].mxu1 %v3135_v21  ;;  %12091 = vmatmul.mubr.bf16.gmra.mrb[84].mxu0 %v6437_v13  ;;  %v6493_v21 = vshrl.u32 %v15031_v30, 16  ;;  %v3147_v13 = vsel %vm2215_vm4, %v3144_v51, %v3146_v47  ;;  %v6505_v30 = vshll.u32 %v15040_v52, 16  ;;  %v6514_v52 = vshll.u32 %v15049_v8, 16  ;;  %v13904_v8 = vld [vmem:[#allocation3 + $0x110] sm:$0xff]  }
 0x416   :  { %11294 = vmatprep.mubr.msk.bf16.mxu1 %vm14034_vm0, %v18033_v0  ;;  %12094 = vmatprep.mubr.msk.bf16.mxu0 %vm14034_vm0, %v18033_v0  ;;  %v6550_v47 = vshll.u32 %v13910_v58, 16  ;;  %v7936_v58 = vld [vmem:[%s18026_s4 + $0x40] sm:$0xff] }
 0x417   :  { %12360 = vmatpush3.bf16.msra.mxu1 %v13890_v48  ;;  %v6495_v22 = vrot.slane %v6493_v21, 2  ;;  %v6516_v49 = vrot.slane %v6514_v52, 3 }
 0x418   :  { %12353 = vmatprep.subr.bf16.mxu1 %v18033_v0 }
 0x419   :  { %v6499_v63 = vor.u32 %v6498_v23, %v6495_v22 }
 0x41b   :  { %12361 = vmatpush3.bf16.msra.mxu1 %v13891_v9  ;;  %v6500_v48 = vsel %vm6231_vm5, %v6490_v44, %v6499_v63 }
 0x41c   :  { %12354 = vmatprep.subr.bf16.mxu1 %v18033_v0 }
 0x41d   :  { %11295 = vmatmul.mubr.bf16.gmra.mrb[8].mxu1 %v3137_v17  ;;  %12095 = vmatmul.mubr.bf16.gmra.mrb[88].mxu0 %v6446_v38  ;;  %v6504_v17 = vrot.slane %v6502_v35, 2  ;;  %v6507_v38 = vrot.slane %v6505_v30, 3 }
 0x41e   :  { %11298 = vmatprep.mubr.msk.bf16.mxu1 %vm14034_vm0, %v18033_v0  ;;  %12098 = vmatprep.mubr.msk.bf16.mxu0 %vm14034_vm0, %v18033_v0 }
 0x41f   :  { %12362 = vmatpush3.bf16.msra.mxu1 %v13893_v36  ;;  %v6508_v9 = vor.u32 %v6507_v38, %v6504_v17  ;;  %v13903_v36 = vld [vmem:[#allocation3 + $0x60] sm:$0xff]   ;;  %v13913_v17 = vld [vmem:[#allocation3 + $0x88] sm:$0xff]  }
 0x420   :  { %12355 = vmatprep.subr.bf16.mxu1 %v18033_v0  ;;  %v3162_v38 = vrot.slane %v13913_v17, 1 }
 0x421   :  { %v6509_v15 = vsel %vm6231_vm5, %v6499_v63, %v6508_v9  ;;  %v6559_v63 = vshll.u32 %v13912_v28, 16  ;;  %v7937_v28 = vld [vmem:[%s18026_s4 + $0x48] sm:$0xff] }
 0x423   :  { %12363 = vmatpush3.bf16.msra.mxu1 %v13894_v29  ;;  %v6523_v29 = vshll.u32 %v13904_v8, 16  ;;  %v14035_v8 = vmov 0  }
 0x424   :  { %12356 = vmatprep.subr.bf16.mxu1 %v18033_v0  ;;  %13602 = vset.pattern.permute.xlu0 %v14035_v8 }
 0x425   :  { %11299 = vmatmul.mubr.bf16.gmra.mrb[12].mxu1 %v3139_v54  ;;  %12099 = vmatmul.mubr.bf16.gmra.mrb[92].mxu0 %v6455_v5  ;;  %v3152_v54 = vrot.slane %v13903_v36, 1  ;;  %v6517_v5 = vor.u32 %v6516_v49, %v6513_v34  ;;  %v6525_v26 = vrot.slane %v6523_v29, 3  ;;  %v13915_v49 = vld [vmem:[#allocation3 + $0x90] sm:$0xff]   ;;  %v7928_v29 = vld [vmem:[%s18026_s4] sm:$0xff] }
 0x426   :  { %11302 = vmatprep.mubr.msk.bf16.mxu1 %vm14034_vm0, %v18033_v0  ;;  %12102 = vmatprep.mubr.msk.bf16.mxu0 %vm14034_vm0, %v18033_v0  ;;  %v3164_v36 = vrot.slane %v13915_v49, 1 }
 0x427   :  { %12364 = vmatpush3.bf16.msra.mxu1 %v13896_v46  ;;  %v3153_v62 = vsel %vm2215_vm4, %v3150_v12, %v3152_v54  ;;  %v6518_v33 = vsel %vm6231_vm5, %v6508_v9, %v6517_v5  ;;  %v3154_v46 = vrot.slane %v13905_v60, 1  ;;  %v13914_v12 = vld [vmem:[#allocation3 + $0x138] sm:$0xff]   ;;  %13603 = vset.pattern.permute.xlu1 %v14035_v8  ;;  %v7929_v60 = vld [vmem:[%s18026_s4 + $0x8] sm:$0xff] }
 0x428   :  { %12357 = vmatprep.subr.bf16.mxu1 %v18033_v0  ;;  %v6565_v9 = vshrl.u32 %v13914_v12, 16  ;;  %v6568_v45 = vshll.u32 %v13914_v12, 16  ;;  %8011 = vperm.xlu0 %13602, %v7928_v29   ;;  %v7944_v12 = vld [vmem:[%s18026_s4 + $0x80] sm:$0xff] }
 0x429   :  { %v3155_v20 = vsel %vm2215_vm4, %v3152_v54, %v3154_v46 }
 0x42a   :  { %v6570_v34 = vrot.slane %v6568_v45, 3  ;;  %v13923_v45 = vld [vmem:[#allocation3 + $0x14] sm:$0xf] }
 0x42b   :  { %12365 = vmatpush3.bf16.msra.mxu1 %v13897_v25  ;;  %v6532_v25 = vshll.u32 %v13906_v53, 16 }
 0x42c   :  { %8016 = vperm.xlu0 %13602, %v7929_v60   ;;  %v13927_v60 = vld [vmem:[#allocation3 + $0x20] sm:$0xff]  }
 0x42d   :  { %11303 = vmatmul.mubr.bf16.gmra.mrb[16].mxu1 %v3141_v43  ;;  %12103 = vmatmul.mubr.bf16.gmra.mrb[96].mxu0 %v6464_v55  ;;  %v6526_v43 = vor.u32 %v6525_v26, %v6522_v6  ;;  %v18209_v55 = vld [vmem:[#allocation12_spill] sm:$0xff]  ;;  %v6534_v7 = vrot.slane %v6532_v25, 3 }
 0x42e   :  { %11306 = vmatprep.mubr.msk.bf16.mxu1 %vm14034_vm0, %v18033_v0  ;;  %12106 = vmatprep.mubr.msk.bf16.mxu0 %vm14034_vm0, %v18033_v0  ;;  %v6529_v24 = vshrl.u32 %v18209_v55, 16 }
 0x42f   :  { %v6527_v2 = vsel %vm6231_vm5, %v6517_v5, %v6526_v43  ;;  %v13916_v5 = vld [vmem:[#allocation3 + $0x140] sm:$0xff]  }
 0x430   :  { %v6531_v27 = vrot.slane %v6529_v24, 2  ;;  %v6574_v10 = vshrl.u32 %v13916_v5, 16  ;;  %v6577_v40 = vshll.u32 %v13916_v5, 16  ;;  %v13918_v24 = vld [vmem:[#allocation3 + $0x148] sm:$0xff]  }
 0x431   :  { %v6583_v53 = vshrl.u32 %v13918_v24, 16  ;;  %v6586_v25 = vshll.u32 %v13918_v24, 16 }
 0x432   :  { %v6576_v6 = vrot.slane %v6574_v10, 2  ;;  %v6579_v26 = vrot.slane %v6577_v40, 3  ;;  %v7945_v10 = vld [vmem:[%s18026_s4 + $0x88] sm:$0xff]  ;;  %v7948_v40 = vld [vmem:[%s18026_s4 + $0xa0] sm:$0xff] }
 0x433   :  { %v6585_v39 = vrot.slane %v6583_v53, 2  ;;  %v6588_v42 = vrot.slane %v6586_v25, 3  ;;  %v7951_v25 = vld [vmem:[%s18026_s4 + $0xb8] sm:$0xff] }
 0x434   :  { %v6580_v55 = vor.u32 %v6579_v26, %v6576_v6  ;;  %v15605_v6 = vld [vmem:[#allocation3 + $0xc0] sm:$0xff]  }
 0x435   :  { %11307 = vmatmul.mubr.bf16.gmra.mrb[20].mxu1 %v3143_v37  ;;  %12107 = vmatmul.mubr.bf16.gmra.mrb[100].mxu0 %v6473_v31  ;;  %v3156_v37 = vrot.slane %v13907_v56, 1  ;;  %v6535_v31 = vor.u32 %v6534_v7, %v6531_v27  ;;  %v7932_v27 = vld [vmem:[%s18026_s4 + $0x20] sm:$0xff]  ;;  %v13919_v56 = vld [vmem:[#allocation3 + $0x150] sm:$0xf]  ;;  %v6589_v41 = vor.u32 %v6588_v42, %v6585_v39  ;;  %v3176_v26 = vrot.slane %v15605_v6, 1 }
 0x436   :  { %11310 = vmatprep.mubr.msk.bf16.mxu1 %vm14034_vm0, %v18033_v0  ;;  %12110 = vmatprep.mubr.msk.bf16.mxu0 %vm14034_vm0, %v18033_v0  ;;  %v7956_v39 = vld [vmem:[%s18026_s4 + $0xe0] sm:$0xff] }
 0x437   :  { %v3157_v51 = vsel %vm2215_vm4, %v3154_v46, %v3156_v37  ;;  %v6536_v57 = vsel %vm6231_vm5, %v6526_v43, %v6535_v31  ;;  %v6545_v21 = vsel %vm6231_vm5, %v6535_v31, %v6544_v11  ;;  %v13917_v46 = vld [vmem:[#allocation3 + $0x98] sm:$0xff]   ;;  %8031 = vperm.xlu0 %13602, %v7932_v27  }
 0x438   :  { %v3166_v43 = vrot.slane %v13917_v46, 1  ;;  %v7155_v46 = vrot.slane %v13927_v60, 3  ;;  %v7971_v60 = vld [vmem:[%s18026_s4 + $0x158] sm:$0xff] }
 0x43a   :  { %v3167_v7 = vsel %vm2215_vm4, %v3164_v36, %v3166_v43 }
 0x43d   :  { %11311 = vmatmul.mubr.bf16.gmra.mrb[24].mxu1 %v3145_v14  ;;  %12111 = vmatmul.mubr.bf16.gmra.mrb[104].mxu0 %v6482_v1  ;;  %v13909_v14 = vld [vmem:[#allocation3 + $0x78] sm:$0xff]  }
 0x43e   :  { %11314 = vmatprep.mubr.msk.bf16.mxu1 %vm14034_vm0, %v18033_v0  ;;  %12114 = vmatprep.mubr.msk.bf16.mxu0 %vm14034_vm0, %v18033_v0  ;;  %v3158_v1 = vrot.slane %v13909_v14, 1 }
 0x440   :  { %v3159_v44 = vsel %vm2215_vm4, %v3156_v37, %v3158_v1 }
 0x445   :  { %11315 = vmatmul.mubr.bf16.gmra.mrb[28].mxu1 %v3147_v13  ;;  %12115 = vmatmul.mubr.bf16.gmra.mrb[108].mxu0 %v6491_v3  ;;  %v6552_v13 = vrot.slane %v6550_v47, 3  ;;  %v13911_v3 = vld [vmem:[#allocation3 + $0x80] sm:$0xff]   ;;  %v6590_v47 = vsel %vm6231_vm5, %v6580_v55, %v6589_v41 }
 0x446   :  { %11318 = vmatprep.mubr.msk.bf16.mxu1 %vm14034_vm0, %v18033_v0  ;;  %12118 = vmatprep.mubr.msk.bf16.mxu0 %vm14034_vm0, %v18033_v0  ;;  %v3160_v22 = vrot.slane %v13911_v3, 1  ;;  %v13921_v3 = vld [vmem:[#allocation3 + $0xa8] sm:$0xff]  }
 0x447   :  { %v6553_v23 = vor.u32 %v6552_v13, %v6549_v4  ;;  %v7935_v4 = vld [vmem:[%s18026_s4 + $0x38] sm:$0xff]  ;;  %v7938_v13 = vld [vmem:[%s18026_s4 + $0x50] sm:$0xff] }
 0x448   :  { %v3161_v35 = vsel %vm2215_vm4, %v3158_v1, %v3160_v22  ;;  %v3163_v52 = vsel %vm2215_vm4, %v3160_v22, %v3162_v38  ;;  %v3170_v22 = vrot.slane %v13921_v3, 1  ;;  %v13933_v3 = vld [vmem:[#allocation3 + $0x38] sm:$0xff]  }
 0x449   :  { %v6554_v30 = vsel %vm6231_vm5, %v6544_v11, %v6553_v23  ;;  %v7933_v11 = vld [vmem:[%s18026_s4 + $0x28] sm:$0xff] }
 0x44d   :  { %11319 = vmatmul.mubr.bf16.gmra.mrb[32].mxu1 %v3149_v16  ;;  %12119 = vmatmul.mubr.bf16.gmra.mrb[112].mxu0 %v6500_v48  ;;  %v6558_v16 = vrot.slane %v6556_v61, 2  ;;  %v6561_v48 = vrot.slane %v6559_v63, 3  ;;  %v7940_v61 = vld [vmem:[%s18026_s4 + $0x60] sm:$0xff] }
 0x44e   :  { %11322 = vmatprep.mubr.msk.bf16.mxu1 %vm14034_vm0, %v18033_v0  ;;  %12122 = vmatprep.mubr.msk.bf16.mxu0 %vm14034_vm0, %v18033_v0 }
 0x44f   :  { %v6562_v18 = vor.u32 %v6561_v48, %v6558_v16  ;;  %v7942_v16 = vld [vmem:[%s18026_s4 + $0x70] sm:$0xff] }
 0x450   :  { %v13922_v48 = vld [vmem:[#allocation3 + $0xb0] sm:$0xff]  }
 0x451   :  { %v3172_v17 = vrot.slane %v13922_v48, 1 }
 0x455   :  { %11323 = vmatmul.mubr.bf16.gmra.mrb[36].mxu1 %v3151_v19  ;;  %12123 = vmatmul.mubr.bf16.gmra.mrb[116].mxu0 %v6509_v15  ;;  %v6563_v19 = vsel %vm6231_vm5, %v6553_v23, %v6562_v18  ;;  %v6567_v15 = vrot.slane %v6565_v9, 2  ;;  %v3173_v9 = vsel %vm2215_vm4, %v3170_v22, %v3172_v17 }
 0x456   :  { %11326 = vmatprep.mubr.msk.bf16.mxu1 %vm14034_vm0, %v18033_v0  ;;  %12126 = vmatprep.mubr.msk.bf16.mxu0 %vm14034_vm0, %v18033_v0 }
 0x457   :  { %v6571_v54 = vor.u32 %v6570_v34, %v6567_v15  ;;  %v7946_v15 = vld [vmem:[%s18026_s4 + $0x90] sm:$0xff]  ;;  %v15584_v34 = vld [vmem:[#allocation3 + $0xb8] sm:$0xff]  }
 0x458   :  { %v3174_v49 = vrot.slane %v15584_v34, 1 }
 0x459   :  { %v6581_v31 = vsel %vm6231_vm5, %v6571_v54, %v6580_v55  ;;  %v7952_v55 = vld [vmem:[%s18026_s4 + $0xc0] sm:$0xff] }
 0x45a   :  { %v3175_v8 = vsel %vm2215_vm4, %v3172_v17, %v3174_v49  ;;  %v3177_v24 = vsel %vm2215_vm4, %v3174_v49, %v3176_v26  ;;  %v13935_v17 = vld [vmem:[#allocation3 + $0x40] sm:$0xff]  }
 0x45d   :  { %11327 = vmatmul.mubr.bf16.gmra.mrb[40].mxu1 %v3153_v62  ;;  %12127 = vmatmul.mubr.bf16.gmra.mrb[120].mxu0 %v6518_v33  ;;  %v3165_v62 = vsel %vm2215_vm4, %v3162_v38, %v3164_v36  ;;  %v6572_v33 = vsel %vm6231_vm5, %v6562_v18, %v6571_v54  ;;  %v7130_v38 = vld [vmem:[#allocation3 + $0x10] sm:$0x8]  ;;  %v7941_v18 = vld [vmem:[%s18026_s4 + $0x68] sm:$0xff]  ;;  %v13925_v54 = vld [vmem:[#allocation3 + $0x18] sm:$0xff]  }
 0x45e   :  { %11330 = vmatprep.mubr.msk.bf16.mxu1 %vm14034_vm0, %v18033_v0  ;;  %12130 = vmatprep.mubr.msk.bf16.mxu0 %vm14034_vm0, %v18033_v0  ;;  %v7153_v5 = vrot.slane %v13925_v54, 3 }
 0x460   :  { %v7156_v53 = vsel %vm7151_vm6, %v7153_v5, %v7155_v46 }
 0x465   :  { %11331 = vmatmul.mubr.bf16.gmra.mrb[44].mxu1 %v3155_v20  ;;  %12131 = vmatmul.mubr.bf16.gmra.mrb[124].mxu0 %v6527_v2  ;;  %v6210_v20 = vld [vmem:[#allocation3 + $0x154] sm:$0x7] }
 0x466   :  { %11334 = vmatprep.mubr.msk.bf16.mxu1 %vm14034_vm0, %v18033_v0  ;;  %12134 = vmatprep.mubr.msk.bf16.mxu0 %vm14034_vm0, %v18033_v0  ;;  %v7930_v2 = vld [vmem:[%s18026_s4 + $0x10] sm:$0xff]  ;;  %v15518_v37 = vcombine.low %v13919_v56, %v6210_v20 }
 0x467   :  { %8021 = vperm.xlu1 %13603, %v7930_v2   ;;  %v7954_v20 = vld [vmem:[%s18026_s4 + $0xd0] sm:$0xff]  ;;  %v15626_v2 = vld [vmem:[#allocation3 + $0xc8] sm:$0xff]  }
 0x468   :  { %v6592_v14 = vshrl.u32 %v15518_v37, 16  ;;  %v6595_v1 = vshll.u32 %v15518_v37, 16  ;;  %v3178_v27 = vrot.slane %v15626_v2, 1 }
 0x46a   :  { %v3179_v42 = vsel %vm2215_vm4, %v3176_v26, %v3178_v27 }
 0x46b   :  { %8026 = vperm.xlu1 %13603, %v7931_v32  }
 0x46d   :  { %11335 = vmatmul.mubr.bf16.gmra.mrb[48].mxu1 %v3157_v51  ;;  %12135 = vmatmul.mubr.bf16.gmra.mrb[128].mxu0 %v6536_v57  ;;  %v7934_v51 = vld [vmem:[%s18026_s4 + $0x30] sm:$0xff]  ;;  %v13920_v57 = vld [vmem:[#allocation3 + $0xa0] sm:$0xff]  }
 0x46e   :  { %11338 = vmatprep.mubr.msk.bf16.mxu1 %vm14034_vm0, %v18033_v0  ;;  %12138 = vmatprep.mubr.msk.bf16.mxu0 %vm14034_vm0, %v18033_v0  ;;  %v3168_v50 = vrot.slane %v13920_v57, 1  ;;  %v7958_v57 = vld [vmem:[%s18026_s4 + $0xf0] sm:$0xff] }
 0x46f   :  { %8041 = vperm.xlu0 %13602, %v7934_v51   ;;  %8036 = vperm.xlu1 %13603, %v7933_v11   ;;  %v7955_v51 = vld [vmem:[%s18026_s4 + $0xd8] sm:$0xff]  ;;  %v7957_v11 = vld [vmem:[%s18026_s4 + $0xe8] sm:$0xff] }
 0x470   :  { %v3169_v59 = vsel %vm2215_vm4, %v3166_v43, %v3168_v50  ;;  %v3171_v63 = vsel %vm2215_vm4, %v3168_v50, %v3170_v22  ;;  %v7949_v43 = vld [vmem:[%s18026_s4 + $0xa8] sm:$0xff]  ;;  %v15647_v50 = vld [vmem:[#allocation3 + $0xd0] sm:$0xff]   ;;  %v7161_v22 = vrot.slane %v13933_v3, 3 }
 0x473   :  { %8051 = vperm.xlu0 %13602, %v7936_v58   ;;  %8046 = vperm.xlu1 %13603, %v7935_v4   ;;  %v7960_v58 = vld [vmem:[%s18026_s4 + $0x100] sm:$0xff]  ;;  %v15668_v4 = vld [vmem:[#allocation3 + $0xd8] sm:$0xff]  }
 0x475   :  { %11339 = vmatmul.mubr.bf16.gmra.mrb[52].mxu1 %v3159_v44  ;;  %12139 = vmatmul.mubr.bf16.gmra.mrb[132].mxu0 %v6545_v21  ;;  %v6594_v44 = vrot.slane %v6592_v14, 2  ;;  %v6597_v21 = vrot.slane %v6595_v1, 3  ;;  %v13931_v14 = vld [vmem:[#allocation3 + $0x30] sm:$0xff]  }
 0x476   :  { %11342 = vmatprep.mubr.msk.bf16.mxu1 %vm14034_vm0, %v18033_v0  ;;  %12142 = vmatprep.mubr.msk.bf16.mxu0 %vm14034_vm0, %v18033_v0  ;;  %v7159_v1 = vrot.slane %v13931_v14, 3  ;;  %v13941_v14 = vld [vmem:[#allocation3 + $0x58] sm:$0xff]  }
 0x477   :  { %v6598_v23 = vor.u32 %v6597_v21, %v6594_v44  ;;  %8061 = vperm.xlu0 %13602, %v7938_v13   ;;  %8056 = vperm.xlu1 %13603, %v7937_v28   ;;  %v7959_v44 = vld [vmem:[%s18026_s4 + $0xf8] sm:$0xff]  ;;  %v7962_v21 = vld [vmem:[%s18026_s4 + $0x110] sm:$0xff]  ;;  %v3182_v13 = vrot.slane %v15668_v4, 1  ;;  %v7964_v28 = vld [vmem:[%s18026_s4 + $0x120] sm:$0xff] }
 0x47b   :  { %8071 = vperm.xlu0 %13602, %v7940_v61  }
 0x47d   :  { %11343 = vmatmul.mubr.bf16.gmra.mrb[56].mxu1 %v3161_v35  ;;  %12143 = vmatmul.mubr.bf16.gmra.mrb[136].mxu0 %v6554_v30  ;;  %v6599_v35 = vsel %vm6231_vm5, %v6589_v41, %v6598_v23  ;;  %v7939_v30 = vld [vmem:[%s18026_s4 + $0x58] sm:$0xff]  ;;  %v3180_v41 = vrot.slane %v15647_v50, 1 }
 0x47e   :  { %11346 = vmatprep.mubr.msk.bf16.mxu1 %vm14034_vm0, %v18033_v0  ;;  %12146 = vmatprep.mubr.msk.bf16.mxu0 %vm14034_vm0, %v18033_v0 }
 0x47f   :  { %8066 = vperm.xlu1 %13603, %v7939_v30   ;;  %8081 = vperm.xlu0 %13602, %v7942_v16   ;;  %v3183_v61 = vsel %vm2215_vm4, %v3180_v41, %v3182_v13  ;;  %v7966_v30 = vld [vmem:[%s18026_s4 + $0x130] sm:$0xff]  ;;  %v15689_v16 = vld [vmem:[#allocation3 + $0xe0] sm:$0xff]  }
 0x480   :  { %v3184_v48 = vrot.slane %v15689_v16, 1 }
 0x483   :  { %8076 = vperm.xlu1 %13603, %v7941_v18   ;;  %8091 = vperm.xlu0 %13602, %v7944_v12   ;;  %v7965_v18 = vld [vmem:[%s18026_s4 + $0x128] sm:$0xff]  ;;  %v7968_v12 = vld [vmem:[%s18026_s4 + $0x140] sm:$0xff] }
 0x485   :  { %11347 = vmatmul.mubr.bf16.gmra.mrb[60].mxu1 %v3163_v52  ;;  %12147 = vmatmul.mubr.bf16.gmra.mrb[140].mxu0 %v6563_v19  ;;  %v9879_v52 = vcombine.low %v7130_v38, %v13923_v45  ;;  %v7943_v19 = vld [vmem:[%s18026_s4 + $0x78] sm:$0xff]  ;;  %v7163_v38 = vrot.slane %v13935_v17, 3  ;;  %v7981_v17 = vld [vmem:[%s18026_s4 + $0x1a8] sm:$0xff] }
 0x486   :  { %11350 = vmatprep.mubr.msk.bf16.mxu1 %vm14034_vm0, %v18033_v0  ;;  %12150 = vmatprep.mubr.msk.bf16.mxu0 %vm14034_vm0, %v18033_v0 }
 0x487   :  { %v7152_v36 = vrot.slane %v9879_v52, 3  ;;  %8086 = vperm.xlu1 %13603, %v7943_v19   ;;  %8101 = vperm.xlu0 %13602, %v7946_v15   ;;  %v7164_v45 = vsel %vm7151_vm6, %v7161_v22, %v7163_v38  ;;  %v7967_v52 = vld [vmem:[%s18026_s4 + $0x138] sm:$0xff]  ;;  %v7970_v19 = vld [vmem:[%s18026_s4 + $0x150] sm:$0xff]  ;;  %v15710_v15 = vld [vmem:[#allocation3 + $0xe8] sm:$0xff]  }
 0x488   :  { %v3186_v49 = vrot.slane %v15710_v15, 1 }
 0x489   :  { %v7154_v29 = vsel %vm7151_vm6, %v7152_v36, %v7153_v5  ;;  %v13937_v36 = vld [vmem:[#allocation3 + $0x48] sm:$0xff]  }
 0x48a   :  { %v7165_v54 = vrot.slane %v13937_v36, 3 }
 0x48b   :  { %8096 = vperm.xlu1 %13603, %v7945_v10   ;;  %8111 = vperm.xlu0 %13602, %v7948_v40   ;;  %v7969_v40 = vld [vmem:[%s18026_s4 + $0x148] sm:$0xff] }
 0x48c   :  { %v7166_v26 = vsel %vm7151_vm6, %v7163_v38, %v7165_v54  ;;  %v7984_v38 = vld [vmem:[%s18026_s4 + $0x1c0] sm:$0xff] }
 0x48d   :  { %11351 = vmatmul.mubr.bf16.gmra.mrb[64].mxu1 %v3165_v62  ;;  %12151 = vmatmul.mubr.bf16.gmra.mrb[144].mxu0 %v6572_v33  ;;  %v7947_v62 = vld [vmem:[%s18026_s4 + $0x98] sm:$0xff]  ;;  %v7950_v33 = vld [vmem:[%s18026_s4 + $0xb0] sm:$0xff] }
 0x48e   :  { %11354 = vmatprep.mubr.msk.bf16.mxu1 %vm14034_vm0, %v18033_v0  ;;  %12154 = vmatprep.mubr.msk.bf16.mxu0 %vm14034_vm0, %v18033_v0 }
 0x48f   :  { %8106 = vperm.xlu1 %13603, %v7947_v62   ;;  %8121 = vperm.xlu0 %13602, %v7950_v33   ;;  %v3187_v62 = vsel %vm2215_vm4, %v3184_v48, %v3186_v49 }
 0x493   :  { %8116 = vperm.xlu1 %13603, %v7949_v43   ;;  %8131 = vperm.xlu0 %13602, %v7952_v55   ;;  %v15735_v43 = vld [vmem:[#allocation3 + $0xf0] sm:$0xff]  }
 0x494   :  { %v3188_v55 = vrot.slane %v15735_v43, 1 }
 0x495   :  { %11355 = vmatmul.mubr.bf16.gmra.mrb[68].mxu1 %v3167_v7  ;;  %12155 = vmatmul.mubr.bf16.gmra.mrb[148].mxu0 %v6581_v31  ;;  %v13929_v7 = vld [vmem:[#allocation3 + $0x28] sm:$0xff]  }
 0x496   :  { %11358 = vmatprep.mubr.msk.bf16.mxu1 %vm14034_vm0, %v18033_v0  ;;  %12158 = vmatprep.mubr.msk.bf16.mxu0 %vm14034_vm0, %v18033_v0  ;;  %v7157_v56 = vrot.slane %v13929_v7, 3  ;;  %v7953_v31 = vld [vmem:[%s18026_s4 + $0xc8] sm:$0xff]  ;;  %v7976_v7 = vld [vmem:[%s18026_s4 + $0x180] sm:$0xff] }
 0x497   :  { %8126 = vperm.xlu1 %13603, %v7951_v25   ;;  %8141 = vperm.xlu0 %13602, %v7954_v20  }
 0x498   :  { %v7158_v32 = vsel %vm7151_vm6, %v7155_v46, %v7157_v56  ;;  %v7974_v46 = vld [vmem:[%s18026_s4 + $0x170] sm:$0xff] }
 0x49b   :  { %8136 = vperm.xlu1 %13603, %v7953_v31   ;;  %8151 = vperm.xlu0 %13602, %v7956_v39   ;;  %v3189_v31 = vsel %vm2215_vm4, %v3186_v49, %v3188_v55  ;;  %v15810_v49 = vld [vmem:[#allocation3 + $0x108] sm:$0xff]  }
 0x49c   :  { %v3194_v36 = vrot.slane %v15810_v49, 1 }
 0x49d   :  { %11359 = vmatmul.mubr.bf16.gmra.mrb[72].mxu1 %v3169_v59  ;;  %12159 = vmatmul.mubr.bf16.gmra.mrb[152].mxu0 %v6590_v47  ;;  %v3181_v59 = vsel %vm2215_vm4, %v3178_v27, %v3180_v41  ;;  %v7160_v47 = vsel %vm7151_vm6, %v7157_v56, %v7159_v1  ;;  %v7973_v27 = vld [vmem:[%s18026_s4 + $0x168] sm:$0xff] }
 0x49e   :  { %11362 = vmatprep.mubr.msk.bf16.mxu1 %vm14034_vm0, %v18033_v0  ;;  %12162 = vmatprep.mubr.msk.bf16.mxu0 %vm14034_vm0, %v18033_v0 }
 0x49f   :  { %8146 = vperm.xlu1 %13603, %v7955_v51   ;;  %8161 = vperm.xlu0 %13602, %v7958_v57   ;;  %v7978_v51 = vld [vmem:[%s18026_s4 + $0x190] sm:$0xff]  ;;  %v15760_v57 = vld [vmem:[#allocation3 + $0xf8] sm:$0xff]  }
 0x4a0   :  { %v3190_v41 = vrot.slane %v15760_v57, 1 }
 0x4a3   :  { %8156 = vperm.xlu1 %13603, %v7957_v11   ;;  %8171 = vperm.xlu0 %13602, %v7960_v58  }
 0x4a5   :  { %11363 = vmatmul.mubr.bf16.gmra.mrb[76].mxu1 %v3171_v63  ;;  %12163 = vmatmul.mubr.bf16.gmra.mrb[156].mxu0 %v6599_v35  ;;  %v7162_v63 = vsel %vm7151_vm6, %v7159_v1, %v7161_v22  ;;  %v7963_v35 = vld [vmem:[%s18026_s4 + $0x118] sm:$0xff]  ;;  %v7169_v1 = vrot.slane %v13941_v14, 3 }
 0x4a6   :  { %11366 = vmatprep.mubr.msk.bf16.mxu1 %vm14034_vm0, %v18033_v0  ;;  %12166 = vmatprep.mubr.msk.bf16.mxu0 %vm14034_vm0, %v18033_v0  ;;  %v7979_v22 = vld [vmem:[%s18026_s4 + $0x198] sm:$0xff] }
 0x4a7   :  { %8166 = vperm.xlu1 %13603, %v7959_v44   ;;  %8181 = vperm.xlu0 %13602, %v7962_v21   ;;  %v3191_v21 = vsel %vm2215_vm4, %v3188_v55, %v3190_v41 }
 0x4ab   :  { %8191 = vperm.xlu0 %13602, %v7964_v28   ;;  %v15785_v28 = vld [vmem:[#allocation3 + $0x100] sm:$0xff]  }
 0x4ad   :  { %11367 = vmatmul.mubr.bf16.gmra.mrb[80].mxu1 %v3173_v9  ;;  %12167 = vmatmul.mubr.bf16.gmra.mrb[160].mxu0 %v6598_v23  ;;  %v7961_v23 = vld [vmem:[%s18026_s4 + $0x108] sm:$0xff]  ;;  %v3185_v9 = vsel %vm2215_vm4, %v3182_v13, %v3184_v48 }
 0x4ae   :  { %11370 = vmatprep.mubr.msk.bf16.mxu1 %vm14034_vm0, %v18033_v0  ;;  %12186 = vmatprep.mubr.msk.bf16.mxu0 %vm14034_vm0, %v18033_v0 }
 0x4af   :  { %8176 = vperm.xlu1 %13603, %v7961_v23   ;;  %8201 = vperm.xlu0 %13602, %v7966_v30   ;;  %v7982_v23 = vld [vmem:[%s18026_s4 + $0x1b0] sm:$0xff] }
 0x4b3   :  { %8186 = vperm.xlu1 %13603, %v7963_v35   ;;  %8211 = vperm.xlu0 %13602, %v7968_v12  }
 0x4b5   :  { %11371 = vmatmul.mubr.bf16.gmra.mrb[84].mxu1 %v3175_v8  ;;  %12187 = vmatmul.mubr.bf16.vlgmr.msra.gmra.mrb[0].mxu0 %v7154_v29  ;;  %v7972_v8 = vld [vmem:[%s18026_s4 + $0x160] sm:$0xff] }
 0x4b6   :  { %11374 = vmatprep.mubr.msk.bf16.mxu1 %vm14034_vm0, %v18033_v0  ;;  %12190 = vmatprep.mubr.msk.bf16.mxu0 %vm14034_vm0, %v18033_v0 }
 0x4b7   :  { %8196 = vperm.xlu1 %13603, %v7965_v18   ;;  %8221 = vperm.xlu0 %13602, %v7970_v19   ;;  %v7986_v19 = vld [vmem:[%s18026_s4 + $0x1d0] sm:$0xff] }
 0x4bb   :  { %8206 = vperm.xlu1 %13603, %v7967_v52   ;;  %8231 = vperm.xlu0 %13602, %v7972_v8   ;;  %v7983_v52 = vld [vmem:[%s18026_s4 + $0x1b8] sm:$0xff] }
 0x4bd   :  { %11375 = vmatmul.mubr.bf16.gmra.mrb[88].mxu1 %v3177_v24  ;;  %12191 = vmatmul.mubr.bf16.gmra.mrb[4].mxu0 %v7156_v53  ;;  %v13939_v24 = vld [vmem:[#allocation3 + $0x50] sm:$0xff]  }
 0x4be   :  { %11378 = vmatprep.mubr.msk.bf16.mxu1 %vm14034_vm0, %v18033_v0  ;;  %12194 = vmatprep.mubr.msk.bf16.mxu0 %vm14034_vm0, %v18033_v0  ;;  %v7167_v53 = vrot.slane %v13939_v24, 3  ;;  %v7987_v24 = vld [vmem:[%s18026_s4 + $0x1d8] sm:$0xff] }
 0x4bf   :  { %8216 = vperm.xlu1 %13603, %v7969_v40   ;;  %8241 = vperm.xlu0 %13602, %v7974_v46  }
 0x4c0   :  { %v7170_v3 = vsel %vm7151_vm6, %v7167_v53, %v7169_v1 }
 0x4c3   :  { %8226 = vperm.xlu1 %13603, %v7971_v60   ;;  %8251 = vperm.xlu0 %13602, %v7976_v7   ;;  %v13947_v7 = vld [vmem:[#allocation3 + $0x70] sm:$0xff]  }
 0x4c5   :  { %11379 = vmatmul.mubr.bf16.gmra.mrb[92].mxu1 %v3179_v42  ;;  %12195 = vmatmul.mubr.bf16.gmra.mrb[8].mxu0 %v7158_v32  ;;  %v7168_v42 = vsel %vm7151_vm6, %v7165_v54, %v7167_v53  ;;  %v7975_v32 = vld [vmem:[%s18026_s4 + $0x178] sm:$0xff]  ;;  %v13945_v54 = vld [vmem:[#allocation3 + $0x68] sm:$0xff]   ;;  %v7990_v53 = vld [vmem:[%s18026_s4 + $0x1f0] sm:$0xff] }
 0x4c6   :  { %11382 = vmatprep.mubr.msk.bf16.mxu1 %vm14034_vm0, %v18033_v0  ;;  %12198 = vmatprep.mubr.msk.bf16.mxu0 %vm14034_vm0, %v18033_v0 }
 0x4c7   :  { %8236 = vperm.xlu1 %13603, %v7973_v27   ;;  %8261 = vperm.xlu0 %13602, %v7978_v51   ;;  %v7992_v51 = vld [vmem:[%s18026_s4 + $0x200] sm:$0xff] }
 0x4cb   :  { %8246 = vperm.xlu1 %13603, %v7975_v32   ;;  %v7989_v32 = vld [vmem:[%s18026_s4 + $0x1e8] sm:$0xff] }
 0x4cd   :  { %11383 = vmatmul.mubr.bf16.gmra.mrb[96].mxu1 %v3181_v59  ;;  %12199 = vmatmul.mubr.bf16.gmra.mrb[12].mxu0 %v7160_v47  ;;  %v7977_v59 = vld [vmem:[%s18026_s4 + $0x188] sm:$0xff]  ;;  %v7980_v47 = vld [vmem:[%s18026_s4 + $0x1a0] sm:$0xff] }
 0x4ce   :  { %11386 = vmatprep.mubr.msk.bf16.mxu1 %vm14034_vm0, %v18033_v0  ;;  %12202 = vmatprep.mubr.msk.bf16.mxu0 %vm14034_vm0, %v18033_v0 }
 0x4cf   :  { %8256 = vperm.xlu1 %13603, %v7977_v59   ;;  %8271 = vperm.xlu0 %13602, %v7980_v47   ;;  %v7991_v59 = vld [vmem:[%s18026_s4 + $0x1f8] sm:$0xff]  ;;  %v7994_v47 = vld [vmem:[%s18026_s4 + $0x210] sm:$0xff] }
 0x4d3   :  { %8266 = vperm.xlu1 %13603, %v7979_v22   ;;  %8281 = vperm.xlu0 %13602, %v7982_v23  }
 0x4d5   :  { %11387 = vmatmul.mubr.bf16.gmra.mrb[100].mxu1 %v3183_v61  ;;  %12203 = vmatmul.mubr.bf16.gmra.mrb[16].mxu0 %v7162_v63  ;;  %v3192_v61 = vrot.slane %v15785_v28, 1  ;;  %v13943_v63 = vld [vmem:[#allocation3 + $0x60] sm:$0xff]  }
 0x4d6   :  { %11390 = vmatprep.mubr.msk.bf16.mxu1 %vm14034_vm0, %v18033_v0  ;;  %12206 = vmatprep.mubr.msk.bf16.mxu0 %vm14034_vm0, %v18033_v0  ;;  %v7171_v35 = vrot.slane %v13943_v63, 3  ;;  %v7993_v63 = vld [vmem:[%s18026_s4 + $0x208] sm:$0xff] }
 0x4d7   :  { %v3193_v12 = vsel %vm2215_vm4, %v3190_v41, %v3192_v61  ;;  %8276 = vperm.xlu1 %13603, %v7981_v17   ;;  %8291 = vperm.xlu0 %13602, %v7984_v38   ;;  %v3195_v60 = vsel %vm2215_vm4, %v3192_v61, %v3194_v36 }
 0x4db   :  { %8286 = vperm.xlu1 %13603, %v7983_v52   ;;  %8301 = vperm.xlu0 %13602, %v7986_v19   ;;  %v15885_v52 = vld [vmem:[#allocation3 + $0x120] sm:$0xff]  }
 0x4dc   :  { %v3200_v19 = vrot.slane %v15885_v52, 1 }
 0x4dd   :  { %11391 = vmatmul.mubr.bf16.gmra.mrb[104].mxu1 %v3185_v9  ;;  %12207 = vmatmul.mubr.bf16.gmra.mrb[20].mxu0 %v7164_v45  ;;  %v7172_v45 = vsel %vm7151_vm6, %v7169_v1, %v7171_v35 }
 0x4de   :  { %11394 = vmatprep.mubr.msk.bf16.mxu1 %vm14034_vm0, %v18033_v0  ;;  %12210 = vmatprep.mubr.msk.bf16.mxu0 %vm14034_vm0, %v18033_v0 }
 0x4e0   :  { %v15715_v5 = vpop.f32.mrb[0].mxu1 }
 0x4e1   :  { %v11288_v10 = vpop.f32.mrb[1].mxu1 }
 0x4e2   :  { %v15723_v29 = vpop.f32.mrb[2].mxu1  ;;  %v7173_v10 = vrot.slane %v13945_v54, 3 }
 0x4e3   :  { %v11289_v33 = vpop.f32.mrb[3].mxu1 }
 0x4e4   :  { %v7988_v33 = vld [vmem:[%s18026_s4 + $0x1e0] sm:$0xff]  ;;  %v7174_v55 = vsel %vm7151_vm6, %v7171_v35, %v7173_v10 }
 0x4e5   :  { %11395 = vmatmul.mubr.bf16.gmra.mrb[108].mxu1 %v3187_v62  ;;  %12211 = vmatmul.mubr.bf16.gmra.mrb[24].mxu0 %v7166_v26  ;;  %v7985_v62 = vld [vmem:[%s18026_s4 + $0x1c8] sm:$0xff]  ;;  %v7996_v35 = vld [vmem:[%s18026_s4 + $0x220] sm:$0xff] }
 0x4e6   :  { %11398 = vmatprep.mubr.msk.bf16.mxu1 %vm14034_vm0, %v18033_v0  ;;  %12214 = vmatprep.mubr.msk.bf16.mxu0 %vm14034_vm0, %v18033_v0 }
 0x4e7   :  { %8296 = vperm.xlu1 %13603, %v7985_v62   ;;  %8311 = vperm.xlu0 %13602, %v7988_v33   ;;  %v7997_v62 = vld [vmem:[%s18026_s4 + $0x228] sm:$0xff]  ;;  %v8000_v33 = vld [vmem:[%s18026_s4 + $0x240] sm:$0xff] }
 0x4e8   :  { %v15740_v25 = vpop.f32.mrb[4].mxu1 }
 0x4e9   :  { %v11292_v20 = vpop.f32.mrb[5].mxu1 }
 0x4ea   :  { %v15748_v56 = vpop.f32.mrb[6].mxu1  ;;  %v15835_v20 = vld [vmem:[#allocation3 + $0x110] sm:$0xff]  }
 0x4eb   :  { %v11293_v39 = vpop.f32.mrb[7].mxu1  ;;  %v3196_v27 = vrot.slane %v15835_v20, 1  ;;  %8306 = vperm.xlu1 %13603, %v7987_v24   ;;  %8321 = vperm.xlu0 %13602, %v7990_v53   ;;  %v7999_v53 = vld [vmem:[%s18026_s4 + $0x238] sm:$0xff] }
 0x4ed   :  { %11399 = vmatmul.mubr.bf16.gmra.mrb[112].mxu1 %v3189_v31  ;;  %12215 = vmatmul.mubr.bf16.gmra.mrb[28].mxu0 %v7168_v42  ;;  %v7175_v31 = vrot.slane %v13947_v7, 3  ;;  %v3197_v14 = vsel %vm2215_vm4, %v3194_v36, %v3196_v27  ;;  %v13951_v36 = vld [vmem:[#allocation3 + $0x80] sm:$0xff]   ;;  %v15910_v7 = vld [vmem:[#allocation3 + $0x128] sm:$0xff]  }
 0x4ee   :  { %11402 = vmatprep.mubr.msk.bf16.mxu1 %vm14034_vm0, %v18033_v0  ;;  %12218 = vmatprep.mubr.msk.bf16.mxu0 %vm14034_vm0, %v18033_v0  ;;  %v7179_v54 = vrot.slane %v13951_v36, 3 }
 0x4ef   :  { %8316 = vperm.xlu1 %13603, %v7989_v32   ;;  %8331 = vperm.xlu0 %13602, %v7992_v51  }
 0x4f0   :  { %v15765_v11 = vpop.f32.mrb[8].mxu1 }
 0x4f1   :  { %v11296_v58 = vpop.f32.mrb[9].mxu1 }
 0x4f2   :  { %v15773_v44 = vpop.f32.mrb[10].mxu1  ;;  %v7176_v58 = vsel %vm7151_vm6, %v7173_v10, %v7175_v31 }
 0x4f3   :  { %v11297_v13 = vpop.f32.mrb[11].mxu1  ;;  %8326 = vperm.xlu1 %13603, %v7991_v59   ;;  %8341 = vperm.xlu0 %13602, %v7994_v47  }
 0x4f5   :  { %11403 = vmatmul.mubr.bf16.gmra.mrb[116].mxu1 %v3191_v21  ;;  %12219 = vmatmul.mubr.bf16.gmra.mrb[32].mxu0 %v7170_v3  ;;  %v15860_v21 = vld [vmem:[#allocation3 + $0x118] sm:$0xff]  }
 0x4f6   :  { %11406 = vmatprep.mubr.msk.bf16.mxu1 %vm14034_vm0, %v18033_v0  ;;  %12222 = vmatprep.mubr.msk.bf16.mxu0 %vm14034_vm0, %v18033_v0  ;;  %v3198_v13 = vrot.slane %v15860_v21, 1  ;;  %v13949_v3 = vld [vmem:[#allocation3 + $0x78] sm:$0xff]  }
 0x4f7   :  { %v7177_v22 = vrot.slane %v13949_v3, 3  ;;  %8336 = vperm.xlu1 %13603, %v7993_v63   ;;  %8351 = vperm.xlu0 %13602, %v7996_v35   ;;  %v15935_v63 = vld [vmem:[#allocation3 + $0x130] sm:$0xff]  }
 0x4f8   :  { %v15790_v30 = vpop.f32.mrb[12].mxu1  ;;  %v3199_v17 = vsel %vm2215_vm4, %v3196_v27, %v3198_v13  ;;  %v8002_v27 = vld [vmem:[%s18026_s4 + $0x250] sm:$0xff]  ;;  %v3204_v35 = vrot.slane %v15935_v63, 1 }
 0x4f9   :  { %v11300_v48 = vpop.f32.mrb[13].mxu1  ;;  %v7180_v24 = vsel %vm7151_vm6, %v7177_v22, %v7179_v54 }
 0x4fa   :  { %v15798_v18 = vpop.f32.mrb[14].mxu1 }
 0x4fb   :  { %v11301_v9 = vpop.f32.mrb[15].mxu1 }
 0x4fc   :  { %v7995_v9 = vld [vmem:[%s18026_s4 + $0x218] sm:$0xff] }
 0x4fd   :  { %11407 = vmatmul.mubr.bf16.gmra.mrb[120].mxu1 %v3193_v12  ;;  %12223 = vmatmul.mubr.bf16.gmra.mrb[36].mxu0 %v7172_v45  ;;  %v7178_v12 = vsel %vm7151_vm6, %v7175_v31, %v7177_v22  ;;  %v7998_v45 = vld [vmem:[%s18026_s4 + $0x230] sm:$0xff]  ;;  %v3202_v31 = vrot.slane %v15910_v7, 1  ;;  %v8003_v22 = vld [vmem:[%s18026_s4 + $0x258] sm:$0xff] }
 0x4fe   :  { %11410 = vmatprep.mubr.msk.bf16.mxu1 %vm14034_vm0, %v18033_v0  ;;  %12226 = vmatprep.mubr.msk.bf16.mxu0 %vm14034_vm0, %v18033_v0 }
 0x4ff   :  { %8346 = vperm.xlu1 %13603, %v7995_v9   ;;  %8361 = vperm.xlu0 %13602, %v7998_v45   ;;  %v3203_v47 = vsel %vm2215_vm4, %v3200_v19, %v3202_v31  ;;  %v8005_v45 = vld [vmem:[%s18026_s4 + $0x268] sm:$0xff] }
 0x500   :  { %v15815_v40 = vpop.f32.mrb[16].mxu1 }
 0x501   :  { %v11304_v8 = vpop.f32.mrb[17].mxu1 }
 0x502   :  { %v15823_v26 = vpop.f32.mrb[18].mxu1 }
 0x503   :  { %v11305_v46 = vpop.f32.mrb[19].mxu1  ;;  %8356 = vperm.xlu1 %13603, %v7997_v62   ;;  %8371 = vperm.xlu0 %13602, %v8000_v33   ;;  %v8007_v33 = vld [vmem:[%s18026_s4 + $0x278] sm:$0xff] }
 0x504   :  { %v3201_v46 = vsel %vm2215_vm4, %v3198_v13, %v3200_v19  ;;  %v8008_v19 = vld [vmem:[%s18026_s4 + $0x280] sm:$0xff] }
 0x505   :  { %11411 = vmatmul.mubr.bf16.gmra.mrb[124].mxu1 %v3195_v60  ;;  %12227 = vmatmul.mubr.bf16.gmra.mrb[40].mxu0 %v7174_v55 }
 0x506   :  { %11414 = vmatprep.mubr.msk.bf16.mxu1 %vm14034_vm0, %v18033_v0  ;;  %12230 = vmatprep.mubr.msk.bf16.mxu0 %vm14034_vm0, %v18033_v0 }
 0x507   :  { %8366 = vperm.xlu1 %13603, %v7999_v53   ;;  %8381 = vperm.xlu0 %13602, %v8002_v27  }
 0x508   :  { %v15840_v39 = vpop.f32.mrb[20].mxu1 }
 0x509   :  { %v11308_v42 = vpop.f32.mrb[21].mxu1 }
 0x50a   :  { %v15848_v41 = vpop.f32.mrb[22].mxu1  ;;  %v13953_v42 = vld [vmem:[#allocation3 + $0x88] sm:$0xff]  }
 0x50b   :  { %v11309_v1 = vpop.f32.mrb[23].mxu1  ;;  %v7181_v32 = vrot.slane %v13953_v42, 3 }
 0x50c   :  { %v8001_v1 = vld [vmem:[%s18026_s4 + $0x248] sm:$0xff] }
 0x50d   :  { %11415 = vmatmul.mubr.bf16.gmra.mrb[128].mxu1 %v3197_v14  ;;  %12231 = vmatmul.mubr.bf16.gmra.mrb[44].mxu0 %v7176_v58  ;;  %v8004_v58 = vld [vmem:[%s18026_s4 + $0x260] sm:$0xff]  ;;  %v7182_v3 = vsel %vm7151_vm6, %v7179_v54, %v7181_v32  ;;  %v3205_v54 = vsel %vm2215_vm4, %v3202_v31, %v3204_v35 }
 0x50e   :  { %11418 = vmatprep.mubr.msk.bf16.mxu1 %vm14034_vm0, %v18033_v0  ;;  %12234 = vmatprep.mubr.msk.bf16.mxu0 %vm14034_vm0, %v18033_v0 }
 0x50f   :  { %8376 = vperm.xlu1 %13603, %v8001_v1   ;;  %8391 = vperm.xlu0 %13602, %v8004_v58   ;;  %v15970_v58 = vld [vmem:[#allocation3 + $0x140] sm:$0xff]  }
 0x510   :  { %v15865_v23 = vpop.f32.mrb[24].mxu1 }
 0x511   :  { %v11312_v61 = vpop.f32.mrb[25].mxu1 }
 0x512   :  { %v15873_v48 = vpop.f32.mrb[26].mxu1  ;;  %v8006_v61 = vld [vmem:[%s18026_s4 + $0x270] sm:$0xff] }
 0x513   :  { %v11313_v38 = vpop.f32.mrb[27].mxu1  ;;  %8386 = vperm.xlu1 %13603, %v8003_v22   ;;  %8401 = vperm.xlu0 %13602, %v8006_v61   ;;  %v2908_v22 = vld [vmem:[#allocation3 + $0x14c] sm:$0x1] }
 0x515   :  { %11419 = vmatmul.mubr.bf16.gmra.mrb[132].mxu1 %v3199_v17  ;;  %12235 = vmatmul.mubr.bf16.gmra.mrb[48].mxu0 %v7178_v12  ;;  %v13955_v17 = vld [vmem:[#allocation3 + $0x90] sm:$0xff]  }
 0x516   :  { %11422 = vmatprep.mubr.msk.bf16.mxu1 %vm14034_vm0, %v18033_v0  ;;  %12238 = vmatprep.mubr.msk.bf16.mxu0 %vm14034_vm0, %v18033_v0  ;;  %v7183_v38 = vrot.slane %v13955_v17, 3 }
 0x517   :  { %8396 = vperm.xlu1 %13603, %v8005_v45   ;;  %8411 = vperm.xlu0 %13602, %v8008_v19  }
 0x518   :  { %v15890_v10 = vpop.f32.mrb[28].mxu1  ;;  %v7184_v62 = vsel %vm7151_vm6, %v7181_v32, %v7183_v38 }
 0x519   :  { %v11316_v8 = vpop.f32.mrb[29].mxu1 }
 0x51a   :  { %v15898_v60 = vpop.f32.mrb[30].mxu1 }
 0x51b   :  { %v11317_v55 = vpop.f32.mrb[31].mxu1  ;;  %8406 = vperm.xlu1 %13603, %v8007_v33  }
 0x51d   :  { %11423 = vmatmul.mubr.bf16.gmra.mrb[136].mxu1 %v3201_v46  ;;  %12239 = vmatmul.mubr.bf16.gmra.mrb[52].mxu0 %v7180_v24  ;;  %v15957_v46 = vld [vmem:[#allocation3 + $0x138] sm:$0xff]  }
 0x51e   :  { %11426 = vmatprep.mubr.msk.bf16.mxu1 %vm14034_vm0, %v18033_v0  ;;  %12242 = vmatprep.mubr.msk.bf16.mxu0 %vm14034_vm0, %v18033_v0  ;;  %v3206_v55 = vrot.slane %v15957_v46, 1  ;;  %v13957_v24 = vld [vmem:[#allocation3 + $0x98] sm:$0xff]  }
 0x51f   :  { %v7185_v53 = vrot.slane %v13957_v24, 3 }
 0x520   :  { %v15915_v51 = vpop.f32.mrb[32].mxu1  ;;  %v3207_v32 = vsel %vm2215_vm4, %v3204_v35, %v3206_v55 }
 0x521   :  { %v11320_v14 = vpop.f32.mrb[33].mxu1  ;;  %v7186_v1 = vsel %vm7151_vm6, %v7183_v38, %v7185_v53 }
 0x522   :  { %v15923_v59 = vpop.f32.mrb[34].mxu1 }
 0x523   :  { %v11321_v13 = vpop.f32.mrb[35].mxu1 }
 0x524   :  { %v13959_v13 = vld [vmem:[#allocation3 + $0xa0] sm:$0xff]  }
 0x525   :  { %11427 = vmatmul.mubr.bf16.gmra.mrb[140].mxu1 %v3203_v47  ;;  %12243 = vmatmul.mubr.bf16.gmra.mrb[56].mxu0 %v7182_v3  ;;  %v3208_v47 = vrot.slane %v15970_v58, 1  ;;  %v7187_v3 = vrot.slane %v13959_v13, 3  ;;  %v3965_v13 = vshll.u32 %v15584_v34, 16 }
 0x526   :  { %11430 = vmatprep.mubr.msk.bf16.mxu1 %vm14034_vm0, %v18033_v0  ;;  %12246 = vmatprep.mubr.msk.bf16.mxu0 %vm14034_vm0, %v18033_v0 }
 0x527   :  { %v3209_v38 = vsel %vm2215_vm4, %v3206_v55, %v3208_v47 }
 0x528   :  { %v15940_v12 = vpop.f32.mrb[36].mxu1 }
 0x529   :  { %v11324_v9 = vpop.f32.mrb[37].mxu1 }
 0x52a   :  { %v15948_v36 = vpop.f32.mrb[38].mxu1  ;;  %v13960_v9 = vld [vmem:[#allocation3 + $0x148] sm:$0xf] }
 0x52b   :  { %v11325_v8 = vpop.f32.mrb[39].mxu1  ;;  %v9714_v45 = vcombine.low %v13960_v9, %v2908_v22  ;;  %v13962_v22 = vld [vmem:[#allocation3 + $0xb0] sm:$0xff]  }
 0x52d   :  { %11431 = vmatmul.mubr.bf16.gmra.mrb[144].mxu1 %v3205_v54  ;;  %12247 = vmatmul.mubr.bf16.gmra.mrb[60].mxu0 %v7184_v62  ;;  %v7188_v54 = vsel %vm7151_vm6, %v7185_v53, %v7187_v3  ;;  %v3210_v8 = vrot.slane %v9714_v45, 1  ;;  %v13961_v62 = vld [vmem:[#allocation3 + $0xa8] sm:$0xff]   ;;  %v3967_v45 = vrot.slane %v3965_v13, 2 }
 0x52e   :  { %11434 = vmatprep.mubr.msk.bf16.mxu1 %vm14034_vm0, %v18033_v0  ;;  %12250 = vmatprep.mubr.msk.bf16.mxu0 %vm14034_vm0, %v18033_v0  ;;  %v7189_v33 = vrot.slane %v13961_v62, 3  ;;  %v3971_v62 = vshrl.u32 %v15605_v6, 16 }
 0x530   :  { %v15962_v27 = vpop.f32.mrb[40].mxu1  ;;  %v7190_v53 = vsel %vm7151_vm6, %v7187_v3, %v7189_v33 }
 0x531   :  { %v11328_v31 = vpop.f32.mrb[41].mxu1 }
 0x532   :  { %v15964_v42 = vpop.f32.mrb[42].mxu1 }
 0x533   :  { %v11329_v14 = vpop.f32.mrb[43].mxu1 }
 0x535   :  { %11435 = vmatmul.mubr.bf16.gmra.mrb[148].mxu1 %v3207_v32  ;;  %12251 = vmatmul.mubr.bf16.gmra.mrb[64].mxu0 %v7186_v1  ;;  %v3211_v32 = vsel %vm2215_vm4, %v3208_v47, %v3210_v8  ;;  %v3962_v1 = vshrl.u32 %v15584_v34, 16 }
 0x536   :  { %11438 = vmatprep.mubr.msk.bf16.mxu1 %vm14034_vm0, %v18033_v0  ;;  %12254 = vmatprep.mubr.msk.bf16.mxu0 %vm14034_vm0, %v18033_v0 }
 0x537   :  { %v3964_v3 = vrot.slane %v3962_v1, 1 }
 0x538   :  { %v15975_v61 = vpop.f32.mrb[44].mxu1 }
 0x539   :  { %v11332_v35 = vpop.f32.mrb[45].mxu1  ;;  %v3968_v34 = vor.u32 %v3967_v45, %v3964_v3 }
 0x53a   :  { %v15977_v17 = vpop.f32.mrb[46].mxu1  ;;  %v7191_v35 = vrot.slane %v13962_v22, 3  ;;  %v3973_v22 = vrot.slane %v3971_v62, 1 }
 0x53b   :  { %v11333_v19 = vpop.f32.mrb[47].mxu1 }
 0x53d   :  { %11439 = vmatmul.mubr.bf16.gmra.mrb[152].mxu1 %v3209_v38  ;;  %12255 = vmatmul.mubr.bf16.gmra.mrb[68].mxu0 %v7188_v54  ;;  %v7192_v54 = vsel %vm7151_vm6, %v7189_v33, %v7191_v35 }
 0x53e   :  { %11442 = vmatprep.mubr.msk.bf16.mxu1 %vm14034_vm0, %v18033_v0  ;;  %12258 = vmatprep.mubr.msk.bf16.mxu0 %vm14034_vm0, %v18033_v0 }
 0x540   :  { %v15985_v24 = vpop.f32.mrb[48].mxu1 }
 0x541   :  { %v11336_v31 = vpop.f32.mrb[49].mxu1 }
 0x542   :  { %v15987_v55 = vpop.f32.mrb[50].mxu1  ;;  %v3974_v31 = vshll.u32 %v15605_v6, 16 }
 0x543   :  { %v11337_v14 = vpop.f32.mrb[51].mxu1 }
 0x545   :  { %11443 = vmatmul.mubr.bf16.gmra.mrb[156].mxu1 %v3211_v32  ;;  %12259 = vmatmul.mubr.bf16.gmra.mrb[72].mxu0 %v7190_v53  ;;  %v13963_v32 = vld [vmem:[#allocation3 + $0xb8] sm:$0xff]  }
 0x546   :  { %11446 = vmatprep.mubr.msk.bf16.mxu1 %vm14034_vm0, %v18033_v0  ;;  %12262 = vmatprep.mubr.msk.bf16.mxu0 %vm14034_vm0, %v18033_v0  ;;  %v7193_v14 = vrot.slane %v13963_v32, 3  ;;  %v13964_v32 = vld [vmem:[#allocation3 + $0xc0] sm:$0xff]  }
 0x548   :  { %v15997_v38 = vpop.f32.mrb[52].mxu1  ;;  %v7194_v45 = vsel %vm7151_vm6, %v7191_v35, %v7193_v14 }
 0x549   :  { %v11340_v47 = vpop.f32.mrb[53].mxu1 }
 0x54a   :  { %v15999_v9 = vpop.f32.mrb[54].mxu1  ;;  %v3976_v47 = vrot.slane %v3974_v31, 2 }
 0x54b   :  { %v11341_v19 = vpop.f32.mrb[55].mxu1 }
 0x54c   :  { %v3977_v6 = vor.u32 %v3976_v47, %v3973_v22  ;;  %v3980_v19 = vshrl.u32 %v15626_v2, 16  ;;  %v3989_v47 = vshrl.u32 %v15647_v50, 16 }
 0x54d   :  { %11447 = vmatmul.mubr.bf16.gmra.mrb[160].mxu1 %v3210_v8  ;;  %12263 = vmatmul.mubr.bf16.gmra.mrb[76].mxu0 %v7192_v54  ;;  %v18210_v8 = vld [vmem:[#allocation9_spill] sm:$0xff]  ;;  %v3983_v54 = vshll.u32 %v15626_v2, 16 }
 0x54e   :  { %11550 = vmatprep.mubr.msk.bf16.mxu1 %vm14034_vm0, %v18033_v0  ;;  %12266 = vmatprep.mubr.msk.bf16.mxu0 %vm14034_vm0, %v18033_v0  ;;  %v3969_v33 = vsel %vm3763_vm1, %v18210_v8, %v3968_v34  ;;  %v3978_v35 = vsel %vm3763_vm1, %v3968_v34, %v3977_v6 }
 0x550   :  { %v16008_v53 = vpop.f32.mrb[56].mxu1 }
 0x551   :  { %v11344_v1 = vpop.f32.mrb[57].mxu1 }
 0x552   :  { %v16010_v13 = vpop.f32.mrb[58].mxu1  ;;  %v7195_v1 = vrot.slane %v13964_v32, 3  ;;  %v3992_v32 = vshll.u32 %v15647_v50, 16 }
 0x553   :  { %v11345_v3 = vpop.f32.mrb[59].mxu1 }
 0x554   :  { %v3985_v3 = vrot.slane %v3983_v54, 2  ;;  %v7196_v22 = vsel %vm7151_vm6, %v7193_v14, %v7195_v1 }
 0x555   :  { %11551 = vmatmul.mubr.bf16.vlgmr.msra.gmra.mrb[84].mxu1 %v3969_v33  ;;  %12267 = vmatmul.mubr.bf16.gmra.mrb[80].mxu0 %v7194_v45  ;;  %v3982_v33 = vrot.slane %v3980_v19, 1 }
 0x556   :  { %11554 = vmatprep.mubr.msk.bf16.mxu1 %vm14034_vm0, %v18033_v0  ;;  %12270 = vmatprep.mubr.msk.bf16.mxu0 %vm14034_vm0, %v18033_v0 }
 0x557   :  { %v3986_v2 = vor.u32 %v3985_v3, %v3982_v33  ;;  %v3998_v3 = vshrl.u32 %v15668_v4, 16 }
 0x558   :  { %v16021_v62 = vpop.f32.mrb[60].mxu1 }
 0x559   :  { %v11348_v31 = vpop.f32.mrb[61].mxu1  ;;  %v3987_v14 = vsel %vm3763_vm1, %v3977_v6, %v3986_v2 }
 0x55a   :  { %v16023_v8 = vpop.f32.mrb[62].mxu1  ;;  %v13965_v31 = vld [vmem:[#allocation3 + $0xc8] sm:$0xff]  }
 0x55b   :  { %18211 = vst [vmem:[#allocation11_spill] sm:$0xff] %v16023_v8  ;;  %v11349_v45 = vpop.f32.mrb[63].mxu1  ;;  %v7197_v34 = vrot.slane %v13965_v31, 3  ;;  %v4001_v31 = vshll.u32 %v15668_v4, 16 }
 0x55d   :  { %11555 = vmatmul.mubr.bf16.gmra.mrb[88].mxu1 %v3978_v35  ;;  %12271 = vmatmul.mubr.bf16.gmra.mrb[84].mxu0 %v7196_v22  ;;  %v3991_v35 = vrot.slane %v3989_v47, 1  ;;  %v3994_v22 = vrot.slane %v3992_v32, 2  ;;  %v7198_v33 = vsel %vm7151_vm6, %v7195_v1, %v7197_v34 }
 0x55e   :  { %11558 = vmatprep.mubr.msk.bf16.mxu1 %vm14034_vm0, %v18033_v0  ;;  %12274 = vmatprep.mubr.msk.bf16.mxu0 %vm14034_vm0, %v18033_v0 }
 0x55f   :  { %v3995_v50 = vor.u32 %v3994_v22, %v3991_v35  ;;  %v4007_v22 = vshrl.u32 %v15689_v16, 16 }
 0x560   :  { %v16033_v19 = vpop.f32.mrb[64].mxu1 }
 0x561   :  { %v11352_v54 = vpop.f32.mrb[65].mxu1  ;;  %v3996_v1 = vsel %vm3763_vm1, %v3986_v2, %v3995_v50 }
 0x562   :  { %v16035_v45 = vpop.f32.mrb[66].mxu1  ;;  %v13966_v54 = vld [vmem:[#allocation3 + $0xd0] sm:$0xff]  }
 0x563   :  { %18212 = vst [vmem:[#allocation12_spill] sm:$0xff] %v16035_v45  ;;  %v11353_v8 = vpop.f32.mrb[67].mxu1  ;;  %v7199_v6 = vrot.slane %v13966_v54, 3  ;;  %v4010_v54 = vshll.u32 %v15689_v16, 16 }
 0x565   :  { %11559 = vmatmul.mubr.bf16.gmra.mrb[92].mxu1 %v3987_v14  ;;  %12275 = vmatmul.mubr.bf16.gmra.mrb[88].mxu0 %v7198_v33  ;;  %v4000_v14 = vrot.slane %v3998_v3, 1  ;;  %v4003_v33 = vrot.slane %v4001_v31, 2  ;;  %v7200_v35 = vsel %vm7151_vm6, %v7197_v34, %v7199_v6 }
 0x566   :  { %11562 = vmatprep.mubr.msk.bf16.mxu1 %vm14034_vm0, %v18033_v0  ;;  %12278 = vmatprep.mubr.msk.bf16.mxu0 %vm14034_vm0, %v18033_v0 }
 0x567   :  { %v4004_v4 = vor.u32 %v4003_v33, %v4000_v14  ;;  %v4016_v33 = vshrl.u32 %v15710_v15, 16 }
 0x568   :  { %v16045_v47 = vpop.f32.mrb[68].mxu1 }
 0x569   :  { %18213 = vst [vmem:[#allocation9_spill] sm:$0xff] %v16045_v47  ;;  %v11356_v8 = vpop.f32.mrb[69].mxu1  ;;  %v4005_v34 = vsel %vm3763_vm1, %v3995_v50, %v4004_v4  ;;  %v18241_v47 = vld [vmem:[#allocation10_spill] sm:$0xff] }
 0x56a   :  { %v16047_v32 = vpop.f32.mrb[70].mxu1  ;;  %v13967_v8 = vld [vmem:[#allocation3 + $0xd8] sm:$0xff]  }
 0x56b   :  { %18214 = vst [vmem:[#allocation13_spill] sm:$0xff] %v16047_v32  ;;  %v11357_v45 = vpop.f32.mrb[71].mxu1  ;;  %v7201_v2 = vrot.slane %v13967_v8, 3  ;;  %v4019_v8 = vshll.u32 %v15710_v15, 16 }
 0x56d   :  { %11563 = vmatmul.mubr.bf16.gmra.mrb[96].mxu1 %v3996_v1  ;;  %12279 = vmatmul.mubr.bf16.gmra.mrb[92].mxu0 %v7200_v35  ;;  %v4009_v1 = vrot.slane %v4007_v22, 1  ;;  %v4012_v35 = vrot.slane %v4010_v54, 2  ;;  %v7202_v14 = vsel %vm7151_vm6, %v7199_v6, %v7201_v2 }
 0x56e   :  { %11566 = vmatprep.mubr.msk.bf16.mxu1 %vm14034_vm0, %v18033_v0  ;;  %12282 = vmatprep.mubr.msk.bf16.mxu0 %vm14034_vm0, %v18033_v0 }
 0x56f   :  { %v4013_v16 = vor.u32 %v4012_v35, %v4009_v1  ;;  %v4025_v35 = vshrl.u32 %v15735_v43, 16 }
 0x570   :  { %v16057_v3 = vpop.f32.mrb[72].mxu1 }
 0x571   :  { %18215 = vst [vmem:[#allocation14_spill] sm:$0xff] %v16057_v3  ;;  %v11360_v45 = vpop.f32.mrb[73].mxu1  ;;  %v4014_v6 = vsel %vm3763_vm1, %v4004_v4, %v4013_v16 }
 0x572   :  { %v16059_v31 = vpop.f32.mrb[74].mxu1  ;;  %v13968_v45 = vld [vmem:[#allocation3 + $0xe0] sm:$0xff]  }
 0x573   :  { %18216 = vst [vmem:[#allocation15_spill] sm:$0xff] %v16059_v31  ;;  %v11361_v32 = vpop.f32.mrb[75].mxu1  ;;  %v7203_v50 = vrot.slane %v13968_v45, 3  ;;  %v4028_v45 = vshll.u32 %v15735_v43, 16 }
 0x575   :  { %11567 = vmatmul.mubr.bf16.gmra.mrb[100].mxu1 %v4005_v34  ;;  %12283 = vmatmul.mubr.bf16.gmra.mrb[96].mxu0 %v7202_v14  ;;  %v4018_v34 = vrot.slane %v4016_v33, 1  ;;  %v4021_v14 = vrot.slane %v4019_v8, 2  ;;  %v7204_v1 = vsel %vm7151_vm6, %v7201_v2, %v7203_v50 }
 0x576   :  { %11570 = vmatprep.mubr.msk.bf16.mxu1 %vm14034_vm0, %v18033_v0  ;;  %12286 = vmatprep.mubr.msk.bf16.mxu0 %vm14034_vm0, %v18033_v0 }
 0x577   :  { %v4022_v15 = vor.u32 %v4021_v14, %v4018_v34  ;;  %v4034_v14 = vshrl.u32 %v15760_v57, 16 }
 0x578   :  { %v16069_v22 = vpop.f32.mrb[76].mxu1 }
 0x579   :  { %18217 = vst [vmem:[#allocation16_spill] sm:$0xff] %v16069_v22  ;;  %v11364_v32 = vpop.f32.mrb[77].mxu1  ;;  %v4023_v2 = vsel %vm3763_vm1, %v4013_v16, %v4022_v15 }
 0x57a   :  { %v16071_v54 = vpop.f32.mrb[78].mxu1  ;;  %v13969_v32 = vld [vmem:[#allocation3 + $0xe8] sm:$0xff]  }
 0x57b   :  { %18218 = vst [vmem:[#allocation17_spill] sm:$0xff] %v16071_v54  ;;  %v11365_v31 = vpop.f32.mrb[79].mxu1  ;;  %v7205_v4 = vrot.slane %v13969_v32, 3  ;;  %v4037_v32 = vshll.u32 %v15760_v57, 16 }
 0x57d   :  { %11571 = vmatmul.mubr.bf16.gmra.mrb[104].mxu1 %v4014_v6  ;;  %12287 = vmatmul.mubr.bf16.gmra.mrb[100].mxu0 %v7204_v1  ;;  %v4027_v6 = vrot.slane %v4025_v35, 1  ;;  %v4030_v1 = vrot.slane %v4028_v45, 2  ;;  %v7206_v34 = vsel %vm7151_vm6, %v7203_v50, %v7205_v4 }
 0x57e   :  { %11574 = vmatprep.mubr.msk.bf16.mxu1 %vm14034_vm0, %v18033_v0  ;;  %12290 = vmatprep.mubr.msk.bf16.mxu0 %vm14034_vm0, %v18033_v0 }
 0x57f   :  { %v4031_v43 = vor.u32 %v4030_v1, %v4027_v6 }
 0x580   :  { %v16081_v33 = vpop.f32.mrb[80].mxu1 }
 0x581   :  { %18219 = vst [vmem:[#allocation18_spill] sm:$0xff] %v16081_v33  ;;  %v11368_v31 = vpop.f32.mrb[81].mxu1  ;;  %v4032_v45 = vsel %vm3763_vm1, %v4022_v15, %v4031_v43  ;;  %v13971_v15 = vld [vmem:[#allocation3 + $0xf8] sm:$0xff]  }
 0x582   :  { %v16083_v8 = vpop.f32.mrb[82].mxu1  ;;  %v13970_v31 = vld [vmem:[#allocation3 + $0xf0] sm:$0xff]  }
 0x583   :  { %18220 = vst [vmem:[#allocation19_spill] sm:$0xff] %v16083_v8  ;;  %v11369_v54 = vpop.f32.mrb[83].mxu1  ;;  %v7207_v16 = vrot.slane %v13970_v31, 3 }
 0x585   :  { %11575 = vmatmul.mubr.bf16.gmra.mrb[108].mxu1 %v4023_v2  ;;  %12291 = vmatmul.mubr.bf16.gmra.mrb[104].mxu0 %v7206_v34  ;;  %v4036_v2 = vrot.slane %v4034_v14, 1  ;;  %v4039_v34 = vrot.slane %v4037_v32, 2  ;;  %v7208_v6 = vsel %vm7151_vm6, %v7205_v4, %v7207_v16  ;;  %v7209_v14 = vrot.slane %v13971_v15, 3 }
 0x586   :  { %11578 = vmatprep.mubr.msk.bf16.mxu1 %vm14034_vm0, %v18033_v0  ;;  %12294 = vmatprep.mubr.msk.bf16.mxu0 %vm14034_vm0, %v18033_v0  ;;  %v4055_v15 = vshll.u32 %v15810_v49, 16 }
 0x587   :  { %v4040_v31 = vor.u32 %v4039_v34, %v4036_v2  ;;  %v7210_v2 = vsel %vm7151_vm6, %v7207_v16, %v7209_v14 }
 0x588   :  { %v7356_v35 = vpop.f32.mrb[0].mxu0 }
 0x589   :  { %v16094_v54 = vadd.f32 %v7356_v35, %v15715_v5  ;;  %v12188_v50 = vpop.f32.mrb[1].mxu0  ;;  %v4043_v5 = vshrl.u32 %v15785_v28, 16  ;;  %v4046_v35 = vshll.u32 %v15785_v28, 16  ;;  %v4041_v32 = vsel %vm3763_vm1, %v4031_v43, %v4040_v31  ;;  %v13972_v43 = vld [vmem:[#allocation3 + $0x100] sm:$0xff]  }
 0x58a   :  { %v7359_v8 = vpop.f32.mrb[2].mxu0 }
 0x58b   :  { %18221 = vst [vmem:[#allocation20_spill] sm:$0xff] %v16094_v54  ;;  %v16099_v1 = vadd.f32 %v7359_v8, %v15723_v29  ;;  %v12189_v57 = vpop.f32.mrb[3].mxu0  ;;  %v4045_v50 = vrot.slane %v4043_v5, 1  ;;  %v7211_v5 = vrot.slane %v13972_v43, 3 }
 0x58d   :  { %18222 = vst [vmem:[#allocation21_spill] sm:$0xff] %v16099_v1  ;;  %11579 = vmatmul.mubr.bf16.gmra.mrb[112].mxu1 %v4032_v45  ;;  %12295 = vmatmul.mubr.bf16.gmra.mrb[108].mxu0 %v7208_v6  ;;  %v4048_v45 = vrot.slane %v4046_v35, 2 }
 0x58e   :  { %11582 = vmatprep.mubr.msk.bf16.mxu1 %vm14034_vm0, %v18033_v0  ;;  %12298 = vmatprep.mubr.msk.bf16.mxu0 %vm14034_vm0, %v18033_v0 }
 0x58f   :  { %v4049_v57 = vor.u32 %v4048_v45, %v4045_v50  ;;  %v7212_v50 = vsel %vm7151_vm6, %v7209_v14, %v7211_v5 }
 0x590   :  { %v7364_v4 = vpop.f32.mrb[4].mxu0 }
 0x591   :  { %v16108_v29 = vadd.f32 %v7364_v4, %v15740_v25  ;;  %v12192_v8 = vpop.f32.mrb[5].mxu0  ;;  %v4052_v25 = vshrl.u32 %v15810_v49, 16  ;;  %v4050_v4 = vsel %vm3763_vm1, %v4040_v31, %v4049_v57  ;;  %v13973_v31 = vld [vmem:[#allocation3 + $0x108] sm:$0xff]  }
 0x592   :  { %v7367_v6 = vpop.f32.mrb[6].mxu0 }
 0x593   :  { %v16113_v34 = vadd.f32 %v7367_v6, %v15748_v56  ;;  %v12193_v28 = vpop.f32.mrb[7].mxu0  ;;  %v4054_v8 = vrot.slane %v4052_v25, 1  ;;  %v7213_v25 = vrot.slane %v13973_v31, 3 }
 0x594   :  { %v4064_v28 = vshll.u32 %v15835_v20, 16 }
 0x595   :  { %11583 = vmatmul.mubr.bf16.gmra.mrb[116].mxu1 %v4041_v32  ;;  %12299 = vmatmul.mubr.bf16.gmra.mrb[112].mxu0 %v7210_v2  ;;  %v4057_v32 = vrot.slane %v4055_v15, 2 }
 0x596   :  { %11586 = vmatprep.mubr.msk.bf16.mxu1 %vm14034_vm0, %v18033_v0  ;;  %12302 = vmatprep.mubr.msk.bf16.mxu0 %vm14034_vm0, %v18033_v0 }
 0x597   :  { %v4058_v2 = vor.u32 %v4057_v32, %v4054_v8  ;;  %v7214_v8 = vsel %vm7151_vm6, %v7211_v5, %v7213_v25 }
 0x598   :  { %v7372_v16 = vpop.f32.mrb[8].mxu0 }
 0x599   :  { %v16122_v56 = vadd.f32 %v7372_v16, %v15765_v11  ;;  %v12196_v35 = vpop.f32.mrb[9].mxu0  ;;  %v4061_v11 = vshrl.u32 %v15835_v20, 16  ;;  %v4059_v43 = vsel %vm3763_vm1, %v4049_v57, %v4058_v2  ;;  %v13974_v57 = vld [vmem:[#allocation3 + $0x110] sm:$0xff]  }
 0x59a   :  { %v7375_v6 = vpop.f32.mrb[10].mxu0  ;;  %v4066_v35 = vrot.slane %v4064_v28, 2 }
 0x59b   :  { %v16127_v45 = vadd.f32 %v7375_v6, %v15773_v44  ;;  %v12197_v49 = vpop.f32.mrb[11].mxu0  ;;  %v4063_v16 = vrot.slane %v4061_v11, 1 }
 0x59c   :  { %v7215_v49 = vrot.slane %v13974_v57, 3 }
 0x59d   :  { %11587 = vmatmul.mubr.bf16.gmra.mrb[120].mxu1 %v4050_v4  ;;  %12303 = vmatmul.mubr.bf16.gmra.mrb[116].mxu0 %v7212_v50  ;;  %v4067_v6 = vor.u32 %v4066_v35, %v4063_v16  ;;  %v4073_v50 = vshll.u32 %v15860_v21, 16 }
 0x59e   :  { %11590 = vmatprep.mubr.msk.bf16.mxu1 %vm14034_vm0, %v18033_v0  ;;  %12306 = vmatprep.mubr.msk.bf16.mxu0 %vm14034_vm0, %v18033_v0 }
 0x59f   :  { %v4068_v28 = vsel %vm3763_vm1, %v4058_v2, %v4067_v6  ;;  %v16161_v2 = vpop.permute.xlu0 %8011 }
 0x5a0   :  { %v7380_v14 = vpop.f32.mrb[12].mxu0  ;;  %18223 = vst [vmem:[#allocation22_spill] sm:$0xff] %v16161_v2 }
 0x5a1   :  { %v16136_v44 = vadd.f32 %v7380_v14, %v15790_v30  ;;  %v12200_v15 = vpop.f32.mrb[13].mxu0  ;;  %v4070_v30 = vshrl.u32 %v15860_v21, 16  ;;  %v4075_v14 = vrot.slane %v4073_v50, 2 }
 0x5a2   :  { %v7383_v4 = vpop.f32.mrb[14].mxu0 }
 0x5a3   :  { %v16141_v32 = vadd.f32 %v7383_v4, %v15798_v18  ;;  %v12201_v20 = vpop.f32.mrb[15].mxu0  ;;  %v4072_v31 = vrot.slane %v4070_v30, 1  ;;  %v4082_v4 = vshll.u32 %v15885_v52, 16 }
 0x5a5   :  { %11591 = vmatmul.mubr.bf16.gmra.mrb[124].mxu1 %v4059_v43  ;;  %12307 = vmatmul.mubr.bf16.gmra.mrb[120].mxu0 %v7214_v8  ;;  %v7216_v43 = vsel %vm7151_vm6, %v7213_v25, %v7215_v49  ;;  %v4076_v35 = vor.u32 %v4075_v14, %v4072_v31  ;;  %v13975_v25 = vld [vmem:[#allocation3 + $0x118] sm:$0xff]   ;;  %v16173_v14 = vpop.permute.xlu0 %8016 }
 0x5a6   :  { %11594 = vmatprep.mubr.msk.bf16.mxu1 %vm14034_vm0, %v18033_v0  ;;  %12310 = vmatprep.mubr.msk.bf16.mxu0 %vm14034_vm0, %v18033_v0  ;;  %v7217_v8 = vrot.slane %v13975_v25, 3  ;;  %18224 = vst [vmem:[#allocation23_spill] sm:$0xff] %v16173_v14 }
 0x5a7   :  { %v4077_v50 = vsel %vm3763_vm1, %v4067_v6, %v4076_v35  ;;  %v4088_v6 = vshrl.u32 %v15910_v7, 16 }
 0x5a8   :  { %v7388_v5 = vpop.f32.mrb[16].mxu0 }
 0x5a9   :  { %v16150_v18 = vadd.f32 %v7388_v5, %v15815_v40  ;;  %v12204_v11 = vpop.f32.mrb[17].mxu0  ;;  %v4079_v40 = vshrl.u32 %v15885_v52, 16  ;;  %v4084_v5 = vrot.slane %v4082_v4, 2 }
 0x5aa   :  { %v7391_v15 = vpop.f32.mrb[18].mxu0 }
 0x5ab   :  { %v16155_v16 = vadd.f32 %v7391_v15, %v15823_v26  ;;  %v12205_v21 = vpop.f32.mrb[19].mxu0  ;;  %v4081_v57 = vrot.slane %v4079_v40, 1  ;;  %v16175_v15 = vpop.permute.xlu1 %8021 }
 0x5ac   :  { %18225 = vst [vmem:[#allocation24_spill] sm:$0xff] %v16175_v15 }
 0x5ad   :  { %11595 = vmatmul.mubr.bf16.gmra.mrb[128].mxu1 %v4068_v28  ;;  %12311 = vmatmul.mubr.bf16.gmra.mrb[124].mxu0 %v7216_v43  ;;  %v7218_v28 = vsel %vm7151_vm6, %v7215_v49, %v7217_v8  ;;  %v4091_v43 = vshll.u32 %v15910_v7, 16 }
 0x5ae   :  { %11598 = vmatprep.mubr.msk.bf16.mxu1 %vm14034_vm0, %v18033_v0  ;;  %12314 = vmatprep.mubr.msk.bf16.mxu0 %vm14034_vm0, %v18033_v0 }
 0x5af   :  { %v16190_v7 = vpop.permute.xlu1 %8026 }
 0x5b0   :  { %v7396_v26 = vpop.f32.mrb[20].mxu0  ;;  %18227 = vst [vmem:[#allocation26_spill] sm:$0xff] %v16190_v7 }
 0x5b1   :  { %v16166_v20 = vadd.f32 %v7396_v26, %v15840_v39  ;;  %v12208_v30 = vpop.f32.mrb[21].mxu0  ;;  %v4085_v39 = vor.u32 %v4084_v5, %v4081_v57  ;;  %v4090_v26 = vrot.slane %v4088_v6, 1 }
 0x5b2   :  { %v7399_v11 = vpop.f32.mrb[22].mxu0  ;;  %v4093_v30 = vrot.slane %v4091_v43, 2 }
 0x5b3   :  { %v16171_v52 = vadd.f32 %v7399_v11, %v15848_v41  ;;  %v12209_v31 = vpop.f32.mrb[23].mxu0  ;;  %v13976_v41 = vld [vmem:[#allocation3 + $0x120] sm:$0xff]   ;;  %v4086_v25 = vsel %vm3763_vm1, %v4076_v35, %v4085_v39  ;;  %v4097_v35 = vshrl.u32 %v15935_v63, 16 }
 0x5b4   :  { %v7219_v49 = vrot.slane %v13976_v41, 3  ;;  %v4100_v31 = vshll.u32 %v15935_v63, 16  ;;  %v16203_v41 = vpop.permute.xlu1 %8036 }
 0x5b5   :  { %11599 = vmatmul.mubr.bf16.gmra.mrb[132].mxu1 %v4077_v50  ;;  %12315 = vmatmul.mubr.bf16.gmra.mrb[128].mxu0 %v7218_v28  ;;  %v16187_v50 = vpop.permute.xlu0 %8031  ;;  %18229 = vst [vmem:[#allocation28_spill] sm:$0xff] %v16203_v41 }
 0x5b6   :  { %11602 = vmatprep.mubr.msk.bf16.mxu1 %vm14034_vm0, %v18033_v0  ;;  %12318 = vmatprep.mubr.msk.bf16.mxu0 %vm14034_vm0, %v18033_v0  ;;  %18226 = vst [vmem:[#allocation25_spill] sm:$0xff] %v16187_v50  ;;  %v7220_v5 = vsel %vm7151_vm6, %v7217_v8, %v7219_v49  ;;  %v13977_v8 = vld [vmem:[#allocation3 + $0x128] sm:$0xff]  }
 0x5b7   :  { %v7221_v6 = vrot.slane %v13977_v8, 3 }
 0x5b8   :  { %v7404_v21 = vpop.f32.mrb[24].mxu0 }
 0x5b9   :  { %v16184_v40 = vadd.f32 %v7404_v21, %v15865_v23  ;;  %v12212_v4 = vpop.f32.mrb[25].mxu0  ;;  %v4094_v23 = vor.u32 %v4093_v30, %v4090_v26  ;;  %v16201_v43 = vpop.permute.xlu0 %8041  ;;  %v4099_v26 = vrot.slane %v4097_v35, 1  ;;  %v4102_v30 = vrot.slane %v4100_v31, 2 }
 0x5ba   :  { %v7407_v57 = vpop.f32.mrb[26].mxu0  ;;  %18228 = vst [vmem:[#allocation27_spill] sm:$0xff] %v16201_v43  ;;  %v7222_v63 = vsel %vm7151_vm6, %v7219_v49, %v7221_v6  ;;  %v13978_v49 = vld [vmem:[#allocation3 + $0x130] sm:$0xff]  }
 0x5bb   :  { %v16193_v11 = vadd.f32 %v7407_v57, %v15873_v48  ;;  %v12213_v28 = vpop.f32.mrb[27].mxu0  ;;  %v4103_v8 = vor.u32 %v4102_v30, %v4099_v26  ;;  %v7223_v35 = vrot.slane %v13978_v49, 3 }
 0x5bd   :  { %11603 = vmatmul.mubr.bf16.gmra.mrb[136].mxu1 %v4086_v25  ;;  %12319 = vmatmul.mubr.bf16.gmra.mrb[132].mxu0 %v7220_v5  ;;  %v4095_v25 = vsel %vm3763_vm1, %v4085_v39, %v4094_v23  ;;  %v16217_v39 = vpop.permute.xlu0 %8051  ;;  %v4104_v26 = vsel %vm3763_vm1, %v4094_v23, %v4103_v8  ;;  %v4115_v23 = vshrl.u32 %v15970_v58, 16 }
 0x5be   :  { %11606 = vmatprep.mubr.msk.bf16.mxu1 %vm14034_vm0, %v18033_v0  ;;  %12322 = vmatprep.mubr.msk.bf16.mxu0 %vm14034_vm0, %v18033_v0  ;;  %18230 = vst [vmem:[#allocation29_spill] sm:$0xff] %v16217_v39 }
 0x5c0   :  { %v7412_v48 = vpop.f32.mrb[28].mxu0 }
 0x5c1   :  { %v16206_v21 = vadd.f32 %v7412_v48, %v15890_v10  ;;  %v12216_v4 = vpop.f32.mrb[29].mxu0  ;;  %v4106_v10 = vshrl.u32 %v15957_v46, 16  ;;  %v4109_v48 = vshll.u32 %v15957_v46, 16  ;;  %v7224_v46 = vsel %vm7151_vm6, %v7221_v6, %v7223_v35  ;;  %v16231_v33 = vpop.permute.xlu0 %8061 }
 0x5c2   :  { %v7415_v57 = vpop.f32.mrb[30].mxu0  ;;  %18234 = vst [vmem:[#allocation33_spill] sm:$0xff] %v16231_v33 }
 0x5c3   :  { %v16211_v5 = vadd.f32 %v7415_v57, %v15898_v60  ;;  %v12217_v28 = vpop.f32.mrb[31].mxu0  ;;  %v16221_v60 = vpop.permute.xlu1 %8046  ;;  %v4108_v30 = vrot.slane %v4106_v10, 1  ;;  %v4111_v57 = vrot.slane %v4109_v48, 2  ;;  %v4118_v10 = vshll.u32 %v15970_v58, 16 }
 0x5c4   :  { %18231 = vst [vmem:[#allocation30_spill] sm:$0xff] %v16221_v60 }
 0x5c5   :  { %11607 = vmatmul.mubr.bf16.gmra.mrb[140].mxu1 %v4095_v25  ;;  %12323 = vmatmul.mubr.bf16.gmra.mrb[136].mxu0 %v7222_v63  ;;  %v16245_v22 = vpop.permute.xlu0 %8071 }
 0x5c6   :  { %11610 = vmatprep.mubr.msk.bf16.mxu1 %vm14034_vm0, %v18033_v0  ;;  %12326 = vmatprep.mubr.msk.bf16.mxu0 %vm14034_vm0, %v18033_v0  ;;  %18238 = vst [vmem:[#allocation36_spill] sm:$0xff] %v16245_v22 }
 0x5c7   :  { %v16233_v49 = vpop.permute.xlu1 %8056 }
 0x5c8   :  { %v7420_v31 = vpop.f32.mrb[32].mxu0  ;;  %18235 = vst [vmem:[#allocation34_spill] sm:$0xff] %v16233_v49 }
 0x5c9   :  { %v16224_v4 = vadd.f32 %v7420_v31, %v15915_v51  ;;  %v12220_v25 = vpop.f32.mrb[33].mxu0  ;;  %v18236_v51 = vmov 0.0   ;;  %v4112_v31 = vor.u32 %v4111_v57, %v4108_v30 }
 0x5ca   :  { %v7423_v63 = vpop.f32.mrb[34].mxu0 }
 0x5cb   :  { %18232 = vst [vmem:[#allocation31_spill] sm:$0xff] %v16224_v4  ;;  %v16229_v28 = vadd.f32 %v7423_v63, %v15923_v59  ;;  %v12221_v0 = vpop.f32.mrb[35].mxu0  ;;  %v13979_v59 = vld [vmem:[#allocation3 + $0x138] sm:$0xff]   ;;  %v4117_v63 = vrot.slane %v4115_v23, 1  ;;  %v16248_v58 = vpop.permute.xlu1 %8066 }
 0x5cc   :  { %v7225_v6 = vrot.slane %v13979_v59, 3  ;;  %18239 = vst [vmem:[#allocation37_spill] sm:$0xff] %v16248_v58 }
 0x5cd   :  { %18233 = vst [vmem:[#allocation32_spill] sm:$0xff] %v16229_v28  ;;  %11611 = vmatmul.mubr.bf16.gmra.mrb[144].mxu1 %v4104_v26  ;;  %12327 = vmatmul.mubr.bf16.gmra.mrb[140].mxu0 %v7224_v46  ;;  %v4113_v26 = vsel %vm3763_vm1, %v4103_v8, %v4112_v31  ;;  %v4120_v46 = vrot.slane %v4118_v10, 2  ;;  %v16259_v10 = vpop.permute.xlu0 %8081 }
 0x5ce   :  { %11614 = vmatprep.mubr.msk.bf16.mxu1 %vm14034_vm0, %v18236_v51  ;;  %12330 = vmatprep.mubr.msk.bf16.mxu0 %vm14034_vm0, %v18236_v51  ;;  %v7226_v57 = vsel %vm7151_vm6, %v7223_v35, %v7225_v6  ;;  %v13980_v35 = vld [vmem:[#allocation3 + $0x140] sm:$0xff]   ;;  %18242 = vst [vmem:[#allocation10_spill] sm:$0xff] %v16259_v10 }
 0x5cf   :  { %v4121_v8 = vor.u32 %v4120_v46, %v4117_v63  ;;  %v7227_v23 = vrot.slane %v13980_v35, 3  ;;  %v8415_v46 = vmul.f32 %v16099_v1, %v16173_v14 }
 0x5d0   :  { %v7428_v0 = vpop.f32.mrb[36].mxu0 }
 0x5d1   :  { %v16242_v48 = vadd.f32 %v7428_v0, %v15940_v12  ;;  %v12224_v25 = vpop.f32.mrb[37].mxu0  ;;  %v4124_v12 = vshrl.u32 %v18241_v47, 16  ;;  %v4127_v0 = vshll.u32 %v18241_v47, 16  ;;  %v7228_v63 = vsel %vm7151_vm6, %v7225_v6, %v7227_v23 }
 0x5d2   :  { %v7431_v30 = vpop.f32.mrb[38].mxu0  ;;  %v8582_v6 = vmul.f32 %v16099_v1, %v8415_v46 }
 0x5d3   :  { %18237 = vst [vmem:[#allocation35_spill] sm:$0xff] %v16242_v48  ;;  %v16251_v3 = vadd.f32 %v7431_v30, %v15948_v36  ;;  %v12225_v59 = vpop.f32.mrb[39].mxu0  ;;  %v4126_v25 = vrot.slane %v4124_v12, 1  ;;  %v4129_v30 = vrot.slane %v4127_v0, 2  ;;  %v8414_v12 = vmul.f32 %v16094_v54, %v16161_v2 }
 0x5d5   :  { %18240 = vst [vmem:[#allocation38_spill] sm:$0xff] %v16251_v3  ;;  %11615 = vmatmul.mubr.bf16.gmra.mrb[148].mxu1 %v4113_v26  ;;  %12331 = vmatmul.mubr.bf16.gmra.mrb[144].mxu0 %v7226_v57  ;;  %v16261_v26 = vpop.permute.xlu1 %8076  ;;  %v4122_v57 = vsel %vm3763_vm1, %v4112_v31, %v4121_v8  ;;  %v4130_v0 = vor.u32 %v4129_v30, %v4126_v25  ;;  %v16279_v31 = vpop.permute.xlu0 %8091 }
 0x5d6   :  { %11618 = vmatprep.mubr.msk.bf16.mxu1 %vm14034_vm0, %v18236_v51  ;;  %12334 = vmatprep.mubr.msk.bf16.mxu0 %vm14034_vm0, %v18236_v51  ;;  %18243 = vst [vmem:[#allocation39_spill] sm:$0xff] %v16261_v26  ;;  %18246 = vst [vmem:[#allocation42_spill] sm:$0xff] %v16279_v31 }
 0x5d7   :  { %v4131_v30 = vsel %vm3763_vm1, %v4121_v8, %v4130_v0 }
 0x5d8   :  { %v7436_v36 = vpop.f32.mrb[40].mxu0 }
 0x5d9   :  { %v16264_v59 = vadd.f32 %v7436_v36, %v15962_v27  ;;  %v12228_v47 = vpop.f32.mrb[41].mxu0  ;;  %v8416_v27 = vmul.f32 %v16108_v29, %v16175_v15  ;;  %v8581_v36 = vmul.f32 %v16094_v54, %v8414_v12  ;;  %v8418_v54 = vmul.f32 %v16122_v56, %v16187_v50 }
 0x5da   :  { %v7439_v3 = vpop.f32.mrb[42].mxu0  ;;  %v8495_v47 = vadd.f32 %v8415_v46, %v8414_v12  ;;  %v16300_v12 = vpop.permute.xlu0 %8101 }
 0x5db   :  { %18244 = vst [vmem:[#allocation40_spill] sm:$0xff] %v16264_v59  ;;  %v16271_v35 = vadd.f32 %v7439_v3, %v15964_v42  ;;  %v12229_v48 = vpop.f32.mrb[43].mxu0  ;;  %v13981_v42 = vld [vmem:[#allocation3 + $0x148] sm:$0xff]   ;;  %v8662_v1 = vadd.f32 %v8582_v6, %v8581_v36  ;;  %18250 = vst [vmem:[#allocation46_spill] sm:$0xff] %v16300_v12 }
 0x5dc   :  { %v7229_v3 = vrot.slane %v13981_v42, 3  ;;  %v16284_v48 = vpop.permute.xlu1 %8086 }
 0x5dd   :  { %18245 = vst [vmem:[#allocation41_spill] sm:$0xff] %v16271_v35  ;;  %11619 = vmatmul.mubr.bf16.gmra.mrb[152].mxu1 %v4122_v57  ;;  %12335 = vmatmul.mubr.bf16.gmra.mrb[148].mxu0 %v7228_v63  ;;  %18247 = vst [vmem:[#allocation43_spill] sm:$0xff] %v16284_v48  ;;  %v8583_v57 = vmul.f32 %v16108_v29, %v8416_v27  ;;  %v8417_v63 = vmul.f32 %v16113_v34, %v16190_v7 }
 0x5de   :  { %11622 = vmatprep.mubr.msk.bf16.mxu1 %vm14034_vm0, %v18236_v51  ;;  %12338 = vmatprep.mubr.msk.bf16.mxu0 %vm14034_vm0, %v18236_v51  ;;  %v7230_v2 = vsel %vm7151_vm6, %v7227_v23, %v7229_v3  ;;  %v8496_v35 = vadd.f32 %v8495_v47, %v8416_v27  ;;  %v8585_v23 = vmul.f32 %v16122_v56, %v8418_v54 }
 0x5df   :  { %v8663_v7 = vadd.f32 %v8662_v1, %v8583_v57  ;;  %v8419_v27 = vmul.f32 %v16127_v45, %v16203_v41  ;;  %v16318_v57 = vpop.permute.xlu0 %8111 }
 0x5e0   :  { %v7444_v25 = vpop.f32.mrb[44].mxu0  ;;  %18253 = vst [vmem:[#allocation49_spill] sm:$0xff] %v16318_v57 }
 0x5e1   :  { %v16292_v15 = vadd.f32 %v7444_v25, %v15975_v61  ;;  %v12232_v14 = vpop.f32.mrb[45].mxu0  ;;  %v8584_v61 = vmul.f32 %v16113_v34, %v8417_v63  ;;  %v16303_v25 = vpop.permute.xlu1 %8096 }
 0x5e2   :  { %v7447_v42 = vpop.f32.mrb[46].mxu0  ;;  %18251 = vst [vmem:[#allocation47_spill] sm:$0xff] %v16303_v25  ;;  %v7231_v14 = vrot.slane %v15518_v37, 3 }
 0x5e3   :  { %18248 = vst [vmem:[#allocation44_spill] sm:$0xff] %v16292_v15  ;;  %v16298_v8 = vadd.f32 %v7447_v42, %v15977_v17  ;;  %v12233_v46 = vpop.f32.mrb[47].mxu0  ;;  %v8497_v17 = vadd.f32 %v8496_v35, %v8417_v63  ;;  %v8664_v6 = vadd.f32 %v8663_v7, %v8584_v61  ;;  %v8586_v63 = vmul.f32 %v16127_v45, %v8419_v27 }
 0x5e4   :  { %v7232_v37 = vsel %vm7151_vm6, %v7229_v3, %v7231_v14 }
 0x5e5   :  { %18249 = vst [vmem:[#allocation45_spill] sm:$0xff] %v16298_v8  ;;  %11623 = vmatmul.mubr.bf16.gmra.mrb[156].mxu1 %v4131_v30  ;;  %12339 = vmatmul.mubr.bf16.gmra.mrb[152].mxu0 %v7230_v2  ;;  %v8498_v36 = vadd.f32 %v8497_v17, %v8418_v54  ;;  %v8420_v2 = vmul.f32 %v16136_v44, %v16201_v43  ;;  %v16322_v46 = vpop.permute.xlu1 %8106 }
 0x5e6   :  { %11626 = vmatprep.mubr.msk.bf16.mxu1 %vm14034_vm0, %v18236_v51  ;;  %12342 = vmatprep.mubr.msk.bf16.mxu0 %vm14034_vm0, %v18236_v51  ;;  %v8665_v35 = vadd.f32 %v8664_v6, %v8585_v23  ;;  %18254 = vst [vmem:[#allocation50_spill] sm:$0xff] %v16322_v46  ;;  %v8421_v17 = vmul.f32 %v16141_v32, %v16221_v60  ;;  %v16334_v6 = vpop.permute.xlu0 %8121 }
 0x5e7   :  { %v8499_v61 = vadd.f32 %v8498_v36, %v8419_v27  ;;  %18256 = vst [vmem:[#allocation52_spill] sm:$0xff] %v16334_v6 }
 0x5e8   :  { %v7452_v1 = vpop.f32.mrb[48].mxu0  ;;  %v8666_v3 = vadd.f32 %v8665_v35, %v8586_v63 }
 0x5e9   :  { %v16316_v30 = vadd.f32 %v7452_v1, %v15985_v24  ;;  %v12236_v47 = vpop.f32.mrb[49].mxu0  ;;  %v8587_v24 = vmul.f32 %v16136_v44, %v8420_v2  ;;  %v8500_v23 = vadd.f32 %v8499_v61, %v8420_v2  ;;  %v8422_v1 = vmul.f32 %v16150_v18, %v16217_v39  ;;  %v16337_v27 = vpop.permute.xlu1 %8116 }
 0x5ea   :  { %v7455_v42 = vpop.f32.mrb[50].mxu0  ;;  %18257 = vst [vmem:[#allocation53_spill] sm:$0xff] %v16337_v27  ;;  %v8423_v2 = vmul.f32 %v16155_v16, %v16233_v49 }
 0x5eb   :  { %18252 = vst [vmem:[#allocation48_spill] sm:$0xff] %v16316_v30  ;;  %v16325_v7 = vadd.f32 %v7455_v42, %v15987_v55  ;;  %v12237_v54 = vpop.f32.mrb[51].mxu0  ;;  %v8667_v47 = vadd.f32 %v8666_v3, %v8587_v24  ;;  %v8424_v3 = vmul.f32 %v16166_v20, %v16231_v33 }
 0x5ec   :  { %v8501_v54 = vadd.f32 %v8500_v23, %v8421_v17 }
 0x5ed   :  { %18255 = vst [vmem:[#allocation51_spill] sm:$0xff] %v16325_v7  ;;  %11627 = vmatmul.mubr.bf16.gmra.mrb[160].mxu1 %v4130_v0  ;;  %12343 = vmatmul.mubr.bf16.gmra.mrb[156].mxu0 %v7232_v37  ;;  %v8588_v0 = vmul.f32 %v16141_v32, %v8421_v17  ;;  %v8590_v17 = vmul.f32 %v16155_v16, %v8423_v2  ;;  %v16353_v23 = vpop.permute.xlu1 %8126 }
 0x5ee   :  { %12346 = vmatprep.mubr.msk.bf16.mxu0 %vm14034_vm0, %v18236_v51  ;;  %v8589_v51 = vmul.f32 %v16150_v18, %v8422_v1  ;;  %v8502_v24 = vadd.f32 %v8501_v54, %v8422_v1  ;;  %18261 = vst [vmem:[#allocation57_spill] sm:$0xff] %v16353_v23  ;;  %v8591_v49 = vmul.f32 %v16166_v20, %v8424_v3 }
 0x5ef   :  { %v8668_v61 = vadd.f32 %v8667_v47, %v8588_v0  ;;  %v8426_v54 = vmul.f32 %v16184_v40, %v16245_v22  ;;  %v18268_v22 = vld [vmem:[#allocation11_spill] sm:$0xff] }
 0x5f0   :  { %v7460_v55 = vpop.f32.mrb[52].mxu0  ;;  %v8503_v39 = vadd.f32 %v8502_v24, %v8423_v2 }
 0x5f1   :  { %v16340_v36 = vadd.f32 %v7460_v55, %v15997_v38  ;;  %v12240_v42 = vpop.f32.mrb[53].mxu0  ;;  %v16350_v38 = vpop.permute.xlu0 %8131  ;;  %v8669_v55 = vadd.f32 %v8668_v61, %v8589_v51 }
 0x5f2   :  { %v7463_v37 = vpop.f32.mrb[54].mxu0  ;;  %18260 = vst [vmem:[#allocation56_spill] sm:$0xff] %v16350_v38 }
 0x5f3   :  { %18258 = vst [vmem:[#allocation54_spill] sm:$0xff] %v16340_v36  ;;  %v16346_v35 = vadd.f32 %v7463_v37, %v15999_v9  ;;  %v12241_v63 = vpop.f32.mrb[55].mxu0  ;;  %v8425_v9 = vmul.f32 %v16171_v52, %v16248_v58  ;;  %v8504_v37 = vadd.f32 %v8503_v39, %v8424_v3  ;;  %v16369_v58 = vpop.permute.xlu1 %8136  ;;  %v8427_v39 = vmul.f32 %v16193_v11, %v16261_v26 }
 0x5f4   :  { %18264 = vst [vmem:[#allocation60_spill] sm:$0xff] %v16369_v58 }
 0x5f5   :  { %18259 = vst [vmem:[#allocation55_spill] sm:$0xff] %v16346_v35  ;;  %12347 = vmatmul.mubr.bf16.gmra.mrb[160].mxu0 %v7231_v14  ;;  %v8670_v14 = vadd.f32 %v8669_v55, %v8590_v17  ;;  %v16366_v2 = vpop.permute.xlu0 %8141  ;;  %v8592_v24 = vmul.f32 %v16171_v52, %v8425_v9 }
 0x5f6   :  { %18263 = vst [vmem:[#allocation59_spill] sm:$0xff] %v16366_v2 }
 0x5f7   :  { %v8671_v61 = vadd.f32 %v8670_v14, %v8591_v49 }
 0x5f8   :  { %v7468_v42 = vpop.f32.mrb[56].mxu0 }
 0x5f9   :  { %v16359_v1 = vadd.f32 %v7468_v42, %v16008_v53  ;;  %v12244_v47 = vpop.f32.mrb[57].mxu0  ;;  %v8505_v53 = vadd.f32 %v8504_v37, %v8425_v9  ;;  %v8593_v42 = vmul.f32 %v16184_v40, %v8426_v54  ;;  %v8672_v55 = vadd.f32 %v8671_v61, %v8592_v24  ;;  %v16382_v37 = vpop.permute.xlu1 %8146 }
 0x5fa   :  { %v7471_v0 = vpop.f32.mrb[58].mxu0  ;;  %v8594_v9 = vmul.f32 %v16193_v11, %v8427_v39  ;;  %18267 = vst [vmem:[#allocation63_spill] sm:$0xff] %v16382_v37 }
 0x5fb   :  { %18262 = vst [vmem:[#allocation58_spill] sm:$0xff] %v16359_v1  ;;  %v16364_v51 = vadd.f32 %v7471_v0, %v16010_v13  ;;  %v12245_v63 = vpop.f32.mrb[59].mxu0  ;;  %v8506_v17 = vadd.f32 %v8505_v53, %v8426_v54  ;;  %v8428_v13 = vmul.f32 %v16206_v21, %v16259_v10  ;;  %v16379_v0 = vpop.permute.xlu0 %8151 }
 0x5fc   :  { %18266 = vst [vmem:[#allocation62_spill] sm:$0xff] %v16379_v0  ;;  %v8673_v63 = vadd.f32 %v8672_v55, %v8593_v42 }
 0x5fd   :  { %v8507_v54 = vadd.f32 %v8506_v17, %v8427_v39  ;;  %v8595_v24 = vmul.f32 %v16206_v21, %v8428_v13 }
 0x5fe   :  { %v8674_v53 = vadd.f32 %v8673_v63, %v8594_v9  ;;  %v18271_v9 = vld [vmem:[#allocation12_spill] sm:$0xff] }
 0x5ff   :  { %v16392_v42 = vpop.permute.xlu0 %8161 }
 0x600   :  { %v7476_v3 = vpop.f32.mrb[60].mxu0  ;;  %18269 = vst [vmem:[#allocation11_spill] sm:$0xff] %v16392_v42  ;;  %v8675_v10 = vadd.f32 %v8674_v53, %v8595_v24 }
 0x601   :  { %v16377_v47 = vadd.f32 %v7476_v3, %v16021_v62  ;;  %v12248_v49 = vpop.f32.mrb[61].mxu0  ;;  %v8429_v62 = vmul.f32 %v16211_v5, %v16284_v48  ;;  %v8508_v3 = vadd.f32 %v8507_v54, %v8428_v13  ;;  %v8431_v13 = vmul.f32 %v16229_v28, %v16303_v25  ;;  %v18272_v48 = vld [vmem:[#allocation35_spill] sm:$0xff] }
 0x602   :  { %v7479_v14 = vpop.f32.mrb[62].mxu0  ;;  %v8430_v49 = vmul.f32 %v16224_v4, %v16279_v31  ;;  %v8432_v60 = vmul.f32 %v18272_v48, %v16300_v12 }
 0x603   :  { %18265 = vst [vmem:[#allocation61_spill] sm:$0xff] %v16377_v47  ;;  %v16385_v26 = vadd.f32 %v7479_v14, %v18268_v22  ;;  %v12249_v61 = vpop.f32.mrb[63].mxu0  ;;  %v8596_v33 = vmul.f32 %v16211_v5, %v8429_v62  ;;  %v16395_v22 = vpop.permute.xlu1 %8156 }
 0x604   :  { %18270 = vst [vmem:[#allocation64_spill] sm:$0xff] %v16395_v22  ;;  %v8509_v61 = vadd.f32 %v8508_v3, %v8429_v62  ;;  %v8597_v63 = vmul.f32 %v16224_v4, %v8430_v49  ;;  %v16408_v43 = vpop.permute.xlu0 %8171  ;;  %v8599_v25 = vmul.f32 %v18272_v48, %v8432_v60 }
 0x605   :  { %v8676_v24 = vadd.f32 %v8675_v10, %v8596_v33  ;;  %18273 = vst [vmem:[#allocation12_spill] sm:$0xff] %v16408_v43 }
 0x606   :  { %v8510_v53 = vadd.f32 %v8509_v61, %v8430_v49 }
 0x607   :  { %v16411_v62 = vpop.permute.xlu1 %8166 }
 0x608   :  { %v7484_v55 = vpop.f32.mrb[64].mxu0  ;;  %18274 = vst [vmem:[#allocation65_spill] sm:$0xff] %v16411_v62 }
 0x609   :  { %v16398_v39 = vadd.f32 %v7484_v55, %v16033_v19  ;;  %v12252_v17 = vpop.f32.mrb[65].mxu0  ;;  %v8677_v19 = vadd.f32 %v8676_v24, %v8597_v63  ;;  %v8598_v55 = vmul.f32 %v16229_v28, %v8431_v13  ;;  %v8434_v63 = vmul.f32 %v16264_v59, %v16318_v57  ;;  %v18278_v24 = vld [vmem:[#allocation13_spill] sm:$0xff] }
 0x60a   :  { %v7487_v14 = vpop.f32.mrb[66].mxu0  ;;  %v8511_v17 = vadd.f32 %v8510_v53, %v8431_v13  ;;  %v16424_v13 = vpop.permute.xlu0 %8181 }
 0x60b   :  { %v16404_v54 = vadd.f32 %v7487_v14, %v18271_v9  ;;  %v12253_v31 = vpop.f32.mrb[67].mxu0  ;;  %v18275_v14 = vld [vmem:[#allocation38_spill] sm:$0xff]  ;;  %v8678_v61 = vadd.f32 %v8677_v19, %v8598_v55  ;;  %18280 = vst [vmem:[#allocation66_spill] sm:$0xff] %v16424_v13  ;;  %v16426_v48 = vpop.permute.xlu1 %8176  ;;  %v18282_v19 = vld [vmem:[#allocation41_spill] sm:$0xff] }
 0x60c   :  { %v8433_v9 = vmul.f32 %v18275_v14, %v16322_v46  ;;  %v18276_v31 = vld [vmem:[#allocation9_spill] sm:$0xff]  ;;  %v8512_v12 = vadd.f32 %v8511_v17, %v8432_v60  ;;  %18281 = vst [vmem:[#allocation67_spill] sm:$0xff] %v16426_v48  ;;  %v8435_v60 = vmul.f32 %v18282_v19, %v16337_v27 }
 0x60d   :  { %v8679_v53 = vadd.f32 %v8678_v61, %v8599_v25 }
 0x60e   :  { %v8600_v46 = vmul.f32 %v18275_v14, %v8433_v9  ;;  %v16437_v61 = vpop.permute.xlu0 %8191 }
 0x60f   :  { %18285 = vst [vmem:[#allocation68_spill] sm:$0xff] %v16437_v61  ;;  %v16439_v14 = vpop.permute.xlu1 %8186 }
 0x610   :  { %v7492_v3 = vpop.f32.mrb[68].mxu0  ;;  %v8680_v17 = vadd.f32 %v8679_v53, %v8600_v46  ;;  %18286 = vst [vmem:[#allocation69_spill] sm:$0xff] %v16439_v14 }
 0x611   :  { %v16417_v33 = vadd.f32 %v7492_v3, %v18276_v31  ;;  %v12256_v10 = vpop.f32.mrb[69].mxu0  ;;  %v8513_v3 = vadd.f32 %v8512_v12, %v8433_v9  ;;  %v8601_v31 = vmul.f32 %v16264_v59, %v8434_v63  ;;  %v8602_v9 = vmul.f32 %v18282_v19, %v8435_v60  ;;  %v18287_v59 = vld [vmem:[#allocation15_spill] sm:$0xff] }
 0x612   :  { %v7495_v49 = vpop.f32.mrb[70].mxu0 }
 0x613   :  { %18277 = vst [vmem:[#allocation9_spill] sm:$0xff] %v16417_v33  ;;  %v16422_v41 = vadd.f32 %v7495_v49, %v18278_v24  ;;  %v12257_v50 = vpop.f32.mrb[71].mxu0  ;;  %v8514_v10 = vadd.f32 %v8513_v3, %v8434_v63  ;;  %v8436_v49 = vmul.f32 %v16292_v15, %v16334_v6  ;;  %v8681_v12 = vadd.f32 %v8680_v17, %v8601_v31  ;;  %v16450_v6 = vpop.permute.xlu0 %8201 }
 0x614   :  { %v18283_v50 = vld [vmem:[#allocation14_spill] sm:$0xff]  ;;  %v8437_v3 = vmul.f32 %v16298_v8, %v16353_v23  ;;  %18288 = vst [vmem:[#allocation15_spill] sm:$0xff] %v16450_v6  ;;  %v16452_v17 = vpop.permute.xlu1 %8196 }
 0x615   :  { %18279 = vst [vmem:[#allocation13_spill] sm:$0xff] %v16422_v41  ;;  %v8515_v63 = vadd.f32 %v8514_v10, %v8435_v60  ;;  %v8603_v53 = vmul.f32 %v16292_v15, %v8436_v49  ;;  %18289 = vst [vmem:[#allocation70_spill] sm:$0xff] %v16452_v17 }
 0x618   :  { %v7500_v55 = vpop.f32.mrb[72].mxu0 }
 0x619   :  { %v16435_v24 = vadd.f32 %v7500_v55, %v18283_v50  ;;  %v12260_v25 = vpop.f32.mrb[73].mxu0  ;;  %v8682_v55 = vadd.f32 %v8681_v12, %v8602_v9  ;;  %v8516_v50 = vadd.f32 %v8515_v63, %v8436_v49  ;;  %v8439_v49 = vmul.f32 %v16325_v7, %v16369_v58  ;;  %v18292_v9 = vld [vmem:[#allocation17_spill] sm:$0xff] }
 0x61a   :  { %v7503_v57 = vpop.f32.mrb[74].mxu0  ;;  %v8438_v25 = vmul.f32 %v16316_v30, %v16350_v38 }
 0x61b   :  { %18284 = vst [vmem:[#allocation14_spill] sm:$0xff] %v16435_v24  ;;  %v16443_v27 = vadd.f32 %v7503_v57, %v18287_v59  ;;  %v12261_v46 = vpop.f32.mrb[75].mxu0  ;;  %v8683_v19 = vadd.f32 %v8682_v55, %v8603_v53  ;;  %v8604_v59 = vmul.f32 %v16298_v8, %v8437_v3  ;;  %v18290_v57 = vld [vmem:[#allocation16_spill] sm:$0xff]  ;;  %v8517_v15 = vadd.f32 %v8516_v50, %v8437_v3  ;;  %v16466_v55 = vpop.permute.xlu0 %8211 }
 0x61c   :  { %v8605_v12 = vmul.f32 %v16316_v30, %v8438_v25  ;;  %v8440_v53 = vmul.f32 %v16340_v36, %v16366_v2  ;;  %18293 = vst [vmem:[#allocation17_spill] sm:$0xff] %v16466_v55  ;;  %v8606_v3 = vmul.f32 %v16325_v7, %v8439_v49  ;;  %v18296_v7 = vld [vmem:[#allocation19_spill] sm:$0xff] }
 0x61d   :  { %v8684_v23 = vadd.f32 %v8683_v19, %v8604_v59  ;;  %v8518_v28 = vadd.f32 %v8517_v15, %v8438_v25  ;;  %v18295_v15 = vld [vmem:[#allocation18_spill] sm:$0xff] }
 0x61f   :  { %v8519_v58 = vadd.f32 %v8518_v28, %v8439_v49 }
 0x620   :  { %v7508_v31 = vpop.f32.mrb[76].mxu0 }
 0x621   :  { %v16456_v60 = vadd.f32 %v7508_v31, %v18290_v57  ;;  %v12264_v10 = vpop.f32.mrb[77].mxu0  ;;  %v16468_v31 = vpop.permute.xlu1 %8206  ;;  %v8685_v57 = vadd.f32 %v8684_v23, %v8605_v12  ;;  %v8520_v23 = vadd.f32 %v8519_v58, %v8440_v53  ;;  %v8442_v12 = vmul.f32 %v16359_v1, %v16379_v0 }
 0x622   :  { %v7511_v46 = vpop.f32.mrb[78].mxu0  ;;  %18294 = vst [vmem:[#allocation71_spill] sm:$0xff] %v16468_v31  ;;  %v8443_v58 = vmul.f32 %v16364_v51, %v16395_v22 }
 0x623   :  { %18291 = vst [vmem:[#allocation16_spill] sm:$0xff] %v16456_v60  ;;  %v16462_v63 = vadd.f32 %v7511_v46, %v18292_v9  ;;  %v12265_v38 = vpop.f32.mrb[79].mxu0  ;;  %v8607_v46 = vmul.f32 %v16340_v36, %v8440_v53  ;;  %v8686_v8 = vadd.f32 %v8685_v57, %v8606_v3 }
 0x624   :  { %v8441_v38 = vmul.f32 %v16346_v35, %v16382_v37  ;;  %v16483_v37 = vpop.permute.xlu0 %8221 }
 0x625   :  { %v8687_v49 = vadd.f32 %v8686_v8, %v8607_v46  ;;  %18297 = vst [vmem:[#allocation18_spill] sm:$0xff] %v16483_v37  ;;  %v8444_v8 = vmul.f32 %v16377_v47, %v16392_v42 }
 0x626   :  { %v8608_v36 = vmul.f32 %v16346_v35, %v8441_v38 }
 0x628   :  { %v4423_v50 = vpop.f32.mrb[84].mxu1  ;;  %v7516_v10 = vpop.f32.mrb[80].mxu0  ;;  %v8688_v3 = vadd.f32 %v8687_v49, %v8608_v36  ;;  %v8445_v36 = vmul.f32 %v16385_v26, %v16411_v62 }
 0x629   :  { %v11552_v30 = vpop.f32.mrb[85].mxu1  ;;  %v16475_v19 = vadd.f32 %v7516_v10, %v18295_v15  ;;  %v12268_v25 = vpop.f32.mrb[81].mxu0  ;;  %v8521_v15 = vadd.f32 %v8520_v23, %v8441_v38  ;;  %v8610_v23 = vmul.f32 %v16364_v51, %v8443_v58 }
 0x62a   :  { %v4426_v59 = vpop.f32.mrb[86].mxu1  ;;  %v7519_v9 = vpop.f32.mrb[82].mxu0  ;;  %v8609_v25 = vmul.f32 %v16359_v1, %v8442_v12 }
 0x62b   :  { %v11553_v2 = vpop.f32.mrb[87].mxu1  ;;  %v16480_v30 = vadd.f32 %v7519_v9, %v18296_v7  ;;  %v12269_v28 = vpop.f32.mrb[83].mxu0  ;;  %v8522_v7 = vadd.f32 %v8521_v15, %v8442_v12 }
 0x62c   :  { %v16485_v10 = vpop.permute.xlu1 %8216  ;;  %v8689_v38 = vadd.f32 %v8688_v3, %v8609_v25  ;;  %v16500_v12 = vpop.permute.xlu0 %8231 }
 0x62d   :  { %18298 = vst [vmem:[#allocation19_spill] sm:$0xff] %v16485_v10  ;;  %v8523_v4 = vadd.f32 %v8522_v7, %v8443_v58  ;;  %18301 = vst [vmem:[#allocation74_spill] sm:$0xff] %v16500_v12 }
 0x62e   :  { %v8690_v49 = vadd.f32 %v8689_v38, %v8610_v23 }
 0x62f   :  { %v8524_v15 = vadd.f32 %v8523_v4, %v8444_v8  ;;  %v8447_v4 = vmul.f32 %v16404_v54, %v16426_v48 }
 0x630   :  { %v4431_v2 = vpop.f32.mrb[88].mxu1  ;;  %v7524_v53 = vpop.f32.mrb[84].mxu0 }
 0x631   :  { %v11556_v57 = vpop.f32.mrb[89].mxu1  ;;  %v16492_v46 = vadd.f32 %v7524_v53, %v4423_v50  ;;  %v12272_v9 = vpop.f32.mrb[85].mxu0  ;;  %v8525_v42 = vadd.f32 %v8524_v15, %v8445_v36 }
 0x632   :  { %v4434_v28 = vpop.f32.mrb[90].mxu1  ;;  %v7527_v0 = vpop.f32.mrb[86].mxu0  ;;  %v8611_v57 = vmul.f32 %v16377_v47, %v8444_v8 }
 0x633   :  { %18299 = vst [vmem:[#allocation72_spill] sm:$0xff] %v16492_v46  ;;  %v11557_v35 = vpop.f32.mrb[91].mxu1  ;;  %v16495_v1 = vadd.f32 %v7527_v0, %v4426_v59  ;;  %v12273_v22 = vpop.f32.mrb[87].mxu0 }
 0x634   :  { %v16502_v50 = vpop.permute.xlu1 %8226  ;;  %v8446_v35 = vmul.f32 %v16398_v39, %v16408_v43  ;;  %v8691_v59 = vadd.f32 %v8690_v49, %v8611_v57  ;;  %v8612_v22 = vmul.f32 %v16385_v26, %v8445_v36  ;;  %v8448_v57 = vmul.f32 %v16417_v33, %v16424_v13 }
 0x635   :  { %18300 = vst [vmem:[#allocation73_spill] sm:$0xff] %v16495_v1  ;;  %18302 = vst [vmem:[#allocation75_spill] sm:$0xff] %v16502_v50 }
 0x636   :  { %v8613_v47 = vmul.f32 %v16398_v39, %v8446_v35  ;;  %v8692_v23 = vadd.f32 %v8691_v59, %v8612_v22  ;;  %v8449_v59 = vmul.f32 %v16422_v41, %v16439_v14 }
 0x638   :  { %v4439_v25 = vpop.f32.mrb[92].mxu1  ;;  %v7532_v53 = vpop.f32.mrb[88].mxu0 }
 0x639   :  { %v11560_v0 = vpop.f32.mrb[93].mxu1  ;;  %v16507_v58 = vadd.f32 %v7532_v53, %v4431_v2  ;;  %v12276_v3 = vpop.f32.mrb[89].mxu0  ;;  %v8693_v53 = vadd.f32 %v8692_v23, %v8613_v47  ;;  %v8450_v47 = vmul.f32 %v16435_v24, %v16437_v61 }
 0x63a   :  { %v4442_v7 = vpop.f32.mrb[94].mxu1  ;;  %v7535_v9 = vpop.f32.mrb[90].mxu0  ;;  %v8526_v0 = vadd.f32 %v8525_v42, %v8446_v35 }
 0x63b   :  { %18303 = vst [vmem:[#allocation76_spill] sm:$0xff] %v16507_v58  ;;  %v11561_v62 = vpop.f32.mrb[95].mxu1  ;;  %v16512_v8 = vadd.f32 %v7535_v9, %v4434_v28  ;;  %v12277_v38 = vpop.f32.mrb[91].mxu0  ;;  %v8615_v28 = vmul.f32 %v16417_v33, %v8448_v57 }
 0x63c   :  { %v16516_v2 = vpop.permute.xlu0 %8241  ;;  %v16518_v49 = vpop.permute.xlu1 %8236  ;;  %v8614_v62 = vmul.f32 %v16404_v54, %v8447_v4  ;;  %v8527_v43 = vadd.f32 %v8526_v0, %v8447_v4  ;;  %v8616_v0 = vmul.f32 %v16422_v41, %v8449_v59 }
 0x63d   :  { %18304 = vst [vmem:[#allocation77_spill] sm:$0xff] %v16516_v2  ;;  %18305 = vst [vmem:[#allocation78_spill] sm:$0xff] %v16518_v49 }
 0x63e   :  { %v8694_v13 = vadd.f32 %v8693_v53, %v8614_v62  ;;  %v8528_v48 = vadd.f32 %v8527_v43, %v8448_v57  ;;  %v8451_v53 = vmul.f32 %v16443_v27, %v16452_v17 }
 0x640   :  { %v4447_v36 = vpop.f32.mrb[96].mxu1  ;;  %v7540_v15 = vpop.f32.mrb[92].mxu0  ;;  %v8695_v4 = vadd.f32 %v8694_v13, %v8615_v28  ;;  %v8452_v13 = vmul.f32 %v16456_v60, %v16450_v6 }
 0x641   :  { %v11564_v3 = vpop.f32.mrb[97].mxu1  ;;  %v16524_v42 = vadd.f32 %v7540_v15, %v4439_v25  ;;  %v12280_v35 = vpop.f32.mrb[93].mxu0  ;;  %v8529_v25 = vadd.f32 %v8528_v48, %v8449_v59  ;;  %v8617_v15 = vmul.f32 %v16435_v24, %v8450_v47  ;;  %v8618_v59 = vmul.f32 %v16443_v27, %v8451_v53 }
 0x642   :  { %v4450_v22 = vpop.f32.mrb[98].mxu1  ;;  %v7543_v9 = vpop.f32.mrb[94].mxu0  ;;  %v8696_v35 = vadd.f32 %v8695_v4, %v8616_v0 }
 0x643   :  { %18306 = vst [vmem:[#allocation79_spill] sm:$0xff] %v16524_v42  ;;  %v11565_v38 = vpop.f32.mrb[99].mxu1  ;;  %v16528_v23 = vadd.f32 %v7543_v9, %v4442_v7  ;;  %v12281_v3 = vpop.f32.mrb[95].mxu0  ;;  %v8530_v7 = vadd.f32 %v8529_v25, %v8450_v47  ;;  %v8453_v47 = vmul.f32 %v16462_v63, %v16468_v31 }
 0x644   :  { %v16531_v33 = vpop.permute.xlu0 %8251  ;;  %v16533_v14 = vpop.permute.xlu1 %8246  ;;  %v8697_v48 = vadd.f32 %v8696_v35, %v8617_v15 }
 0x645   :  { %18307 = vst [vmem:[#allocation80_spill] sm:$0xff] %v16531_v33  ;;  %18308 = vst [vmem:[#allocation81_spill] sm:$0xff] %v16533_v14  ;;  %v8531_v41 = vadd.f32 %v8530_v7, %v8451_v53 }
 0x646   :  { %v8698_v0 = vadd.f32 %v8697_v48, %v8618_v59 }
 0x647   :  { %v8532_v25 = vadd.f32 %v8531_v41, %v8452_v13  ;;  %v8455_v41 = vmul.f32 %v16480_v30, %v16485_v10 }
 0x648   :  { %v4455_v43 = vpop.f32.mrb[100].mxu1  ;;  %v7548_v57 = vpop.f32.mrb[96].mxu0 }
 0x649   :  { %v11568_v62 = vpop.f32.mrb[101].mxu1  ;;  %v16540_v28 = vadd.f32 %v7548_v57, %v4447_v36  ;;  %v12284_v9 = vpop.f32.mrb[97].mxu0  ;;  %v8533_v6 = vadd.f32 %v8532_v25, %v8453_v47 }
 0x64a   :  { %v4458_v38 = vpop.f32.mrb[102].mxu1  ;;  %v7551_v3 = vpop.f32.mrb[98].mxu0  ;;  %v8619_v62 = vmul.f32 %v16456_v60, %v8452_v13 }
 0x64b   :  { %v11569_v61 = vpop.f32.mrb[103].mxu1  ;;  %v16543_v24 = vadd.f32 %v7551_v3, %v4450_v22  ;;  %v12285_v17 = vpop.f32.mrb[99].mxu0 }
 0x64c   :  { %v16548_v4 = vpop.permute.xlu0 %8261  ;;  %v16550_v36 = vpop.permute.xlu1 %8256  ;;  %v8454_v61 = vmul.f32 %v16475_v19, %v16466_v55  ;;  %v8699_v35 = vadd.f32 %v8698_v0, %v8619_v62  ;;  %v8620_v17 = vmul.f32 %v16462_v63, %v8453_v47  ;;  %v8456_v62 = vmul.f32 %v16492_v46, %v16483_v37 }
 0x64d   :  { %18309 = vst [vmem:[#allocation82_spill] sm:$0xff] %v16548_v4  ;;  %18310 = vst [vmem:[#allocation83_spill] sm:$0xff] %v16550_v36 }
 0x64e   :  { %v8621_v60 = vmul.f32 %v16475_v19, %v8454_v61  ;;  %v8700_v59 = vadd.f32 %v8699_v35, %v8620_v17  ;;  %v8457_v35 = vmul.f32 %v16495_v1, %v16502_v50 }
 0x650   :  { %v4463_v15 = vpop.f32.mrb[104].mxu1  ;;  %v7556_v57 = vpop.f32.mrb[100].mxu0 }
 0x651   :  { %v11572_v22 = vpop.f32.mrb[105].mxu1  ;;  %v16555_v53 = vadd.f32 %v7556_v57, %v4455_v43  ;;  %v12288_v7 = vpop.f32.mrb[101].mxu0  ;;  %v8701_v57 = vadd.f32 %v8700_v59, %v8621_v60  ;;  %v8458_v60 = vmul.f32 %v16507_v58, %v16500_v12 }
 0x652   :  { %v4466_v9 = vpop.f32.mrb[106].mxu1  ;;  %v7559_v3 = vpop.f32.mrb[102].mxu0  ;;  %v8534_v22 = vadd.f32 %v8533_v6, %v8454_v61 }
 0x653   :  { %18311 = vst [vmem:[#allocation84_spill] sm:$0xff] %v16555_v53  ;;  %v11573_v31 = vpop.f32.mrb[107].mxu1  ;;  %v16560_v13 = vadd.f32 %v7559_v3, %v4458_v38  ;;  %v12289_v48 = vpop.f32.mrb[103].mxu0  ;;  %v8623_v38 = vmul.f32 %v16492_v46, %v8456_v62 }
 0x654   :  { %v16564_v43 = vpop.permute.xlu0 %8271  ;;  %v16566_v0 = vpop.permute.xlu1 %8266  ;;  %v8622_v31 = vmul.f32 %v16480_v30, %v8455_v41  ;;  %v8535_v55 = vadd.f32 %v8534_v22, %v8455_v41  ;;  %v8624_v22 = vmul.f32 %v16495_v1, %v8457_v35 }
 0x655   :  { %18312 = vst [vmem:[#allocation85_spill] sm:$0xff] %v16560_v13  ;;  %18313 = vst [vmem:[#allocation86_spill] sm:$0xff] %v16564_v43 }
 0x656   :  { %18314 = vst [vmem:[#allocation87_spill] sm:$0xff] %v16566_v0  ;;  %v8702_v37 = vadd.f32 %v8701_v57, %v8622_v31  ;;  %v8536_v10 = vadd.f32 %v8535_v55, %v8456_v62  ;;  %v8459_v57 = vmul.f32 %v16512_v8, %v16518_v49 }
 0x658   :  { %v4471_v47 = vpop.f32.mrb[108].mxu1  ;;  %v7564_v25 = vpop.f32.mrb[104].mxu0  ;;  %v8703_v41 = vadd.f32 %v8702_v37, %v8623_v38  ;;  %v8460_v37 = vmul.f32 %v16524_v42, %v16516_v2 }
 0x659   :  { %v11576_v7 = vpop.f32.mrb[109].mxu1  ;;  %v16572_v6 = vadd.f32 %v7564_v25, %v4463_v15  ;;  %v12292_v61 = vpop.f32.mrb[105].mxu0  ;;  %v8537_v15 = vadd.f32 %v8536_v10, %v8457_v35  ;;  %v8625_v25 = vmul.f32 %v16507_v58, %v8458_v60  ;;  %v8626_v35 = vmul.f32 %v16512_v8, %v8459_v57 }
 0x65a   :  { %v4474_v17 = vpop.f32.mrb[110].mxu1  ;;  %v7567_v3 = vpop.f32.mrb[106].mxu0  ;;  %v8704_v61 = vadd.f32 %v8703_v41, %v8624_v22 }
 0x65b   :  { %18315 = vst [vmem:[#allocation88_spill] sm:$0xff] %v16572_v6  ;;  %v11577_v48 = vpop.f32.mrb[111].mxu1  ;;  %v16576_v59 = vadd.f32 %v7567_v3, %v4466_v9  ;;  %v12293_v7 = vpop.f32.mrb[107].mxu0  ;;  %v8538_v9 = vadd.f32 %v8537_v15, %v8458_v60  ;;  %v8461_v60 = vmul.f32 %v16528_v23, %v16533_v14 }
 0x65c   :  { %v16579_v46 = vpop.permute.xlu0 %8281  ;;  %v16581_v50 = vpop.permute.xlu1 %8276  ;;  %v8705_v10 = vadd.f32 %v8704_v61, %v8625_v25 }
 0x65d   :  { %18316 = vst [vmem:[#allocation89_spill] sm:$0xff] %v16579_v46  ;;  %18317 = vst [vmem:[#allocation90_spill] sm:$0xff] %v16581_v50  ;;  %v8539_v1 = vadd.f32 %v8538_v9, %v8459_v57 }
 0x65e   :  { %v8706_v22 = vadd.f32 %v8705_v10, %v8626_v35 }
 0x65f   :  { %v8540_v15 = vadd.f32 %v8539_v1, %v8460_v37  ;;  %v8463_v1 = vmul.f32 %v16543_v24, %v16550_v36 }
 0x660   :  { %v4479_v55 = vpop.f32.mrb[112].mxu1  ;;  %v7572_v62 = vpop.f32.mrb[108].mxu0 }
 0x661   :  { %v11580_v31 = vpop.f32.mrb[113].mxu1  ;;  %v16588_v38 = vadd.f32 %v7572_v62, %v4471_v47  ;;  %v12296_v3 = vpop.f32.mrb[109].mxu0  ;;  %v8541_v2 = vadd.f32 %v8540_v15, %v8461_v60 }
 0x662   :  { %v4482_v48 = vpop.f32.mrb[114].mxu1  ;;  %v7575_v7 = vpop.f32.mrb[110].mxu0  ;;  %v8627_v31 = vmul.f32 %v16524_v42, %v8460_v37 }
 0x663   :  { %18318 = vst [vmem:[#allocation91_spill] sm:$0xff] %v16588_v38  ;;  %v11581_v12 = vpop.f32.mrb[115].mxu1  ;;  %v16591_v58 = vadd.f32 %v7575_v7, %v4474_v17  ;;  %v12297_v49 = vpop.f32.mrb[111].mxu0 }
 0x664   :  { %v16596_v41 = vpop.permute.xlu0 %8291  ;;  %v16598_v47 = vpop.permute.xlu1 %8286  ;;  %v8462_v12 = vmul.f32 %v16540_v28, %v16531_v33  ;;  %v8707_v61 = vadd.f32 %v8706_v22, %v8627_v31  ;;  %v8628_v49 = vmul.f32 %v16528_v23, %v8461_v60  ;;  %v8464_v31 = vmul.f32 %v16555_v53, %v16548_v4 }
 0x665   :  { %18319 = vst [vmem:[#allocation92_spill] sm:$0xff] %v16596_v41  ;;  %18320 = vst [vmem:[#allocation93_spill] sm:$0xff] %v16598_v47 }
 0x666   :  { %v8629_v42 = vmul.f32 %v16540_v28, %v8462_v12  ;;  %v8708_v35 = vadd.f32 %v8707_v61, %v8628_v49  ;;  %v8465_v61 = vmul.f32 %v16560_v13, %v16566_v0 }
 0x668   :  { %v4487_v25 = vpop.f32.mrb[116].mxu1  ;;  %v7580_v62 = vpop.f32.mrb[112].mxu0 }
 0x669   :  { %v11584_v17 = vpop.f32.mrb[117].mxu1  ;;  %v16603_v57 = vadd.f32 %v7580_v62, %v4479_v55  ;;  %v12300_v9 = vpop.f32.mrb[113].mxu0  ;;  %v8709_v62 = vadd.f32 %v8708_v35, %v8629_v42  ;;  %v8466_v42 = vmul.f32 %v16572_v6, %v16564_v43 }
 0x66a   :  { %v4490_v3 = vpop.f32.mrb[118].mxu1  ;;  %v7583_v7 = vpop.f32.mrb[114].mxu0  ;;  %v8542_v17 = vadd.f32 %v8541_v2, %v8462_v12 }
 0x66b   :  { %v11585_v14 = vpop.f32.mrb[119].mxu1  ;;  %v16608_v37 = vadd.f32 %v7583_v7, %v4482_v48  ;;  %v12301_v10 = vpop.f32.mrb[115].mxu0  ;;  %v8631_v48 = vmul.f32 %v16555_v53, %v8464_v31 }
 0x66c   :  { %v16612_v55 = vpop.permute.xlu0 %8301  ;;  %v16614_v22 = vpop.permute.xlu1 %8296  ;;  %v8630_v14 = vmul.f32 %v16543_v24, %v8463_v1  ;;  %v8543_v33 = vadd.f32 %v8542_v17, %v8463_v1  ;;  %v8632_v17 = vmul.f32 %v16560_v13, %v8465_v61 }
 0x66d   :  { %18321 = vst [vmem:[#allocation94_spill] sm:$0xff] %v16612_v55  ;;  %18322 = vst [vmem:[#allocation95_spill] sm:$0xff] %v16614_v22 }
 0x66e   :  { %v8710_v4 = vadd.f32 %v8709_v62, %v8630_v14  ;;  %v8544_v36 = vadd.f32 %v8543_v33, %v8464_v31  ;;  %v8467_v62 = vmul.f32 %v16576_v59, %v16581_v50 }
 0x670   :  { %v4495_v60 = vpop.f32.mrb[120].mxu1  ;;  %v7588_v15 = vpop.f32.mrb[116].mxu0  ;;  %v8711_v1 = vadd.f32 %v8710_v4, %v8631_v48  ;;  %v8468_v4 = vmul.f32 %v16588_v38, %v16579_v46 }
 0x671   :  { %v11588_v9 = vpop.f32.mrb[121].mxu1  ;;  %v16620_v2 = vadd.f32 %v7588_v15, %v4487_v25  ;;  %v12304_v12 = vpop.f32.mrb[117].mxu0  ;;  %v8545_v25 = vadd.f32 %v8544_v36, %v8465_v61  ;;  %v8633_v15 = vmul.f32 %v16572_v6, %v8466_v42  ;;  %v8634_v61 = vmul.f32 %v16576_v59, %v8467_v62 }
 0x672   :  { %v4498_v49 = vpop.f32.mrb[122].mxu1  ;;  %v7591_v7 = vpop.f32.mrb[118].mxu0  ;;  %v8712_v12 = vadd.f32 %v8711_v1, %v8632_v17 }
 0x673   :  { %18323 = vst [vmem:[#allocation96_spill] sm:$0xff] %v16620_v2  ;;  %v11589_v10 = vpop.f32.mrb[123].mxu1  ;;  %v16624_v35 = vadd.f32 %v7591_v7, %v4490_v3  ;;  %v12305_v9 = vpop.f32.mrb[119].mxu0  ;;  %v8546_v3 = vadd.f32 %v8545_v25, %v8466_v42  ;;  %v8469_v42 = vmul.f32 %v16591_v58, %v16598_v47 }
 0x674   :  { %v16627_v53 = vpop.permute.xlu0 %8311  ;;  %v16629_v0 = vpop.permute.xlu1 %8306  ;;  %v8713_v36 = vadd.f32 %v8712_v12, %v8633_v15 }
 0x675   :  { %18324 = vst [vmem:[#allocation97_spill] sm:$0xff] %v16624_v35  ;;  %18325 = vst [vmem:[#allocation98_spill] sm:$0xff] %v16627_v53  ;;  %v8547_v13 = vadd.f32 %v8546_v3, %v8467_v62 }
 0x676   :  { %18326 = vst [vmem:[#allocation99_spill] sm:$0xff] %v16629_v0  ;;  %v8714_v17 = vadd.f32 %v8713_v36, %v8634_v61 }
 0x677   :  { %v8548_v25 = vadd.f32 %v8547_v13, %v8468_v4  ;;  %v8471_v13 = vmul.f32 %v16608_v37, %v16614_v22 }
 0x678   :  { %v4503_v33 = vpop.f32.mrb[124].mxu1  ;;  %v7596_v31 = vpop.f32.mrb[120].mxu0 }
 0x679   :  { %v11592_v14 = vpop.f32.mrb[125].mxu1  ;;  %v16636_v48 = vadd.f32 %v7596_v31, %v4495_v60  ;;  %v12308_v7 = vpop.f32.mrb[121].mxu0  ;;  %v8549_v46 = vadd.f32 %v8548_v25, %v8469_v42 }
 0x67a   :  { %v4506_v10 = vpop.f32.mrb[126].mxu1  ;;  %v7599_v9 = vpop.f32.mrb[122].mxu0  ;;  %v8635_v14 = vmul.f32 %v16588_v38, %v8468_v4 }
 0x67b   :  { %18327 = vst [vmem:[#allocation100_spill] sm:$0xff] %v16636_v48  ;;  %v11593_v43 = vpop.f32.mrb[127].mxu1  ;;  %v16639_v6 = vadd.f32 %v7599_v9, %v4498_v49  ;;  %v12309_v50 = vpop.f32.mrb[123].mxu0 }
 0x67c   :  { %v16644_v1 = vpop.permute.xlu0 %8321  ;;  %v16646_v60 = vpop.permute.xlu1 %8316  ;;  %v8470_v43 = vmul.f32 %v16603_v57, %v16596_v41  ;;  %v8715_v12 = vadd.f32 %v8714_v17, %v8635_v14  ;;  %v8636_v50 = vmul.f32 %v16591_v58, %v8469_v42  ;;  %v8472_v14 = vmul.f32 %v16620_v2, %v16612_v55 }
 0x67d   :  { %18328 = vst [vmem:[#allocation101_spill] sm:$0xff] %v16644_v1  ;;  %18329 = vst [vmem:[#allocation102_spill] sm:$0xff] %v16646_v60 }
 0x67e   :  { %v8637_v38 = vmul.f32 %v16603_v57, %v8470_v43  ;;  %v8716_v61 = vadd.f32 %v8715_v12, %v8636_v50  ;;  %v8473_v12 = vmul.f32 %v16624_v35, %v16629_v0 }
 0x680   :  { %v4511_v15 = vpop.f32.mrb[128].mxu1  ;;  %v7604_v31 = vpop.f32.mrb[124].mxu0 }
 0x681   :  { %v11596_v49 = vpop.f32.mrb[129].mxu1  ;;  %v16651_v62 = vadd.f32 %v7604_v31, %v4503_v33  ;;  %v12312_v3 = vpop.f32.mrb[125].mxu0  ;;  %v8717_v31 = vadd.f32 %v8716_v61, %v8637_v38  ;;  %v8474_v38 = vmul.f32 %v16636_v48, %v16627_v53 }
 0x682   :  { %v4514_v7 = vpop.f32.mrb[130].mxu1  ;;  %v7607_v9 = vpop.f32.mrb[126].mxu0  ;;  %v8550_v49 = vadd.f32 %v8549_v46, %v8470_v43 }
 0x683   :  { %18330 = vst [vmem:[#allocation103_spill] sm:$0xff] %v16651_v62  ;;  %v11597_v47 = vpop.f32.mrb[131].mxu1  ;;  %v16656_v4 = vadd.f32 %v7607_v9, %v4506_v10  ;;  %v12313_v36 = vpop.f32.mrb[127].mxu0  ;;  %v8639_v10 = vmul.f32 %v16620_v2, %v8472_v14 }
 0x684   :  { %v16660_v33 = vpop.permute.xlu0 %8331  ;;  %v16662_v17 = vpop.permute.xlu1 %8326  ;;  %v8638_v47 = vmul.f32 %v16608_v37, %v8471_v13  ;;  %v8551_v41 = vadd.f32 %v8550_v49, %v8471_v13  ;;  %v8640_v49 = vmul.f32 %v16624_v35, %v8473_v12 }
 0x685   :  { %18331 = vst [vmem:[#allocation104_spill] sm:$0xff] %v16660_v33  ;;  %18332 = vst [vmem:[#allocation105_spill] sm:$0xff] %v16662_v17 }
 0x686   :  { %v8718_v55 = vadd.f32 %v8717_v31, %v8638_v47  ;;  %v8552_v22 = vadd.f32 %v8551_v41, %v8472_v14  ;;  %v8475_v31 = vmul.f32 %v16639_v6, %v16646_v60 }
 0x688   :  { %v4519_v42 = vpop.f32.mrb[132].mxu1  ;;  %v7612_v25 = vpop.f32.mrb[128].mxu0  ;;  %v8719_v13 = vadd.f32 %v8718_v55, %v8639_v10  ;;  %v8476_v55 = vmul.f32 %v16651_v62, %v16644_v1 }
 0x689   :  { %v11600_v3 = vpop.f32.mrb[133].mxu1  ;;  %v16668_v46 = vadd.f32 %v7612_v25, %v4511_v15  ;;  %v12316_v43 = vpop.f32.mrb[129].mxu0  ;;  %v8553_v15 = vadd.f32 %v8552_v22, %v8473_v12  ;;  %v8641_v25 = vmul.f32 %v16636_v48, %v8474_v38  ;;  %v8642_v12 = vmul.f32 %v16639_v6, %v8475_v31 }
 0x68a   :  { %v4522_v50 = vpop.f32.mrb[134].mxu1  ;;  %v7615_v9 = vpop.f32.mrb[130].mxu0  ;;  %v8720_v43 = vadd.f32 %v8719_v13, %v8640_v49 }
 0x68b   :  { %v11601_v36 = vpop.f32.mrb[135].mxu1  ;;  %v16672_v61 = vadd.f32 %v7615_v9, %v4514_v7  ;;  %v12317_v3 = vpop.f32.mrb[131].mxu0  ;;  %v8554_v7 = vadd.f32 %v8553_v15, %v8474_v38  ;;  %v8477_v38 = vmul.f32 %v16656_v4, %v16662_v17 }
 0x68c   :  { %v16675_v2 = vpop.permute.xlu0 %8341  ;;  %v16677_v0 = vpop.permute.xlu1 %8336  ;;  %v8721_v22 = vadd.f32 %v8720_v43, %v8641_v25 }
 0x68d   :  { %18333 = vst [vmem:[#allocation106_spill] sm:$0xff] %v16675_v2  ;;  %18334 = vst [vmem:[#allocation107_spill] sm:$0xff] %v16677_v0  ;;  %v8555_v35 = vadd.f32 %v8554_v7, %v8475_v31 }
 0x68e   :  { %v8722_v49 = vadd.f32 %v8721_v22, %v8642_v12 }
 0x68f   :  { %v8556_v15 = vadd.f32 %v8555_v35, %v8476_v55  ;;  %v8479_v35 = vmul.f32 %v16672_v61, %v16677_v0 }
 0x690   :  { %v4527_v41 = vpop.f32.mrb[136].mxu1  ;;  %v7620_v14 = vpop.f32.mrb[132].mxu0 }
 0x691   :  { %v11604_v47 = vpop.f32.mrb[137].mxu1  ;;  %v16684_v10 = vadd.f32 %v7620_v14, %v4519_v42  ;;  %v12320_v9 = vpop.f32.mrb[133].mxu0  ;;  %v8557_v1 = vadd.f32 %v8556_v15, %v8477_v38 }
 0x692   :  { %v4530_v36 = vpop.f32.mrb[138].mxu1  ;;  %v7623_v3 = vpop.f32.mrb[134].mxu0  ;;  %v8643_v47 = vmul.f32 %v16651_v62, %v8476_v55 }
 0x693   :  { %18335 = vst [vmem:[#allocation108_spill] sm:$0xff] %v16684_v10  ;;  %v11605_v53 = vpop.f32.mrb[139].mxu1  ;;  %v16687_v48 = vadd.f32 %v7623_v3, %v4522_v50  ;;  %v12321_v60 = vpop.f32.mrb[135].mxu0 }
 0x694   :  { %v16692_v13 = vpop.permute.xlu0 %8351  ;;  %v16694_v42 = vpop.permute.xlu1 %8346  ;;  %v8478_v53 = vmul.f32 %v16668_v46, %v16660_v33  ;;  %v8723_v43 = vadd.f32 %v8722_v49, %v8643_v47  ;;  %v8644_v60 = vmul.f32 %v16656_v4, %v8477_v38  ;;  %v8480_v47 = vmul.f32 %v16684_v10, %v16675_v2 }
 0x695   :  { %18336 = vst [vmem:[#allocation109_spill] sm:$0xff] %v16687_v48  ;;  %18337 = vst [vmem:[#allocation110_spill] sm:$0xff] %v16692_v13 }
 0x696   :  { %18338 = vst [vmem:[#allocation111_spill] sm:$0xff] %v16694_v42  ;;  %v8645_v62 = vmul.f32 %v16668_v46, %v8478_v53  ;;  %v8724_v12 = vadd.f32 %v8723_v43, %v8644_v60  ;;  %v8481_v43 = vmul.f32 %v16687_v48, %v16694_v42 }
 0x698   :  { %v4535_v25 = vpop.f32.mrb[140].mxu1  ;;  %v7628_v14 = vpop.f32.mrb[136].mxu0 }
 0x699   :  { %v11608_v50 = vpop.f32.mrb[141].mxu1  ;;  %v16699_v31 = vadd.f32 %v7628_v14, %v4527_v41  ;;  %v12324_v7 = vpop.f32.mrb[137].mxu0  ;;  %v8725_v14 = vadd.f32 %v8724_v12, %v8645_v62 }
 0x69a   :  { %v4538_v9 = vpop.f32.mrb[142].mxu1  ;;  %v7631_v3 = vpop.f32.mrb[138].mxu0  ;;  %v8558_v50 = vadd.f32 %v8557_v1, %v8478_v53 }
 0x69b   :  { %18339 = vst [vmem:[#allocation112_spill] sm:$0xff] %v16699_v31  ;;  %v11609_v17 = vpop.f32.mrb[143].mxu1  ;;  %v16704_v55 = vadd.f32 %v7631_v3, %v4530_v36  ;;  %v12325_v22 = vpop.f32.mrb[139].mxu0  ;;  %v8647_v36 = vmul.f32 %v16684_v10, %v8480_v47  ;;  %v8482_v62 = vmul.f32 %v16699_v31, %v16692_v13 }
 0x69c   :  { %v16708_v41 = vpop.permute.xlu0 %8361  ;;  %v16710_v49 = vpop.permute.xlu1 %8356  ;;  %v8646_v17 = vmul.f32 %v16672_v61, %v8479_v35  ;;  %v8559_v33 = vadd.f32 %v8558_v50, %v8479_v35  ;;  %v8648_v50 = vmul.f32 %v16687_v48, %v8481_v43 }
 0x69d   :  { %18340 = vst [vmem:[#allocation113_spill] sm:$0xff] %v16708_v41  ;;  %18341 = vst [vmem:[#allocation114_spill] sm:$0xff] %v16710_v49 }
 0x69e   :  { %v8726_v2 = vadd.f32 %v8725_v14, %v8646_v17  ;;  %v8560_v0 = vadd.f32 %v8559_v33, %v8480_v47  ;;  %v8483_v14 = vmul.f32 %v16704_v55, %v16710_v49 }
 0x6a0   :  { %v4543_v38 = vpop.f32.mrb[144].mxu1  ;;  %v7636_v15 = vpop.f32.mrb[140].mxu0  ;;  %v8727_v35 = vadd.f32 %v8726_v2, %v8647_v36 }
 0x6a1   :  { %v11612_v7 = vpop.f32.mrb[145].mxu1  ;;  %v16716_v1 = vadd.f32 %v7636_v15, %v4535_v25  ;;  %v12328_v53 = vpop.f32.mrb[141].mxu0  ;;  %v8561_v25 = vadd.f32 %v8560_v0, %v8481_v43  ;;  %v8649_v15 = vmul.f32 %v16699_v31, %v8482_v62  ;;  %v8650_v43 = vmul.f32 %v16704_v55, %v8483_v14 }
 0x6a2   :  { %v4546_v60 = vpop.f32.mrb[146].mxu1  ;;  %v7639_v3 = vpop.f32.mrb[142].mxu0  ;;  %v8728_v53 = vadd.f32 %v8727_v35, %v8648_v50 }
 0x6a3   :  { %18342 = vst [vmem:[#allocation115_spill] sm:$0xff] %v16716_v1  ;;  %v11613_v22 = vpop.f32.mrb[147].mxu1  ;;  %v16720_v12 = vadd.f32 %v7639_v3, %v4538_v9  ;;  %v12329_v7 = vpop.f32.mrb[143].mxu0  ;;  %v8562_v9 = vadd.f32 %v8561_v25, %v8482_v62  ;;  %v8484_v2 = vmul.f32 %v16716_v1, %v16708_v41 }
 0x6a4   :  { %v16723_v10 = vpop.permute.xlu0 %8371  ;;  %v16725_v42 = vpop.permute.xlu1 %8366  ;;  %v8729_v0 = vadd.f32 %v8728_v53, %v8649_v15 }
 0x6a5   :  { %18343 = vst [vmem:[#allocation116_spill] sm:$0xff] %v16723_v10  ;;  %18344 = vst [vmem:[#allocation117_spill] sm:$0xff] %v16725_v42  ;;  %v8563_v48 = vadd.f32 %v8562_v9, %v8483_v14  ;;  %v8485_v62 = vmul.f32 %v16720_v12, %v16725_v42 }
 0x6a6   :  { %v8730_v50 = vadd.f32 %v8729_v0, %v8650_v43 }
 0x6a7   :  { %v8564_v25 = vadd.f32 %v8563_v48, %v8484_v2 }
 0x6a8   :  { %v4551_v33 = vpop.f32.mrb[148].mxu1  ;;  %v7644_v47 = vpop.f32.mrb[144].mxu0 }
 0x6a9   :  { %v11616_v17 = vpop.f32.mrb[149].mxu1  ;;  %v16732_v36 = vadd.f32 %v7644_v47, %v4543_v38  ;;  %v12332_v3 = vpop.f32.mrb[145].mxu0  ;;  %v8565_v41 = vadd.f32 %v8564_v25, %v8485_v62 }
 0x6aa   :  { %v4554_v22 = vpop.f32.mrb[150].mxu1  ;;  %v7647_v7 = vpop.f32.mrb[146].mxu0  ;;  %v8651_v17 = vmul.f32 %v16716_v1, %v8484_v2 }
 0x6ab   :  { %v11617_v13 = vpop.f32.mrb[151].mxu1  ;;  %v16735_v31 = vadd.f32 %v7647_v7, %v4546_v60  ;;  %v12333_v49 = vpop.f32.mrb[147].mxu0 }
 0x6ac   :  { %v16740_v35 = vpop.permute.xlu0 %8381  ;;  %v16742_v38 = vpop.permute.xlu1 %8376  ;;  %v8486_v13 = vmul.f32 %v16732_v36, %v16723_v10  ;;  %v8731_v53 = vadd.f32 %v8730_v50, %v8651_v17  ;;  %v8652_v49 = vmul.f32 %v16720_v12, %v8485_v62 }
 0x6ad   :  { %18345 = vst [vmem:[#allocation118_spill] sm:$0xff] %v16740_v35  ;;  %18346 = vst [vmem:[#allocation119_spill] sm:$0xff] %v16742_v38  ;;  %v8487_v48 = vmul.f32 %v16735_v31, %v16742_v38 }
 0x6ae   :  { %v8653_v1 = vmul.f32 %v16732_v36, %v8486_v13  ;;  %v8732_v43 = vadd.f32 %v8731_v53, %v8652_v49 }
 0x6b0   :  { %v4559_v15 = vpop.f32.mrb[152].mxu1  ;;  %v7652_v47 = vpop.f32.mrb[148].mxu0 }
 0x6b1   :  { %v11620_v60 = vpop.f32.mrb[153].mxu1  ;;  %v16747_v14 = vadd.f32 %v7652_v47, %v4551_v33  ;;  %v12336_v9 = vpop.f32.mrb[149].mxu0  ;;  %v8733_v47 = vadd.f32 %v8732_v43, %v8653_v1 }
 0x6b2   :  { %v4562_v3 = vpop.f32.mrb[154].mxu1  ;;  %v7655_v7 = vpop.f32.mrb[150].mxu0  ;;  %v8566_v60 = vadd.f32 %v8565_v41, %v8486_v13 }
 0x6b3   :  { %18347 = vst [vmem:[#allocation120_spill] sm:$0xff] %v16747_v14  ;;  %v11621_v42 = vpop.f32.mrb[155].mxu1  ;;  %v16752_v2 = vadd.f32 %v7655_v7, %v4554_v22  ;;  %v12337_v0 = vpop.f32.mrb[151].mxu0  ;;  %v8488_v17 = vmul.f32 %v16747_v14, %v16740_v35 }
 0x6b4   :  { %v16756_v33 = vpop.permute.xlu0 %8391  ;;  %v16758_v50 = vpop.permute.xlu1 %8386  ;;  %v8654_v42 = vmul.f32 %v16735_v31, %v8487_v48  ;;  %v8567_v10 = vadd.f32 %v8566_v60, %v8487_v48 }
 0x6b5   :  { %18348 = vst [vmem:[#allocation121_spill] sm:$0xff] %v16752_v2  ;;  %18349 = vst [vmem:[#allocation122_spill] sm:$0xff] %v16756_v33  ;;  %v8655_v22 = vmul.f32 %v16747_v14, %v8488_v17  ;;  %v8489_v53 = vmul.f32 %v16752_v2, %v16758_v50 }
 0x6b6   :  { %18350 = vst [vmem:[#allocation123_spill] sm:$0xff] %v16758_v50  ;;  %v8734_v35 = vadd.f32 %v8733_v47, %v8654_v42  ;;  %v8568_v38 = vadd.f32 %v8567_v10, %v8488_v17 }
 0x6b7   :  { %v8656_v60 = vmul.f32 %v16752_v2, %v8489_v53 }
 0x6b8   :  { %v4567_v62 = vpop.f32.mrb[156].mxu1  ;;  %v7660_v25 = vpop.f32.mrb[152].mxu0  ;;  %v8735_v48 = vadd.f32 %v8734_v35, %v8655_v22 }
 0x6b9   :  { %v11624_v9 = vpop.f32.mrb[157].mxu1  ;;  %v16764_v41 = vadd.f32 %v7660_v25, %v4559_v15  ;;  %v12340_v13 = vpop.f32.mrb[153].mxu0  ;;  %v8569_v15 = vadd.f32 %v8568_v38, %v8489_v53 }
 0x6ba   :  { %v4570_v49 = vpop.f32.mrb[158].mxu1  ;;  %v7663_v7 = vpop.f32.mrb[154].mxu0  ;;  %v8736_v13 = vadd.f32 %v8735_v48, %v8656_v60 }
 0x6bb   :  { %18351 = vst [vmem:[#allocation124_spill] sm:$0xff] %v16764_v41  ;;  %v11625_v0 = vpop.f32.mrb[159].mxu1  ;;  %v8490_v1 = vmul.f32 %v16764_v41, %v16756_v33  ;;  %v16768_v43 = vadd.f32 %v7663_v7, %v4562_v3  ;;  %v12341_v9 = vpop.f32.mrb[155].mxu0 }
 0x6bc   :  { %v16771_v14 = vpop.permute.xlu1 %8396  ;;  %v16773_v50 = vpop.permute.xlu0 %8401 }
 0x6bd   :  { %18352 = vst [vmem:[#allocation125_spill] sm:$0xff] %v16768_v43  ;;  %18353 = vst [vmem:[#allocation126_spill] sm:$0xff] %v16771_v14  ;;  %v8657_v25 = vmul.f32 %v16764_v41, %v8490_v1  ;;  %v8491_v47 = vmul.f32 %v16768_v43, %v16771_v14  ;;  %v8570_v3 = vadd.f32 %v8569_v15, %v8490_v1 }
 0x6be   :  { %18354 = vst [vmem:[#allocation127_spill] sm:$0xff] %v16773_v50 }
 0x6bf   :  { %v8737_v33 = vadd.f32 %v8736_v13, %v8657_v25  ;;  %v8658_v2 = vmul.f32 %v16768_v43, %v8491_v47 }
 0x6c0   :  { %v4575_v10 = vpop.f32.mrb[160].mxu1  ;;  %v7668_v17 = vpop.f32.mrb[156].mxu0 }
 0x6c1   :  { %v11628_v42 = vpop.f32.mrb[161].mxu1  ;;  %v16778_v7 = vadd.f32 %v7668_v17, %v4567_v62  ;;  %v12344_v35 = vpop.f32.mrb[157].mxu0  ;;  %v8738_v48 = vadd.f32 %v8737_v33, %v8658_v2 }
 0x6c2   :  { %v4578_v22 = vpop.f32.mrb[162].mxu1  ;;  %v7671_v0 = vpop.f32.mrb[158].mxu0  ;;  %v8571_v42 = vadd.f32 %v8570_v3, %v8491_v47 }
 0x6c3   :  { %18355 = vst [vmem:[#allocation128_spill] sm:$0xff] %v16778_v7  ;;  %v11629_v9 = vpop.f32.mrb[163].mxu1  ;;  %v8492_v38 = vmul.f32 %v16778_v7, %v16773_v50  ;;  %v16783_v53 = vadd.f32 %v7671_v0, %v4570_v49  ;;  %v12345_v14 = vpop.f32.mrb[159].mxu0 }
 0x6c4   :  { %v16785_v41 = vpop.permute.xlu1 %8406  ;;  %v16791_v22 = vpop.permute.xlu0 %8411 }
 0x6c5   :  { %18356 = vst [vmem:[#allocation129_spill] sm:$0xff] %v16783_v53  ;;  %18357 = vst [vmem:[#allocation130_spill] sm:$0xff] %v16785_v41  ;;  %v8659_v1 = vmul.f32 %v16778_v7, %v8492_v38  ;;  %v8493_v62 = vmul.f32 %v16783_v53, %v16785_v41  ;;  %v8572_v60 = vadd.f32 %v8571_v42, %v8492_v38 }
 0x6c7   :  { %v8739_v25 = vadd.f32 %v8738_v48, %v8659_v1  ;;  %v8660_v17 = vmul.f32 %v16783_v53, %v8493_v62  ;;  %v8573_v14 = vadd.f32 %v8572_v60, %v8493_v62 }
 0x6c8   :  { %v7676_v15 = vpop.f32.mrb[160].mxu0 }
 0x6c9   :  { %v12446_v13 = vadd.f32 %v7676_v15, %v4575_v10  ;;  %v12348_v35 = vpop.f32.mrb[161].mxu0  ;;  %v8740_v3 = vadd.f32 %v8739_v25, %v8660_v17 }
 0x6ca   :  { %v7679_v49 = vpop.f32.mrb[162].mxu0 }
 0x6cb   :  { %v8494_v0 = vmul.f32 %v12446_v13, %v16791_v22  ;;  %v12349_v47 = vpop.f32.mrb[163].mxu0 }
 0x6cd   :  { %v8574_v9 = vadd.f32 %v8573_v14, %v8494_v0  ;;  %v8661_v50 = vmul.f32 %v12446_v13, %v8494_v0  ;;  %v8761_v14 = vlaneseq }
 0x6cf   :  { %v8575_v7 = vrot.slane %v8574_v9, 4  ;;  %v8741_v41 = vadd.f32 %v8740_v3, %v8661_v50  ;;  %v8762_v50 = vshrl.u32 %v8761_v14, 7  ;;  %v18363_v14 = vld [vmem:[#allocation38_spill] sm:$0xff] }
 0x6d1   :  { %v8576_v2 = vadd.f32 %v8575_v7, %v8574_v9  ;;  %v8742_v33 = vrot.slane %v8741_v41, 4  ;;  %v8763_v7 = vsub.s32 0, %v8762_v50 }
 0x6d3   :  { %v8577_v38 = vrot.slane %v8576_v2, 2  ;;  %v8743_v42 = vadd.f32 %v8742_v33, %v8741_v41  ;;  %v8753_v41 = vld [vmem:[%s18024_s2] sm:$0x1]  ;;  %s14036_s2 = smov [#allocation6]  }
 0x6d5   :  { %v8578_v1 = vadd.f32 %v8577_v38, %v8576_v2  ;;  %v8744_v48 = vrot.slane %v8743_v42, 2  ;;  %v18358_v38 = vld [vmem:[#allocation20_spill] sm:$0xff] }
 0x6d7   :  { %v8579_v10 = vrot.slane %v8578_v1, 1  ;;  %v8745_v15 = vadd.f32 %v8744_v48, %v8743_v42 }
 0x6d9   :  { %v8580_v35 = vadd.f32 %v8579_v10, %v8578_v1  ;;  %v8746_v53 = vrot.slane %v8745_v15, 1  ;;  %v18359_v1 = vld [vmem:[#allocation21_spill] sm:$0xff] }
 0x6db   :  { %v8747_v49 = vadd.f32 %v8746_v53, %v8745_v15  ;;  %v8748_v62 = vmul.f32 0.001953125, %v8580_v35  ;;  %v8757_v53 = vld [vmem:[%s18025_s3] sm:$0x1]  ;;  %s9507_s3 = sshll.u32 %s14036_s2, 4  ;;  %s9508_s3 = int_to_ptr.vmem [resolvable:$true] %s9507_s3 }
 0x6dc   :  { %s14004_s12 = scalar_lea.vmem %s9508_s3, 5184  ;;  %p14009_p9 = scmp.lt.s32.totalorder %s9508_s3, %s9508_s3 }
 0x6dd   :  { %v8749_v60 = vmul.f32 0.001953125, %v8747_v49  ;;  %v8750_v43 = vmul.f32 %v8748_v62, %v8748_v62  ;;  %p14005_p8 = scmp.ne.s32.totalorder %s9508_s3, %s14004_s12  ;;  %p14010_p10 = scmp.lt.s32.totalorder %s14004_s12, %s14004_s12 }
 0x6df   :  { %v8751_v47 = vsub.f32 %v8749_v60, %v8750_v43  ;;  %p14011_p11 = por %p14010_p10, %p14009_p9 }
 0x6e1   :  { %v8752_v25 = vmax.f32 %v8751_v47, 0.0  ;;  %p14012_p12 = pnand %p14011_p11, %p14005_p8 }
 0x6e3   :  { %v8754_v17 = vadd.f32 1e-05, %v8752_v25 }
 0x6e5   :  { %13845 = vrsqrt.f32 %v8754_v17  ;;  %v18362_v17 = vld [vmem:[#allocation35_spill] sm:$0xff] }
 0x6ef   :  { %v13846_v0 = vpop.eup %13845 }
 0x6f0   :  { %v8756_v3 = vmul.f32 %v13846_v0, %v8753_v41 }
 0x6f2   :  { %v8758_v9 = vmul.f32 %v8756_v3, %v8748_v62  ;;  %v16800_v2 = vrot.slane %v8756_v3, %v8763_v7  ;;  %v18366_v3 = vld [vmem:[#allocation44_spill] sm:$0xff] }
 0x6f4   :  { %v8759_v43 = vsub.f32 %v8757_v53, %v8758_v9  ;;  %v8846_v33 = vmul.f32 %v12446_v13, %v16800_v2  ;;  %v16805_v42 = vmul.f32 %v18358_v38, %v16800_v2  ;;  %v16809_v48 = vmul.f32 %v18359_v1, %v16800_v2  ;;  %v18367_v9 = vld [vmem:[#allocation45_spill] sm:$0xff]  ;;  %v18369_v1 = vld [vmem:[#allocation51_spill] sm:$0xff] }
 0x6f5   :  { %v16813_v10 = vmul.f32 %v16108_v29, %v16800_v2  ;;  %v16817_v15 = vmul.f32 %v16113_v34, %v16800_v2  ;;  %v16821_v35 = vmul.f32 %v16122_v56, %v16800_v2  ;;  %v16825_v13 = vmul.f32 %v16127_v45, %v16800_v2 }
 0x6f6   :  { %v16827_v49 = vrot.slane %v8759_v43, %v8763_v7  ;;  %v16831_v62 = vmul.f32 %v16136_v44, %v16800_v2  ;;  %v16835_v29 = vmul.f32 %v16141_v32, %v16800_v2  ;;  %v16839_v34 = vmul.f32 %v16150_v18, %v16800_v2  ;;  %v18365_v7 = vld [vmem:[#allocation41_spill] sm:$0xff] }
 0x6f7   :  { %v16843_v56 = vmul.f32 %v16155_v16, %v16800_v2  ;;  %v16847_v45 = vmul.f32 %v16166_v20, %v16800_v2  ;;  %v16851_v44 = vmul.f32 %v16171_v52, %v16800_v2  ;;  %v16855_v32 = vmul.f32 %v16184_v40, %v16800_v2  ;;  %v18360_v52 = vld [vmem:[#allocation31_spill] sm:$0xff]  ;;  %v18361_v40 = vld [vmem:[#allocation32_spill] sm:$0xff] }
 0x6f8   :  { %v8933_v60 = vadd.f32 %v16827_v49, %v8846_v33  ;;  %v16860_v18 = vmul.f32 %v16193_v11, %v16800_v2  ;;  %v16864_v16 = vmul.f32 %v16206_v21, %v16800_v2  ;;  %v16868_v20 = vmul.f32 %v16211_v5, %v16800_v2  ;;  %v18364_v5 = vld [vmem:[#allocation40_spill] sm:$0xff] }
 0x6f9   :  { %v16872_v47 = vmul.f32 %v18360_v52, %v16800_v2  ;;  %v16876_v25 = vmul.f32 %v18361_v40, %v16800_v2  ;;  %v16880_v11 = vmul.f32 %v18362_v17, %v16800_v2  ;;  %v16884_v21 = vmul.f32 %v18363_v14, %v16800_v2  ;;  %v18368_v33 = vld [vmem:[#allocation48_spill] sm:$0xff]  ;;  %v18370_v52 = vld [vmem:[#allocation54_spill] sm:$0xff]  ;;  %v18371_v14 = vld [vmem:[#allocation55_spill] sm:$0xff] }
 0x6fa   :  { %v9014_v50 = vmax.f32 %v8933_v60, 0.0  ;;  %v16888_v41 = vmul.f32 %v18364_v5, %v16800_v2  ;;  %v16892_v0 = vmul.f32 %v18365_v7, %v16800_v2  ;;  %v16896_v53 = vmul.f32 %v18366_v3, %v16800_v2  ;;  %v18372_v7 = vld [vmem:[#allocation58_spill] sm:$0xff] }
 0x6fb   :  { %v16900_v43 = vmul.f32 %v18367_v9, %v16800_v2  ;;  %v16904_v38 = vmul.f32 %v18368_v33, %v16800_v2  ;;  %v16908_v60 = vmul.f32 %v18369_v1, %v16800_v2  ;;  %v16912_v40 = vmul.f32 %v18370_v52, %v16800_v2  ;;  %v18373_v33 = vld [vmem:[#allocation61_spill] sm:$0xff] }
 0x6fc   :  { %v9095_v17 = vmul.f32 %v9014_v50, %v16791_v22  ;;  %v16917_v5 = vmul.f32 %v18371_v14, %v16800_v2  ;;  %v16921_v3 = vmul.f32 %v18372_v7, %v16800_v2  ;;  %v16925_v9 = vmul.f32 %v16364_v51, %v16800_v2  ;;  %v18377_v51 = vld [vmem:[#allocation9_spill] sm:$0xff] }
 0x6fd   :  { %v16929_v1 = vmul.f32 %v18373_v33, %v16800_v2  ;;  %v16933_v52 = vmul.f32 %v16385_v26, %v16800_v2  ;;  %v16937_v22 = vmul.f32 %v16398_v39, %v16800_v2  ;;  %v16941_v50 = vmul.f32 %v16404_v54, %v16800_v2  ;;  %v18378_v33 = vld [vmem:[#allocation13_spill] sm:$0xff]  ;;  %v18379_v26 = vld [vmem:[#allocation14_spill] sm:$0xff]  ;;  %v18380_v54 = vld [vmem:[#allocation16_spill] sm:$0xff] }
 0x6fe   :  { %v10049_v14 = vpack.c.bf16 %v9095_v17, %v9095_v17  ;;  %v16945_v7 = vmul.f32 %v18377_v51, %v16800_v2  ;;  %v16957_v39 = vmul.f32 %v16443_v27, %v16800_v2  ;;  %v16965_v17 = vmul.f32 %v16462_v63, %v16800_v2  ;;  %v18383_v27 = vld [vmem:[#allocation72_spill] sm:$0xff] }
 0x6ff   :  { %18374 = vst [vmem:[#allocation20_spill] sm:$0xff] %v16929_v1  ;;  %18375 = vst [vmem:[#allocation21_spill] sm:$0xff] %v16933_v52  ;;  %v16949_v1 = vmul.f32 %v18378_v33, %v16800_v2  ;;  %v16953_v52 = vmul.f32 %v18379_v26, %v16800_v2  ;;  %v16969_v51 = vmul.f32 %v16475_v19, %v16800_v2  ;;  %v18385_v63 = vld [vmem:[#allocation76_spill] sm:$0xff] }
 0x700   :  { %18376 = vst [vmem:[#allocation31_spill] sm:$0xff] %v16941_v50  ;;  %v16961_v50 = vmul.f32 %v18380_v54, %v16800_v2  ;;  %18382 = vst [vmem:[#allocation35_spill] sm:$0xff] %v16965_v17  ;;  %v16973_v33 = vmul.f32 %v16480_v30, %v16800_v2  ;;  %v16977_v26 = vmul.f32 %v18383_v27, %v16800_v2  ;;  %v18384_v54 = vld [vmem:[#allocation73_spill] sm:$0xff] }
 0x701   :  { %9501 = vst [vmem:[#allocation6 + $0x140] sm:$0xf] %v10049_v14  ;;  %v16985_v17 = vmul.f32 %v18385_v63, %v16800_v2  ;;  %v16989_v19 = vmul.f32 %v16512_v8, %v16800_v2  ;;  %v18388_v14 = vld [vmem:[#allocation79_spill] sm:$0xff]  ;;  %v16997_v27 = vmul.f32 %v16528_v23, %v16800_v2  ;;  %v17005_v63 = vmul.f32 %v16543_v24, %v16800_v2 }
 0x702   :  { %18381 = vst [vmem:[#allocation32_spill] sm:$0xff] %v16961_v50  ;;  %v16981_v50 = vmul.f32 %v18384_v54, %v16800_v2  ;;  %v16993_v30 = vmul.f32 %v18388_v14, %v16800_v2  ;;  %v17001_v54 = vmul.f32 %v16540_v28, %v16800_v2  ;;  %v17021_v28 = vmul.f32 %v16576_v59, %v16800_v2 }
 0x703   :  { %18386 = vst [vmem:[#allocation38_spill] sm:$0xff] %v16985_v17  ;;  %18387 = vst [vmem:[#allocation40_spill] sm:$0xff] %v16989_v19  ;;  %v18391_v17 = vld [vmem:[#allocation84_spill] sm:$0xff]  ;;  %v18392_v19 = vld [vmem:[#allocation85_spill] sm:$0xff] }
 0x704   :  { %18389 = vst [vmem:[#allocation41_spill] sm:$0xff] %v16993_v30  ;;  %18390 = vst [vmem:[#allocation44_spill] sm:$0xff] %v17001_v54  ;;  %v17009_v8 = vmul.f32 %v18391_v17, %v16800_v2  ;;  %v17013_v14 = vmul.f32 %v18392_v19, %v16800_v2  ;;  %v18393_v30 = vld [vmem:[#allocation88_spill] sm:$0xff]  ;;  %v18396_v54 = vld [vmem:[#allocation91_spill] sm:$0xff]  ;;  %v17029_v17 = vmul.f32 %v16591_v58, %v16800_v2 }
 0x705   :  { %v17017_v23 = vmul.f32 %v18393_v30, %v16800_v2  ;;  %18395 = vst [vmem:[#allocation48_spill] sm:$0xff] %v17021_v28  ;;  %v17025_v24 = vmul.f32 %v18396_v54, %v16800_v2  ;;  %v17033_v19 = vmul.f32 %v16603_v57, %v16800_v2  ;;  %v17037_v30 = vmul.f32 %v16608_v37, %v16800_v2  ;;  %v18400_v28 = vld [vmem:[#allocation97_spill] sm:$0xff] }
 0x706   :  { %v17045_v54 = vmul.f32 %v18400_v28, %v16800_v2  ;;  %v17053_v57 = vmul.f32 %v16639_v6, %v16800_v2  ;;  %v17065_v28 = vmul.f32 %v16668_v46, %v16800_v2  ;;  %v17085_v46 = vmul.f32 %v16704_v55, %v16800_v2 }
 0x707   :  { %18394 = vst [vmem:[#allocation45_spill] sm:$0xff] %v17017_v23  ;;  %18397 = vst [vmem:[#allocation51_spill] sm:$0xff] %v17025_v24  ;;  %v18399_v23 = vld [vmem:[#allocation96_spill] sm:$0xff] }
 0x708   :  { %18398 = vst [vmem:[#allocation54_spill] sm:$0xff] %v17033_v19  ;;  %v17041_v59 = vmul.f32 %v18399_v23, %v16800_v2  ;;  %v18401_v24 = vld [vmem:[#allocation100_spill] sm:$0xff]  ;;  %18403 = vst [vmem:[#allocation58_spill] sm:$0xff] %v17053_v57  ;;  %v18404_v19 = vld [vmem:[#allocation103_spill] sm:$0xff]  ;;  %v17061_v23 = vmul.f32 %v16656_v4, %v16800_v2 }
 0x709   :  { %v17049_v58 = vmul.f32 %v18401_v24, %v16800_v2  ;;  %v17057_v37 = vmul.f32 %v18404_v19, %v16800_v2  ;;  %18406 = vst [vmem:[#allocation9_spill] sm:$0xff] %v17065_v28  ;;  %v17069_v24 = vmul.f32 %v16672_v61, %v16800_v2  ;;  %v18408_v57 = vld [vmem:[#allocation109_spill] sm:$0xff]  ;;  %18411 = vst [vmem:[#allocation14_spill] sm:$0xff] %v17085_v46  ;;  %v18412_v28 = vld [vmem:[#allocation115_spill] sm:$0xff] }
 0x70a   :  { %v17077_v19 = vmul.f32 %v18408_v57, %v16800_v2  ;;  %v17089_v61 = vmul.f32 %v18412_v28, %v16800_v2  ;;  %v17097_v57 = vmul.f32 %v16732_v36, %v16800_v2  ;;  %v18418_v46 = vld [vmem:[#allocation121_spill] sm:$0xff] }
 0x70b   :  { %18402 = vst [vmem:[#allocation55_spill] sm:$0xff] %v17049_v58  ;;  %18405 = vst [vmem:[#allocation61_spill] sm:$0xff] %v17057_v37  ;;  %v18407_v58 = vld [vmem:[#allocation108_spill] sm:$0xff]  ;;  %v17109_v28 = vmul.f32 %v18418_v46, %v16800_v2  ;;  %v17129_v46 = vadd.f32 %v16827_v49, %v16805_v42  ;;  %v17149_v42 = vadd.f32 %v16827_v49, %v16825_v13 }
 0x70c   :  { %v17073_v6 = vmul.f32 %v18407_v58, %v16800_v2  ;;  %v18409_v37 = vld [vmem:[#allocation112_spill] sm:$0xff]  ;;  %18413 = vst [vmem:[#allocation16_spill] sm:$0xff] %v17089_v61  ;;  %v17093_v58 = vmul.f32 %v16720_v12, %v16800_v2  ;;  %18415 = vst [vmem:[#allocation73_spill] sm:$0xff] %v17097_v57  ;;  %v17169_v13 = vadd.f32 %v16827_v49, %v16847_v45 }
 0x70d   :  { %v17081_v4 = vmul.f32 %v18409_v37, %v16800_v2  ;;  %v17101_v37 = vmul.f32 %v16735_v31, %v16800_v2  ;;  %v18419_v61 = vld [vmem:[#allocation124_spill] sm:$0xff]  ;;  %v17189_v45 = vadd.f32 %v16827_v49, %v16868_v20  ;;  %v17209_v20 = vadd.f32 %v16827_v49, %v16888_v41 }
 0x70e   :  { %18414 = vst [vmem:[#allocation72_spill] sm:$0xff] %v17093_v58  ;;  %v17113_v12 = vmul.f32 %v18419_v61, %v16800_v2  ;;  %v18420_v58 = vld [vmem:[#allocation125_spill] sm:$0xff]  ;;  %v18421_v57 = vld [vmem:[#allocation128_spill] sm:$0xff]  ;;  %v17133_v61 = vadd.f32 %v16827_v49, %v16809_v48  ;;  %v17153_v48 = vadd.f32 %v16827_v49, %v16831_v62  ;;  %v17173_v62 = vadd.f32 %v16827_v49, %v16851_v44 }
 0x70f   :  { %18410 = vst [vmem:[#allocation13_spill] sm:$0xff] %v17081_v4  ;;  %18416 = vst [vmem:[#allocation76_spill] sm:$0xff] %v17101_v37  ;;  %v18417_v4 = vld [vmem:[#allocation120_spill] sm:$0xff]  ;;  %v17117_v36 = vmul.f32 %v18420_v58, %v16800_v2  ;;  %v17121_v31 = vmul.f32 %v18421_v57, %v16800_v2  ;;  %v18422_v37 = vld [vmem:[#allocation129_spill] sm:$0xff]  ;;  %v17137_v58 = vadd.f32 %v16827_v49, %v16813_v10 }
 0x710   :  { %v17105_v55 = vmul.f32 %v18417_v4, %v16800_v2  ;;  %v17125_v4 = vmul.f32 %v18422_v37, %v16800_v2  ;;  %v17141_v57 = vadd.f32 %v16827_v49, %v16817_v15  ;;  %v17145_v2 = vadd.f32 %v16827_v49, %v16821_v35  ;;  %v18430_v37 = vld [vmem:[#allocation20_spill] sm:$0xff] }
 0x711   :  { %v17157_v10 = vadd.f32 %v16827_v49, %v16835_v29  ;;  %v17161_v15 = vadd.f32 %v16827_v49, %v16839_v34  ;;  %v17165_v35 = vadd.f32 %v16827_v49, %v16843_v56  ;;  %v17177_v29 = vadd.f32 %v16827_v49, %v16855_v32 }
 0x712   :  { %v17181_v34 = vadd.f32 %v16827_v49, %v16860_v18  ;;  %v17185_v56 = vadd.f32 %v16827_v49, %v16864_v16  ;;  %v17193_v44 = vadd.f32 %v16827_v49, %v16872_v47  ;;  %v17197_v32 = vadd.f32 %v16827_v49, %v16876_v25 }
 0x713   :  { %v17201_v18 = vadd.f32 %v16827_v49, %v16880_v11  ;;  %v17205_v16 = vadd.f32 %v16827_v49, %v16884_v21  ;;  %v17213_v47 = vadd.f32 %v16827_v49, %v16892_v0  ;;  %v17217_v25 = vadd.f32 %v16827_v49, %v16896_v53 }
 0x714   :  { %18423 = vst [vmem:[#allocation79_spill] sm:$0xff] %v17193_v44  ;;  %v17221_v11 = vadd.f32 %v16827_v49, %v16900_v43  ;;  %v17225_v21 = vadd.f32 %v16827_v49, %v16904_v38  ;;  %v17229_v41 = vadd.f32 %v16827_v49, %v16908_v60  ;;  %v17233_v0 = vadd.f32 %v16827_v49, %v16912_v40 }
 0x715   :  { %18424 = vst [vmem:[#allocation84_spill] sm:$0xff] %v17213_v47  ;;  %18425 = vst [vmem:[#allocation85_spill] sm:$0xff] %v17217_v25  ;;  %v17237_v53 = vadd.f32 %v16827_v49, %v16917_v5  ;;  %v17241_v43 = vadd.f32 %v16827_v49, %v16921_v3  ;;  %v17245_v38 = vadd.f32 %v16827_v49, %v16925_v9 }
 0x716   :  { %18426 = vst [vmem:[#allocation88_spill] sm:$0xff] %v17229_v41  ;;  %v17249_v60 = vadd.f32 %v16827_v49, %v18430_v37  ;;  %v18431_v41 = vld [vmem:[#allocation21_spill] sm:$0xff]  ;;  %v17257_v5 = vadd.f32 %v16827_v49, %v16937_v22  ;;  %v17265_v9 = vadd.f32 %v16827_v49, %v16945_v7  ;;  %v17269_v37 = vadd.f32 %v16827_v49, %v16949_v1 }
 0x717   :  { %18427 = vst [vmem:[#allocation91_spill] sm:$0xff] %v17237_v53  ;;  %18428 = vst [vmem:[#allocation96_spill] sm:$0xff] %v17241_v43  ;;  %v17253_v40 = vadd.f32 %v16827_v49, %v18431_v41  ;;  %v18434_v53 = vld [vmem:[#allocation31_spill] sm:$0xff]  ;;  %v17273_v41 = vadd.f32 %v16827_v49, %v16953_v52  ;;  %v17277_v22 = vadd.f32 %v16827_v49, %v16957_v39 }
 0x718   :  { %18429 = vst [vmem:[#allocation97_spill] sm:$0xff] %v17245_v38  ;;  %18433 = vst [vmem:[#allocation103_spill] sm:$0xff] %v17257_v5  ;;  %v17261_v3 = vadd.f32 %v16827_v49, %v18434_v53  ;;  %v18439_v5 = vld [vmem:[#allocation32_spill] sm:$0xff]  ;;  %v17289_v1 = vadd.f32 %v16827_v49, %v16969_v51  ;;  %v17293_v52 = vadd.f32 %v16827_v49, %v16973_v33 }
 0x719   :  { %18432 = vst [vmem:[#allocation100_spill] sm:$0xff] %v17253_v40  ;;  %18436 = vst [vmem:[#allocation109_spill] sm:$0xff] %v17269_v37  ;;  %v17281_v53 = vadd.f32 %v16827_v49, %v18439_v5  ;;  %v17297_v39 = vadd.f32 %v16827_v49, %v16977_v26  ;;  %v17301_v5 = vadd.f32 %v16827_v49, %v16981_v50 }
 0x71a   :  { %18435 = vst [vmem:[#allocation108_spill] sm:$0xff] %v17261_v3  ;;  %18437 = vst [vmem:[#allocation112_spill] sm:$0xff] %v17273_v41  ;;  %v18441_v3 = vld [vmem:[#allocation35_spill] sm:$0xff]  ;;  %v17317_v26 = vadd.f32 %v16827_v49, %v16997_v27 }
 0x71b   :  { %18438 = vst [vmem:[#allocation115_spill] sm:$0xff] %v17277_v22  ;;  %18440 = vst [vmem:[#allocation120_spill] sm:$0xff] %v17281_v53  ;;  %v17285_v7 = vadd.f32 %v16827_v49, %v18441_v3  ;;  %v18446_v53 = vld [vmem:[#allocation38_spill] sm:$0xff] }
 0x71c   :  { %18443 = vst [vmem:[#allocation124_spill] sm:$0xff] %v17289_v1  ;;  %18444 = vst [vmem:[#allocation125_spill] sm:$0xff] %v17297_v39  ;;  %v17305_v3 = vadd.f32 %v16827_v49, %v18446_v53  ;;  %v18450_v1 = vld [vmem:[#allocation41_spill] sm:$0xff]  ;;  %v18453_v39 = vld [vmem:[#allocation44_spill] sm:$0xff]  ;;  %v17325_v53 = vadd.f32 %v16827_v49, %v17005_v63 }
 0x71d   :  { %18442 = vst [vmem:[#allocation121_spill] sm:$0xff] %v17285_v7  ;;  %18445 = vst [vmem:[#allocation128_spill] sm:$0xff] %v17301_v5  ;;  %v18448_v7 = vld [vmem:[#allocation40_spill] sm:$0xff]  ;;  %v17313_v33 = vadd.f32 %v16827_v49, %v18450_v1  ;;  %v17321_v50 = vadd.f32 %v16827_v49, %v18453_v39  ;;  %v17333_v1 = vadd.f32 %v16827_v49, %v17013_v14 }
 0x71e   :  { %18447 = vst [vmem:[#allocation129_spill] sm:$0xff] %v17305_v3  ;;  %v17309_v51 = vadd.f32 %v16827_v49, %v18448_v7  ;;  %18452 = vst [vmem:[#allocation31_spill] sm:$0xff] %v17317_v26  ;;  %v17329_v7 = vadd.f32 %v16827_v49, %v17009_v8  ;;  %v18459_v26 = vld [vmem:[#allocation48_spill] sm:$0xff]  ;;  %v17349_v8 = vadd.f32 %v16827_v49, %v17029_v17 }
 0x71f   :  { %18451 = vst [vmem:[#allocation21_spill] sm:$0xff] %v17313_v33  ;;  %18454 = vst [vmem:[#allocation32_spill] sm:$0xff] %v17321_v50  ;;  %v18457_v33 = vld [vmem:[#allocation45_spill] sm:$0xff]  ;;  %v17341_v39 = vadd.f32 %v16827_v49, %v18459_v26  ;;  %v18461_v50 = vld [vmem:[#allocation51_spill] sm:$0xff]  ;;  %v17361_v26 = vadd.f32 %v16827_v49, %v17041_v59  ;;  %v17381_v59 = vadd.f32 %v16827_v49, %v17061_v23 }
 0x720   :  { %18449 = vst [vmem:[#allocation20_spill] sm:$0xff] %v17309_v51  ;;  %18455 = vst [vmem:[#allocation35_spill] sm:$0xff] %v17329_v7  ;;  %v17337_v27 = vadd.f32 %v16827_v49, %v18457_v33  ;;  %v17345_v63 = vadd.f32 %v16827_v49, %v18461_v50  ;;  %v18464_v7 = vld [vmem:[#allocation54_spill] sm:$0xff]  ;;  %v17357_v33 = vadd.f32 %v16827_v49, %v17037_v30  ;;  %v18492_v47 = vld [vmem:[#allocation103_spill] sm:$0xff] }
 0x721   :  { %18456 = vst [vmem:[#allocation38_spill] sm:$0xff] %v17333_v1  ;;  %18460 = vst [vmem:[#allocation41_spill] sm:$0xff] %v17341_v39  ;;  %v17353_v14 = vadd.f32 %v16827_v49, %v18464_v7  ;;  %v17365_v50 = vadd.f32 %v16827_v49, %v17045_v54  ;;  %v18493_v25 = vld [vmem:[#allocation108_spill] sm:$0xff] }
 0x722   :  { %18458 = vst [vmem:[#allocation40_spill] sm:$0xff] %v17337_v27  ;;  %18462 = vst [vmem:[#allocation44_spill] sm:$0xff] %v17345_v63  ;;  %v18467_v63 = vld [vmem:[#allocation55_spill] sm:$0xff]  ;;  %v18494_v44 = vld [vmem:[#allocation120_spill] sm:$0xff] }
 0x723   :  { %18463 = vst [vmem:[#allocation45_spill] sm:$0xff] %v17349_v8  ;;  %18465 = vst [vmem:[#allocation48_spill] sm:$0xff] %v17353_v14  ;;  %v17369_v17 = vadd.f32 %v16827_v49, %v18467_v63  ;;  %v18468_v8 = vld [vmem:[#allocation58_spill] sm:$0xff]  ;;  %v18469_v14 = vld [vmem:[#allocation61_spill] sm:$0xff]  ;;  %v17389_v63 = vadd.f32 %v16827_v49, %v17069_v24 }
 0x724   :  { %18466 = vst [vmem:[#allocation51_spill] sm:$0xff] %v17361_v26  ;;  %v17373_v7 = vadd.f32 %v16827_v49, %v18468_v8  ;;  %v17377_v30 = vadd.f32 %v16827_v49, %v18469_v14  ;;  %18471 = vst [vmem:[#allocation55_spill] sm:$0xff] %v17381_v59  ;;  %v18472_v26 = vld [vmem:[#allocation9_spill] sm:$0xff]  ;;  %v17393_v8 = vadd.f32 %v16827_v49, %v17073_v6  ;;  %v18478_v59 = vld [vmem:[#allocation14_spill] sm:$0xff] }
 0x725   :  { %v17385_v54 = vadd.f32 %v16827_v49, %v18472_v26  ;;  %18474 = vst [vmem:[#allocation61_spill] sm:$0xff] %v17389_v63  ;;  %v17397_v14 = vadd.f32 %v16827_v49, %v17077_v19  ;;  %v17405_v26 = vadd.f32 %v16827_v49, %v18478_v59  ;;  %v18481_v63 = vld [vmem:[#allocation72_spill] sm:$0xff]  ;;  %v17425_v59 = vadd.f32 %v16827_v49, %v17105_v55  ;;  %v18497_v40 = vld [vmem:[#allocation125_spill] sm:$0xff] }
 0x726   :  { %18470 = vst [vmem:[#allocation54_spill] sm:$0xff] %v17377_v30  ;;  %18475 = vst [vmem:[#allocation9_spill] sm:$0xff] %v17393_v8  ;;  %v18477_v30 = vld [vmem:[#allocation13_spill] sm:$0xff]  ;;  %v17413_v6 = vadd.f32 %v16827_v49, %v18481_v63  ;;  %v17433_v63 = vadd.f32 %v16827_v49, %v17113_v12  ;;  %v17445_v55 = vadd.f32 %v16827_v49, %v17125_v4  ;;  %v18496_v38 = vld [vmem:[#allocation124_spill] sm:$0xff]  ;;  %v18518_v4 = vmax.f32 %v17129_v46, 0.0 }
 0x727   :  { %18473 = vst [vmem:[#allocation58_spill] sm:$0xff] %v17385_v54  ;;  %18476 = vst [vmem:[#allocation131_spill] sm:$0xff] %v17397_v14  ;;  %v17401_v23 = vadd.f32 %v16827_v49, %v18477_v30  ;;  %v18480_v54 = vld [vmem:[#allocation16_spill] sm:$0xff]  ;;  %v18482_v8 = vld [vmem:[#allocation73_spill] sm:$0xff]  ;;  %v18520_v12 = vmax.f32 %v17133_v61, 0.0  ;;  %v18526_v46 = vmax.f32 %v17145_v2, 0.0 }
 0x728   :  { %18479 = vst [vmem:[#allocation13_spill] sm:$0xff] %v17405_v26  ;;  %v17409_v24 = vadd.f32 %v16827_v49, %v18480_v54  ;;  %v17417_v19 = vadd.f32 %v16827_v49, %v18482_v8  ;;  %v18483_v14 = vld [vmem:[#allocation76_spill] sm:$0xff]  ;;  %18485 = vst [vmem:[#allocation16_spill] sm:$0xff] %v17425_v59  ;;  %v17429_v54 = vadd.f32 %v16827_v49, %v17109_v28  ;;  %v18498_v37 = vld [vmem:[#allocation21_spill] sm:$0xff]  ;;  %v18514_v5 = vmov %v17433_v63 }
 0x729   :  { %v17421_v30 = vadd.f32 %v16827_v49, %v18483_v14  ;;  %18487 = vst [vmem:[#allocation73_spill] sm:$0xff] %v17433_v63  ;;  %v17437_v8 = vadd.f32 %v16827_v49, %v17117_v36  ;;  %v17441_v14 = vadd.f32 %v16827_v49, %v17121_v31  ;;  %v18490_v59 = vld [vmem:[#allocation88_spill] sm:$0xff]  ;;  %v18501_v43 = vld [vmem:[#allocation35_spill] sm:$0xff]  ;;  %v18517_v26 = vld [vmem:[#allocation22_spill] sm:$0xff]  ;;  %v18522_v36 = vmax.f32 %v17137_v58, 0.0 }
 0x72a   :  { %18486 = vst [vmem:[#allocation72_spill] sm:$0xff] %v17429_v54  ;;  %v18500_v22 = vld [vmem:[#allocation32_spill] sm:$0xff]  ;;  %v18513_v39 = vmov %v17429_v54  ;;  %v17530_v28 = vmul.f32 %v18518_v4, %v18517_v26  ;;  %v18519_v54 = vld [vmem:[#allocation23_spill] sm:$0xff]  ;;  %v18523_v31 = vld [vmem:[#allocation26_spill] sm:$0xff]  ;;  %v18528_v61 = vmax.f32 %v17149_v42, 0.0  ;;  %v18530_v58 = vmax.f32 %v17153_v48, 0.0 }
 0x72b   :  { %18484 = vst [vmem:[#allocation14_spill] sm:$0xff] %v17421_v30  ;;  %18488 = vst [vmem:[#allocation76_spill] sm:$0xff] %v17437_v8  ;;  %v18505_v41 = vld [vmem:[#allocation51_spill] sm:$0xff]  ;;  %v18515_v3 = vmov %v17437_v8  ;;  %v17535_v30 = vmul.f32 %v18520_v12, %v18519_v54  ;;  %v18521_v63 = vld [vmem:[#allocation24_spill] sm:$0xff]  ;;  %v18534_v2 = vmax.f32 %v17161_v15, 0.0  ;;  %v18536_v42 = vmax.f32 %v17165_v35, 0.0 }
 0x72c   :  { %18489 = vst [vmem:[#allocation132_spill] sm:$0xff] %v17441_v14  ;;  %v17540_v8 = vmul.f32 %v18522_v36, %v18521_v63  ;;  %v18524_v14 = vmax.f32 %v17141_v57, 0.0  ;;  %v18525_v49 = vld [vmem:[#allocation25_spill] sm:$0xff]  ;;  %v18527_v4 = vld [vmem:[#allocation28_spill] sm:$0xff]  ;;  %v18529_v12 = vld [vmem:[#allocation27_spill] sm:$0xff]  ;;  %v18532_v57 = vmax.f32 %v17157_v10, 0.0 }
 0x72d   :  { %v18506_v1 = vld [vmem:[#allocation54_spill] sm:$0xff]  ;;  %v17550_v26 = vmul.f32 %v18526_v46, %v18525_v49  ;;  %v17555_v54 = vmul.f32 %v18528_v61, %v18527_v4  ;;  %v17560_v63 = vmul.f32 %v18530_v58, %v18529_v12  ;;  %v18537_v61 = vld [vmem:[#allocation33_spill] sm:$0xff]  ;;  %v18538_v48 = vmax.f32 %v17169_v13, 0.0 }
 0x72e   :  { %v17545_v51 = vmul.f32 %v18524_v14, %v18523_v31  ;;  %v18531_v36 = vld [vmem:[#allocation30_spill] sm:$0xff]  ;;  %v18533_v31 = vld [vmem:[#allocation29_spill] sm:$0xff]  ;;  %v18540_v10 = vmax.f32 %v17173_v62, 0.0  ;;  %v18543_v15 = vmax.f32 %v17177_v29, 0.0  ;;  %v18545_v35 = vmax.f32 %v17181_v34, 0.0 }
 0x72f   :  { %v18512_v27 = vld [vmem:[#allocation16_spill] sm:$0xff]  ;;  %v17565_v14 = vmul.f32 %v18532_v57, %v18531_v36  ;;  %v17570_v49 = vmul.f32 %v18534_v2, %v18533_v31  ;;  %v18535_v46 = vld [vmem:[#allocation34_spill] sm:$0xff]  ;;  %v17580_v12 = vmul.f32 %v18538_v48, %v18537_v61  ;;  %v18539_v58 = vld [vmem:[#allocation37_spill] sm:$0xff]  ;;  %v18547_v13 = vmax.f32 %v17185_v56, 0.0 }
 0x730   :  { %v17575_v4 = vmul.f32 %v18536_v42, %v18535_v46  ;;  %v17585_v36 = vmul.f32 %v18540_v10, %v18539_v58  ;;  %v18542_v57 = vld [vmem:[#allocation36_spill] sm:$0xff]  ;;  %v18544_v2 = vld [vmem:[#allocation39_spill] sm:$0xff]  ;;  %v18546_v42 = vld [vmem:[#allocation10_spill] sm:$0xff]  ;;  %v18549_v62 = vmax.f32 %v17189_v45, 0.0  ;;  %v18555_v34 = vmax.f32 %v17197_v32, 0.0 }
 0x731   :  { %v17590_v31 = vmul.f32 %v18543_v15, %v18542_v57  ;;  %v17595_v46 = vmul.f32 %v18545_v35, %v18544_v2  ;;  %v17600_v61 = vmul.f32 %v18547_v13, %v18546_v42  ;;  %v18548_v48 = vld [vmem:[#allocation43_spill] sm:$0xff]  ;;  %v18550_v10 = vld [vmem:[#allocation42_spill] sm:$0xff]  ;;  %v18558_v56 = vmax.f32 %v17201_v18, 0.0 }
 0x732   :  { %18541 = vst [vmem:[#allocation88_spill] sm:$0xff] %v17585_v36  ;;  %v17605_v58 = vmul.f32 %v18549_v62, %v18548_v48  ;;  %v18551_v36 = vld [vmem:[#allocation79_spill] sm:$0xff]  ;;  %v18557_v35 = vld [vmem:[#allocation46_spill] sm:$0xff]  ;;  %v18560_v45 = vmax.f32 %v17205_v16, 0.0  ;;  %v18561_v62 = vld [vmem:[#allocation49_spill] sm:$0xff]  ;;  %v18571_v16 = vmax.f32 %v17221_v11, 0.0 }
 0x733   :  { %v18552_v29 = vmax.f32 %v18551_v36, 0.0  ;;  %v18554_v15 = vld [vmem:[#allocation47_spill] sm:$0xff]  ;;  %v17620_v42 = vmul.f32 %v18558_v56, %v18557_v35  ;;  %v18559_v13 = vld [vmem:[#allocation50_spill] sm:$0xff]  ;;  %v18562_v36 = vmax.f32 %v17209_v20, 0.0  ;;  %v18570_v56 = vld [vmem:[#allocation57_spill] sm:$0xff]  ;;  %v18574_v20 = vmax.f32 %v17225_v21, 0.0 }
 0x734   :  { %v17615_v2 = vmul.f32 %v18555_v34, %v18554_v15  ;;  %v17625_v48 = vmul.f32 %v18560_v45, %v18559_v13  ;;  %v18566_v34 = vld [vmem:[#allocation52_spill] sm:$0xff]  ;;  %v17645_v13 = vmul.f32 %v18571_v16, %v18570_v56  ;;  %v18584_v16 = vld [vmem:[#allocation62_spill] sm:$0xff] }
 0x735   :  { %v17610_v57 = vmul.f32 %v18552_v29, %v18550_v10  ;;  %v17630_v10 = vmul.f32 %v18562_v36, %v18561_v62  ;;  %v18563_v29 = vld [vmem:[#allocation53_spill] sm:$0xff]  ;;  %v18573_v45 = vld [vmem:[#allocation56_spill] sm:$0xff] }
 0x736   :  { %18556 = vst [vmem:[#allocation108_spill] sm:$0xff] %v17615_v2  ;;  %v18567_v2 = vld [vmem:[#allocation85_spill] sm:$0xff]  ;;  %18572 = vst [vmem:[#allocation124_spill] sm:$0xff] %v17645_v13  ;;  %v17650_v62 = vmul.f32 %v18574_v20, %v18573_v45  ;;  %v18576_v36 = vld [vmem:[#allocation60_spill] sm:$0xff] }
 0x737   :  { %18553 = vst [vmem:[#allocation103_spill] sm:$0xff] %v17610_v57  ;;  %v18564_v57 = vld [vmem:[#allocation84_spill] sm:$0xff]  ;;  %v18568_v18 = vmax.f32 %v18567_v2, 0.0  ;;  %v18579_v2 = vmax.f32 %v17233_v0, 0.0  ;;  %v18591_v0 = vmax.f32 %v17249_v60, 0.0  ;;  %v18603_v60 = vmax.f32 %v17265_v9, 0.0 }
 0x738   :  { %v18565_v32 = vmax.f32 %v18564_v57, 0.0  ;;  %18575 = vst [vmem:[#allocation125_spill] sm:$0xff] %v17650_v62  ;;  %v18577_v57 = vmax.f32 %v18490_v59, 0.0  ;;  %v18585_v13 = vld [vmem:[#allocation96_spill] sm:$0xff]  ;;  %v18588_v62 = vld [vmem:[#allocation97_spill] sm:$0xff]  ;;  %v18615_v9 = vmax.f32 %v18494_v44, 0.0 }
 0x739   :  { %v17640_v35 = vmul.f32 %v18568_v18, %v18566_v34  ;;  %v18581_v18 = vld [vmem:[#allocation63_spill] sm:$0xff]  ;;  %v18586_v21 = vmax.f32 %v18585_v13, 0.0  ;;  %v18587_v20 = vld [vmem:[#allocation64_spill] sm:$0xff]  ;;  %v18589_v59 = vmax.f32 %v18588_v62, 0.0  ;;  %v18598_v13 = vmax.f32 %v18492_v47, 0.0 }
 0x73a   :  { %v17635_v15 = vmul.f32 %v18565_v32, %v18563_v29  ;;  %v17655_v29 = vmul.f32 %v18577_v57, %v18576_v36  ;;  %v18578_v32 = vld [vmem:[#allocation59_spill] sm:$0xff]  ;;  %v18601_v62 = vmax.f32 %v18493_v25, 0.0  ;;  %v18627_v44 = vmax.f32 %v18497_v40, 0.0 }
 0x73b   :  { %18569 = vst [vmem:[#allocation120_spill] sm:$0xff] %v17640_v35  ;;  %v17660_v34 = vmul.f32 %v18579_v2, %v18578_v32  ;;  %v18582_v35 = vld [vmem:[#allocation91_spill] sm:$0xff]  ;;  %v17670_v45 = vmul.f32 %v18586_v21, %v18584_v16  ;;  %v17675_v36 = vmul.f32 %v18589_v59, %v18587_v20  ;;  %v18593_v2 = vld [vmem:[#allocation65_spill] sm:$0xff]  ;;  %v18602_v59 = vld [vmem:[#allocation66_spill] sm:$0xff]  ;;  %v18639_v40 = vmax.f32 %v18498_v37, 0.0 }
 0x73c   :  { %v18583_v11 = vmax.f32 %v18582_v35, 0.0  ;;  %v18590_v57 = vld [vmem:[#allocation11_spill] sm:$0xff]  ;;  %v18652_v37 = vmax.f32 %v18501_v43, 0.0 }
 0x73d   :  { %18580 = vst [vmem:[#allocation21_spill] sm:$0xff] %v17660_v34  ;;  %v17680_v32 = vmul.f32 %v18591_v0, %v18590_v57  ;;  %v18594_v34 = vld [vmem:[#allocation100_spill] sm:$0xff]  ;;  %v18600_v21 = vld [vmem:[#allocation67_spill] sm:$0xff]  ;;  %v17700_v57 = vmul.f32 %v18603_v60, %v18602_v59  ;;  %v18605_v0 = vld [vmem:[#allocation69_spill] sm:$0xff] }
 0x73e   :  { %v17665_v56 = vmul.f32 %v18583_v11, %v18581_v18  ;;  %v18595_v35 = vmax.f32 %v18594_v34, 0.0  ;;  %v18597_v11 = vld [vmem:[#allocation12_spill] sm:$0xff]  ;;  %v17695_v20 = vmul.f32 %v18601_v62, %v18600_v21  ;;  %v18614_v62 = vld [vmem:[#allocation15_spill] sm:$0xff] }
 0x73f   :  { %18592 = vst [vmem:[#allocation32_spill] sm:$0xff] %v17680_v32  ;;  %v17690_v16 = vmul.f32 %v18598_v13, %v18597_v11  ;;  %18604 = vst [vmem:[#allocation54_spill] sm:$0xff] %v17700_v57  ;;  %v18606_v32 = vld [vmem:[#allocation109_spill] sm:$0xff]  ;;  %v18611_v13 = vld [vmem:[#allocation70_spill] sm:$0xff]  ;;  %v17720_v59 = vmul.f32 %v18615_v9, %v18614_v62 }
 0x740   :  { %v17685_v18 = vmul.f32 %v18595_v35, %v18593_v2  ;;  %v18607_v34 = vmax.f32 %v18606_v32, 0.0  ;;  %v18608_v35 = vld [vmem:[#allocation68_spill] sm:$0xff]  ;;  %v18617_v60 = vld [vmem:[#allocation71_spill] sm:$0xff]  ;;  %v18618_v57 = vld [vmem:[#allocation121_spill] sm:$0xff] }
 0x741   :  { %18599 = vst [vmem:[#allocation51_spill] sm:$0xff] %v17690_v16  ;;  %v18612_v16 = vld [vmem:[#allocation115_spill] sm:$0xff]  ;;  %18616 = vst [vmem:[#allocation16_spill] sm:$0xff] %v17720_v59  ;;  %v18619_v32 = vmax.f32 %v18618_v57, 0.0  ;;  %v18630_v59 = vld [vmem:[#allocation128_spill] sm:$0xff] }
 0x742   :  { %18596 = vst [vmem:[#allocation35_spill] sm:$0xff] %v17685_v18  ;;  %v17705_v2 = vmul.f32 %v18607_v34, %v18605_v0  ;;  %v18609_v18 = vld [vmem:[#allocation112_spill] sm:$0xff]  ;;  %v18613_v25 = vmax.f32 %v18612_v16, 0.0  ;;  %v18621_v34 = vld [vmem:[#allocation17_spill] sm:$0xff]  ;;  %v18625_v16 = vmax.f32 %v17293_v52, 0.0  ;;  %v18629_v9 = vld [vmem:[#allocation75_spill] sm:$0xff] }
 0x743   :  { %v18610_v47 = vmax.f32 %v18609_v18, 0.0  ;;  %v17725_v0 = vmul.f32 %v18619_v32, %v18617_v60  ;;  %v18622_v18 = vmax.f32 %v18496_v38, 0.0  ;;  %v18631_v57 = vmax.f32 %v18630_v59, 0.0  ;;  %v18632_v32 = vld [vmem:[#allocation74_spill] sm:$0xff] }
 0x744   :  { %v17715_v21 = vmul.f32 %v18613_v25, %v18611_v13  ;;  %v18626_v25 = vld [vmem:[#allocation18_spill] sm:$0xff] }
 0x745   :  { %v17710_v11 = vmul.f32 %v18610_v47, %v18608_v35  ;;  %18620 = vst [vmem:[#allocation72_spill] sm:$0xff] %v17725_v0  ;;  %v17730_v35 = vmul.f32 %v18622_v18, %v18621_v34  ;;  %v18624_v47 = vld [vmem:[#allocation19_spill] sm:$0xff]  ;;  %v17740_v62 = vmul.f32 %v18627_v44, %v18626_v25  ;;  %v17745_v60 = vmul.f32 %v18631_v57, %v18629_v9  ;;  %v18633_v0 = vld [vmem:[#allocation129_spill] sm:$0xff]  ;;  %v18635_v18 = vld [vmem:[#allocation78_spill] sm:$0xff] }
 0x746   :  { %v17735_v13 = vmul.f32 %v18625_v16, %v18624_v47  ;;  %v18634_v38 = vmax.f32 %v18633_v0, 0.0  ;;  %v18638_v16 = vld [vmem:[#allocation77_spill] sm:$0xff]  ;;  %v18645_v57 = vld [vmem:[#allocation80_spill] sm:$0xff]  ;;  %v18646_v0 = vmax.f32 %v18500_v22, 0.0 }
 0x747   :  { %18623 = vst [vmem:[#allocation73_spill] sm:$0xff] %v17730_v35  ;;  %18628 = vst [vmem:[#allocation76_spill] sm:$0xff] %v17740_v62  ;;  %v18636_v35 = vld [vmem:[#allocation20_spill] sm:$0xff]  ;;  %v17760_v25 = vmul.f32 %v18639_v40, %v18638_v16  ;;  %v18641_v44 = vld [vmem:[#allocation81_spill] sm:$0xff] }
 0x748   :  { %v17750_v34 = vmul.f32 %v18634_v38, %v18632_v32  ;;  %v18637_v52 = vmax.f32 %v18636_v35, 0.0  ;;  %v18642_v62 = vld [vmem:[#allocation31_spill] sm:$0xff]  ;;  %v17770_v32 = vmul.f32 %v18646_v0, %v18645_v57  ;;  %v18649_v35 = vmax.f32 %v17325_v53, 0.0  ;;  %v18661_v0 = vld [vmem:[#allocation90_spill] sm:$0xff] }
 0x749   :  { %18640 = vst [vmem:[#allocation22_spill] sm:$0xff] %v17760_v25  ;;  %v18643_v59 = vmax.f32 %v18642_v62, 0.0  ;;  %v18648_v38 = vld [vmem:[#allocation83_spill] sm:$0xff]  ;;  %v18655_v25 = vld [vmem:[#allocation38_spill] sm:$0xff] }
 0x74a   :  { %v17755_v47 = vmul.f32 %v18637_v52, %v18635_v18  ;;  %18647 = vst [vmem:[#allocation24_spill] sm:$0xff] %v17770_v32  ;;  %v17775_v18 = vmul.f32 %v18649_v35, %v18648_v38  ;;  %v18651_v52 = vld [vmem:[#allocation82_spill] sm:$0xff]  ;;  %v18654_v40 = vld [vmem:[#allocation87_spill] sm:$0xff]  ;;  %v18656_v62 = vmax.f32 %v18655_v25, 0.0  ;;  %v18662_v32 = vld [vmem:[#allocation41_spill] sm:$0xff] }
 0x74b   :  { %v17765_v9 = vmul.f32 %v18643_v59, %v18641_v44  ;;  %v17780_v16 = vmul.f32 %v18652_v37, %v18651_v52  ;;  %v18658_v59 = vld [vmem:[#allocation86_spill] sm:$0xff]  ;;  %v18663_v53 = vmax.f32 %v18662_v32, 0.0  ;;  %v18664_v35 = vld [vmem:[#allocation89_spill] sm:$0xff]  ;;  %v18674_v32 = vmax.f32 %v17357_v33, 0.0 }
 0x74c   :  { %18650 = vst [vmem:[#allocation26_spill] sm:$0xff] %v17775_v18  ;;  %v17785_v44 = vmul.f32 %v18656_v62, %v18654_v40  ;;  %v18665_v18 = vld [vmem:[#allocation44_spill] sm:$0xff]  ;;  %v18667_v37 = vld [vmem:[#allocation93_spill] sm:$0xff]  ;;  %v18685_v33 = vmax.f32 %v17373_v7, 0.0 }
 0x74d   :  { %18644 = vst [vmem:[#allocation23_spill] sm:$0xff] %v17765_v9  ;;  %18653 = vst [vmem:[#allocation25_spill] sm:$0xff] %v17780_v16  ;;  %v18659_v9 = vld [vmem:[#allocation40_spill] sm:$0xff]  ;;  %v17795_v38 = vmul.f32 %v18663_v53, %v18661_v0  ;;  %v18666_v43 = vmax.f32 %v18665_v18, 0.0  ;;  %v18668_v16 = vld [vmem:[#allocation45_spill] sm:$0xff]  ;;  %v18676_v18 = vmax.f32 %v18505_v41, 0.0 }
 0x74e   :  { %18657 = vst [vmem:[#allocation28_spill] sm:$0xff] %v17785_v44  ;;  %v18660_v22 = vmax.f32 %v18659_v9, 0.0  ;;  %v18669_v25 = vmax.f32 %v18668_v16, 0.0  ;;  %v18670_v62 = vld [vmem:[#allocation92_spill] sm:$0xff]  ;;  %v18675_v53 = vld [vmem:[#allocation94_spill] sm:$0xff]  ;;  %v18679_v16 = vmax.f32 %v17365_v50, 0.0 }
 0x74f   :  { %v17800_v52 = vmul.f32 %v18666_v43, %v18664_v35  ;;  %v18671_v44 = vld [vmem:[#allocation48_spill] sm:$0xff]  ;;  %v17820_v35 = vmul.f32 %v18676_v18, %v18675_v53  ;;  %v18678_v43 = vld [vmem:[#allocation99_spill] sm:$0xff]  ;;  %v18688_v41 = vmax.f32 %v18506_v1, 0.0  ;;  %v18690_v18 = vld [vmem:[#allocation105_spill] sm:$0xff] }
 0x750   :  { %v17790_v57 = vmul.f32 %v18660_v22, %v18658_v59  ;;  %v17805_v40 = vmul.f32 %v18669_v25, %v18667_v37  ;;  %v18672_v9 = vmax.f32 %v18671_v44, 0.0  ;;  %v18673_v22 = vld [vmem:[#allocation95_spill] sm:$0xff]  ;;  %v17825_v37 = vmul.f32 %v18679_v16, %v18678_v43  ;;  %v18681_v25 = vld [vmem:[#allocation98_spill] sm:$0xff]  ;;  %v18693_v16 = vld [vmem:[#allocation104_spill] sm:$0xff] }
 0x751   :  { %v17815_v0 = vmul.f32 %v18674_v32, %v18673_v22  ;;  %18677 = vst [vmem:[#allocation27_spill] sm:$0xff] %v17820_v35  ;;  %v18682_v44 = vmax.f32 %v17369_v17, 0.0  ;;  %v18687_v32 = vld [vmem:[#allocation101_spill] sm:$0xff]  ;;  %v18691_v35 = vld [vmem:[#allocation55_spill] sm:$0xff] }
 0x752   :  { %v17810_v59 = vmul.f32 %v18672_v9, %v18670_v62  ;;  %18680 = vst [vmem:[#allocation30_spill] sm:$0xff] %v17825_v37  ;;  %v18684_v9 = vld [vmem:[#allocation102_spill] sm:$0xff]  ;;  %v17840_v53 = vmul.f32 %v18688_v41, %v18687_v32  ;;  %v18692_v50 = vmax.f32 %v18691_v35, 0.0  ;;  %v18703_v41 = vld [vmem:[#allocation111_spill] sm:$0xff] }
 0x753   :  { %v17830_v62 = vmul.f32 %v18682_v44, %v18681_v25  ;;  %v17835_v22 = vmul.f32 %v18685_v33, %v18684_v9  ;;  %v18694_v37 = vld [vmem:[#allocation58_spill] sm:$0xff]  ;;  %v18697_v44 = vld [vmem:[#allocation107_spill] sm:$0xff] }
 0x754   :  { %18689 = vst [vmem:[#allocation33_spill] sm:$0xff] %v17840_v53  ;;  %v17845_v43 = vmul.f32 %v18692_v50, %v18690_v18  ;;  %v18695_v17 = vmax.f32 %v18694_v37, 0.0  ;;  %v18700_v33 = vld [vmem:[#allocation106_spill] sm:$0xff]  ;;  %v18704_v53 = vld [vmem:[#allocation131_spill] sm:$0xff]  ;;  %v18707_v37 = vmax.f32 %v17401_v23, 0.0  ;;  %v18717_v23 = vmax.f32 %v17417_v19, 0.0 }
 0x755   :  { %18683 = vst [vmem:[#allocation29_spill] sm:$0xff] %v17830_v62  ;;  %18686 = vst [vmem:[#allocation34_spill] sm:$0xff] %v17835_v22  ;;  %v18698_v62 = vld [vmem:[#allocation61_spill] sm:$0xff]  ;;  %v18705_v35 = vmax.f32 %v18704_v53, 0.0  ;;  %v18706_v50 = vld [vmem:[#allocation110_spill] sm:$0xff]  ;;  %v18715_v53 = vmax.f32 %v17413_v6, 0.0 }
 0x756   :  { %v17850_v25 = vmul.f32 %v18695_v17, %v18693_v16  ;;  %v18699_v7 = vmax.f32 %v18698_v62, 0.0  ;;  %v18701_v22 = vld [vmem:[#allocation9_spill] sm:$0xff]  ;;  %v17870_v16 = vmul.f32 %v18707_v37, %v18706_v50  ;;  %v18709_v17 = vld [vmem:[#allocation114_spill] sm:$0xff]  ;;  %v18718_v37 = vld [vmem:[#allocation119_spill] sm:$0xff]  ;;  %v18725_v6 = vmax.f32 %v18513_v39, 0.0 }
 0x757   :  { %v18702_v1 = vmax.f32 %v18701_v22, 0.0  ;;  %v17865_v18 = vmul.f32 %v18705_v35, %v18703_v41  ;;  %v18713_v22 = vmax.f32 %v17409_v24, 0.0  ;;  %v18716_v35 = vld [vmem:[#allocation116_spill] sm:$0xff]  ;;  %v18723_v24 = vmax.f32 %v18512_v27, 0.0 }
 0x758   :  { %18696 = vst [vmem:[#allocation37_spill] sm:$0xff] %v17850_v25  ;;  %v17855_v9 = vmul.f32 %v18699_v7, %v18697_v44  ;;  %18708 = vst [vmem:[#allocation36_spill] sm:$0xff] %v17870_v16  ;;  %v18710_v25 = vld [vmem:[#allocation13_spill] sm:$0xff]  ;;  %v17890_v50 = vmul.f32 %v18717_v23, %v18716_v35  ;;  %v18719_v16 = vld [vmem:[#allocation14_spill] sm:$0xff]  ;;  %v18727_v19 = vmax.f32 %v18514_v5, 0.0  ;;  %v18734_v39 = vmax.f32 %v17445_v55, 0.0 }
 0x759   :  { %v17860_v32 = vmul.f32 %v18702_v1, %v18700_v33  ;;  %v18711_v62 = vmax.f32 %v18710_v25, 0.0  ;;  %v18712_v7 = vld [vmem:[#allocation113_spill] sm:$0xff]  ;;  %v18720_v25 = vmax.f32 %v18719_v16, 0.0  ;;  %v18728_v23 = vld [vmem:[#allocation126_spill] sm:$0xff]  ;;  %v18729_v16 = vmax.f32 %v18515_v3, 0.0  ;;  %v18735_v55 = vld [vmem:[#allocation88_spill] sm:$0xff] }
 0x75a   :  { %v17880_v33 = vmul.f32 %v18713_v22, %v18712_v7  ;;  %v18714_v1 = vld [vmem:[#allocation117_spill] sm:$0xff]  ;;  %v18724_v22 = vld [vmem:[#allocation123_spill] sm:$0xff]  ;;  %v10053_v5 = vpack.c.bf16 %v17535_v30, %v17530_v28  ;;  %v10063_v3 = vpack.c.bf16 %v17555_v54, %v17550_v26  ;;  %v10088_v30 = vpack.c.bf16 %v17605_v58, %v17600_v61  ;;  %v18742_v58 = vld [vmem:[#allocation32_spill] sm:$0xff] }
 0x75b   :  { %v17875_v44 = vmul.f32 %v18711_v62, %v18709_v17  ;;  %v17885_v41 = vmul.f32 %v18715_v53, %v18714_v1  ;;  %v17895_v17 = vmul.f32 %v18720_v25, %v18718_v37  ;;  %v18722_v62 = vld [vmem:[#allocation118_spill] sm:$0xff]  ;;  %v17905_v1 = vmul.f32 %v18725_v6, %v18724_v22  ;;  %v18730_v25 = vld [vmem:[#allocation127_spill] sm:$0xff] }
 0x75c   :  { %v17900_v7 = vmul.f32 %v18723_v24, %v18722_v62  ;;  %v18726_v53 = vld [vmem:[#allocation122_spill] sm:$0xff]  ;;  %v17915_v37 = vmul.f32 %v18729_v16, %v18728_v23  ;;  %v10058_v6 = vpack.c.bf16 %v17545_v51, %v17540_v8  ;;  %10054 = vst [vmem:[#allocation6] sm:$0xff] %v10053_v5   ;;  %v10083_v23 = vpack.c.bf16 %v17595_v46, %v17590_v31  ;;  %v18736_v51 = vld [vmem:[#allocation103_spill] sm:$0xff]  ;;  %v18737_v8 = vld [vmem:[#allocation108_spill] sm:$0xff] }
 0x75d   :  { %18721 = vst [vmem:[#allocation39_spill] sm:$0xff] %v17895_v17  ;;  %v17910_v35 = vmul.f32 %v18727_v19, %v18726_v53  ;;  %v18731_v17 = vld [vmem:[#allocation132_spill] sm:$0xff]  ;;  %v18733_v24 = vld [vmem:[#allocation130_spill] sm:$0xff]  ;;  %v10068_v53 = vpack.c.bf16 %v17565_v14, %v17560_v63  ;;  %v10078_v19 = vpack.c.bf16 %v18735_v55, %v17580_v12  ;;  %v10093_v28 = vpack.c.bf16 %v18737_v8, %v18736_v51  ;;  %v18741_v31 = vld [vmem:[#allocation21_spill] sm:$0xff] }
 0x75e   :  { %v18732_v27 = vmax.f32 %v18731_v17, 0.0  ;;  %v17925_v22 = vmul.f32 %v18734_v39, %v18733_v24  ;;  %v10073_v17 = vpack.c.bf16 %v17575_v4, %v17570_v49  ;;  %10250 = vst [vmem:[#allocation6 + $0x8] sm:$0xff] %v10058_v6   ;;  %10251 = vst [vmem:[#allocation6 + $0x10] sm:$0xff] %v10063_v3   ;;  %v10098_v26 = vpack.c.bf16 %v17625_v48, %v17620_v42  ;;  %v18738_v63 = vld [vmem:[#allocation120_spill] sm:$0xff]  ;;  %v18740_v4 = vld [vmem:[#allocation125_spill] sm:$0xff] }
 0x75f   :  { %10252 = vst [vmem:[#allocation6 + $0x18] sm:$0xff] %v10068_v53   ;;  %v10103_v54 = vpack.c.bf16 %v17635_v15, %v17630_v10  ;;  %v18739_v14 = vld [vmem:[#allocation124_spill] sm:$0xff]  ;;  %v10113_v12 = vpack.c.bf16 %v17655_v29, %v18740_v4  ;;  %10254 = vst [vmem:[#allocation6 + $0x28] sm:$0xff] %v10078_v19   ;;  %v10118_v46 = vpack.c.bf16 %v17665_v56, %v18741_v31  ;;  %v18743_v42 = vld [vmem:[#allocation35_spill] sm:$0xff] }
 0x760   :  { %v17920_v62 = vmul.f32 %v18732_v27, %v18730_v25  ;;  %10253 = vst [vmem:[#allocation6 + $0x20] sm:$0xff] %v10073_v17   ;;  %v10108_v49 = vpack.c.bf16 %v18739_v14, %v18738_v63  ;;  %10255 = vst [vmem:[#allocation6 + $0x30] sm:$0xff] %v10083_v23   ;;  %v10123_v61 = vpack.c.bf16 %v17675_v36, %v17670_v45  ;;  %v18744_v10 = vld [vmem:[#allocation51_spill] sm:$0xff]  ;;  %v18745_v29 = vld [vmem:[#allocation54_spill] sm:$0xff] }
 0x761   :  { %10256 = vst [vmem:[#allocation6 + $0x38] sm:$0xff] %v10088_v30   ;;  %10257 = vst [vmem:[#allocation6 + $0x40] sm:$0xff] %v10093_v28   ;;  %v10128_v48 = vpack.c.bf16 %v18743_v42, %v18742_v58  ;;  %v10133_v15 = vpack.c.bf16 %v17695_v20, %v18744_v10  ;;  %v10138_v16 = vpack.c.bf16 %v17705_v2, %v18745_v29  ;;  %v18746_v56 = vld [vmem:[#allocation16_spill] sm:$0xff]  ;;  %v18748_v45 = vld [vmem:[#allocation73_spill] sm:$0xff] }
 0x762   :  { %10258 = vst [vmem:[#allocation6 + $0x48] sm:$0xff] %v10098_v26   ;;  %10259 = vst [vmem:[#allocation6 + $0x50] sm:$0xff] %v10103_v54   ;;  %v10143_v25 = vpack.c.bf16 %v17715_v21, %v17710_v11  ;;  %v18747_v27 = vld [vmem:[#allocation72_spill] sm:$0xff]  ;;  %v10153_v36 = vpack.c.bf16 %v17735_v13, %v18748_v45  ;;  %v10163_v5 = vpack.c.bf16 %v17755_v47, %v17750_v34  ;;  %v18750_v2 = vld [vmem:[#allocation22_spill] sm:$0xff] }
 0x763   :  { %10260 = vst [vmem:[#allocation6 + $0x58] sm:$0xff] %v10108_v49   ;;  %10261 = vst [vmem:[#allocation6 + $0x60] sm:$0xff] %v10113_v12   ;;  %v10148_v24 = vpack.c.bf16 %v18747_v27, %v18746_v56  ;;  %v18749_v20 = vld [vmem:[#allocation76_spill] sm:$0xff]  ;;  %v18751_v6 = vld [vmem:[#allocation23_spill] sm:$0xff]  ;;  %v10183_v19 = vpack.c.bf16 %v17795_v38, %v17790_v57  ;;  %v10193_v34 = vpack.c.bf16 %v17815_v0, %v17810_v59 }
 0x764   :  { %10262 = vst [vmem:[#allocation6 + $0x68] sm:$0xff] %v10118_v46   ;;  %10263 = vst [vmem:[#allocation6 + $0x70] sm:$0xff] %v10123_v61   ;;  %v10158_v39 = vpack.c.bf16 %v17745_v60, %v18749_v20  ;;  %v10168_v3 = vpack.c.bf16 %v18751_v6, %v18750_v2  ;;  %v18752_v11 = vld [vmem:[#allocation24_spill] sm:$0xff]  ;;  %v18753_v21 = vld [vmem:[#allocation26_spill] sm:$0xff]  ;;  %v10188_v60 = vpack.c.bf16 %v17805_v40, %v17800_v52 }
 0x765   :  { %10264 = vst [vmem:[#allocation6 + $0x78] sm:$0xff] %v10128_v48   ;;  %10265 = vst [vmem:[#allocation6 + $0x80] sm:$0xff] %v10133_v15   ;;  %v10173_v53 = vpack.c.bf16 %v18753_v21, %v18752_v11  ;;  %v18754_v13 = vld [vmem:[#allocation25_spill] sm:$0xff]  ;;  %v18755_v17 = vld [vmem:[#allocation28_spill] sm:$0xff]  ;;  %v10218_v40 = vpack.c.bf16 %v17865_v18, %v17860_v32  ;;  %v10228_v54 = vpack.c.bf16 %v17885_v41, %v17880_v33 }
 0x766   :  { %10266 = vst [vmem:[#allocation6 + $0x88] sm:$0xff] %v10138_v16   ;;  %10267 = vst [vmem:[#allocation6 + $0x90] sm:$0xff] %v10143_v25   ;;  %v10178_v55 = vpack.c.bf16 %v18755_v17, %v18754_v13  ;;  %v18756_v47 = vld [vmem:[#allocation27_spill] sm:$0xff]  ;;  %v18757_v23 = vld [vmem:[#allocation30_spill] sm:$0xff]  ;;  %v10248_v32 = vpack.c.bf16 %v17925_v22, %v17920_v62 }
 0x767   :  { %10268 = vst [vmem:[#allocation6 + $0x98] sm:$0xff] %v10148_v24   ;;  %10269 = vst [vmem:[#allocation6 + $0xa0] sm:$0xff] %v10153_v36   ;;  %v10198_v30 = vpack.c.bf16 %v18757_v23, %v18756_v47  ;;  %v18758_v51 = vld [vmem:[#allocation29_spill] sm:$0xff]  ;;  %v18759_v8 = vld [vmem:[#allocation34_spill] sm:$0xff] }
 0x768   :  { %10270 = vst [vmem:[#allocation6 + $0xa8] sm:$0xff] %v10158_v39   ;;  %10271 = vst [vmem:[#allocation6 + $0xb0] sm:$0xff] %v10163_v5   ;;  %v10203_v28 = vpack.c.bf16 %v18759_v8, %v18758_v51  ;;  %v18760_v26 = vld [vmem:[#allocation33_spill] sm:$0xff]  ;;  %v18762_v59 = vld [vmem:[#allocation36_spill] sm:$0xff] }
 0x769   :  { %10272 = vst [vmem:[#allocation6 + $0xb8] sm:$0xff] %v10168_v3   ;;  %10273 = vst [vmem:[#allocation6 + $0xc0] sm:$0xff] %v10173_v53   ;;  %v10208_v57 = vpack.c.bf16 %v17845_v43, %v18760_v26  ;;  %v18761_v38 = vld [vmem:[#allocation37_spill] sm:$0xff]  ;;  %v10223_v0 = vpack.c.bf16 %v17875_v44, %v18762_v59  ;;  %v18763_v63 = vld [vmem:[#allocation39_spill] sm:$0xff]  ;;  %v10238_v43 = vpack.c.bf16 %v17905_v1, %v17900_v7 }
 0x76a   :  { %v10213_v52 = vpack.c.bf16 %v17855_v9, %v18761_v38  ;;  %10274 = vst [vmem:[#allocation6 + $0xc8] sm:$0xff] %v10178_v55   ;;  %10275 = vst [vmem:[#allocation6 + $0xd0] sm:$0xff] %v10183_v19   ;;  %v10233_v14 = vpack.c.bf16 %v18763_v63, %v17890_v50  ;;  %v10243_v9 = vpack.c.bf16 %v17915_v37, %v17910_v35 }
 0x76b   :  { %10276 = vst [vmem:[#allocation6 + $0xd8] sm:$0xff] %v10188_v60   ;;  %10277 = vst [vmem:[#allocation6 + $0xe0] sm:$0xff] %v10193_v34  }
 0x76c   :  { %10278 = vst [vmem:[#allocation6 + $0xe8] sm:$0xff] %v10198_v30   ;;  %10279 = vst [vmem:[#allocation6 + $0xf0] sm:$0xff] %v10203_v28  }
 0x76d   :  { %10280 = vst [vmem:[#allocation6 + $0xf8] sm:$0xff] %v10208_v57   ;;  %10281 = vst [vmem:[#allocation6 + $0x100] sm:$0xff] %v10213_v52  }
 0x76e   :  { %10282 = vst [vmem:[#allocation6 + $0x108] sm:$0xff] %v10218_v40   ;;  %10283 = vst [vmem:[#allocation6 + $0x110] sm:$0xff] %v10223_v0  }
 0x76f   :  { %10284 = vst [vmem:[#allocation6 + $0x118] sm:$0xff] %v10228_v54   ;;  %10285 = vst [vmem:[#allocation6 + $0x120] sm:$0xff] %v10233_v14  }
 0x770   :  { %10286 = vst [vmem:[#allocation6 + $0x128] sm:$0xff] %v10238_v43   ;;  %10287 = vst [vmem:[#allocation6 + $0x130] sm:$0xff] %v10243_v9  }
 0x771   :  { %10288 = vst [vmem:[#allocation6 + $0x138] sm:$0xff] %v10248_v32  }
 0x772   :  { %14015 = shalt.err (!%p14012_p12)
}
 0x773   :  { %s14016_s15 = scalar_lea.hbm %s18027_s5, 5184 }
 0x774   :  { %p14017_p13 = scmp.ne.s32.totalorder %s18027_s5, %s14016_s15  ;;  %p14020_p0 = scmp.lt.u32.totalorder %s14016_s15, %s18027_s5 }
 0x776   :  { %p14022_p1 = pnand %p14020_p0, %p14017_p13 }
 0x778   :  { %14025 = shalt.err (!%p14022_p1)
}
 0x779   :  { %9513 = dma.vmem_to_hbm [thread:$0]  %s9508_s3, 5184, %s18027_s5, [#allocation5], %s14031_s28, %s14031_s28, %s14032_s29  }
 0x77a   :  { %14028 = dma.done.wait [#allocation5], 5184  }
 0x77b   :  { %14029 = vsyncadd [#allocation5], 4294962112 }
 0x77c   :  { %9517 = vsyncpa [#allocation4], 1 }
 0x77d   :  { %9518 = vsyncpa [#allocation5], 1 }

</bundles_post_ra>
